<compile_context>
chip_gen: v5e
topology: v5e:2x2
jax: 0.10.0
libtpu: 0.0.40
codegen_flags: <defaults>
</compile_context>

<pallas_src>
import functools
import math

import jax
import jax.numpy as jnp
from jax.experimental import pallas as pl
from jax.experimental.pallas import tpu as pltpu


# ----------------------------------------------------------------------------
# helpers (mirror the PyTorch reference)
# ----------------------------------------------------------------------------
def _make_divisible(v, divisor, min_value=None):
    if min_value is None:
        min_value = divisor
    new_v = max(min_value, int(v + divisor / 2) // divisor * divisor)
    if new_v < 0.9 * v:
        new_v += divisor
    return new_v


_PARALLEL = pltpu.CompilerParams(dimension_semantics=("parallel",))


# ----------------------------------------------------------------------------
# Pallas kernels
# ----------------------------------------------------------------------------
def _pw_kernel(*refs, act, has_gate):
    """1x1 conv (matmul) + folded-BN bias (+ optional SE pre-gate, ReLU)."""
    if has_gate:
        x_ref, gate_ref, w_ref, b_ref, o_ref = refs
        # SE rescale fused into the consuming conv: scale rows before the dot.
        x = (x_ref[0].astype(jnp.float32) * gate_ref[0]).astype(jnp.bfloat16)
    else:
        x_ref, w_ref, b_ref, o_ref = refs
        x = x_ref[0]                                   # (P, K) bf16
    y = jnp.dot(x, w_ref[...], preferred_element_type=jnp.float32)
    y = y + b_ref[...]                                 # f32 epilogue
    if act == "relu":
        y = jnp.maximum(y, 0.0)
    o_ref[0] = y.astype(o_ref.dtype)


def conv1x1(x, w, b, *, act="none", gate=None, out_dtype=jnp.bfloat16):
    """x: (N, P, K) bf16, w: (K, Cout) bf16 (BN folded), b: (1, Cout) f32,
    gate: optional (N, 1, K) f32 SE gate applied to x before the matmul."""
    N, P, K = x.shape
    cout = w.shape[1]
    in_specs = [pl.BlockSpec((1, P, K), lambda n: (n, 0, 0))]
    args = [x]
    if gate is not None:
        in_specs.append(pl.BlockSpec((1, 1, K), lambda n: (n, 0, 0)))
        args.append(gate)
    in_specs += [pl.BlockSpec((K, cout), lambda n: (0, 0)),
                 pl.BlockSpec((1, cout), lambda n: (0, 0))]
    args += [w, b]
    return pl.pallas_call(
        functools.partial(_pw_kernel, act=act, has_gate=gate is not None),
        out_shape=jax.ShapeDtypeStruct((N, P, cout), out_dtype),
        grid=(N,),
        in_specs=in_specs,
        out_specs=pl.BlockSpec((1, P, cout), lambda n: (n, 0, 0)),
        compiler_params=_PARALLEL,
    )(*args)


def _dw_kernel(x_ref, w_ref, b_ref, o_ref, *, taps, ph_rows, ho, wo):
    """Depthwise conv: K*K shifted static slices of one resident image tile."""
    xp = x_ref[0].astype(jnp.float32)                  # (S2*PH, PW, C)
    w = w_ref[...]                                     # (KK, C) f32 (BN folded)
    acc = None
    for t, (ph, qy, qx) in enumerate(taps):
        r0 = ph * ph_rows + qy
        sl = xp[r0:r0 + ho, qx:qx + wo, :] * w[t]
        acc = sl if acc is None else acc + sl
    o_ref[0] = (acc + b_ref[...]).astype(o_ref.dtype)


def dw_conv(x, w, b, k, stride, pad, out_dtype=jnp.bfloat16):
    """Depthwise k x k conv + folded BN. x: (N,H,W,C) bf16, w: (k*k, C) f32."""
    N, H, W, C = x.shape
    ho = (H + 2 * pad - k) // stride + 1
    wo = (W + 2 * pad - k) // stride + 1
    xp = jnp.pad(x, ((0, 0), (pad, pad), (pad, pad), (0, 0)))
    hp, wp = H + 2 * pad, W + 2 * pad
    s = stride
    ph_rows = -(-hp // s)
    pw_cols = -(-wp // s)
    if s == 1:
        phases = xp                                    # no copy at all
    else:
        # stride phases (space-to-depth): exactly 1x the data, not k*k copies.
        parts = []
        for ry in range(s):
            for rx in range(s):
                p_ = xp[:, ry::s, rx::s, :]
                p_ = jnp.pad(p_, ((0, 0), (0, ph_rows - p_.shape[1]),
                                  (0, pw_cols - p_.shape[2]), (0, 0)))
                parts.append(p_)
        phases = jnp.concatenate(parts, axis=1)        # (N, S2*PH, PW, C)
    taps = tuple(((dy % s) * s + (dx % s), dy // s, dx // s)
                 for dy in range(k) for dx in range(k))
    s2 = s * s
    # TODO(synk): for large resolutions, tile the H axis with halos instead of
    # one whole image per grid step (budget against v7x's 64 MiB VMEM).
    return pl.pallas_call(
        functools.partial(_dw_kernel, taps=taps, ph_rows=ph_rows, ho=ho, wo=wo),
        out_shape=jax.ShapeDtypeStruct((N, ho, wo, C), out_dtype),
        grid=(N,),
        in_specs=[pl.BlockSpec((1, s2 * ph_rows, pw_cols, C),
                               lambda n: (n, 0, 0, 0)),
                  pl.BlockSpec((k * k, C), lambda n: (0, 0)),
                  pl.BlockSpec((1, C), lambda n: (0, 0))],
        out_specs=pl.BlockSpec((1, ho, wo, C), lambda n: (n, 0, 0, 0)),
        compiler_params=_PARALLEL,
    )(phases, w, b)


def _ghost_cheap_kernel(*refs, act, k, pad, ho, wo, c2, has_add):
    """GhostModule cheap op: depthwise 3x3 on x1, fused concat([x1, x2]) and
    optional fused residual add, all written as one lane-wider output block."""
    if has_add:
        x_ref, w_ref, b_ref, add_ref, o_ref = refs
    else:
        x_ref, w_ref, b_ref, o_ref = refs
    xp = x_ref[0].astype(jnp.float32)                  # padded x1: (Hp, Wp, c1)
    w = w_ref[...]                                     # (k*k, c2) f32 (BN folded)
    acc = None
    t = 0
    for dy in range(k):
        for dx in range(k):
            sl = xp[dy:dy + ho, dx:dx + wo, :c2] * w[t]
            acc = sl if acc is None else acc + sl
            t += 1
    x2 = acc + b_ref[...]
    if act == "relu":
        x2 = jnp.maximum(x2, 0.0)
    x1 = xp[pad:pad + ho, pad:pad + wo, :]             # primary-branch pass-through
    out = jnp.concatenate([x1, x2], axis=-1)           # fused GhostModule concat
    if has_add:
        out = out + add_ref[0].astype(jnp.float32)     # fused residual add
    o_ref[0] = out.astype(o_ref.dtype)


def ghost_cheap(x1, w, b, oup, *, relu, add=None, out_dtype=jnp.bfloat16):
    """x1: (N,H,W,c1) bf16; returns (N,H,W,oup) = cat([x1, dw3x3(x1)])[..:oup]."""
    N, H, W, c1 = x1.shape
    c2 = oup - c1                                      # channels actually kept
    k, pad = 3, 1
    xp = jnp.pad(x1, ((0, 0), (pad, pad), (pad, pad), (0, 0)))
    hp, wp = H + 2 * pad, W + 2 * pad
    in_specs = [pl.BlockSpec((1, hp, wp, c1), lambda n: (n, 0, 0, 0)),
                pl.BlockSpec((k * k, c2), lambda n: (0, 0)),
                pl.BlockSpec((1, c2), lambda n: (0, 0))]
    args = [xp, w[:, :c2], b[:, :c2]]
    if add is not None:
        in_specs.append(pl.BlockSpec((1, H, W, oup), lambda n: (n, 0, 0, 0)))
        args.append(add)
    return pl.pallas_call(
        functools.partial(_ghost_cheap_kernel, act="relu" if relu else "none",
                          k=k, pad=pad, ho=H, wo=W, c2=c2,
                          has_add=add is not None),
        out_shape=jax.ShapeDtypeStruct((N, H, W, oup), out_dtype),
        grid=(N,),
        in_specs=in_specs,
        out_specs=pl.BlockSpec((1, H, W, oup), lambda n: (n, 0, 0, 0)),
        compiler_params=_PARALLEL,
    )(*args)


def _se_gate_kernel(x_ref, wr_ref, br_ref, we_ref, be_ref, o_ref):
    """Fused SE: global avg pool + reduce conv + ReLU + expand conv + hard_sigmoid."""
    x = x_ref[0].astype(jnp.float32)                   # (P, C)
    pooled = jnp.mean(x, axis=0, keepdims=True)        # (1, C)
    r = jnp.dot(pooled.astype(jnp.bfloat16), wr_ref[...],
                preferred_element_type=jnp.float32) + br_ref[...]
    r = jnp.maximum(r, 0.0)
    e = jnp.dot(r.astype(jnp.bfloat16), we_ref[...],
                preferred_element_type=jnp.float32) + be_ref[...]
    o_ref[0] = jnp.clip(e + 3.0, 0.0, 6.0) * (1.0 / 6.0)   # hard_sigmoid


def se_gate(x, p):
    """x: (N, P, C) bf16 -> SE gate (N, 1, C) f32."""
    N, P, C = x.shape
    R = p["w_red"].shape[1]
    return pl.pallas_call(
        _se_gate_kernel,
        out_shape=jax.ShapeDtypeStruct((N, 1, C), jnp.float32),
        grid=(N,),
        in_specs=[pl.BlockSpec((1, P, C), lambda n: (n, 0, 0)),
                  pl.BlockSpec((C, R), lambda n: (0, 0)),
                  pl.BlockSpec((1, R), lambda n: (0, 0)),
                  pl.BlockSpec((R, C), lambda n: (0, 0)),
                  pl.BlockSpec((1, C), lambda n: (0, 0))],
        out_specs=pl.BlockSpec((1, 1, C), lambda n: (n, 0, 0)),
        compiler_params=_PARALLEL,
    )(x, p["w_red"], p["b_red"], p["w_exp"], p["b_exp"])


def _head_kernel(x_ref, w1_ref, b1_ref, w2_ref, b2_ref, o_ref):
    """Fused global avg pool + conv_head (bias, ReLU) + classifier."""
    x = x_ref[0].astype(jnp.float32)                   # (P, Cf)
    pooled = jnp.mean(x, axis=0, keepdims=True)        # (1, Cf)
    h = jnp.dot(pooled.astype(jnp.bfloat16), w1_ref[...],
                preferred_element_type=jnp.float32) + b1_ref[...]
    h = jnp.maximum(h, 0.0)
    # TODO(synk): dropout is eval-mode identity.
    o_ref[0] = jnp.dot(h.astype(jnp.bfloat16), w2_ref[...],
                       preferred_element_type=jnp.float32) + b2_ref[...]


def pool_head_classifier(x, head_w, head_b, cls_w, cls_b):
    """x: (N, P, Cf) bf16 -> logits (N, num_classes) f32."""
    N, P, Cf = x.shape
    nh = head_w.shape[1]
    ncls = cls_w.shape[1]
    out = pl.pallas_call(
        _head_kernel,
        out_shape=jax.ShapeDtypeStruct((N, 1, ncls), jnp.float32),
        grid=(N,),
        in_specs=[pl.BlockSpec((1, P, Cf), lambda n: (n, 0, 0)),
                  pl.BlockSpec((Cf, nh), lambda n: (0, 0)),
                  pl.BlockSpec((1, nh), lambda n: (0, 0)),
                  pl.BlockSpec((nh, ncls), lambda n: (0, 0)),
                  pl.BlockSpec((1, ncls), lambda n: (0, 0))],
        out_specs=pl.BlockSpec((1, 1, ncls), lambda n: (n, 0, 0)),
        compiler_params=_PARALLEL,
    )(x, head_w, head_b, cls_w, cls_b)
    return out.reshape(N, ncls)


# ----------------------------------------------------------------------------
# model glue (wrapper-side reshapes are layout plumbing only)
# ----------------------------------------------------------------------------
def _im2col(x, kh, kw, stride, padding):
    """x: (N,H,W,C) -> ((N, Ho*Wo, kh*kw*C), Ho, Wo). Used only for the 3x3
    dense stem conv (tiny 8-channel input).
    # TODO(synk): replace by a halo'd-tile dense-conv kernel for large inputs."""
    N, H, W, C = x.shape
    Ho = (H + 2 * padding - kh) // stride + 1
    Wo = (W + 2 * padding - kw) // stride + 1
    xp = jnp.pad(x, ((0, 0), (padding, padding), (padding, padding), (0, 0)))
    cols = []
    for dy in range(kh):
        for dx in range(kw):
            cols.append(xp[:, dy:dy + Ho * stride:stride,
                           dx:dx + Wo * stride:stride, :])
    patches = jnp.stack(cols, axis=3)                  # (N, Ho, Wo, KK, C)
    return patches.reshape(N, Ho * Wo, kh * kw * C), Ho, Wo


def ghost_module(x, p, oup, *, relu, gate=None, add=None):
    N, H, W, cin = x.shape
    c1 = p["pw"].shape[1]
    x1 = conv1x1(x.reshape(N, H * W, cin), p["pw"], p["pb"],
                 act="relu" if relu else "none", gate=gate)
    x1 = x1.reshape(N, H, W, c1)
    return ghost_cheap(x1, p["cw"], p["cb"], oup, relu=relu, add=add)


def ghost_bottleneck(x, p):
    stride = p["stride"]
    residual = x
    y = ghost_module(x, p["ghost1"], p["mid_chs"], relu=True)
    if stride > 1:
        y = dw_conv(y, p["dw_w"], p["dw_b"], p["dw_k"], stride,
                    (p["dw_k"] - 1) // 2)
    gate = None
    if p["se"] is not None:
        N, H, W, C = y.shape
        gate = se_gate(y.reshape(N, H * W, C), p["se"])
    if p["shortcut"] is None:
        sc = residual
    else:
        s = p["shortcut"]
        sc = dw_conv(residual, s["dw_w"], s["dw_b"], p["dw_k"], stride,
                     (p["dw_k"] - 1) // 2)
        Ns, Hs, Ws, Cs = sc.shape
        sc = conv1x1(sc.reshape(Ns, Hs * Ws, Cs), s["pw_w"], s["pw_b"],
                     act="none").reshape(Ns, Hs, Ws, -1)
    # ghost2: SE gate folded into its primary 1x1 conv; residual add folded
    # into its cheap-op kernel (which also fuses the GhostModule concat).
    return ghost_module(y, p["ghost2"], p["out_chs"], relu=False,
                        gate=gate, add=sc)


def ghostnet_forward(params, x_nchw):
    x = jnp.transpose(x_nchw, (0, 2, 3, 1)).astype(jnp.bfloat16)  # NCHW -> NHWC
    # conv_stem + bn1 + act1 (dense 3x3, stride 2)
    patches, ho, wo = _im2col(x, 3, 3, 2, 1)
    N = x.shape[0]
    y = conv1x1(patches, params["stem_w"], params["stem_b"], act="relu")
    y = y.reshape(N, ho, wo, -1)
    # bottleneck stages
    for bp in params["blocks"]:
        y = ghost_bottleneck(y, bp)
    # final ConvBnAct (1x1)
    N, H, W, C = y.shape
    y = conv1x1(y.reshape(N, H * W, C), params["final_w"], params["final_b"],
                act="relu")
    # fused: global pool -> conv_head (bias) -> ReLU -> (dropout id) -> classifier
    return pool_head_classifier(y, params["head_w"], params["head_b"],
                                params["cls_w"], params["cls_b"])


# ----------------------------------------------------------------------------
# deterministic parameter initialization (BN folded, matmul weights in bf16)
# ----------------------------------------------------------------------------
class ParamGen:
    def __init__(self, key):
        self.key = key

    def _next(self):
        self.key, sub = jax.random.split(self.key)
        return sub

    def normal(self, shape, scale=0.1):
        return scale * jax.random.normal(self._next(), shape, dtype=jnp.float32)

    def conv(self, kh, kw, cin, cout):
        return self.normal((kh, kw, cin, cout), scale=1.0 / math.sqrt(kh * kw * cin))

    def dwconv(self, k, c):
        return self.normal((k, k, c), scale=1.0 / k)

    def bn(self, c):
        gamma = 1.0 + self.normal((c,), 0.1)
        beta = self.normal((c,), 0.1)
        mean = self.normal((c,), 0.1)
        var = 1.0 + jnp.abs(self.normal((c,), 0.1))
        scale = gamma / jnp.sqrt(var + 1e-5)
        bias = beta - mean * scale
        return scale, bias


def _fold_pw(w, scale, bias):
    # dense/1x1 conv: fold BN scale into the weight columns, keep bias in f32.
    return (w * scale[None, :]).astype(jnp.bfloat16), bias.reshape(1, -1)


def _fold_dw(w, scale, bias):
    # depthwise conv runs on the VPU: keep folded weights in f32.
    return (w * scale[None, :]).astype(jnp.float32), bias.reshape(1, -1)


def make_ghost_params(pg, inp, oup):
    init_c = math.ceil(oup / 2)          # ratio = 2
    pw = pg.conv(1, 1, inp, init_c).reshape(inp, init_c)
    ps, pb = pg.bn(init_c)
    cw = pg.dwconv(3, init_c).reshape(9, init_c)
    cs, cb = pg.bn(init_c)
    p = {}
    p["pw"], p["pb"] = _fold_pw(pw, ps, pb)
    p["cw"], p["cb"] = _fold_dw(cw, cs, cb)
    return p


def make_bottleneck_params(pg, in_chs, mid_chs, out_chs, dw_k, stride, se_ratio):
    p = {"stride": stride, "dw_k": dw_k, "mid_chs": mid_chs, "out_chs": out_chs}
    p["ghost1"] = make_ghost_params(pg, in_chs, mid_chs)
    if stride > 1:
        w = pg.dwconv(dw_k, mid_chs).reshape(dw_k * dw_k, mid_chs)
        s, b = pg.bn(mid_chs)
        p["dw_w"], p["dw_b"] = _fold_dw(w, s, b)
    if se_ratio is not None and se_ratio > 0.0:
        reduced = _make_divisible(mid_chs * se_ratio, 4)
        p["se"] = {
            "w_red": pg.normal((mid_chs, reduced),
                               1.0 / math.sqrt(mid_chs)).astype(jnp.bfloat16),
            "b_red": pg.normal((reduced,), 0.1).reshape(1, reduced),
            "w_exp": pg.normal((reduced, mid_chs),
                               1.0 / math.sqrt(reduced)).astype(jnp.bfloat16),
            "b_exp": pg.normal((mid_chs,), 0.1).reshape(1, mid_chs),
        }
    else:
        p["se"] = None
    p["ghost2"] = make_ghost_params(pg, mid_chs, out_chs)
    if in_chs == out_chs and stride == 1:
        p["shortcut"] = None
    else:
        dw = pg.dwconv(dw_k, in_chs).reshape(dw_k * dw_k, in_chs)
        s1, b1 = pg.bn(in_chs)
        pw = pg.conv(1, 1, in_chs, out_chs).reshape(in_chs, out_chs)
        s2, b2 = pg.bn(out_chs)
        sc = {}
        sc["dw_w"], sc["dw_b"] = _fold_dw(dw, s1, b1)
        sc["pw_w"], sc["pw_b"] = _fold_pw(pw, s2, b2)
        p["shortcut"] = sc
    return p


def build_params(cfgs, num_classes=8, width=1.0, key=None):
    pg = ParamGen(jax.random.PRNGKey(42) if key is None else key)
    params = {}
    out_ch = _make_divisible(16 * width, 4)
    stem_w = pg.conv(3, 3, 8, out_ch).reshape(9 * 8, out_ch)  # conv_stem: 8 in-channels
    ss, sb = pg.bn(out_ch)
    params["stem_w"], params["stem_b"] = _fold_pw(stem_w, ss, sb)
    in_ch = out_ch
    blocks = []
    exp_size = 16
    for cfg in cfgs:
        for (k, exp_size, c, se_ratio, s) in cfg:
            out_c = _make_divisible(c * width, 4)
            mid_c = _make_divisible(exp_size * width, 4)
            blocks.append(make_bottleneck_params(pg, in_ch, mid_c, out_c, k, s,
                                                 se_ratio))
            in_ch = out_c
    params["blocks"] = blocks
    final_c = _make_divisible(exp_size * width, 4)
    fw = pg.conv(1, 1, in_ch, final_c).reshape(in_ch, final_c)
    fs, fb = pg.bn(final_c)
    params["final_w"], params["final_b"] = _fold_pw(fw, fs, fb)
    params["head_w"] = pg.normal((final_c, 1280),
                                 1.0 / math.sqrt(final_c)).astype(jnp.bfloat16)
    params["head_b"] = pg.normal((1280,), 0.1).reshape(1, 1280)
    params["cls_w"] = pg.normal((1280, num_classes),
                                1.0 / math.sqrt(1280)).astype(jnp.bfloat16)
    params["cls_b"] = pg.normal((num_classes,), 0.1).reshape(1, num_classes)
    return params


# ----------------------------------------------------------------------------
if __name__ == "__main__":
    # small GhostNet config: (k, exp_size, c, se_ratio, stride)
    cfgs = [
        [[3, 16, 16, 0, 1]],
        [[3, 48, 24, 0, 2]],
        [[5, 72, 40, 0.25, 2]],
    ]
    num_classes = 8
    params = build_params(cfgs, num_classes=num_classes, width=1.0,
                          key=jax.random.PRNGKey(42))

    key = jax.random.PRNGKey(0)
    x = jax.random.normal(key, (2, 8, 16, 16), dtype=jnp.float32)  # NCHW, 8 in-chans

    fwd = jax.jit(lambda xx: ghostnet_forward(params, xx))
    out = fwd(x)
    jax.block_until_ready(out)
    assert out.shape == (2, num_classes), out.shape
    assert bool(jnp.all(jnp.isfinite(out)))
    print("KERNEL_OK")
</pallas_src>

<mosaic_0001>
module attributes {stable_mosaic.version = 11 : i64} {
  func.func @_pw_kernel(%arg0: i32, %arg1: memref<1x64x72xbf16, #tpu.memory_space<vmem>>, %arg2: memref<72x16xbf16, #tpu.memory_space<vmem>>, %arg3: memref<1x16xf32, #tpu.memory_space<vmem>>, %arg4: memref<1x64x16xbf16, #tpu.memory_space<vmem>>) attributes {dimension_semantics = [#tpu.dimension_semantics<parallel>], iteration_bounds = array<i64: 2>, scalar_prefetch = 0 : i64, scratch_operands = 0 : i64, tpu.core_type = #tpu.core_type<tc>, window_params = [{transform_indices = @transform_0, window_bounds = array<i64: 1, 64, 72>}, {pipeline_mode = #tpu.pipeline_mode<synchronous>, transform_indices = @transform_1, window_bounds = array<i64: 72, 16>}, {pipeline_mode = #tpu.pipeline_mode<synchronous>, transform_indices = @transform_2, window_bounds = array<i64: 1, 16>}, {transform_indices = @transform_3, window_bounds = array<i64: 1, 64, 16>}]} {
    %c0 = arith.constant 0 : index
    %c0_0 = arith.constant 0 : index
    %c0_1 = arith.constant 0 : index
    %0 = vector.load %arg1[%c0, %c0_0, %c0_1] : memref<1x64x72xbf16, #tpu.memory_space<vmem>>, vector<1x64x72xbf16>
    %1 = vector.shape_cast %0 : vector<1x64x72xbf16> to vector<64x72xbf16>
    %c0_2 = arith.constant 0 : index
    %c0_3 = arith.constant 0 : index
    %2 = vector.load %arg2[%c0_2, %c0_3] : memref<72x16xbf16, #tpu.memory_space<vmem>>, vector<72x16xbf16>
    %cst = arith.constant dense<0.000000e+00> : vector<64x16xf32>
    %3 = tpu.matmul %1, %2, %cst {dimension_numbers = #tpu.dot_dimension_numbers<[1], [0], [0], [1], [0, 0, 1, 1], [], []>} : vector<64x72xbf16>, vector<72x16xbf16>, vector<64x16xf32> -> vector<64x16xf32>
    %c0_4 = arith.constant 0 : index
    %c0_5 = arith.constant 0 : index
    %4 = vector.load %arg3[%c0_4, %c0_5] : memref<1x16xf32, #tpu.memory_space<vmem>>, vector<1x16xf32>
    %5 = vector.broadcast %4 : vector<1x16xf32> to vector<64x16xf32>
    %6 = arith.addf %3, %5 : vector<64x16xf32>
    %cst_6 = arith.constant 0.000000e+00 : f32
    %7 = vector.broadcast %cst_6 : f32 to vector<64x16xf32>
    %8 = arith.maximumf %6, %7 : vector<64x16xf32>
    %9 = arith.truncf %8 : vector<64x16xf32> to vector<64x16xbf16>
    %c0_7 = arith.constant 0 : index
    %c0_8 = arith.constant 0 : index
    %c0_9 = arith.constant 0 : index
    %10 = vector.load %arg4[%c0_7, %c0_8, %c0_9] : memref<1x64x16xbf16, #tpu.memory_space<vmem>>, vector<1x64x16xbf16>
    %11 = vector.shape_cast %10 : vector<1x64x16xbf16> to vector<64x16xbf16>
    %12 = vector.shape_cast %9 : vector<64x16xbf16> to vector<1x64x16xbf16>
    tpu.vector_store %arg4[%c0_7, %c0_8, %c0_9], %12 {strides = array<i32>} : memref<1x64x16xbf16, #tpu.memory_space<vmem>>, vector<1x64x16xbf16>,
    return
  }
  func.func @transform_0(%arg0: i32) -> (i32, i32, i32) {
    %c0_i32 = arith.constant 0 : i32
    %c0_i32_0 = arith.constant 0 : i32
    %c0_i32_1 = arith.constant 0 : i32
    return %arg0, %c0_i32, %c0_i32_0 : i32, i32, i32
  }
  func.func @transform_1(%arg0: i32) -> (i32, i32) {
    %c0_i32 = arith.constant 0 : i32
    %c0_i32_0 = arith.constant 0 : i32
    %c0_i32_1 = arith.constant 0 : i32
    return %c0_i32, %c0_i32_0 : i32, i32
  }
  func.func @transform_2(%arg0: i32) -> (i32, i32) {
    %c0_i32 = arith.constant 0 : i32
    %c0_i32_0 = arith.constant 0 : i32
    %c0_i32_1 = arith.constant 0 : i32
    return %c0_i32, %c0_i32_0 : i32, i32
  }
  func.func @transform_3(%arg0: i32) -> (i32, i32, i32) {
    %c0_i32 = arith.constant 0 : i32
    %c0_i32_0 = arith.constant 0 : i32
    %c0_i32_1 = arith.constant 0 : i32
    return %arg0, %c0_i32, %c0_i32_0 : i32, i32, i32
  }
}

module attributes {stable_mosaic.version = 11 : i64} {
  func.func @_pw_kernel(%arg0: i32, %arg1: memref<1x64x16xbf16, #tpu.memory_space<vmem>>, %arg2: memref<16x8xbf16, #tpu.memory_space<vmem>>, %arg3: memref<1x8xf32, #tpu.memory_space<vmem>>, %arg4: memref<1x64x8xbf16, #tpu.memory_space<vmem>>) attributes {dimension_semantics = [#tpu.dimension_semantics<parallel>], iteration_bounds = array<i64: 2>, scalar_prefetch = 0 : i64, scratch_operands = 0 : i64, tpu.core_type = #tpu.core_type<tc>, window_params = [{transform_indices = @transform_0, window_bounds = array<i64: 1, 64, 16>}, {pipeline_mode = #tpu.pipeline_mode<synchronous>, transform_indices = @transform_1, window_bounds = array<i64: 16, 8>}, {pipeline_mode = #tpu.pipeline_mode<synchronous>, transform_indices = @transform_2, window_bounds = array<i64: 1, 8>}, {transform_indices = @transform_3, window_bounds = array<i64: 1, 64, 8>}]} {
    %c0 = arith.constant 0 : index
    %c0_0 = arith.constant 0 : index
    %c0_1 = arith.constant 0 : index
    %0 = vector.load %arg1[%c0, %c0_0, %c0_1] : memref<1x64x16xbf16, #tpu.memory_space<vmem>>, vector<1x64x16xbf16>
    %1 = vector.shape_cast %0 : vector<1x64x16xbf16> to vector<64x16xbf16>
    %c0_2 = arith.constant 0 : index
    %c0_3 = arith.constant 0 : index
    %2 = vector.load %arg2[%c0_2, %c0_3] : memref<16x8xbf16, #tpu.memory_space<vmem>>, vector<16x8xbf16>
    %cst = arith.constant dense<0.000000e+00> : vector<64x8xf32>
    %3 = tpu.matmul %1, %2, %cst {dimension_numbers = #tpu.dot_dimension_numbers<[1], [0], [0], [1], [0, 0, 1, 1], [], []>} : vector<64x16xbf16>, vector<16x8xbf16>, vector<64x8xf32> -> vector<64x8xf32>
    %c0_4 = arith.constant 0 : index
    %c0_5 = arith.constant 0 : index
    %4 = vector.load %arg3[%c0_4, %c0_5] : memref<1x8xf32, #tpu.memory_space<vmem>>, vector<1x8xf32>
    %5 = vector.broadcast %4 : vector<1x8xf32> to vector<64x8xf32>
    %6 = arith.addf %3, %5 : vector<64x8xf32>
    %cst_6 = arith.constant 0.000000e+00 : f32
    %7 = vector.broadcast %cst_6 : f32 to vector<64x8xf32>
    %8 = arith.maximumf %6, %7 : vector<64x8xf32>
    %9 = arith.truncf %8 : vector<64x8xf32> to vector<64x8xbf16>
    %c0_7 = arith.constant 0 : index
    %c0_8 = arith.constant 0 : index
    %c0_9 = arith.constant 0 : index
    %10 = vector.load %arg4[%c0_7, %c0_8, %c0_9] : memref<1x64x8xbf16, #tpu.memory_space<vmem>>, vector<1x64x8xbf16>
    %11 = vector.shape_cast %10 : vector<1x64x8xbf16> to vector<64x8xbf16>
    %12 = vector.shape_cast %9 : vector<64x8xbf16> to vector<1x64x8xbf16>
    tpu.vector_store %arg4[%c0_7, %c0_8, %c0_9], %12 {strides = array<i32>} : memref<1x64x8xbf16, #tpu.memory_space<vmem>>, vector<1x64x8xbf16>,
    return
  }
  func.func @transform_0(%arg0: i32) -> (i32, i32, i32) {
    %c0_i32 = arith.constant 0 : i32
    %c0_i32_0 = arith.constant 0 : i32
    %c0_i32_1 = arith.constant 0 : i32
    return %arg0, %c0_i32, %c0_i32_0 : i32, i32, i32
  }
  func.func @transform_1(%arg0: i32) -> (i32, i32) {
    %c0_i32 = arith.constant 0 : i32
    %c0_i32_0 = arith.constant 0 : i32
    %c0_i32_1 = arith.constant 0 : i32
    return %c0_i32, %c0_i32_0 : i32, i32
  }
  func.func @transform_2(%arg0: i32) -> (i32, i32) {
    %c0_i32 = arith.constant 0 : i32
    %c0_i32_0 = arith.constant 0 : i32
    %c0_i32_1 = arith.constant 0 : i32
    return %c0_i32, %c0_i32_0 : i32, i32
  }
  func.func @transform_3(%arg0: i32) -> (i32, i32, i32) {
    %c0_i32 = arith.constant 0 : i32
    %c0_i32_0 = arith.constant 0 : i32
    %c0_i32_1 = arith.constant 0 : i32
    return %arg0, %c0_i32, %c0_i32_0 : i32, i32, i32
  }
}

module attributes {stable_mosaic.version = 11 : i64} {
  func.func @_ghost_cheap_kernel(%arg0: i32, %arg1: memref<1x10x10x8xbf16, #tpu.memory_space<vmem>>, %arg2: memref<9x8xf32, #tpu.memory_space<vmem>>, %arg3: memref<1x8xf32, #tpu.memory_space<vmem>>, %arg4: memref<1x8x8x16xbf16, #tpu.memory_space<vmem>>) attributes {dimension_semantics = [#tpu.dimension_semantics<parallel>], iteration_bounds = array<i64: 2>, scalar_prefetch = 0 : i64, scratch_operands = 0 : i64, tpu.core_type = #tpu.core_type<tc>, window_params = [{transform_indices = @transform_0, window_bounds = array<i64: 1, 10, 10, 8>}, {pipeline_mode = #tpu.pipeline_mode<synchronous>, transform_indices = @transform_1, window_bounds = array<i64: 9, 8>}, {pipeline_mode = #tpu.pipeline_mode<synchronous>, transform_indices = @transform_2, window_bounds = array<i64: 1, 8>}, {transform_indices = @transform_3, window_bounds = array<i64: 1, 8, 8, 16>}]} {
    %c0 = arith.constant 0 : index
    %c0_0 = arith.constant 0 : index
    %c0_1 = arith.constant 0 : index
    %c0_2 = arith.constant 0 : index
    %0 = vector.load %arg1[%c0, %c0_0, %c0_1, %c0_2] : memref<1x10x10x8xbf16, #tpu.memory_space<vmem>>, vector<1x10x10x8xbf16>
    %1 = vector.shape_cast %0 : vector<1x10x10x8xbf16> to vector<10x10x8xbf16>
    %2 = arith.extf %1 : vector<10x10x8xbf16> to vector<10x10x8xf32>
    %c0_3 = arith.constant 0 : index
    %c0_4 = arith.constant 0 : index
    %3 = vector.load %arg2[%c0_3, %c0_4] : memref<9x8xf32, #tpu.memory_space<vmem>>, vector<9x8xf32>
    %4 = vector.extract_strided_slice %2 {offsets = [0, 0, 0], sizes = [8, 8, 8], strides = [1, 1, 1]} : vector<10x10x8xf32> to vector<8x8x8xf32>
    %5 = vector.extract_strided_slice %3 {offsets = [0, 0], sizes = [1, 8], strides = [1, 1]} : vector<9x8xf32> to vector<1x8xf32>
    %6 = vector.shape_cast %5 : vector<1x8xf32> to vector<8xf32>
    %7 = vector.shape_cast %6 : vector<8xf32> to vector<1x1x8xf32>
    %8 = vector.broadcast %7 : vector<1x1x8xf32> to vector<8x8x8xf32>
    %9 = arith.mulf %4, %8 : vector<8x8x8xf32>
    %10 = vector.extract_strided_slice %2 {offsets = [0, 1, 0], sizes = [8, 8, 8], strides = [1, 1, 1]} : vector<10x10x8xf32> to vector<8x8x8xf32>
    %11 = vector.extract_strided_slice %3 {offsets = [1, 0], sizes = [1, 8], strides = [1, 1]} : vector<9x8xf32> to vector<1x8xf32>
    %12 = vector.shape_cast %11 : vector<1x8xf32> to vector<8xf32>
    %13 = vector.shape_cast %12 : vector<8xf32> to vector<1x1x8xf32>
    %14 = vector.broadcast %13 : vector<1x1x8xf32> to vector<8x8x8xf32>
    %15 = arith.mulf %10, %14 : vector<8x8x8xf32>
    %16 = arith.addf %9, %15 : vector<8x8x8xf32>
    %17 = vector.extract_strided_slice %2 {offsets = [0, 2, 0], sizes = [8, 8, 8], strides = [1, 1, 1]} : vector<10x10x8xf32> to vector<8x8x8xf32>
    %18 = vector.extract_strided_slice %3 {offsets = [2, 0], sizes = [1, 8], strides = [1, 1]} : vector<9x8xf32> to vector<1x8xf32>
    %19 = vector.shape_cast %18 : vector<1x8xf32> to vector<8xf32>
    %20 = vector.shape_cast %19 : vector<8xf32> to vector<1x1x8xf32>
    %21 = vector.broadcast %20 : vector<1x1x8xf32> to vector<8x8x8xf32>
    %22 = arith.mulf %17, %21 : vector<8x8x8xf32>
    %23 = arith.addf %16, %22 : vector<8x8x8xf32>
    %24 = vector.extract_strided_slice %2 {offsets = [1, 0, 0], sizes = [8, 8, 8], strides = [1, 1, 1]} : vector<10x10x8xf32> to vector<8x8x8xf32>
    %25 = vector.extract_strided_slice %3 {offsets = [3, 0], sizes = [1, 8], strides = [1, 1]} : vector<9x8xf32> to vector<1x8xf32>
    %26 = vector.shape_cast %25 : vector<1x8xf32> to vector<8xf32>
    %27 = vector.shape_cast %26 : vector<8xf32> to vector<1x1x8xf32>
    %28 = vector.broadcast %27 : vector<1x1x8xf32> to vector<8x8x8xf32>
    %29 = arith.mulf %24, %28 : vector<8x8x8xf32>
    %30 = arith.addf %23, %29 : vector<8x8x8xf32>
    %31 = vector.extract_strided_slice %2 {offsets = [1, 1, 0], sizes = [8, 8, 8], strides = [1, 1, 1]} : vector<10x10x8xf32> to vector<8x8x8xf32>
    %32 = vector.extract_strided_slice %3 {offsets = [4, 0], sizes = [1, 8], strides = [1, 1]} : vector<9x8xf32> to vector<1x8xf32>
    %33 = vector.shape_cast %32 : vector<1x8xf32> to vector<8xf32>
    %34 = vector.shape_cast %33 : vector<8xf32> to vector<1x1x8xf32>
    %35 = vector.broadcast %34 : vector<1x1x8xf32> to vector<8x8x8xf32>
    %36 = arith.mulf %31, %35 : vector<8x8x8xf32>
    %37 = arith.addf %30, %36 : vector<8x8x8xf32>
    %38 = vector.extract_strided_slice %2 {offsets = [1, 2, 0], sizes = [8, 8, 8], strides = [1, 1, 1]} : vector<10x10x8xf32> to vector<8x8x8xf32>
    %39 = vector.extract_strided_slice %3 {offsets = [5, 0], sizes = [1, 8], strides = [1, 1]} : vector<9x8xf32> to vector<1x8xf32>
    %40 = vector.shape_cast %39 : vector<1x8xf32> to vector<8xf32>
    %41 = vector.shape_cast %40 : vector<8xf32> to vector<1x1x8xf32>
    %42 = vector.broadcast %41 : vector<1x1x8xf32> to vector<8x8x8xf32>
    %43 = arith.mulf %38, %42 : vector<8x8x8xf32>
    %44 = arith.addf %37, %43 : vector<8x8x8xf32>
    %45 = vector.extract_strided_slice %2 {offsets = [2, 0, 0], sizes = [8, 8, 8], strides = [1, 1, 1]} : vector<10x10x8xf32> to vector<8x8x8xf32>
    %46 = vector.extract_strided_slice %3 {offsets = [6, 0], sizes = [1, 8], strides = [1, 1]} : vector<9x8xf32> to vector<1x8xf32>
    %47 = vector.shape_cast %46 : vector<1x8xf32> to vector<8xf32>
    %48 = vector.shape_cast %47 : vector<8xf32> to vector<1x1x8xf32>
    %49 = vector.broadcast %48 : vector<1x1x8xf32> to vector<8x8x8xf32>
    %50 = arith.mulf %45, %49 : vector<8x8x8xf32>
    %51 = arith.addf %44, %50 : vector<8x8x8xf32>
    %52 = vector.extract_strided_slice %2 {offsets = [2, 1, 0], sizes = [8, 8, 8], strides = [1, 1, 1]} : vector<10x10x8xf32> to vector<8x8x8xf32>
    %53 = vector.extract_strided_slice %3 {offsets = [7, 0], sizes = [1, 8], strides = [1, 1]} : vector<9x8xf32> to vector<1x8xf32>
    %54 = vector.shape_cast %53 : vector<1x8xf32> to vector<8xf32>
    %55 = vector.shape_cast %54 : vector<8xf32> to vector<1x1x8xf32>
    %56 = vector.broadcast %55 : vector<1x1x8xf32> to vector<8x8x8xf32>
    %57 = arith.mulf %52, %56 : vector<8x8x8xf32>
    %58 = arith.addf %51, %57 : vector<8x8x8xf32>
    %59 = vector.extract_strided_slice %2 {offsets = [2, 2, 0], sizes = [8, 8, 8], strides = [1, 1, 1]} : vector<10x10x8xf32> to vector<8x8x8xf32>
    %60 = vector.extract_strided_slice %3 {offsets = [8, 0], sizes = [1, 8], strides = [1, 1]} : vector<9x8xf32> to vector<1x8xf32>
    %61 = vector.shape_cast %60 : vector<1x8xf32> to vector<8xf32>
    %62 = vector.shape_cast %61 : vector<8xf32> to vector<1x1x8xf32>
    %63 = vector.broadcast %62 : vector<1x1x8xf32> to vector<8x8x8xf32>
    %64 = arith.mulf %59, %63 : vector<8x8x8xf32>
    %65 = arith.addf %58, %64 : vector<8x8x8xf32>
    %c0_5 = arith.constant 0 : index
    %c0_6 = arith.constant 0 : index
    %66 = vector.load %arg3[%c0_5, %c0_6] : memref<1x8xf32, #tpu.memory_space<vmem>>, vector<1x8xf32>
    %67 = vector.shape_cast %66 : vector<1x8xf32> to vector<1x1x8xf32>
    %68 = vector.broadcast %67 : vector<1x1x8xf32> to vector<8x8x8xf32>
    %69 = arith.addf %65, %68 : vector<8x8x8xf32>
    %cst = arith.constant 0.000000e+00 : f32
    %70 = vector.broadcast %cst : f32 to vector<8x8x8xf32>
    %71 = arith.maximumf %69, %70 : vector<8x8x8xf32>
    %72 = vector.extract_strided_slice %2 {offsets = [1, 1, 0], sizes = [8, 8, 8], strides = [1, 1, 1]} : vector<10x10x8xf32> to vector<8x8x8xf32>
    %73 = tpu.concatenate %72, %71 in 2 : vector<8x8x8xf32>, vector<8x8x8xf32> -> vector<8x8x16xf32>
    %74 = arith.truncf %73 : vector<8x8x16xf32> to vector<8x8x16xbf16>
    %c0_7 = arith.constant 0 : index
    %c0_8 = arith.constant 0 : index
    %c0_9 = arith.constant 0 : index
    %c0_10 = arith.constant 0 : index
    %75 = vector.load %arg4[%c0_7, %c0_8, %c0_9, %c0_10] : memref<1x8x8x16xbf16, #tpu.memory_space<vmem>>, vector<1x8x8x16xbf16>
    %76 = vector.shape_cast %75 : vector<1x8x8x16xbf16> to vector<8x8x16xbf16>
    %77 = vector.shape_cast %74 : vector<8x8x16xbf16> to vector<1x8x8x16xbf16>
    tpu.vector_store %arg4[%c0_7, %c0_8, %c0_9, %c0_10], %77 {strides = array<i32>} : memref<1x8x8x16xbf16, #tpu.memory_space<vmem>>, vector<1x8x8x16xbf16>,
    return
  }
  func.func @transform_0(%arg0: i32) -> (i32, i32, i32, i32) {
    %c0_i32 = arith.constant 0 : i32
    %c0_i32_0 = arith.constant 0 : i32
    %c0_i32_1 = arith.constant 0 : i32
    %c0_i32_2 = arith.constant 0 : i32
    return %arg0, %c0_i32, %c0_i32_0, %c0_i32_1 : i32, i32, i32, i32
  }
  func.func @transform_1(%arg0: i32) -> (i32, i32) {
    %c0_i32 = arith.constant 0 : i32
    %c0_i32_0 = arith.constant 0 : i32
    %c0_i32_1 = arith.constant 0 : i32
    return %c0_i32, %c0_i32_0 : i32, i32
  }
  func.func @transform_2(%arg0: i32) -> (i32, i32) {
    %c0_i32 = arith.constant 0 : i32
    %c0_i32_0 = arith.constant 0 : i32
    %c0_i32_1 = arith.constant 0 : i32
    return %c0_i32, %c0_i32_0 : i32, i32
  }
  func.func @transform_3(%arg0: i32) -> (i32, i32, i32, i32) {
    %c0_i32 = arith.constant 0 : i32
    %c0_i32_0 = arith.constant 0 : i32
    %c0_i32_1 = arith.constant 0 : i32
    %c0_i32_2 = arith.constant 0 : i32
    return %arg0, %c0_i32, %c0_i32_0, %c0_i32_1 : i32, i32, i32, i32
  }
}

module attributes {stable_mosaic.version = 11 : i64} {
  func.func @_pw_kernel(%arg0: i32, %arg1: memref<1x64x16xbf16, #tpu.memory_space<vmem>>, %arg2: memref<16x8xbf16, #tpu.memory_space<vmem>>, %arg3: memref<1x8xf32, #tpu.memory_space<vmem>>, %arg4: memref<1x64x8xbf16, #tpu.memory_space<vmem>>) attributes {dimension_semantics = [#tpu.dimension_semantics<parallel>], iteration_bounds = array<i64: 2>, scalar_prefetch = 0 : i64, scratch_operands = 0 : i64, tpu.core_type = #tpu.core_type<tc>, window_params = [{transform_indices = @transform_0, window_bounds = array<i64: 1, 64, 16>}, {pipeline_mode = #tpu.pipeline_mode<synchronous>, transform_indices = @transform_1, window_bounds = array<i64: 16, 8>}, {pipeline_mode = #tpu.pipeline_mode<synchronous>, transform_indices = @transform_2, window_bounds = array<i64: 1, 8>}, {transform_indices = @transform_3, window_bounds = array<i64: 1, 64, 8>}]} {
    %c0 = arith.constant 0 : index
    %c0_0 = arith.constant 0 : index
    %c0_1 = arith.constant 0 : index
    %0 = vector.load %arg1[%c0, %c0_0, %c0_1] : memref<1x64x16xbf16, #tpu.memory_space<vmem>>, vector<1x64x16xbf16>
    %1 = vector.shape_cast %0 : vector<1x64x16xbf16> to vector<64x16xbf16>
    %c0_2 = arith.constant 0 : index
    %c0_3 = arith.constant 0 : index
    %2 = vector.load %arg2[%c0_2, %c0_3] : memref<16x8xbf16, #tpu.memory_space<vmem>>, vector<16x8xbf16>
    %cst = arith.constant dense<0.000000e+00> : vector<64x8xf32>
    %3 = tpu.matmul %1, %2, %cst {dimension_numbers = #tpu.dot_dimension_numbers<[1], [0], [0], [1], [0, 0, 1, 1], [], []>} : vector<64x16xbf16>, vector<16x8xbf16>, vector<64x8xf32> -> vector<64x8xf32>
    %c0_4 = arith.constant 0 : index
    %c0_5 = arith.constant 0 : index
    %4 = vector.load %arg3[%c0_4, %c0_5] : memref<1x8xf32, #tpu.memory_space<vmem>>, vector<1x8xf32>
    %5 = vector.broadcast %4 : vector<1x8xf32> to vector<64x8xf32>
    %6 = arith.addf %3, %5 : vector<64x8xf32>
    %7 = arith.truncf %6 : vector<64x8xf32> to vector<64x8xbf16>
    %c0_6 = arith.constant 0 : index
    %c0_7 = arith.constant 0 : index
    %c0_8 = arith.constant 0 : index
    %8 = vector.load %arg4[%c0_6, %c0_7, %c0_8] : memref<1x64x8xbf16, #tpu.memory_space<vmem>>, vector<1x64x8xbf16>
    %9 = vector.shape_cast %8 : vector<1x64x8xbf16> to vector<64x8xbf16>
    %10 = vector.shape_cast %7 : vector<64x8xbf16> to vector<1x64x8xbf16>
    tpu.vector_store %arg4[%c0_6, %c0_7, %c0_8], %10 {strides = array<i32>} : memref<1x64x8xbf16, #tpu.memory_space<vmem>>, vector<1x64x8xbf16>,
    return
  }
  func.func @transform_0(%arg0: i32) -> (i32, i32, i32) {
    %c0_i32 = arith.constant 0 : i32
    %c0_i32_0 = arith.constant 0 : i32
    %c0_i32_1 = arith.constant 0 : i32
    return %arg0, %c0_i32, %c0_i32_0 : i32, i32, i32
  }
  func.func @transform_1(%arg0: i32) -> (i32, i32) {
    %c0_i32 = arith.constant 0 : i32
    %c0_i32_0 = arith.constant 0 : i32
    %c0_i32_1 = arith.constant 0 : i32
    return %c0_i32, %c0_i32_0 : i32, i32
  }
  func.func @transform_2(%arg0: i32) -> (i32, i32) {
    %c0_i32 = arith.constant 0 : i32
    %c0_i32_0 = arith.constant 0 : i32
    %c0_i32_1 = arith.constant 0 : i32
    return %c0_i32, %c0_i32_0 : i32, i32
  }
  func.func @transform_3(%arg0: i32) -> (i32, i32, i32) {
    %c0_i32 = arith.constant 0 : i32
    %c0_i32_0 = arith.constant 0 : i32
    %c0_i32_1 = arith.constant 0 : i32
    return %arg0, %c0_i32, %c0_i32_0 : i32, i32, i32
  }
}

module attributes {stable_mosaic.version = 11 : i64} {
  func.func @_ghost_cheap_kernel(%arg0: i32, %arg1: memref<1x10x10x8xbf16, #tpu.memory_space<vmem>>, %arg2: memref<9x8xf32, #tpu.memory_space<vmem>>, %arg3: memref<1x8xf32, #tpu.memory_space<vmem>>, %arg4: memref<1x8x8x16xbf16, #tpu.memory_space<vmem>>, %arg5: memref<1x8x8x16xbf16, #tpu.memory_space<vmem>>) attributes {dimension_semantics = [#tpu.dimension_semantics<parallel>], iteration_bounds = array<i64: 2>, scalar_prefetch = 0 : i64, scratch_operands = 0 : i64, tpu.core_type = #tpu.core_type<tc>, window_params = [{transform_indices = @transform_0, window_bounds = array<i64: 1, 10, 10, 8>}, {pipeline_mode = #tpu.pipeline_mode<synchronous>, transform_indices = @transform_1, window_bounds = array<i64: 9, 8>}, {pipeline_mode = #tpu.pipeline_mode<synchronous>, transform_indices = @transform_2, window_bounds = array<i64: 1, 8>}, {transform_indices = @transform_3, window_bounds = array<i64: 1, 8, 8, 16>}, {transform_indices = @transform_4, window_bounds = array<i64: 1, 8, 8, 16>}]} {
    %c0 = arith.constant 0 : index
    %c0_0 = arith.constant 0 : index
    %c0_1 = arith.constant 0 : index
    %c0_2 = arith.constant 0 : index
    %0 = vector.load %arg1[%c0, %c0_0, %c0_1, %c0_2] : memref<1x10x10x8xbf16, #tpu.memory_space<vmem>>, vector<1x10x10x8xbf16>
    %1 = vector.shape_cast %0 : vector<1x10x10x8xbf16> to vector<10x10x8xbf16>
    %2 = arith.extf %1 : vector<10x10x8xbf16> to vector<10x10x8xf32>
    %c0_3 = arith.constant 0 : index
    %c0_4 = arith.constant 0 : index
    %3 = vector.load %arg2[%c0_3, %c0_4] : memref<9x8xf32, #tpu.memory_space<vmem>>, vector<9x8xf32>
    %4 = vector.extract_strided_slice %2 {offsets = [0, 0, 0], sizes = [8, 8, 8], strides = [1, 1, 1]} : vector<10x10x8xf32> to vector<8x8x8xf32>
    %5 = vector.extract_strided_slice %3 {offsets = [0, 0], sizes = [1, 8], strides = [1, 1]} : vector<9x8xf32> to vector<1x8xf32>
    %6 = vector.shape_cast %5 : vector<1x8xf32> to vector<8xf32>
    %7 = vector.shape_cast %6 : vector<8xf32> to vector<1x1x8xf32>
    %8 = vector.broadcast %7 : vector<1x1x8xf32> to vector<8x8x8xf32>
    %9 = arith.mulf %4, %8 : vector<8x8x8xf32>
    %10 = vector.extract_strided_slice %2 {offsets = [0, 1, 0], sizes = [8, 8, 8], strides = [1, 1, 1]} : vector<10x10x8xf32> to vector<8x8x8xf32>
    %11 = vector.extract_strided_slice %3 {offsets = [1, 0], sizes = [1, 8], strides = [1, 1]} : vector<9x8xf32> to vector<1x8xf32>
    %12 = vector.shape_cast %11 : vector<1x8xf32> to vector<8xf32>
    %13 = vector.shape_cast %12 : vector<8xf32> to vector<1x1x8xf32>
    %14 = vector.broadcast %13 : vector<1x1x8xf32> to vector<8x8x8xf32>
    %15 = arith.mulf %10, %14 : vector<8x8x8xf32>
    %16 = arith.addf %9, %15 : vector<8x8x8xf32>
    %17 = vector.extract_strided_slice %2 {offsets = [0, 2, 0], sizes = [8, 8, 8], strides = [1, 1, 1]} : vector<10x10x8xf32> to vector<8x8x8xf32>
    %18 = vector.extract_strided_slice %3 {offsets = [2, 0], sizes = [1, 8], strides = [1, 1]} : vector<9x8xf32> to vector<1x8xf32>
    %19 = vector.shape_cast %18 : vector<1x8xf32> to vector<8xf32>
    %20 = vector.shape_cast %19 : vector<8xf32> to vector<1x1x8xf32>
    %21 = vector.broadcast %20 : vector<1x1x8xf32> to vector<8x8x8xf32>
    %22 = arith.mulf %17, %21 : vector<8x8x8xf32>
    %23 = arith.addf %16, %22 : vector<8x8x8xf32>
    %24 = vector.extract_strided_slice %2 {offsets = [1, 0, 0], sizes = [8, 8, 8], strides = [1, 1, 1]} : vector<10x10x8xf32> to vector<8x8x8xf32>
    %25 = vector.extract_strided_slice %3 {offsets = [3, 0], sizes = [1, 8], strides = [1, 1]} : vector<9x8xf32> to vector<1x8xf32>
    %26 = vector.shape_cast %25 : vector<1x8xf32> to vector<8xf32>
    %27 = vector.shape_cast %26 : vector<8xf32> to vector<1x1x8xf32>
    %28 = vector.broadcast %27 : vector<1x1x8xf32> to vector<8x8x8xf32>
    %29 = arith.mulf %24, %28 : vector<8x8x8xf32>
    %30 = arith.addf %23, %29 : vector<8x8x8xf32>
    %31 = vector.extract_strided_slice %2 {offsets = [1, 1, 0], sizes = [8, 8, 8], strides = [1, 1, 1]} : vector<10x10x8xf32> to vector<8x8x8xf32>
    %32 = vector.extract_strided_slice %3 {offsets = [4, 0], sizes = [1, 8], strides = [1, 1]} : vector<9x8xf32> to vector<1x8xf32>
    %33 = vector.shape_cast %32 : vector<1x8xf32> to vector<8xf32>
    %34 = vector.shape_cast %33 : vector<8xf32> to vector<1x1x8xf32>
    %35 = vector.broadcast %34 : vector<1x1x8xf32> to vector<8x8x8xf32>
    %36 = arith.mulf %31, %35 : vector<8x8x8xf32>
    %37 = arith.addf %30, %36 : vector<8x8x8xf32>
    %38 = vector.extract_strided_slice %2 {offsets = [1, 2, 0], sizes = [8, 8, 8], strides = [1, 1, 1]} : vector<10x10x8xf32> to vector<8x8x8xf32>
    %39 = vector.extract_strided_slice %3 {offsets = [5, 0], sizes = [1, 8], strides = [1, 1]} : vector<9x8xf32> to vector<1x8xf32>
    %40 = vector.shape_cast %39 : vector<1x8xf32> to vector<8xf32>
    %41 = vector.shape_cast %40 : vector<8xf32> to vector<1x1x8xf32>
    %42 = vector.broadcast %41 : vector<1x1x8xf32> to vector<8x8x8xf32>
    %43 = arith.mulf %38, %42 : vector<8x8x8xf32>
    %44 = arith.addf %37, %43 : vector<8x8x8xf32>
    %45 = vector.extract_strided_slice %2 {offsets = [2, 0, 0], sizes = [8, 8, 8], strides = [1, 1, 1]} : vector<10x10x8xf32> to vector<8x8x8xf32>
    %46 = vector.extract_strided_slice %3 {offsets = [6, 0], sizes = [1, 8], strides = [1, 1]} : vector<9x8xf32> to vector<1x8xf32>
    %47 = vector.shape_cast %46 : vector<1x8xf32> to vector<8xf32>
    %48 = vector.shape_cast %47 : vector<8xf32> to vector<1x1x8xf32>
    %49 = vector.broadcast %48 : vector<1x1x8xf32> to vector<8x8x8xf32>
    %50 = arith.mulf %45, %49 : vector<8x8x8xf32>
    %51 = arith.addf %44, %50 : vector<8x8x8xf32>
    %52 = vector.extract_strided_slice %2 {offsets = [2, 1, 0], sizes = [8, 8, 8], strides = [1, 1, 1]} : vector<10x10x8xf32> to vector<8x8x8xf32>
    %53 = vector.extract_strided_slice %3 {offsets = [7, 0], sizes = [1, 8], strides = [1, 1]} : vector<9x8xf32> to vector<1x8xf32>
    %54 = vector.shape_cast %53 : vector<1x8xf32> to vector<8xf32>
    %55 = vector.shape_cast %54 : vector<8xf32> to vector<1x1x8xf32>
    %56 = vector.broadcast %55 : vector<1x1x8xf32> to vector<8x8x8xf32>
    %57 = arith.mulf %52, %56 : vector<8x8x8xf32>
    %58 = arith.addf %51, %57 : vector<8x8x8xf32>
    %59 = vector.extract_strided_slice %2 {offsets = [2, 2, 0], sizes = [8, 8, 8], strides = [1, 1, 1]} : vector<10x10x8xf32> to vector<8x8x8xf32>
    %60 = vector.extract_strided_slice %3 {offsets = [8, 0], sizes = [1, 8], strides = [1, 1]} : vector<9x8xf32> to vector<1x8xf32>
    %61 = vector.shape_cast %60 : vector<1x8xf32> to vector<8xf32>
    %62 = vector.shape_cast %61 : vector<8xf32> to vector<1x1x8xf32>
    %63 = vector.broadcast %62 : vector<1x1x8xf32> to vector<8x8x8xf32>
    %64 = arith.mulf %59, %63 : vector<8x8x8xf32>
    %65 = arith.addf %58, %64 : vector<8x8x8xf32>
    %c0_5 = arith.constant 0 : index
    %c0_6 = arith.constant 0 : index
    %66 = vector.load %arg3[%c0_5, %c0_6] : memref<1x8xf32, #tpu.memory_space<vmem>>, vector<1x8xf32>
    %67 = vector.shape_cast %66 : vector<1x8xf32> to vector<1x1x8xf32>
    %68 = vector.broadcast %67 : vector<1x1x8xf32> to vector<8x8x8xf32>
    %69 = arith.addf %65, %68 : vector<8x8x8xf32>
    %70 = vector.extract_strided_slice %2 {offsets = [1, 1, 0], sizes = [8, 8, 8], strides = [1, 1, 1]} : vector<10x10x8xf32> to vector<8x8x8xf32>
    %71 = tpu.concatenate %70, %69 in 2 : vector<8x8x8xf32>, vector<8x8x8xf32> -> vector<8x8x16xf32>
    %c0_7 = arith.constant 0 : index
    %c0_8 = arith.constant 0 : index
    %c0_9 = arith.constant 0 : index
    %c0_10 = arith.constant 0 : index
    %72 = vector.load %arg4[%c0_7, %c0_8, %c0_9, %c0_10] : memref<1x8x8x16xbf16, #tpu.memory_space<vmem>>, vector<1x8x8x16xbf16>
    %73 = vector.shape_cast %72 : vector<1x8x8x16xbf16> to vector<8x8x16xbf16>
    %74 = arith.extf %73 : vector<8x8x16xbf16> to vector<8x8x16xf32>
    %75 = arith.addf %71, %74 : vector<8x8x16xf32>
    %76 = arith.truncf %75 : vector<8x8x16xf32> to vector<8x8x16xbf16>
    %c0_11 = arith.constant 0 : index
    %c0_12 = arith.constant 0 : index
    %c0_13 = arith.constant 0 : index
    %c0_14 = arith.constant 0 : index
    %77 = vector.load %arg5[%c0_11, %c0_12, %c0_13, %c0_14] : memref<1x8x8x16xbf16, #tpu.memory_space<vmem>>, vector<1x8x8x16xbf16>
    %78 = vector.shape_cast %77 : vector<1x8x8x16xbf16> to vector<8x8x16xbf16>
    %79 = vector.shape_cast %76 : vector<8x8x16xbf16> to vector<1x8x8x16xbf16>
    tpu.vector_store %arg5[%c0_11, %c0_12, %c0_13, %c0_14], %79 {strides = array<i32>} : memref<1x8x8x16xbf16, #tpu.memory_space<vmem>>, vector<1x8x8x16xbf16>,
    return
  }
  func.func @transform_0(%arg0: i32) -> (i32, i32, i32, i32) {
    %c0_i32 = arith.constant 0 : i32
    %c0_i32_0 = arith.constant 0 : i32
    %c0_i32_1 = arith.constant 0 : i32
    %c0_i32_2 = arith.constant 0 : i32
    return %arg0, %c0_i32, %c0_i32_0, %c0_i32_1 : i32, i32, i32, i32
  }
  func.func @transform_1(%arg0: i32) -> (i32, i32) {
    %c0_i32 = arith.constant 0 : i32
    %c0_i32_0 = arith.constant 0 : i32
    %c0_i32_1 = arith.constant 0 : i32
    return %c0_i32, %c0_i32_0 : i32, i32
  }
  func.func @transform_2(%arg0: i32) -> (i32, i32) {
    %c0_i32 = arith.constant 0 : i32
    %c0_i32_0 = arith.constant 0 : i32
    %c0_i32_1 = arith.constant 0 : i32
    return %c0_i32, %c0_i32_0 : i32, i32
  }
  func.func @transform_3(%arg0: i32) -> (i32, i32, i32, i32) {
    %c0_i32 = arith.constant 0 : i32
    %c0_i32_0 = arith.constant 0 : i32
    %c0_i32_1 = arith.constant 0 : i32
    %c0_i32_2 = arith.constant 0 : i32
    return %arg0, %c0_i32, %c0_i32_0, %c0_i32_1 : i32, i32, i32, i32
  }
  func.func @transform_4(%arg0: i32) -> (i32, i32, i32, i32) {
    %c0_i32 = arith.constant 0 : i32
    %c0_i32_0 = arith.constant 0 : i32
    %c0_i32_1 = arith.constant 0 : i32
    %c0_i32_2 = arith.constant 0 : i32
    return %arg0, %c0_i32, %c0_i32_0, %c0_i32_1 : i32, i32, i32, i32
  }
}

module attributes {stable_mosaic.version = 11 : i64} {
  func.func @_dw_kernel(%arg0: i32, %arg1: memref<1x20x5x16xbf16, #tpu.memory_space<vmem>>, %arg2: memref<9x16xf32, #tpu.memory_space<vmem>>, %arg3: memref<1x16xf32, #tpu.memory_space<vmem>>, %arg4: memref<1x4x4x16xbf16, #tpu.memory_space<vmem>>) attributes {dimension_semantics = [#tpu.dimension_semantics<parallel>], iteration_bounds = array<i64: 2>, scalar_prefetch = 0 : i64, scratch_operands = 0 : i64, tpu.core_type = #tpu.core_type<tc>, window_params = [{transform_indices = @transform_0, window_bounds = array<i64: 1, 20, 5, 16>}, {pipeline_mode = #tpu.pipeline_mode<synchronous>, transform_indices = @transform_1, window_bounds = array<i64: 9, 16>}, {pipeline_mode = #tpu.pipeline_mode<synchronous>, transform_indices = @transform_2, window_bounds = array<i64: 1, 16>}, {transform_indices = @transform_3, window_bounds = array<i64: 1, 4, 4, 16>}]} {
    %c0 = arith.constant 0 : index
    %c0_0 = arith.constant 0 : index
    %c0_1 = arith.constant 0 : index
    %c0_2 = arith.constant 0 : index
    %0 = vector.load %arg1[%c0, %c0_0, %c0_1, %c0_2] : memref<1x20x5x16xbf16, #tpu.memory_space<vmem>>, vector<1x20x5x16xbf16>
    %1 = vector.shape_cast %0 : vector<1x20x5x16xbf16> to vector<20x5x16xbf16>
    %2 = arith.extf %1 : vector<20x5x16xbf16> to vector<20x5x16xf32>
    %c0_3 = arith.constant 0 : index
    %c0_4 = arith.constant 0 : index
    %3 = vector.load %arg2[%c0_3, %c0_4] : memref<9x16xf32, #tpu.memory_space<vmem>>, vector<9x16xf32>
    %4 = vector.extract_strided_slice %2 {offsets = [0, 0, 0], sizes = [4, 4, 16], strides = [1, 1, 1]} : vector<20x5x16xf32> to vector<4x4x16xf32>
    %5 = vector.extract_strided_slice %3 {offsets = [0, 0], sizes = [1, 16], strides = [1, 1]} : vector<9x16xf32> to vector<1x16xf32>
    %6 = vector.shape_cast %5 : vector<1x16xf32> to vector<16xf32>
    %7 = vector.shape_cast %6 : vector<16xf32> to vector<1x1x16xf32>
    %8 = vector.broadcast %7 : vector<1x1x16xf32> to vector<4x4x16xf32>
    %9 = arith.mulf %4, %8 : vector<4x4x16xf32>
    %10 = vector.extract_strided_slice %2 {offsets = [5, 0, 0], sizes = [4, 4, 16], strides = [1, 1, 1]} : vector<20x5x16xf32> to vector<4x4x16xf32>
    %11 = vector.extract_strided_slice %3 {offsets = [1, 0], sizes = [1, 16], strides = [1, 1]} : vector<9x16xf32> to vector<1x16xf32>
    %12 = vector.shape_cast %11 : vector<1x16xf32> to vector<16xf32>
    %13 = vector.shape_cast %12 : vector<16xf32> to vector<1x1x16xf32>
    %14 = vector.broadcast %13 : vector<1x1x16xf32> to vector<4x4x16xf32>
    %15 = arith.mulf %10, %14 : vector<4x4x16xf32>
    %16 = arith.addf %9, %15 : vector<4x4x16xf32>
    %17 = vector.extract_strided_slice %2 {offsets = [0, 1, 0], sizes = [4, 4, 16], strides = [1, 1, 1]} : vector<20x5x16xf32> to vector<4x4x16xf32>
    %18 = vector.extract_strided_slice %3 {offsets = [2, 0], sizes = [1, 16], strides = [1, 1]} : vector<9x16xf32> to vector<1x16xf32>
    %19 = vector.shape_cast %18 : vector<1x16xf32> to vector<16xf32>
    %20 = vector.shape_cast %19 : vector<16xf32> to vector<1x1x16xf32>
    %21 = vector.broadcast %20 : vector<1x1x16xf32> to vector<4x4x16xf32>
    %22 = arith.mulf %17, %21 : vector<4x4x16xf32>
    %23 = arith.addf %16, %22 : vector<4x4x16xf32>
    %24 = vector.extract_strided_slice %2 {offsets = [10, 0, 0], sizes = [4, 4, 16], strides = [1, 1, 1]} : vector<20x5x16xf32> to vector<4x4x16xf32>
    %25 = vector.extract_strided_slice %3 {offsets = [3, 0], sizes = [1, 16], strides = [1, 1]} : vector<9x16xf32> to vector<1x16xf32>
    %26 = vector.shape_cast %25 : vector<1x16xf32> to vector<16xf32>
    %27 = vector.shape_cast %26 : vector<16xf32> to vector<1x1x16xf32>
    %28 = vector.broadcast %27 : vector<1x1x16xf32> to vector<4x4x16xf32>
    %29 = arith.mulf %24, %28 : vector<4x4x16xf32>
    %30 = arith.addf %23, %29 : vector<4x4x16xf32>
    %31 = vector.extract_strided_slice %2 {offsets = [15, 0, 0], sizes = [4, 4, 16], strides = [1, 1, 1]} : vector<20x5x16xf32> to vector<4x4x16xf32>
    %32 = vector.extract_strided_slice %3 {offsets = [4, 0], sizes = [1, 16], strides = [1, 1]} : vector<9x16xf32> to vector<1x16xf32>
    %33 = vector.shape_cast %32 : vector<1x16xf32> to vector<16xf32>
    %34 = vector.shape_cast %33 : vector<16xf32> to vector<1x1x16xf32>
    %35 = vector.broadcast %34 : vector<1x1x16xf32> to vector<4x4x16xf32>
    %36 = arith.mulf %31, %35 : vector<4x4x16xf32>
    %37 = arith.addf %30, %36 : vector<4x4x16xf32>
    %38 = vector.extract_strided_slice %2 {offsets = [10, 1, 0], sizes = [4, 4, 16], strides = [1, 1, 1]} : vector<20x5x16xf32> to vector<4x4x16xf32>
    %39 = vector.extract_strided_slice %3 {offsets = [5, 0], sizes = [1, 16], strides = [1, 1]} : vector<9x16xf32> to vector<1x16xf32>
    %40 = vector.shape_cast %39 : vector<1x16xf32> to vector<16xf32>
    %41 = vector.shape_cast %40 : vector<16xf32> to vector<1x1x16xf32>
    %42 = vector.broadcast %41 : vector<1x1x16xf32> to vector<4x4x16xf32>
    %43 = arith.mulf %38, %42 : vector<4x4x16xf32>
    %44 = arith.addf %37, %43 : vector<4x4x16xf32>
    %45 = vector.extract_strided_slice %2 {offsets = [1, 0, 0], sizes = [4, 4, 16], strides = [1, 1, 1]} : vector<20x5x16xf32> to vector<4x4x16xf32>
    %46 = vector.extract_strided_slice %3 {offsets = [6, 0], sizes = [1, 16], strides = [1, 1]} : vector<9x16xf32> to vector<1x16xf32>
    %47 = vector.shape_cast %46 : vector<1x16xf32> to vector<16xf32>
    %48 = vector.shape_cast %47 : vector<16xf32> to vector<1x1x16xf32>
    %49 = vector.broadcast %48 : vector<1x1x16xf32> to vector<4x4x16xf32>
    %50 = arith.mulf %45, %49 : vector<4x4x16xf32>
    %51 = arith.addf %44, %50 : vector<4x4x16xf32>
    %52 = vector.extract_strided_slice %2 {offsets = [6, 0, 0], sizes = [4, 4, 16], strides = [1, 1, 1]} : vector<20x5x16xf32> to vector<4x4x16xf32>
    %53 = vector.extract_strided_slice %3 {offsets = [7, 0], sizes = [1, 16], strides = [1, 1]} : vector<9x16xf32> to vector<1x16xf32>
    %54 = vector.shape_cast %53 : vector<1x16xf32> to vector<16xf32>
    %55 = vector.shape_cast %54 : vector<16xf32> to vector<1x1x16xf32>
    %56 = vector.broadcast %55 : vector<1x1x16xf32> to vector<4x4x16xf32>
    %57 = arith.mulf %52, %56 : vector<4x4x16xf32>
    %58 = arith.addf %51, %57 : vector<4x4x16xf32>
    %59 = vector.extract_strided_slice %2 {offsets = [1, 1, 0], sizes = [4, 4, 16], strides = [1, 1, 1]} : vector<20x5x16xf32> to vector<4x4x16xf32>
    %60 = vector.extract_strided_slice %3 {offsets = [8, 0], sizes = [1, 16], strides = [1, 1]} : vector<9x16xf32> to vector<1x16xf32>
    %61 = vector.shape_cast %60 : vector<1x16xf32> to vector<16xf32>
    %62 = vector.shape_cast %61 : vector<16xf32> to vector<1x1x16xf32>
    %63 = vector.broadcast %62 : vector<1x1x16xf32> to vector<4x4x16xf32>
    %64 = arith.mulf %59, %63 : vector<4x4x16xf32>
    %65 = arith.addf %58, %64 : vector<4x4x16xf32>
    %c0_5 = arith.constant 0 : index
    %c0_6 = arith.constant 0 : index
    %66 = vector.load %arg3[%c0_5, %c0_6] : memref<1x16xf32, #tpu.memory_space<vmem>>, vector<1x16xf32>
    %67 = vector.shape_cast %66 : vector<1x16xf32> to vector<1x1x16xf32>
    %68 = vector.broadcast %67 : vector<1x1x16xf32> to vector<4x4x16xf32>
    %69 = arith.addf %65, %68 : vector<4x4x16xf32>
    %70 = arith.truncf %69 : vector<4x4x16xf32> to vector<4x4x16xbf16>
    %c0_7 = arith.constant 0 : index
    %c0_8 = arith.constant 0 : index
    %c0_9 = arith.constant 0 : index
    %c0_10 = arith.constant 0 : index
    %71 = vector.load %arg4[%c0_7, %c0_8, %c0_9, %c0_10] : memref<1x4x4x16xbf16, #tpu.memory_space<vmem>>, vector<1x4x4x16xbf16>
    %72 = vector.shape_cast %71 : vector<1x4x4x16xbf16> to vector<4x4x16xbf16>
    %73 = vector.shape_cast %70 : vector<4x4x16xbf16> to vector<1x4x4x16xbf16>
    tpu.vector_store %arg4[%c0_7, %c0_8, %c0_9, %c0_10], %73 {strides = array<i32>} : memref<1x4x4x16xbf16, #tpu.memory_space<vmem>>, vector<1x4x4x16xbf16>,
    return
  }
  func.func @transform_0(%arg0: i32) -> (i32, i32, i32, i32) {
    %c0_i32 = arith.constant 0 : i32
    %c0_i32_0 = arith.constant 0 : i32
    %c0_i32_1 = arith.constant 0 : i32
    %c0_i32_2 = arith.constant 0 : i32
    return %arg0, %c0_i32, %c0_i32_0, %c0_i32_1 : i32, i32, i32, i32
  }
  func.func @transform_1(%arg0: i32) -> (i32, i32) {
    %c0_i32 = arith.constant 0 : i32
    %c0_i32_0 = arith.constant 0 : i32
    %c0_i32_1 = arith.constant 0 : i32
    return %c0_i32, %c0_i32_0 : i32, i32
  }
  func.func @transform_2(%arg0: i32) -> (i32, i32) {
    %c0_i32 = arith.constant 0 : i32
    %c0_i32_0 = arith.constant 0 : i32
    %c0_i32_1 = arith.constant 0 : i32
    return %c0_i32, %c0_i32_0 : i32, i32
  }
  func.func @transform_3(%arg0: i32) -> (i32, i32, i32, i32) {
    %c0_i32 = arith.constant 0 : i32
    %c0_i32_0 = arith.constant 0 : i32
    %c0_i32_1 = arith.constant 0 : i32
    %c0_i32_2 = arith.constant 0 : i32
    return %arg0, %c0_i32, %c0_i32_0, %c0_i32_1 : i32, i32, i32, i32
  }
}

module attributes {stable_mosaic.version = 11 : i64} {
  func.func @_pw_kernel(%arg0: i32, %arg1: memref<1x64x16xbf16, #tpu.memory_space<vmem>>, %arg2: memref<16x24xbf16, #tpu.memory_space<vmem>>, %arg3: memref<1x24xf32, #tpu.memory_space<vmem>>, %arg4: memref<1x64x24xbf16, #tpu.memory_space<vmem>>) attributes {dimension_semantics = [#tpu.dimension_semantics<parallel>], iteration_bounds = array<i64: 2>, scalar_prefetch = 0 : i64, scratch_operands = 0 : i64, tpu.core_type = #tpu.core_type<tc>, window_params = [{transform_indices = @transform_0, window_bounds = array<i64: 1, 64, 16>}, {pipeline_mode = #tpu.pipeline_mode<synchronous>, transform_indices = @transform_1, window_bounds = array<i64: 16, 24>}, {pipeline_mode = #tpu.pipeline_mode<synchronous>, transform_indices = @transform_2, window_bounds = array<i64: 1, 24>}, {transform_indices = @transform_3, window_bounds = array<i64: 1, 64, 24>}]} {
    %c0 = arith.constant 0 : index
    %c0_0 = arith.constant 0 : index
    %c0_1 = arith.constant 0 : index
    %0 = vector.load %arg1[%c0, %c0_0, %c0_1] : memref<1x64x16xbf16, #tpu.memory_space<vmem>>, vector<1x64x16xbf16>
    %1 = vector.shape_cast %0 : vector<1x64x16xbf16> to vector<64x16xbf16>
    %c0_2 = arith.constant 0 : index
    %c0_3 = arith.constant 0 : index
    %2 = vector.load %arg2[%c0_2, %c0_3] : memref<16x24xbf16, #tpu.memory_space<vmem>>, vector<16x24xbf16>
    %cst = arith.constant dense<0.000000e+00> : vector<64x24xf32>
    %3 = tpu.matmul %1, %2, %cst {dimension_numbers = #tpu.dot_dimension_numbers<[1], [0], [0], [1], [0, 0, 1, 1], [], []>} : vector<64x16xbf16>, vector<16x24xbf16>, vector<64x24xf32> -> vector<64x24xf32>
    %c0_4 = arith.constant 0 : index
    %c0_5 = arith.constant 0 : index
    %4 = vector.load %arg3[%c0_4, %c0_5] : memref<1x24xf32, #tpu.memory_space<vmem>>, vector<1x24xf32>
    %5 = vector.broadcast %4 : vector<1x24xf32> to vector<64x24xf32>
    %6 = arith.addf %3, %5 : vector<64x24xf32>
    %cst_6 = arith.constant 0.000000e+00 : f32
    %7 = vector.broadcast %cst_6 : f32 to vector<64x24xf32>
    %8 = arith.maximumf %6, %7 : vector<64x24xf32>
    %9 = arith.truncf %8 : vector<64x24xf32> to vector<64x24xbf16>
    %c0_7 = arith.constant 0 : index
    %c0_8 = arith.constant 0 : index
    %c0_9 = arith.constant 0 : index
    %10 = vector.load %arg4[%c0_7, %c0_8, %c0_9] : memref<1x64x24xbf16, #tpu.memory_space<vmem>>, vector<1x64x24xbf16>
    %11 = vector.shape_cast %10 : vector<1x64x24xbf16> to vector<64x24xbf16>
    %12 = vector.shape_cast %9 : vector<64x24xbf16> to vector<1x64x24xbf16>
    tpu.vector_store %arg4[%c0_7, %c0_8, %c0_9], %12 {strides = array<i32>} : memref<1x64x24xbf16, #tpu.memory_space<vmem>>, vector<1x64x24xbf16>,
    return
  }
  func.func @transform_0(%arg0: i32) -> (i32, i32, i32) {
    %c0_i32 = arith.constant 0 : i32
    %c0_i32_0 = arith.constant 0 : i32
    %c0_i32_1 = arith.constant 0 : i32
    return %arg0, %c0_i32, %c0_i32_0 : i32, i32, i32
  }
  func.func @transform_1(%arg0: i32) -> (i32, i32) {
    %c0_i32 = arith.constant 0 : i32
    %c0_i32_0 = arith.constant 0 : i32
    %c0_i32_1 = arith.constant 0 : i32
    return %c0_i32, %c0_i32_0 : i32, i32
  }
  func.func @transform_2(%arg0: i32) -> (i32, i32) {
    %c0_i32 = arith.constant 0 : i32
    %c0_i32_0 = arith.constant 0 : i32
    %c0_i32_1 = arith.constant 0 : i32
    return %c0_i32, %c0_i32_0 : i32, i32
  }
  func.func @transform_3(%arg0: i32) -> (i32, i32, i32) {
    %c0_i32 = arith.constant 0 : i32
    %c0_i32_0 = arith.constant 0 : i32
    %c0_i32_1 = arith.constant 0 : i32
    return %arg0, %c0_i32, %c0_i32_0 : i32, i32, i32
  }
}

module attributes {stable_mosaic.version = 11 : i64} {
  func.func @_pw_kernel(%arg0: i32, %arg1: memref<1x16x16xbf16, #tpu.memory_space<vmem>>, %arg2: memref<16x24xbf16, #tpu.memory_space<vmem>>, %arg3: memref<1x24xf32, #tpu.memory_space<vmem>>, %arg4: memref<1x16x24xbf16, #tpu.memory_space<vmem>>) attributes {dimension_semantics = [#tpu.dimension_semantics<parallel>], iteration_bounds = array<i64: 2>, scalar_prefetch = 0 : i64, scratch_operands = 0 : i64, tpu.core_type = #tpu.core_type<tc>, window_params = [{transform_indices = @transform_0, window_bounds = array<i64: 1, 16, 16>}, {pipeline_mode = #tpu.pipeline_mode<synchronous>, transform_indices = @transform_1, window_bounds = array<i64: 16, 24>}, {pipeline_mode = #tpu.pipeline_mode<synchronous>, transform_indices = @transform_2, window_bounds = array<i64: 1, 24>}, {transform_indices = @transform_3, window_bounds = array<i64: 1, 16, 24>}]} {
    %c0 = arith.constant 0 : index
    %c0_0 = arith.constant 0 : index
    %c0_1 = arith.constant 0 : index
    %0 = vector.load %arg1[%c0, %c0_0, %c0_1] : memref<1x16x16xbf16, #tpu.memory_space<vmem>>, vector<1x16x16xbf16>
    %1 = vector.shape_cast %0 : vector<1x16x16xbf16> to vector<16x16xbf16>
    %c0_2 = arith.constant 0 : index
    %c0_3 = arith.constant 0 : index
    %2 = vector.load %arg2[%c0_2, %c0_3] : memref<16x24xbf16, #tpu.memory_space<vmem>>, vector<16x24xbf16>
    %cst = arith.constant dense<0.000000e+00> : vector<16x24xf32>
    %3 = tpu.matmul %1, %2, %cst {dimension_numbers = #tpu.dot_dimension_numbers<[1], [0], [0], [1], [0, 0, 1, 1], [], []>} : vector<16x16xbf16>, vector<16x24xbf16>, vector<16x24xf32> -> vector<16x24xf32>
    %c0_4 = arith.constant 0 : index
    %c0_5 = arith.constant 0 : index
    %4 = vector.load %arg3[%c0_4, %c0_5] : memref<1x24xf32, #tpu.memory_space<vmem>>, vector<1x24xf32>
    %5 = vector.broadcast %4 : vector<1x24xf32> to vector<16x24xf32>
    %6 = arith.addf %3, %5 : vector<16x24xf32>
    %7 = arith.truncf %6 : vector<16x24xf32> to vector<16x24xbf16>
    %c0_6 = arith.constant 0 : index
    %c0_7 = arith.constant 0 : index
    %c0_8 = arith.constant 0 : index
    %8 = vector.load %arg4[%c0_6, %c0_7, %c0_8] : memref<1x16x24xbf16, #tpu.memory_space<vmem>>, vector<1x16x24xbf16>
    %9 = vector.shape_cast %8 : vector<1x16x24xbf16> to vector<16x24xbf16>
    %10 = vector.shape_cast %7 : vector<16x24xbf16> to vector<1x16x24xbf16>
    tpu.vector_store %arg4[%c0_6, %c0_7, %c0_8], %10 {strides = array<i32>} : memref<1x16x24xbf16, #tpu.memory_space<vmem>>, vector<1x16x24xbf16>,
    return
  }
  func.func @transform_0(%arg0: i32) -> (i32, i32, i32) {
    %c0_i32 = arith.constant 0 : i32
    %c0_i32_0 = arith.constant 0 : i32
    %c0_i32_1 = arith.constant 0 : i32
    return %arg0, %c0_i32, %c0_i32_0 : i32, i32, i32
  }
  func.func @transform_1(%arg0: i32) -> (i32, i32) {
    %c0_i32 = arith.constant 0 : i32
    %c0_i32_0 = arith.constant 0 : i32
    %c0_i32_1 = arith.constant 0 : i32
    return %c0_i32, %c0_i32_0 : i32, i32
  }
  func.func @transform_2(%arg0: i32) -> (i32, i32) {
    %c0_i32 = arith.constant 0 : i32
    %c0_i32_0 = arith.constant 0 : i32
    %c0_i32_1 = arith.constant 0 : i32
    return %c0_i32, %c0_i32_0 : i32, i32
  }
  func.func @transform_3(%arg0: i32) -> (i32, i32, i32) {
    %c0_i32 = arith.constant 0 : i32
    %c0_i32_0 = arith.constant 0 : i32
    %c0_i32_1 = arith.constant 0 : i32
    return %arg0, %c0_i32, %c0_i32_0 : i32, i32, i32
  }
}

module attributes {stable_mosaic.version = 11 : i64} {
  func.func @_ghost_cheap_kernel(%arg0: i32, %arg1: memref<1x10x10x24xbf16, #tpu.memory_space<vmem>>, %arg2: memref<9x24xf32, #tpu.memory_space<vmem>>, %arg3: memref<1x24xf32, #tpu.memory_space<vmem>>, %arg4: memref<1x8x8x48xbf16, #tpu.memory_space<vmem>>) attributes {dimension_semantics = [#tpu.dimension_semantics<parallel>], iteration_bounds = array<i64: 2>, scalar_prefetch = 0 : i64, scratch_operands = 0 : i64, tpu.core_type = #tpu.core_type<tc>, window_params = [{transform_indices = @transform_0, window_bounds = array<i64: 1, 10, 10, 24>}, {pipeline_mode = #tpu.pipeline_mode<synchronous>, transform_indices = @transform_1, window_bounds = array<i64: 9, 24>}, {pipeline_mode = #tpu.pipeline_mode<synchronous>, transform_indices = @transform_2, window_bounds = array<i64: 1, 24>}, {transform_indices = @transform_3, window_bounds = array<i64: 1, 8, 8, 48>}]} {
    %c0 = arith.constant 0 : index
    %c0_0 = arith.constant 0 : index
    %c0_1 = arith.constant 0 : index
    %c0_2 = arith.constant 0 : index
    %0 = vector.load %arg1[%c0, %c0_0, %c0_1, %c0_2] : memref<1x10x10x24xbf16, #tpu.memory_space<vmem>>, vector<1x10x10x24xbf16>
    %1 = vector.shape_cast %0 : vector<1x10x10x24xbf16> to vector<10x10x24xbf16>
    %2 = arith.extf %1 : vector<10x10x24xbf16> to vector<10x10x24xf32>
    %c0_3 = arith.constant 0 : index
    %c0_4 = arith.constant 0 : index
    %3 = vector.load %arg2[%c0_3, %c0_4] : memref<9x24xf32, #tpu.memory_space<vmem>>, vector<9x24xf32>
    %4 = vector.extract_strided_slice %2 {offsets = [0, 0, 0], sizes = [8, 8, 24], strides = [1, 1, 1]} : vector<10x10x24xf32> to vector<8x8x24xf32>
    %5 = vector.extract_strided_slice %3 {offsets = [0, 0], sizes = [1, 24], strides = [1, 1]} : vector<9x24xf32> to vector<1x24xf32>
    %6 = vector.shape_cast %5 : vector<1x24xf32> to vector<24xf32>
    %7 = vector.shape_cast %6 : vector<24xf32> to vector<1x1x24xf32>
    %8 = vector.broadcast %7 : vector<1x1x24xf32> to vector<8x8x24xf32>
    %9 = arith.mulf %4, %8 : vector<8x8x24xf32>
    %10 = vector.extract_strided_slice %2 {offsets = [0, 1, 0], sizes = [8, 8, 24], strides = [1, 1, 1]} : vector<10x10x24xf32> to vector<8x8x24xf32>
    %11 = vector.extract_strided_slice %3 {offsets = [1, 0], sizes = [1, 24], strides = [1, 1]} : vector<9x24xf32> to vector<1x24xf32>
    %12 = vector.shape_cast %11 : vector<1x24xf32> to vector<24xf32>
    %13 = vector.shape_cast %12 : vector<24xf32> to vector<1x1x24xf32>
    %14 = vector.broadcast %13 : vector<1x1x24xf32> to vector<8x8x24xf32>
    %15 = arith.mulf %10, %14 : vector<8x8x24xf32>
    %16 = arith.addf %9, %15 : vector<8x8x24xf32>
    %17 = vector.extract_strided_slice %2 {offsets = [0, 2, 0], sizes = [8, 8, 24], strides = [1, 1, 1]} : vector<10x10x24xf32> to vector<8x8x24xf32>
    %18 = vector.extract_strided_slice %3 {offsets = [2, 0], sizes = [1, 24], strides = [1, 1]} : vector<9x24xf32> to vector<1x24xf32>
    %19 = vector.shape_cast %18 : vector<1x24xf32> to vector<24xf32>
    %20 = vector.shape_cast %19 : vector<24xf32> to vector<1x1x24xf32>
    %21 = vector.broadcast %20 : vector<1x1x24xf32> to vector<8x8x24xf32>
    %22 = arith.mulf %17, %21 : vector<8x8x24xf32>
    %23 = arith.addf %16, %22 : vector<8x8x24xf32>
    %24 = vector.extract_strided_slice %2 {offsets = [1, 0, 0], sizes = [8, 8, 24], strides = [1, 1, 1]} : vector<10x10x24xf32> to vector<8x8x24xf32>
    %25 = vector.extract_strided_slice %3 {offsets = [3, 0], sizes = [1, 24], strides = [1, 1]} : vector<9x24xf32> to vector<1x24xf32>
    %26 = vector.shape_cast %25 : vector<1x24xf32> to vector<24xf32>
    %27 = vector.shape_cast %26 : vector<24xf32> to vector<1x1x24xf32>
    %28 = vector.broadcast %27 : vector<1x1x24xf32> to vector<8x8x24xf32>
    %29 = arith.mulf %24, %28 : vector<8x8x24xf32>
    %30 = arith.addf %23, %29 : vector<8x8x24xf32>
    %31 = vector.extract_strided_slice %2 {offsets = [1, 1, 0], sizes = [8, 8, 24], strides = [1, 1, 1]} : vector<10x10x24xf32> to vector<8x8x24xf32>
    %32 = vector.extract_strided_slice %3 {offsets = [4, 0], sizes = [1, 24], strides = [1, 1]} : vector<9x24xf32> to vector<1x24xf32>
    %33 = vector.shape_cast %32 : vector<1x24xf32> to vector<24xf32>
    %34 = vector.shape_cast %33 : vector<24xf32> to vector<1x1x24xf32>
    %35 = vector.broadcast %34 : vector<1x1x24xf32> to vector<8x8x24xf32>
    %36 = arith.mulf %31, %35 : vector<8x8x24xf32>
    %37 = arith.addf %30, %36 : vector<8x8x24xf32>
    %38 = vector.extract_strided_slice %2 {offsets = [1, 2, 0], sizes = [8, 8, 24], strides = [1, 1, 1]} : vector<10x10x24xf32> to vector<8x8x24xf32>
    %39 = vector.extract_strided_slice %3 {offsets = [5, 0], sizes = [1, 24], strides = [1, 1]} : vector<9x24xf32> to vector<1x24xf32>
    %40 = vector.shape_cast %39 : vector<1x24xf32> to vector<24xf32>
    %41 = vector.shape_cast %40 : vector<24xf32> to vector<1x1x24xf32>
    %42 = vector.broadcast %41 : vector<1x1x24xf32> to vector<8x8x24xf32>
    %43 = arith.mulf %38, %42 : vector<8x8x24xf32>
    %44 = arith.addf %37, %43 : vector<8x8x24xf32>
    %45 = vector.extract_strided_slice %2 {offsets = [2, 0, 0], sizes = [8, 8, 24], strides = [1, 1, 1]} : vector<10x10x24xf32> to vector<8x8x24xf32>
    %46 = vector.extract_strided_slice %3 {offsets = [6, 0], sizes = [1, 24], strides = [1, 1]} : vector<9x24xf32> to vector<1x24xf32>
    %47 = vector.shape_cast %46 : vector<1x24xf32> to vector<24xf32>
    %48 = vector.shape_cast %47 : vector<24xf32> to vector<1x1x24xf32>
    %49 = vector.broadcast %48 : vector<1x1x24xf32> to vector<8x8x24xf32>
    %50 = arith.mulf %45, %49 : vector<8x8x24xf32>
    %51 = arith.addf %44, %50 : vector<8x8x24xf32>
    %52 = vector.extract_strided_slice %2 {offsets = [2, 1, 0], sizes = [8, 8, 24], strides = [1, 1, 1]} : vector<10x10x24xf32> to vector<8x8x24xf32>
    %53 = vector.extract_strided_slice %3 {offsets = [7, 0], sizes = [1, 24], strides = [1, 1]} : vector<9x24xf32> to vector<1x24xf32>
    %54 = vector.shape_cast %53 : vector<1x24xf32> to vector<24xf32>
    %55 = vector.shape_cast %54 : vector<24xf32> to vector<1x1x24xf32>
    %56 = vector.broadcast %55 : vector<1x1x24xf32> to vector<8x8x24xf32>
    %57 = arith.mulf %52, %56 : vector<8x8x24xf32>
    %58 = arith.addf %51, %57 : vector<8x8x24xf32>
    %59 = vector.extract_strided_slice %2 {offsets = [2, 2, 0], sizes = [8, 8, 24], strides = [1, 1, 1]} : vector<10x10x24xf32> to vector<8x8x24xf32>
    %60 = vector.extract_strided_slice %3 {offsets = [8, 0], sizes = [1, 24], strides = [1, 1]} : vector<9x24xf32> to vector<1x24xf32>
    %61 = vector.shape_cast %60 : vector<1x24xf32> to vector<24xf32>
    %62 = vector.shape_cast %61 : vector<24xf32> to vector<1x1x24xf32>
    %63 = vector.broadcast %62 : vector<1x1x24xf32> to vector<8x8x24xf32>
    %64 = arith.mulf %59, %63 : vector<8x8x24xf32>
    %65 = arith.addf %58, %64 : vector<8x8x24xf32>
    %c0_5 = arith.constant 0 : index
    %c0_6 = arith.constant 0 : index
    %66 = vector.load %arg3[%c0_5, %c0_6] : memref<1x24xf32, #tpu.memory_space<vmem>>, vector<1x24xf32>
    %67 = vector.shape_cast %66 : vector<1x24xf32> to vector<1x1x24xf32>
    %68 = vector.broadcast %67 : vector<1x1x24xf32> to vector<8x8x24xf32>
    %69 = arith.addf %65, %68 : vector<8x8x24xf32>
    %cst = arith.constant 0.000000e+00 : f32
    %70 = vector.broadcast %cst : f32 to vector<8x8x24xf32>
    %71 = arith.maximumf %69, %70 : vector<8x8x24xf32>
    %72 = vector.extract_strided_slice %2 {offsets = [1, 1, 0], sizes = [8, 8, 24], strides = [1, 1, 1]} : vector<10x10x24xf32> to vector<8x8x24xf32>
    %73 = tpu.concatenate %72, %71 in 2 : vector<8x8x24xf32>, vector<8x8x24xf32> -> vector<8x8x48xf32>
    %74 = arith.truncf %73 : vector<8x8x48xf32> to vector<8x8x48xbf16>
    %c0_7 = arith.constant 0 : index
    %c0_8 = arith.constant 0 : index
    %c0_9 = arith.constant 0 : index
    %c0_10 = arith.constant 0 : index
    %75 = vector.load %arg4[%c0_7, %c0_8, %c0_9, %c0_10] : memref<1x8x8x48xbf16, #tpu.memory_space<vmem>>, vector<1x8x8x48xbf16>
    %76 = vector.shape_cast %75 : vector<1x8x8x48xbf16> to vector<8x8x48xbf16>
    %77 = vector.shape_cast %74 : vector<8x8x48xbf16> to vector<1x8x8x48xbf16>
    tpu.vector_store %arg4[%c0_7, %c0_8, %c0_9, %c0_10], %77 {strides = array<i32>} : memref<1x8x8x48xbf16, #tpu.memory_space<vmem>>, vector<1x8x8x48xbf16>,
    return
  }
  func.func @transform_0(%arg0: i32) -> (i32, i32, i32, i32) {
    %c0_i32 = arith.constant 0 : i32
    %c0_i32_0 = arith.constant 0 : i32
    %c0_i32_1 = arith.constant 0 : i32
    %c0_i32_2 = arith.constant 0 : i32
    return %arg0, %c0_i32, %c0_i32_0, %c0_i32_1 : i32, i32, i32, i32
  }
  func.func @transform_1(%arg0: i32) -> (i32, i32) {
    %c0_i32 = arith.constant 0 : i32
    %c0_i32_0 = arith.constant 0 : i32
    %c0_i32_1 = arith.constant 0 : i32
    return %c0_i32, %c0_i32_0 : i32, i32
  }
  func.func @transform_2(%arg0: i32) -> (i32, i32) {
    %c0_i32 = arith.constant 0 : i32
    %c0_i32_0 = arith.constant 0 : i32
    %c0_i32_1 = arith.constant 0 : i32
    return %c0_i32, %c0_i32_0 : i32, i32
  }
  func.func @transform_3(%arg0: i32) -> (i32, i32, i32, i32) {
    %c0_i32 = arith.constant 0 : i32
    %c0_i32_0 = arith.constant 0 : i32
    %c0_i32_1 = arith.constant 0 : i32
    %c0_i32_2 = arith.constant 0 : i32
    return %arg0, %c0_i32, %c0_i32_0, %c0_i32_1 : i32, i32, i32, i32
  }
}

module attributes {stable_mosaic.version = 11 : i64} {
  func.func @_dw_kernel(%arg0: i32, %arg1: memref<1x20x5x48xbf16, #tpu.memory_space<vmem>>, %arg2: memref<9x48xf32, #tpu.memory_space<vmem>>, %arg3: memref<1x48xf32, #tpu.memory_space<vmem>>, %arg4: memref<1x4x4x48xbf16, #tpu.memory_space<vmem>>) attributes {dimension_semantics = [#tpu.dimension_semantics<parallel>], iteration_bounds = array<i64: 2>, scalar_prefetch = 0 : i64, scratch_operands = 0 : i64, tpu.core_type = #tpu.core_type<tc>, window_params = [{transform_indices = @transform_0, window_bounds = array<i64: 1, 20, 5, 48>}, {pipeline_mode = #tpu.pipeline_mode<synchronous>, transform_indices = @transform_1, window_bounds = array<i64: 9, 48>}, {pipeline_mode = #tpu.pipeline_mode<synchronous>, transform_indices = @transform_2, window_bounds = array<i64: 1, 48>}, {transform_indices = @transform_3, window_bounds = array<i64: 1, 4, 4, 48>}]} {
    %c0 = arith.constant 0 : index
    %c0_0 = arith.constant 0 : index
    %c0_1 = arith.constant 0 : index
    %c0_2 = arith.constant 0 : index
    %0 = vector.load %arg1[%c0, %c0_0, %c0_1, %c0_2] : memref<1x20x5x48xbf16, #tpu.memory_space<vmem>>, vector<1x20x5x48xbf16>
    %1 = vector.shape_cast %0 : vector<1x20x5x48xbf16> to vector<20x5x48xbf16>
    %2 = arith.extf %1 : vector<20x5x48xbf16> to vector<20x5x48xf32>
    %c0_3 = arith.constant 0 : index
    %c0_4 = arith.constant 0 : index
    %3 = vector.load %arg2[%c0_3, %c0_4] : memref<9x48xf32, #tpu.memory_space<vmem>>, vector<9x48xf32>
    %4 = vector.extract_strided_slice %2 {offsets = [0, 0, 0], sizes = [4, 4, 48], strides = [1, 1, 1]} : vector<20x5x48xf32> to vector<4x4x48xf32>
    %5 = vector.extract_strided_slice %3 {offsets = [0, 0], sizes = [1, 48], strides = [1, 1]} : vector<9x48xf32> to vector<1x48xf32>
    %6 = vector.shape_cast %5 : vector<1x48xf32> to vector<48xf32>
    %7 = vector.shape_cast %6 : vector<48xf32> to vector<1x1x48xf32>
    %8 = vector.broadcast %7 : vector<1x1x48xf32> to vector<4x4x48xf32>
    %9 = arith.mulf %4, %8 : vector<4x4x48xf32>
    %10 = vector.extract_strided_slice %2 {offsets = [5, 0, 0], sizes = [4, 4, 48], strides = [1, 1, 1]} : vector<20x5x48xf32> to vector<4x4x48xf32>
    %11 = vector.extract_strided_slice %3 {offsets = [1, 0], sizes = [1, 48], strides = [1, 1]} : vector<9x48xf32> to vector<1x48xf32>
    %12 = vector.shape_cast %11 : vector<1x48xf32> to vector<48xf32>
    %13 = vector.shape_cast %12 : vector<48xf32> to vector<1x1x48xf32>
    %14 = vector.broadcast %13 : vector<1x1x48xf32> to vector<4x4x48xf32>
    %15 = arith.mulf %10, %14 : vector<4x4x48xf32>
    %16 = arith.addf %9, %15 : vector<4x4x48xf32>
    %17 = vector.extract_strided_slice %2 {offsets = [0, 1, 0], sizes = [4, 4, 48], strides = [1, 1, 1]} : vector<20x5x48xf32> to vector<4x4x48xf32>
    %18 = vector.extract_strided_slice %3 {offsets = [2, 0], sizes = [1, 48], strides = [1, 1]} : vector<9x48xf32> to vector<1x48xf32>
    %19 = vector.shape_cast %18 : vector<1x48xf32> to vector<48xf32>
    %20 = vector.shape_cast %19 : vector<48xf32> to vector<1x1x48xf32>
    %21 = vector.broadcast %20 : vector<1x1x48xf32> to vector<4x4x48xf32>
    %22 = arith.mulf %17, %21 : vector<4x4x48xf32>
    %23 = arith.addf %16, %22 : vector<4x4x48xf32>
    %24 = vector.extract_strided_slice %2 {offsets = [10, 0, 0], sizes = [4, 4, 48], strides = [1, 1, 1]} : vector<20x5x48xf32> to vector<4x4x48xf32>
    %25 = vector.extract_strided_slice %3 {offsets = [3, 0], sizes = [1, 48], strides = [1, 1]} : vector<9x48xf32> to vector<1x48xf32>
    %26 = vector.shape_cast %25 : vector<1x48xf32> to vector<48xf32>
    %27 = vector.shape_cast %26 : vector<48xf32> to vector<1x1x48xf32>
    %28 = vector.broadcast %27 : vector<1x1x48xf32> to vector<4x4x48xf32>
    %29 = arith.mulf %24, %28 : vector<4x4x48xf32>
    %30 = arith.addf %23, %29 : vector<4x4x48xf32>
    %31 = vector.extract_strided_slice %2 {offsets = [15, 0, 0], sizes = [4, 4, 48], strides = [1, 1, 1]} : vector<20x5x48xf32> to vector<4x4x48xf32>
    %32 = vector.extract_strided_slice %3 {offsets = [4, 0], sizes = [1, 48], strides = [1, 1]} : vector<9x48xf32> to vector<1x48xf32>
    %33 = vector.shape_cast %32 : vector<1x48xf32> to vector<48xf32>
    %34 = vector.shape_cast %33 : vector<48xf32> to vector<1x1x48xf32>
    %35 = vector.broadcast %34 : vector<1x1x48xf32> to vector<4x4x48xf32>
    %36 = arith.mulf %31, %35 : vector<4x4x48xf32>
    %37 = arith.addf %30, %36 : vector<4x4x48xf32>
    %38 = vector.extract_strided_slice %2 {offsets = [10, 1, 0], sizes = [4, 4, 48], strides = [1, 1, 1]} : vector<20x5x48xf32> to vector<4x4x48xf32>
    %39 = vector.extract_strided_slice %3 {offsets = [5, 0], sizes = [1, 48], strides = [1, 1]} : vector<9x48xf32> to vector<1x48xf32>
    %40 = vector.shape_cast %39 : vector<1x48xf32> to vector<48xf32>
    %41 = vector.shape_cast %40 : vector<48xf32> to vector<1x1x48xf32>
    %42 = vector.broadcast %41 : vector<1x1x48xf32> to vector<4x4x48xf32>
    %43 = arith.mulf %38, %42 : vector<4x4x48xf32>
    %44 = arith.addf %37, %43 : vector<4x4x48xf32>
    %45 = vector.extract_strided_slice %2 {offsets = [1, 0, 0], sizes = [4, 4, 48], strides = [1, 1, 1]} : vector<20x5x48xf32> to vector<4x4x48xf32>
    %46 = vector.extract_strided_slice %3 {offsets = [6, 0], sizes = [1, 48], strides = [1, 1]} : vector<9x48xf32> to vector<1x48xf32>
    %47 = vector.shape_cast %46 : vector<1x48xf32> to vector<48xf32>
    %48 = vector.shape_cast %47 : vector<48xf32> to vector<1x1x48xf32>
    %49 = vector.broadcast %48 : vector<1x1x48xf32> to vector<4x4x48xf32>
    %50 = arith.mulf %45, %49 : vector<4x4x48xf32>
    %51 = arith.addf %44, %50 : vector<4x4x48xf32>
    %52 = vector.extract_strided_slice %2 {offsets = [6, 0, 0], sizes = [4, 4, 48], strides = [1, 1, 1]} : vector<20x5x48xf32> to vector<4x4x48xf32>
    %53 = vector.extract_strided_slice %3 {offsets = [7, 0], sizes = [1, 48], strides = [1, 1]} : vector<9x48xf32> to vector<1x48xf32>
    %54 = vector.shape_cast %53 : vector<1x48xf32> to vector<48xf32>
    %55 = vector.shape_cast %54 : vector<48xf32> to vector<1x1x48xf32>
    %56 = vector.broadcast %55 : vector<1x1x48xf32> to vector<4x4x48xf32>
    %57 = arith.mulf %52, %56 : vector<4x4x48xf32>
    %58 = arith.addf %51, %57 : vector<4x4x48xf32>
    %59 = vector.extract_strided_slice %2 {offsets = [1, 1, 0], sizes = [4, 4, 48], strides = [1, 1, 1]} : vector<20x5x48xf32> to vector<4x4x48xf32>
    %60 = vector.extract_strided_slice %3 {offsets = [8, 0], sizes = [1, 48], strides = [1, 1]} : vector<9x48xf32> to vector<1x48xf32>
    %61 = vector.shape_cast %60 : vector<1x48xf32> to vector<48xf32>
    %62 = vector.shape_cast %61 : vector<48xf32> to vector<1x1x48xf32>
    %63 = vector.broadcast %62 : vector<1x1x48xf32> to vector<4x4x48xf32>
    %64 = arith.mulf %59, %63 : vector<4x4x48xf32>
    %65 = arith.addf %58, %64 : vector<4x4x48xf32>
    %c0_5 = arith.constant 0 : index
    %c0_6 = arith.constant 0 : index
    %66 = vector.load %arg3[%c0_5, %c0_6] : memref<1x48xf32, #tpu.memory_space<vmem>>, vector<1x48xf32>
    %67 = vector.shape_cast %66 : vector<1x48xf32> to vector<1x1x48xf32>
    %68 = vector.broadcast %67 : vector<1x1x48xf32> to vector<4x4x48xf32>
    %69 = arith.addf %65, %68 : vector<4x4x48xf32>
    %70 = arith.truncf %69 : vector<4x4x48xf32> to vector<4x4x48xbf16>
    %c0_7 = arith.constant 0 : index
    %c0_8 = arith.constant 0 : index
    %c0_9 = arith.constant 0 : index
    %c0_10 = arith.constant 0 : index
    %71 = vector.load %arg4[%c0_7, %c0_8, %c0_9, %c0_10] : memref<1x4x4x48xbf16, #tpu.memory_space<vmem>>, vector<1x4x4x48xbf16>
    %72 = vector.shape_cast %71 : vector<1x4x4x48xbf16> to vector<4x4x48xbf16>
    %73 = vector.shape_cast %70 : vector<4x4x48xbf16> to vector<1x4x4x48xbf16>
    tpu.vector_store %arg4[%c0_7, %c0_8, %c0_9, %c0_10], %73 {strides = array<i32>} : memref<1x4x4x48xbf16, #tpu.memory_space<vmem>>, vector<1x4x4x48xbf16>,
    return
  }
  func.func @transform_0(%arg0: i32) -> (i32, i32, i32, i32) {
    %c0_i32 = arith.constant 0 : i32
    %c0_i32_0 = arith.constant 0 : i32
    %c0_i32_1 = arith.constant 0 : i32
    %c0_i32_2 = arith.constant 0 : i32
    return %arg0, %c0_i32, %c0_i32_0, %c0_i32_1 : i32, i32, i32, i32
  }
  func.func @transform_1(%arg0: i32) -> (i32, i32) {
    %c0_i32 = arith.constant 0 : i32
    %c0_i32_0 = arith.constant 0 : i32
    %c0_i32_1 = arith.constant 0 : i32
    return %c0_i32, %c0_i32_0 : i32, i32
  }
  func.func @transform_2(%arg0: i32) -> (i32, i32) {
    %c0_i32 = arith.constant 0 : i32
    %c0_i32_0 = arith.constant 0 : i32
    %c0_i32_1 = arith.constant 0 : i32
    return %c0_i32, %c0_i32_0 : i32, i32
  }
  func.func @transform_3(%arg0: i32) -> (i32, i32, i32, i32) {
    %c0_i32 = arith.constant 0 : i32
    %c0_i32_0 = arith.constant 0 : i32
    %c0_i32_1 = arith.constant 0 : i32
    %c0_i32_2 = arith.constant 0 : i32
    return %arg0, %c0_i32, %c0_i32_0, %c0_i32_1 : i32, i32, i32, i32
  }
}

module attributes {stable_mosaic.version = 11 : i64} {
  func.func @_pw_kernel(%arg0: i32, %arg1: memref<1x16x48xbf16, #tpu.memory_space<vmem>>, %arg2: memref<48x12xbf16, #tpu.memory_space<vmem>>, %arg3: memref<1x12xf32, #tpu.memory_space<vmem>>, %arg4: memref<1x16x12xbf16, #tpu.memory_space<vmem>>) attributes {dimension_semantics = [#tpu.dimension_semantics<parallel>], iteration_bounds = array<i64: 2>, scalar_prefetch = 0 : i64, scratch_operands = 0 : i64, tpu.core_type = #tpu.core_type<tc>, window_params = [{transform_indices = @transform_0, window_bounds = array<i64: 1, 16, 48>}, {pipeline_mode = #tpu.pipeline_mode<synchronous>, transform_indices = @transform_1, window_bounds = array<i64: 48, 12>}, {pipeline_mode = #tpu.pipeline_mode<synchronous>, transform_indices = @transform_2, window_bounds = array<i64: 1, 12>}, {transform_indices = @transform_3, window_bounds = array<i64: 1, 16, 12>}]} {
    %c0 = arith.constant 0 : index
    %c0_0 = arith.constant 0 : index
    %c0_1 = arith.constant 0 : index
    %0 = vector.load %arg1[%c0, %c0_0, %c0_1] : memref<1x16x48xbf16, #tpu.memory_space<vmem>>, vector<1x16x48xbf16>
    %1 = vector.shape_cast %0 : vector<1x16x48xbf16> to vector<16x48xbf16>
    %c0_2 = arith.constant 0 : index
    %c0_3 = arith.constant 0 : index
    %2 = vector.load %arg2[%c0_2, %c0_3] : memref<48x12xbf16, #tpu.memory_space<vmem>>, vector<48x12xbf16>
    %cst = arith.constant dense<0.000000e+00> : vector<16x12xf32>
    %3 = tpu.matmul %1, %2, %cst {dimension_numbers = #tpu.dot_dimension_numbers<[1], [0], [0], [1], [0, 0, 1, 1], [], []>} : vector<16x48xbf16>, vector<48x12xbf16>, vector<16x12xf32> -> vector<16x12xf32>
    %c0_4 = arith.constant 0 : index
    %c0_5 = arith.constant 0 : index
    %4 = vector.load %arg3[%c0_4, %c0_5] : memref<1x12xf32, #tpu.memory_space<vmem>>, vector<1x12xf32>
    %5 = vector.broadcast %4 : vector<1x12xf32> to vector<16x12xf32>
    %6 = arith.addf %3, %5 : vector<16x12xf32>
    %7 = arith.truncf %6 : vector<16x12xf32> to vector<16x12xbf16>
    %c0_6 = arith.constant 0 : index
    %c0_7 = arith.constant 0 : index
    %c0_8 = arith.constant 0 : index
    %8 = vector.load %arg4[%c0_6, %c0_7, %c0_8] : memref<1x16x12xbf16, #tpu.memory_space<vmem>>, vector<1x16x12xbf16>
    %9 = vector.shape_cast %8 : vector<1x16x12xbf16> to vector<16x12xbf16>
    %10 = vector.shape_cast %7 : vector<16x12xbf16> to vector<1x16x12xbf16>
    tpu.vector_store %arg4[%c0_6, %c0_7, %c0_8], %10 {strides = array<i32>} : memref<1x16x12xbf16, #tpu.memory_space<vmem>>, vector<1x16x12xbf16>,
    return
  }
  func.func @transform_0(%arg0: i32) -> (i32, i32, i32) {
    %c0_i32 = arith.constant 0 : i32
    %c0_i32_0 = arith.constant 0 : i32
    %c0_i32_1 = arith.constant 0 : i32
    return %arg0, %c0_i32, %c0_i32_0 : i32, i32, i32
  }
  func.func @transform_1(%arg0: i32) -> (i32, i32) {
    %c0_i32 = arith.constant 0 : i32
    %c0_i32_0 = arith.constant 0 : i32
    %c0_i32_1 = arith.constant 0 : i32
    return %c0_i32, %c0_i32_0 : i32, i32
  }
  func.func @transform_2(%arg0: i32) -> (i32, i32) {
    %c0_i32 = arith.constant 0 : i32
    %c0_i32_0 = arith.constant 0 : i32
    %c0_i32_1 = arith.constant 0 : i32
    return %c0_i32, %c0_i32_0 : i32, i32
  }
  func.func @transform_3(%arg0: i32) -> (i32, i32, i32) {
    %c0_i32 = arith.constant 0 : i32
    %c0_i32_0 = arith.constant 0 : i32
    %c0_i32_1 = arith.constant 0 : i32
    return %arg0, %c0_i32, %c0_i32_0 : i32, i32, i32
  }
}

module attributes {stable_mosaic.version = 11 : i64} {
  func.func @_ghost_cheap_kernel(%arg0: i32, %arg1: memref<1x6x6x12xbf16, #tpu.memory_space<vmem>>, %arg2: memref<9x12xf32, #tpu.memory_space<vmem>>, %arg3: memref<1x12xf32, #tpu.memory_space<vmem>>, %arg4: memref<1x4x4x24xbf16, #tpu.memory_space<vmem>>, %arg5: memref<1x4x4x24xbf16, #tpu.memory_space<vmem>>) attributes {dimension_semantics = [#tpu.dimension_semantics<parallel>], iteration_bounds = array<i64: 2>, scalar_prefetch = 0 : i64, scratch_operands = 0 : i64, tpu.core_type = #tpu.core_type<tc>, window_params = [{transform_indices = @transform_0, window_bounds = array<i64: 1, 6, 6, 12>}, {pipeline_mode = #tpu.pipeline_mode<synchronous>, transform_indices = @transform_1, window_bounds = array<i64: 9, 12>}, {pipeline_mode = #tpu.pipeline_mode<synchronous>, transform_indices = @transform_2, window_bounds = array<i64: 1, 12>}, {transform_indices = @transform_3, window_bounds = array<i64: 1, 4, 4, 24>}, {transform_indices = @transform_4, window_bounds = array<i64: 1, 4, 4, 24>}]} {
    %c0 = arith.constant 0 : index
    %c0_0 = arith.constant 0 : index
    %c0_1 = arith.constant 0 : index
    %c0_2 = arith.constant 0 : index
    %0 = vector.load %arg1[%c0, %c0_0, %c0_1, %c0_2] : memref<1x6x6x12xbf16, #tpu.memory_space<vmem>>, vector<1x6x6x12xbf16>
    %1 = vector.shape_cast %0 : vector<1x6x6x12xbf16> to vector<6x6x12xbf16>
    %2 = arith.extf %1 : vector<6x6x12xbf16> to vector<6x6x12xf32>
    %c0_3 = arith.constant 0 : index
    %c0_4 = arith.constant 0 : index
    %3 = vector.load %arg2[%c0_3, %c0_4] : memref<9x12xf32, #tpu.memory_space<vmem>>, vector<9x12xf32>
    %4 = vector.extract_strided_slice %2 {offsets = [0, 0, 0], sizes = [4, 4, 12], strides = [1, 1, 1]} : vector<6x6x12xf32> to vector<4x4x12xf32>
    %5 = vector.extract_strided_slice %3 {offsets = [0, 0], sizes = [1, 12], strides = [1, 1]} : vector<9x12xf32> to vector<1x12xf32>
    %6 = vector.shape_cast %5 : vector<1x12xf32> to vector<12xf32>
    %7 = vector.shape_cast %6 : vector<12xf32> to vector<1x1x12xf32>
    %8 = vector.broadcast %7 : vector<1x1x12xf32> to vector<4x4x12xf32>
    %9 = arith.mulf %4, %8 : vector<4x4x12xf32>
    %10 = vector.extract_strided_slice %2 {offsets = [0, 1, 0], sizes = [4, 4, 12], strides = [1, 1, 1]} : vector<6x6x12xf32> to vector<4x4x12xf32>
    %11 = vector.extract_strided_slice %3 {offsets = [1, 0], sizes = [1, 12], strides = [1, 1]} : vector<9x12xf32> to vector<1x12xf32>
    %12 = vector.shape_cast %11 : vector<1x12xf32> to vector<12xf32>
    %13 = vector.shape_cast %12 : vector<12xf32> to vector<1x1x12xf32>
    %14 = vector.broadcast %13 : vector<1x1x12xf32> to vector<4x4x12xf32>
    %15 = arith.mulf %10, %14 : vector<4x4x12xf32>
    %16 = arith.addf %9, %15 : vector<4x4x12xf32>
    %17 = vector.extract_strided_slice %2 {offsets = [0, 2, 0], sizes = [4, 4, 12], strides = [1, 1, 1]} : vector<6x6x12xf32> to vector<4x4x12xf32>
    %18 = vector.extract_strided_slice %3 {offsets = [2, 0], sizes = [1, 12], strides = [1, 1]} : vector<9x12xf32> to vector<1x12xf32>
    %19 = vector.shape_cast %18 : vector<1x12xf32> to vector<12xf32>
    %20 = vector.shape_cast %19 : vector<12xf32> to vector<1x1x12xf32>
    %21 = vector.broadcast %20 : vector<1x1x12xf32> to vector<4x4x12xf32>
    %22 = arith.mulf %17, %21 : vector<4x4x12xf32>
    %23 = arith.addf %16, %22 : vector<4x4x12xf32>
    %24 = vector.extract_strided_slice %2 {offsets = [1, 0, 0], sizes = [4, 4, 12], strides = [1, 1, 1]} : vector<6x6x12xf32> to vector<4x4x12xf32>
    %25 = vector.extract_strided_slice %3 {offsets = [3, 0], sizes = [1, 12], strides = [1, 1]} : vector<9x12xf32> to vector<1x12xf32>
    %26 = vector.shape_cast %25 : vector<1x12xf32> to vector<12xf32>
    %27 = vector.shape_cast %26 : vector<12xf32> to vector<1x1x12xf32>
    %28 = vector.broadcast %27 : vector<1x1x12xf32> to vector<4x4x12xf32>
    %29 = arith.mulf %24, %28 : vector<4x4x12xf32>
    %30 = arith.addf %23, %29 : vector<4x4x12xf32>
    %31 = vector.extract_strided_slice %2 {offsets = [1, 1, 0], sizes = [4, 4, 12], strides = [1, 1, 1]} : vector<6x6x12xf32> to vector<4x4x12xf32>
    %32 = vector.extract_strided_slice %3 {offsets = [4, 0], sizes = [1, 12], strides = [1, 1]} : vector<9x12xf32> to vector<1x12xf32>
    %33 = vector.shape_cast %32 : vector<1x12xf32> to vector<12xf32>
    %34 = vector.shape_cast %33 : vector<12xf32> to vector<1x1x12xf32>
    %35 = vector.broadcast %34 : vector<1x1x12xf32> to vector<4x4x12xf32>
    %36 = arith.mulf %31, %35 : vector<4x4x12xf32>
    %37 = arith.addf %30, %36 : vector<4x4x12xf32>
    %38 = vector.extract_strided_slice %2 {offsets = [1, 2, 0], sizes = [4, 4, 12], strides = [1, 1, 1]} : vector<6x6x12xf32> to vector<4x4x12xf32>
    %39 = vector.extract_strided_slice %3 {offsets = [5, 0], sizes = [1, 12], strides = [1, 1]} : vector<9x12xf32> to vector<1x12xf32>
    %40 = vector.shape_cast %39 : vector<1x12xf32> to vector<12xf32>
    %41 = vector.shape_cast %40 : vector<12xf32> to vector<1x1x12xf32>
    %42 = vector.broadcast %41 : vector<1x1x12xf32> to vector<4x4x12xf32>
    %43 = arith.mulf %38, %42 : vector<4x4x12xf32>
    %44 = arith.addf %37, %43 : vector<4x4x12xf32>
    %45 = vector.extract_strided_slice %2 {offsets = [2, 0, 0], sizes = [4, 4, 12], strides = [1, 1, 1]} : vector<6x6x12xf32> to vector<4x4x12xf32>
    %46 = vector.extract_strided_slice %3 {offsets = [6, 0], sizes = [1, 12], strides = [1, 1]} : vector<9x12xf32> to vector<1x12xf32>
    %47 = vector.shape_cast %46 : vector<1x12xf32> to vector<12xf32>
    %48 = vector.shape_cast %47 : vector<12xf32> to vector<1x1x12xf32>
    %49 = vector.broadcast %48 : vector<1x1x12xf32> to vector<4x4x12xf32>
    %50 = arith.mulf %45, %49 : vector<4x4x12xf32>
    %51 = arith.addf %44, %50 : vector<4x4x12xf32>
    %52 = vector.extract_strided_slice %2 {offsets = [2, 1, 0], sizes = [4, 4, 12], strides = [1, 1, 1]} : vector<6x6x12xf32> to vector<4x4x12xf32>
    %53 = vector.extract_strided_slice %3 {offsets = [7, 0], sizes = [1, 12], strides = [1, 1]} : vector<9x12xf32> to vector<1x12xf32>
    %54 = vector.shape_cast %53 : vector<1x12xf32> to vector<12xf32>
    %55 = vector.shape_cast %54 : vector<12xf32> to vector<1x1x12xf32>
    %56 = vector.broadcast %55 : vector<1x1x12xf32> to vector<4x4x12xf32>
    %57 = arith.mulf %52, %56 : vector<4x4x12xf32>
    %58 = arith.addf %51, %57 : vector<4x4x12xf32>
    %59 = vector.extract_strided_slice %2 {offsets = [2, 2, 0], sizes = [4, 4, 12], strides = [1, 1, 1]} : vector<6x6x12xf32> to vector<4x4x12xf32>
    %60 = vector.extract_strided_slice %3 {offsets = [8, 0], sizes = [1, 12], strides = [1, 1]} : vector<9x12xf32> to vector<1x12xf32>
    %61 = vector.shape_cast %60 : vector<1x12xf32> to vector<12xf32>
    %62 = vector.shape_cast %61 : vector<12xf32> to vector<1x1x12xf32>
    %63 = vector.broadcast %62 : vector<1x1x12xf32> to vector<4x4x12xf32>
    %64 = arith.mulf %59, %63 : vector<4x4x12xf32>
    %65 = arith.addf %58, %64 : vector<4x4x12xf32>
    %c0_5 = arith.constant 0 : index
    %c0_6 = arith.constant 0 : index
    %66 = vector.load %arg3[%c0_5, %c0_6] : memref<1x12xf32, #tpu.memory_space<vmem>>, vector<1x12xf32>
    %67 = vector.shape_cast %66 : vector<1x12xf32> to vector<1x1x12xf32>
    %68 = vector.broadcast %67 : vector<1x1x12xf32> to vector<4x4x12xf32>
    %69 = arith.addf %65, %68 : vector<4x4x12xf32>
    %70 = vector.extract_strided_slice %2 {offsets = [1, 1, 0], sizes = [4, 4, 12], strides = [1, 1, 1]} : vector<6x6x12xf32> to vector<4x4x12xf32>
    %71 = tpu.concatenate %70, %69 in 2 : vector<4x4x12xf32>, vector<4x4x12xf32> -> vector<4x4x24xf32>
    %c0_7 = arith.constant 0 : index
    %c0_8 = arith.constant 0 : index
    %c0_9 = arith.constant 0 : index
    %c0_10 = arith.constant 0 : index
    %72 = vector.load %arg4[%c0_7, %c0_8, %c0_9, %c0_10] : memref<1x4x4x24xbf16, #tpu.memory_space<vmem>>, vector<1x4x4x24xbf16>
    %73 = vector.shape_cast %72 : vector<1x4x4x24xbf16> to vector<4x4x24xbf16>
    %74 = arith.extf %73 : vector<4x4x24xbf16> to vector<4x4x24xf32>
    %75 = arith.addf %71, %74 : vector<4x4x24xf32>
    %76 = arith.truncf %75 : vector<4x4x24xf32> to vector<4x4x24xbf16>
    %c0_11 = arith.constant 0 : index
    %c0_12 = arith.constant 0 : index
    %c0_13 = arith.constant 0 : index
    %c0_14 = arith.constant 0 : index
    %77 = vector.load %arg5[%c0_11, %c0_12, %c0_13, %c0_14] : memref<1x4x4x24xbf16, #tpu.memory_space<vmem>>, vector<1x4x4x24xbf16>
    %78 = vector.shape_cast %77 : vector<1x4x4x24xbf16> to vector<4x4x24xbf16>
    %79 = vector.shape_cast %76 : vector<4x4x24xbf16> to vector<1x4x4x24xbf16>
    tpu.vector_store %arg5[%c0_11, %c0_12, %c0_13, %c0_14], %79 {strides = array<i32>} : memref<1x4x4x24xbf16, #tpu.memory_space<vmem>>, vector<1x4x4x24xbf16>,
    return
  }
  func.func @transform_0(%arg0: i32) -> (i32, i32, i32, i32) {
    %c0_i32 = arith.constant 0 : i32
    %c0_i32_0 = arith.constant 0 : i32
    %c0_i32_1 = arith.constant 0 : i32
    %c0_i32_2 = arith.constant 0 : i32
    return %arg0, %c0_i32, %c0_i32_0, %c0_i32_1 : i32, i32, i32, i32
  }
  func.func @transform_1(%arg0: i32) -> (i32, i32) {
    %c0_i32 = arith.constant 0 : i32
    %c0_i32_0 = arith.constant 0 : i32
    %c0_i32_1 = arith.constant 0 : i32
    return %c0_i32, %c0_i32_0 : i32, i32
  }
  func.func @transform_2(%arg0: i32) -> (i32, i32) {
    %c0_i32 = arith.constant 0 : i32
    %c0_i32_0 = arith.constant 0 : i32
    %c0_i32_1 = arith.constant 0 : i32
    return %c0_i32, %c0_i32_0 : i32, i32
  }
  func.func @transform_3(%arg0: i32) -> (i32, i32, i32, i32) {
    %c0_i32 = arith.constant 0 : i32
    %c0_i32_0 = arith.constant 0 : i32
    %c0_i32_1 = arith.constant 0 : i32
    %c0_i32_2 = arith.constant 0 : i32
    return %arg0, %c0_i32, %c0_i32_0, %c0_i32_1 : i32, i32, i32, i32
  }
  func.func @transform_4(%arg0: i32) -> (i32, i32, i32, i32) {
    %c0_i32 = arith.constant 0 : i32
    %c0_i32_0 = arith.constant 0 : i32
    %c0_i32_1 = arith.constant 0 : i32
    %c0_i32_2 = arith.constant 0 : i32
    return %arg0, %c0_i32, %c0_i32_0, %c0_i32_1 : i32, i32, i32, i32
  }
}

module attributes {stable_mosaic.version = 11 : i64} {
  func.func @_pw_kernel(%arg0: i32, %arg1: memref<1x4x24xbf16, #tpu.memory_space<vmem>>, %arg2: memref<24x40xbf16, #tpu.memory_space<vmem>>, %arg3: memref<1x40xf32, #tpu.memory_space<vmem>>, %arg4: memref<1x4x40xbf16, #tpu.memory_space<vmem>>) attributes {dimension_semantics = [#tpu.dimension_semantics<parallel>], iteration_bounds = array<i64: 2>, scalar_prefetch = 0 : i64, scratch_operands = 0 : i64, tpu.core_type = #tpu.core_type<tc>, window_params = [{transform_indices = @transform_0, window_bounds = array<i64: 1, 4, 24>}, {pipeline_mode = #tpu.pipeline_mode<synchronous>, transform_indices = @transform_1, window_bounds = array<i64: 24, 40>}, {pipeline_mode = #tpu.pipeline_mode<synchronous>, transform_indices = @transform_2, window_bounds = array<i64: 1, 40>}, {transform_indices = @transform_3, window_bounds = array<i64: 1, 4, 40>}]} {
    %c0 = arith.constant 0 : index
    %c0_0 = arith.constant 0 : index
    %c0_1 = arith.constant 0 : index
    %0 = vector.load %arg1[%c0, %c0_0, %c0_1] : memref<1x4x24xbf16, #tpu.memory_space<vmem>>, vector<1x4x24xbf16>
    %1 = vector.shape_cast %0 : vector<1x4x24xbf16> to vector<4x24xbf16>
    %c0_2 = arith.constant 0 : index
    %c0_3 = arith.constant 0 : index
    %2 = vector.load %arg2[%c0_2, %c0_3] : memref<24x40xbf16, #tpu.memory_space<vmem>>, vector<24x40xbf16>
    %cst = arith.constant dense<0.000000e+00> : vector<4x40xf32>
    %3 = tpu.matmul %1, %2, %cst {dimension_numbers = #tpu.dot_dimension_numbers<[1], [0], [0], [1], [0, 0, 1, 1], [], []>} : vector<4x24xbf16>, vector<24x40xbf16>, vector<4x40xf32> -> vector<4x40xf32>
    %c0_4 = arith.constant 0 : index
    %c0_5 = arith.constant 0 : index
    %4 = vector.load %arg3[%c0_4, %c0_5] : memref<1x40xf32, #tpu.memory_space<vmem>>, vector<1x40xf32>
    %5 = vector.broadcast %4 : vector<1x40xf32> to vector<4x40xf32>
    %6 = arith.addf %3, %5 : vector<4x40xf32>
    %7 = arith.truncf %6 : vector<4x40xf32> to vector<4x40xbf16>
    %c0_6 = arith.constant 0 : index
    %c0_7 = arith.constant 0 : index
    %c0_8 = arith.constant 0 : index
    %8 = vector.load %arg4[%c0_6, %c0_7, %c0_8] : memref<1x4x40xbf16, #tpu.memory_space<vmem>>, vector<1x4x40xbf16>
    %9 = vector.shape_cast %8 : vector<1x4x40xbf16> to vector<4x40xbf16>
    %10 = vector.shape_cast %7 : vector<4x40xbf16> to vector<1x4x40xbf16>
    tpu.vector_store %arg4[%c0_6, %c0_7, %c0_8], %10 {strides = array<i32>} : memref<1x4x40xbf16, #tpu.memory_space<vmem>>, vector<1x4x40xbf16>,
    return
  }
  func.func @transform_0(%arg0: i32) -> (i32, i32, i32) {
    %c0_i32 = arith.constant 0 : i32
    %c0_i32_0 = arith.constant 0 : i32
    %c0_i32_1 = arith.constant 0 : i32
    return %arg0, %c0_i32, %c0_i32_0 : i32, i32, i32
  }
  func.func @transform_1(%arg0: i32) -> (i32, i32) {
    %c0_i32 = arith.constant 0 : i32
    %c0_i32_0 = arith.constant 0 : i32
    %c0_i32_1 = arith.constant 0 : i32
    return %c0_i32, %c0_i32_0 : i32, i32
  }
  func.func @transform_2(%arg0: i32) -> (i32, i32) {
    %c0_i32 = arith.constant 0 : i32
    %c0_i32_0 = arith.constant 0 : i32
    %c0_i32_1 = arith.constant 0 : i32
    return %c0_i32, %c0_i32_0 : i32, i32
  }
  func.func @transform_3(%arg0: i32) -> (i32, i32, i32) {
    %c0_i32 = arith.constant 0 : i32
    %c0_i32_0 = arith.constant 0 : i32
    %c0_i32_1 = arith.constant 0 : i32
    return %arg0, %c0_i32, %c0_i32_0 : i32, i32, i32
  }
}

module attributes {stable_mosaic.version = 11 : i64} {
  func.func @_dw_kernel(%arg0: i32, %arg1: memref<1x16x4x24xbf16, #tpu.memory_space<vmem>>, %arg2: memref<25x24xf32, #tpu.memory_space<vmem>>, %arg3: memref<1x24xf32, #tpu.memory_space<vmem>>, %arg4: memref<1x2x2x24xbf16, #tpu.memory_space<vmem>>) attributes {dimension_semantics = [#tpu.dimension_semantics<parallel>], iteration_bounds = array<i64: 2>, scalar_prefetch = 0 : i64, scratch_operands = 0 : i64, tpu.core_type = #tpu.core_type<tc>, window_params = [{transform_indices = @transform_0, window_bounds = array<i64: 1, 16, 4, 24>}, {pipeline_mode = #tpu.pipeline_mode<synchronous>, transform_indices = @transform_1, window_bounds = array<i64: 25, 24>}, {pipeline_mode = #tpu.pipeline_mode<synchronous>, transform_indices = @transform_2, window_bounds = array<i64: 1, 24>}, {transform_indices = @transform_3, window_bounds = array<i64: 1, 2, 2, 24>}]} {
    %c0 = arith.constant 0 : index
    %c0_0 = arith.constant 0 : index
    %c0_1 = arith.constant 0 : index
    %c0_2 = arith.constant 0 : index
    %0 = vector.load %arg1[%c0, %c0_0, %c0_1, %c0_2] : memref<1x16x4x24xbf16, #tpu.memory_space<vmem>>, vector<1x16x4x24xbf16>
    %1 = vector.shape_cast %0 : vector<1x16x4x24xbf16> to vector<16x4x24xbf16>
    %2 = arith.extf %1 : vector<16x4x24xbf16> to vector<16x4x24xf32>
    %c0_3 = arith.constant 0 : index
    %c0_4 = arith.constant 0 : index
    %3 = vector.load %arg2[%c0_3, %c0_4] : memref<25x24xf32, #tpu.memory_space<vmem>>, vector<25x24xf32>
    %4 = vector.extract_strided_slice %2 {offsets = [0, 0, 0], sizes = [2, 2, 24], strides = [1, 1, 1]} : vector<16x4x24xf32> to vector<2x2x24xf32>
    %5 = vector.extract_strided_slice %3 {offsets = [0, 0], sizes = [1, 24], strides = [1, 1]} : vector<25x24xf32> to vector<1x24xf32>
    %6 = vector.shape_cast %5 : vector<1x24xf32> to vector<24xf32>
    %7 = vector.shape_cast %6 : vector<24xf32> to vector<1x1x24xf32>
    %8 = vector.broadcast %7 : vector<1x1x24xf32> to vector<2x2x24xf32>
    %9 = arith.mulf %4, %8 : vector<2x2x24xf32>
    %10 = vector.extract_strided_slice %2 {offsets = [4, 0, 0], sizes = [2, 2, 24], strides = [1, 1, 1]} : vector<16x4x24xf32> to vector<2x2x24xf32>
    %11 = vector.extract_strided_slice %3 {offsets = [1, 0], sizes = [1, 24], strides = [1, 1]} : vector<25x24xf32> to vector<1x24xf32>
    %12 = vector.shape_cast %11 : vector<1x24xf32> to vector<24xf32>
    %13 = vector.shape_cast %12 : vector<24xf32> to vector<1x1x24xf32>
    %14 = vector.broadcast %13 : vector<1x1x24xf32> to vector<2x2x24xf32>
    %15 = arith.mulf %10, %14 : vector<2x2x24xf32>
    %16 = arith.addf %9, %15 : vector<2x2x24xf32>
    %17 = vector.extract_strided_slice %2 {offsets = [0, 1, 0], sizes = [2, 2, 24], strides = [1, 1, 1]} : vector<16x4x24xf32> to vector<2x2x24xf32>
    %18 = vector.extract_strided_slice %3 {offsets = [2, 0], sizes = [1, 24], strides = [1, 1]} : vector<25x24xf32> to vector<1x24xf32>
    %19 = vector.shape_cast %18 : vector<1x24xf32> to vector<24xf32>
    %20 = vector.shape_cast %19 : vector<24xf32> to vector<1x1x24xf32>
    %21 = vector.broadcast %20 : vector<1x1x24xf32> to vector<2x2x24xf32>
    %22 = arith.mulf %17, %21 : vector<2x2x24xf32>
    %23 = arith.addf %16, %22 : vector<2x2x24xf32>
    %24 = vector.extract_strided_slice %2 {offsets = [4, 1, 0], sizes = [2, 2, 24], strides = [1, 1, 1]} : vector<16x4x24xf32> to vector<2x2x24xf32>
    %25 = vector.extract_strided_slice %3 {offsets = [3, 0], sizes = [1, 24], strides = [1, 1]} : vector<25x24xf32> to vector<1x24xf32>
    %26 = vector.shape_cast %25 : vector<1x24xf32> to vector<24xf32>
    %27 = vector.shape_cast %26 : vector<24xf32> to vector<1x1x24xf32>
    %28 = vector.broadcast %27 : vector<1x1x24xf32> to vector<2x2x24xf32>
    %29 = arith.mulf %24, %28 : vector<2x2x24xf32>
    %30 = arith.addf %23, %29 : vector<2x2x24xf32>
    %31 = vector.extract_strided_slice %2 {offsets = [0, 2, 0], sizes = [2, 2, 24], strides = [1, 1, 1]} : vector<16x4x24xf32> to vector<2x2x24xf32>
    %32 = vector.extract_strided_slice %3 {offsets = [4, 0], sizes = [1, 24], strides = [1, 1]} : vector<25x24xf32> to vector<1x24xf32>
    %33 = vector.shape_cast %32 : vector<1x24xf32> to vector<24xf32>
    %34 = vector.shape_cast %33 : vector<24xf32> to vector<1x1x24xf32>
    %35 = vector.broadcast %34 : vector<1x1x24xf32> to vector<2x2x24xf32>
    %36 = arith.mulf %31, %35 : vector<2x2x24xf32>
    %37 = arith.addf %30, %36 : vector<2x2x24xf32>
    %38 = vector.extract_strided_slice %2 {offsets = [8, 0, 0], sizes = [2, 2, 24], strides = [1, 1, 1]} : vector<16x4x24xf32> to vector<2x2x24xf32>
    %39 = vector.extract_strided_slice %3 {offsets = [5, 0], sizes = [1, 24], strides = [1, 1]} : vector<25x24xf32> to vector<1x24xf32>
    %40 = vector.shape_cast %39 : vector<1x24xf32> to vector<24xf32>
    %41 = vector.shape_cast %40 : vector<24xf32> to vector<1x1x24xf32>
    %42 = vector.broadcast %41 : vector<1x1x24xf32> to vector<2x2x24xf32>
    %43 = arith.mulf %38, %42 : vector<2x2x24xf32>
    %44 = arith.addf %37, %43 : vector<2x2x24xf32>
    %45 = vector.extract_strided_slice %2 {offsets = [12, 0, 0], sizes = [2, 2, 24], strides = [1, 1, 1]} : vector<16x4x24xf32> to vector<2x2x24xf32>
    %46 = vector.extract_strided_slice %3 {offsets = [6, 0], sizes = [1, 24], strides = [1, 1]} : vector<25x24xf32> to vector<1x24xf32>
    %47 = vector.shape_cast %46 : vector<1x24xf32> to vector<24xf32>
    %48 = vector.shape_cast %47 : vector<24xf32> to vector<1x1x24xf32>
    %49 = vector.broadcast %48 : vector<1x1x24xf32> to vector<2x2x24xf32>
    %50 = arith.mulf %45, %49 : vector<2x2x24xf32>
    %51 = arith.addf %44, %50 : vector<2x2x24xf32>
    %52 = vector.extract_strided_slice %2 {offsets = [8, 1, 0], sizes = [2, 2, 24], strides = [1, 1, 1]} : vector<16x4x24xf32> to vector<2x2x24xf32>
    %53 = vector.extract_strided_slice %3 {offsets = [7, 0], sizes = [1, 24], strides = [1, 1]} : vector<25x24xf32> to vector<1x24xf32>
    %54 = vector.shape_cast %53 : vector<1x24xf32> to vector<24xf32>
    %55 = vector.shape_cast %54 : vector<24xf32> to vector<1x1x24xf32>
    %56 = vector.broadcast %55 : vector<1x1x24xf32> to vector<2x2x24xf32>
    %57 = arith.mulf %52, %56 : vector<2x2x24xf32>
    %58 = arith.addf %51, %57 : vector<2x2x24xf32>
    %59 = vector.extract_strided_slice %2 {offsets = [12, 1, 0], sizes = [2, 2, 24], strides = [1, 1, 1]} : vector<16x4x24xf32> to vector<2x2x24xf32>
    %60 = vector.extract_strided_slice %3 {offsets = [8, 0], sizes = [1, 24], strides = [1, 1]} : vector<25x24xf32> to vector<1x24xf32>
    %61 = vector.shape_cast %60 : vector<1x24xf32> to vector<24xf32>
    %62 = vector.shape_cast %61 : vector<24xf32> to vector<1x1x24xf32>
    %63 = vector.broadcast %62 : vector<1x1x24xf32> to vector<2x2x24xf32>
    %64 = arith.mulf %59, %63 : vector<2x2x24xf32>
    %65 = arith.addf %58, %64 : vector<2x2x24xf32>
    %66 = vector.extract_strided_slice %2 {offsets = [8, 2, 0], sizes = [2, 2, 24], strides = [1, 1, 1]} : vector<16x4x24xf32> to vector<2x2x24xf32>
    %67 = vector.extract_strided_slice %3 {offsets = [9, 0], sizes = [1, 24], strides = [1, 1]} : vector<25x24xf32> to vector<1x24xf32>
    %68 = vector.shape_cast %67 : vector<1x24xf32> to vector<24xf32>
    %69 = vector.shape_cast %68 : vector<24xf32> to vector<1x1x24xf32>
    %70 = vector.broadcast %69 : vector<1x1x24xf32> to vector<2x2x24xf32>
    %71 = arith.mulf %66, %70 : vector<2x2x24xf32>
    %72 = arith.addf %65, %71 : vector<2x2x24xf32>
    %73 = vector.extract_strided_slice %2 {offsets = [1, 0, 0], sizes = [2, 2, 24], strides = [1, 1, 1]} : vector<16x4x24xf32> to vector<2x2x24xf32>
    %74 = vector.extract_strided_slice %3 {offsets = [10, 0], sizes = [1, 24], strides = [1, 1]} : vector<25x24xf32> to vector<1x24xf32>
    %75 = vector.shape_cast %74 : vector<1x24xf32> to vector<24xf32>
    %76 = vector.shape_cast %75 : vector<24xf32> to vector<1x1x24xf32>
    %77 = vector.broadcast %76 : vector<1x1x24xf32> to vector<2x2x24xf32>
    %78 = arith.mulf %73, %77 : vector<2x2x24xf32>
    %79 = arith.addf %72, %78 : vector<2x2x24xf32>
    %80 = vector.extract_strided_slice %2 {offsets = [5, 0, 0], sizes = [2, 2, 24], strides = [1, 1, 1]} : vector<16x4x24xf32> to vector<2x2x24xf32>
    %81 = vector.extract_strided_slice %3 {offsets = [11, 0], sizes = [1, 24], strides = [1, 1]} : vector<25x24xf32> to vector<1x24xf32>
    %82 = vector.shape_cast %81 : vector<1x24xf32> to vector<24xf32>
    %83 = vector.shape_cast %82 : vector<24xf32> to vector<1x1x24xf32>
    %84 = vector.broadcast %83 : vector<1x1x24xf32> to vector<2x2x24xf32>
    %85 = arith.mulf %80, %84 : vector<2x2x24xf32>
    %86 = arith.addf %79, %85 : vector<2x2x24xf32>
    %87 = vector.extract_strided_slice %2 {offsets = [1, 1, 0], sizes = [2, 2, 24], strides = [1, 1, 1]} : vector<16x4x24xf32> to vector<2x2x24xf32>
    %88 = vector.extract_strided_slice %3 {offsets = [12, 0], sizes = [1, 24], strides = [1, 1]} : vector<25x24xf32> to vector<1x24xf32>
    %89 = vector.shape_cast %88 : vector<1x24xf32> to vector<24xf32>
    %90 = vector.shape_cast %89 : vector<24xf32> to vector<1x1x24xf32>
    %91 = vector.broadcast %90 : vector<1x1x24xf32> to vector<2x2x24xf32>
    %92 = arith.mulf %87, %91 : vector<2x2x24xf32>
    %93 = arith.addf %86, %92 : vector<2x2x24xf32>
    %94 = vector.extract_strided_slice %2 {offsets = [5, 1, 0], sizes = [2, 2, 24], strides = [1, 1, 1]} : vector<16x4x24xf32> to vector<2x2x24xf32>
    %95 = vector.extract_strided_slice %3 {offsets = [13, 0], sizes = [1, 24], strides = [1, 1]} : vector<25x24xf32> to vector<1x24xf32>
    %96 = vector.shape_cast %95 : vector<1x24xf32> to vector<24xf32>
    %97 = vector.shape_cast %96 : vector<24xf32> to vector<1x1x24xf32>
    %98 = vector.broadcast %97 : vector<1x1x24xf32> to vector<2x2x24xf32>
    %99 = arith.mulf %94, %98 : vector<2x2x24xf32>
    %100 = arith.addf %93, %99 : vector<2x2x24xf32>
    %101 = vector.extract_strided_slice %2 {offsets = [1, 2, 0], sizes = [2, 2, 24], strides = [1, 1, 1]} : vector<16x4x24xf32> to vector<2x2x24xf32>
    %102 = vector.extract_strided_slice %3 {offsets = [14, 0], sizes = [1, 24], strides = [1, 1]} : vector<25x24xf32> to vector<1x24xf32>
    %103 = vector.shape_cast %102 : vector<1x24xf32> to vector<24xf32>
    %104 = vector.shape_cast %103 : vector<24xf32> to vector<1x1x24xf32>
    %105 = vector.broadcast %104 : vector<1x1x24xf32> to vector<2x2x24xf32>
    %106 = arith.mulf %101, %105 : vector<2x2x24xf32>
    %107 = arith.addf %100, %106 : vector<2x2x24xf32>
    %108 = vector.extract_strided_slice %2 {offsets = [9, 0, 0], sizes = [2, 2, 24], strides = [1, 1, 1]} : vector<16x4x24xf32> to vector<2x2x24xf32>
    %109 = vector.extract_strided_slice %3 {offsets = [15, 0], sizes = [1, 24], strides = [1, 1]} : vector<25x24xf32> to vector<1x24xf32>
    %110 = vector.shape_cast %109 : vector<1x24xf32> to vector<24xf32>
    %111 = vector.shape_cast %110 : vector<24xf32> to vector<1x1x24xf32>
    %112 = vector.broadcast %111 : vector<1x1x24xf32> to vector<2x2x24xf32>
    %113 = arith.mulf %108, %112 : vector<2x2x24xf32>
    %114 = arith.addf %107, %113 : vector<2x2x24xf32>
    %115 = vector.extract_strided_slice %2 {offsets = [13, 0, 0], sizes = [2, 2, 24], strides = [1, 1, 1]} : vector<16x4x24xf32> to vector<2x2x24xf32>
    %116 = vector.extract_strided_slice %3 {offsets = [16, 0], sizes = [1, 24], strides = [1, 1]} : vector<25x24xf32> to vector<1x24xf32>
    %117 = vector.shape_cast %116 : vector<1x24xf32> to vector<24xf32>
    %118 = vector.shape_cast %117 : vector<24xf32> to vector<1x1x24xf32>
    %119 = vector.broadcast %118 : vector<1x1x24xf32> to vector<2x2x24xf32>
    %120 = arith.mulf %115, %119 : vector<2x2x24xf32>
    %121 = arith.addf %114, %120 : vector<2x2x24xf32>
    %122 = vector.extract_strided_slice %2 {offsets = [9, 1, 0], sizes = [2, 2, 24], strides = [1, 1, 1]} : vector<16x4x24xf32> to vector<2x2x24xf32>
    %123 = vector.extract_strided_slice %3 {offsets = [17, 0], sizes = [1, 24], strides = [1, 1]} : vector<25x24xf32> to vector<1x24xf32>
    %124 = vector.shape_cast %123 : vector<1x24xf32> to vector<24xf32>
    %125 = vector.shape_cast %124 : vector<24xf32> to vector<1x1x24xf32>
    %126 = vector.broadcast %125 : vector<1x1x24xf32> to vector<2x2x24xf32>
    %127 = arith.mulf %122, %126 : vector<2x2x24xf32>
    %128 = arith.addf %121, %127 : vector<2x2x24xf32>
    %129 = vector.extract_strided_slice %2 {offsets = [13, 1, 0], sizes = [2, 2, 24], strides = [1, 1, 1]} : vector<16x4x24xf32> to vector<2x2x24xf32>
    %130 = vector.extract_strided_slice %3 {offsets = [18, 0], sizes = [1, 24], strides = [1, 1]} : vector<25x24xf32> to vector<1x24xf32>
    %131 = vector.shape_cast %130 : vector<1x24xf32> to vector<24xf32>
    %132 = vector.shape_cast %131 : vector<24xf32> to vector<1x1x24xf32>
    %133 = vector.broadcast %132 : vector<1x1x24xf32> to vector<2x2x24xf32>
    %134 = arith.mulf %129, %133 : vector<2x2x24xf32>
    %135 = arith.addf %128, %134 : vector<2x2x24xf32>
    %136 = vector.extract_strided_slice %2 {offsets = [9, 2, 0], sizes = [2, 2, 24], strides = [1, 1, 1]} : vector<16x4x24xf32> to vector<2x2x24xf32>
    %137 = vector.extract_strided_slice %3 {offsets = [19, 0], sizes = [1, 24], strides = [1, 1]} : vector<25x24xf32> to vector<1x24xf32>
    %138 = vector.shape_cast %137 : vector<1x24xf32> to vector<24xf32>
    %139 = vector.shape_cast %138 : vector<24xf32> to vector<1x1x24xf32>
    %140 = vector.broadcast %139 : vector<1x1x24xf32> to vector<2x2x24xf32>
    %141 = arith.mulf %136, %140 : vector<2x2x24xf32>
    %142 = arith.addf %135, %141 : vector<2x2x24xf32>
    %143 = vector.extract_strided_slice %2 {offsets = [2, 0, 0], sizes = [2, 2, 24], strides = [1, 1, 1]} : vector<16x4x24xf32> to vector<2x2x24xf32>
    %144 = vector.extract_strided_slice %3 {offsets = [20, 0], sizes = [1, 24], strides = [1, 1]} : vector<25x24xf32> to vector<1x24xf32>
    %145 = vector.shape_cast %144 : vector<1x24xf32> to vector<24xf32>
    %146 = vector.shape_cast %145 : vector<24xf32> to vector<1x1x24xf32>
    %147 = vector.broadcast %146 : vector<1x1x24xf32> to vector<2x2x24xf32>
    %148 = arith.mulf %143, %147 : vector<2x2x24xf32>
    %149 = arith.addf %142, %148 : vector<2x2x24xf32>
    %150 = vector.extract_strided_slice %2 {offsets = [6, 0, 0], sizes = [2, 2, 24], strides = [1, 1, 1]} : vector<16x4x24xf32> to vector<2x2x24xf32>
    %151 = vector.extract_strided_slice %3 {offsets = [21, 0], sizes = [1, 24], strides = [1, 1]} : vector<25x24xf32> to vector<1x24xf32>
    %152 = vector.shape_cast %151 : vector<1x24xf32> to vector<24xf32>
    %153 = vector.shape_cast %152 : vector<24xf32> to vector<1x1x24xf32>
    %154 = vector.broadcast %153 : vector<1x1x24xf32> to vector<2x2x24xf32>
    %155 = arith.mulf %150, %154 : vector<2x2x24xf32>
    %156 = arith.addf %149, %155 : vector<2x2x24xf32>
    %157 = vector.extract_strided_slice %2 {offsets = [2, 1, 0], sizes = [2, 2, 24], strides = [1, 1, 1]} : vector<16x4x24xf32> to vector<2x2x24xf32>
    %158 = vector.extract_strided_slice %3 {offsets = [22, 0], sizes = [1, 24], strides = [1, 1]} : vector<25x24xf32> to vector<1x24xf32>
    %159 = vector.shape_cast %158 : vector<1x24xf32> to vector<24xf32>
    %160 = vector.shape_cast %159 : vector<24xf32> to vector<1x1x24xf32>
    %161 = vector.broadcast %160 : vector<1x1x24xf32> to vector<2x2x24xf32>
    %162 = arith.mulf %157, %161 : vector<2x2x24xf32>
    %163 = arith.addf %156, %162 : vector<2x2x24xf32>
    %164 = vector.extract_strided_slice %2 {offsets = [6, 1, 0], sizes = [2, 2, 24], strides = [1, 1, 1]} : vector<16x4x24xf32> to vector<2x2x24xf32>
    %165 = vector.extract_strided_slice %3 {offsets = [23, 0], sizes = [1, 24], strides = [1, 1]} : vector<25x24xf32> to vector<1x24xf32>
    %166 = vector.shape_cast %165 : vector<1x24xf32> to vector<24xf32>
    %167 = vector.shape_cast %166 : vector<24xf32> to vector<1x1x24xf32>
    %168 = vector.broadcast %167 : vector<1x1x24xf32> to vector<2x2x24xf32>
    %169 = arith.mulf %164, %168 : vector<2x2x24xf32>
    %170 = arith.addf %163, %169 : vector<2x2x24xf32>
    %171 = vector.extract_strided_slice %2 {offsets = [2, 2, 0], sizes = [2, 2, 24], strides = [1, 1, 1]} : vector<16x4x24xf32> to vector<2x2x24xf32>
    %172 = vector.extract_strided_slice %3 {offsets = [24, 0], sizes = [1, 24], strides = [1, 1]} : vector<25x24xf32> to vector<1x24xf32>
    %173 = vector.shape_cast %172 : vector<1x24xf32> to vector<24xf32>
    %174 = vector.shape_cast %173 : vector<24xf32> to vector<1x1x24xf32>
    %175 = vector.broadcast %174 : vector<1x1x24xf32> to vector<2x2x24xf32>
    %176 = arith.mulf %171, %175 : vector<2x2x24xf32>
    %177 = arith.addf %170, %176 : vector<2x2x24xf32>
    %c0_5 = arith.constant 0 : index
    %c0_6 = arith.constant 0 : index
    %178 = vector.load %arg3[%c0_5, %c0_6] : memref<1x24xf32, #tpu.memory_space<vmem>>, vector<1x24xf32>
    %179 = vector.shape_cast %178 : vector<1x24xf32> to vector<1x1x24xf32>
    %180 = vector.broadcast %179 : vector<1x1x24xf32> to vector<2x2x24xf32>
    %181 = arith.addf %177, %180 : vector<2x2x24xf32>
    %182 = arith.truncf %181 : vector<2x2x24xf32> to vector<2x2x24xbf16>
    %c0_7 = arith.constant 0 : index
    %c0_8 = arith.constant 0 : index
    %c0_9 = arith.constant 0 : index
    %c0_10 = arith.constant 0 : index
    %183 = vector.load %arg4[%c0_7, %c0_8, %c0_9, %c0_10] : memref<1x2x2x24xbf16, #tpu.memory_space<vmem>>, vector<1x2x2x24xbf16>
    %184 = vector.shape_cast %183 : vector<1x2x2x24xbf16> to vector<2x2x24xbf16>
    %185 = vector.shape_cast %182 : vector<2x2x24xbf16> to vector<1x2x2x24xbf16>
    tpu.vector_store %arg4[%c0_7, %c0_8, %c0_9, %c0_10], %185 {strides = array<i32>} : memref<1x2x2x24xbf16, #tpu.memory_space<vmem>>, vector<1x2x2x24xbf16>,
    return
  }
  func.func @transform_0(%arg0: i32) -> (i32, i32, i32, i32) {
    %c0_i32 = arith.constant 0 : i32
    %c0_i32_0 = arith.constant 0 : i32
    %c0_i32_1 = arith.constant 0 : i32
    %c0_i32_2 = arith.constant 0 : i32
    return %arg0, %c0_i32, %c0_i32_0, %c0_i32_1 : i32, i32, i32, i32
  }
  func.func @transform_1(%arg0: i32) -> (i32, i32) {
    %c0_i32 = arith.constant 0 : i32
    %c0_i32_0 = arith.constant 0 : i32
    %c0_i32_1 = arith.constant 0 : i32
    return %c0_i32, %c0_i32_0 : i32, i32
  }
  func.func @transform_2(%arg0: i32) -> (i32, i32) {
    %c0_i32 = arith.constant 0 : i32
    %c0_i32_0 = arith.constant 0 : i32
    %c0_i32_1 = arith.constant 0 : i32
    return %c0_i32, %c0_i32_0 : i32, i32
  }
  func.func @transform_3(%arg0: i32) -> (i32, i32, i32, i32) {
    %c0_i32 = arith.constant 0 : i32
    %c0_i32_0 = arith.constant 0 : i32
    %c0_i32_1 = arith.constant 0 : i32
    %c0_i32_2 = arith.constant 0 : i32
    return %arg0, %c0_i32, %c0_i32_0, %c0_i32_1 : i32, i32, i32, i32
  }
}

module attributes {stable_mosaic.version = 11 : i64} {
  func.func @_pw_kernel(%arg0: i32, %arg1: memref<1x16x24xbf16, #tpu.memory_space<vmem>>, %arg2: memref<24x36xbf16, #tpu.memory_space<vmem>>, %arg3: memref<1x36xf32, #tpu.memory_space<vmem>>, %arg4: memref<1x16x36xbf16, #tpu.memory_space<vmem>>) attributes {dimension_semantics = [#tpu.dimension_semantics<parallel>], iteration_bounds = array<i64: 2>, scalar_prefetch = 0 : i64, scratch_operands = 0 : i64, tpu.core_type = #tpu.core_type<tc>, window_params = [{transform_indices = @transform_0, window_bounds = array<i64: 1, 16, 24>}, {pipeline_mode = #tpu.pipeline_mode<synchronous>, transform_indices = @transform_1, window_bounds = array<i64: 24, 36>}, {pipeline_mode = #tpu.pipeline_mode<synchronous>, transform_indices = @transform_2, window_bounds = array<i64: 1, 36>}, {transform_indices = @transform_3, window_bounds = array<i64: 1, 16, 36>}]} {
    %c0 = arith.constant 0 : index
    %c0_0 = arith.constant 0 : index
    %c0_1 = arith.constant 0 : index
    %0 = vector.load %arg1[%c0, %c0_0, %c0_1] : memref<1x16x24xbf16, #tpu.memory_space<vmem>>, vector<1x16x24xbf16>
    %1 = vector.shape_cast %0 : vector<1x16x24xbf16> to vector<16x24xbf16>
    %c0_2 = arith.constant 0 : index
    %c0_3 = arith.constant 0 : index
    %2 = vector.load %arg2[%c0_2, %c0_3] : memref<24x36xbf16, #tpu.memory_space<vmem>>, vector<24x36xbf16>
    %cst = arith.constant dense<0.000000e+00> : vector<16x36xf32>
    %3 = tpu.matmul %1, %2, %cst {dimension_numbers = #tpu.dot_dimension_numbers<[1], [0], [0], [1], [0, 0, 1, 1], [], []>} : vector<16x24xbf16>, vector<24x36xbf16>, vector<16x36xf32> -> vector<16x36xf32>
    %c0_4 = arith.constant 0 : index
    %c0_5 = arith.constant 0 : index
    %4 = vector.load %arg3[%c0_4, %c0_5] : memref<1x36xf32, #tpu.memory_space<vmem>>, vector<1x36xf32>
    %5 = vector.broadcast %4 : vector<1x36xf32> to vector<16x36xf32>
    %6 = arith.addf %3, %5 : vector<16x36xf32>
    %cst_6 = arith.constant 0.000000e+00 : f32
    %7 = vector.broadcast %cst_6 : f32 to vector<16x36xf32>
    %8 = arith.maximumf %6, %7 : vector<16x36xf32>
    %9 = arith.truncf %8 : vector<16x36xf32> to vector<16x36xbf16>
    %c0_7 = arith.constant 0 : index
    %c0_8 = arith.constant 0 : index
    %c0_9 = arith.constant 0 : index
    %10 = vector.load %arg4[%c0_7, %c0_8, %c0_9] : memref<1x16x36xbf16, #tpu.memory_space<vmem>>, vector<1x16x36xbf16>
    %11 = vector.shape_cast %10 : vector<1x16x36xbf16> to vector<16x36xbf16>
    %12 = vector.shape_cast %9 : vector<16x36xbf16> to vector<1x16x36xbf16>
    tpu.vector_store %arg4[%c0_7, %c0_8, %c0_9], %12 {strides = array<i32>} : memref<1x16x36xbf16, #tpu.memory_space<vmem>>, vector<1x16x36xbf16>,
    return
  }
  func.func @transform_0(%arg0: i32) -> (i32, i32, i32) {
    %c0_i32 = arith.constant 0 : i32
    %c0_i32_0 = arith.constant 0 : i32
    %c0_i32_1 = arith.constant 0 : i32
    return %arg0, %c0_i32, %c0_i32_0 : i32, i32, i32
  }
  func.func @transform_1(%arg0: i32) -> (i32, i32) {
    %c0_i32 = arith.constant 0 : i32
    %c0_i32_0 = arith.constant 0 : i32
    %c0_i32_1 = arith.constant 0 : i32
    return %c0_i32, %c0_i32_0 : i32, i32
  }
  func.func @transform_2(%arg0: i32) -> (i32, i32) {
    %c0_i32 = arith.constant 0 : i32
    %c0_i32_0 = arith.constant 0 : i32
    %c0_i32_1 = arith.constant 0 : i32
    return %c0_i32, %c0_i32_0 : i32, i32
  }
  func.func @transform_3(%arg0: i32) -> (i32, i32, i32) {
    %c0_i32 = arith.constant 0 : i32
    %c0_i32_0 = arith.constant 0 : i32
    %c0_i32_1 = arith.constant 0 : i32
    return %arg0, %c0_i32, %c0_i32_0 : i32, i32, i32
  }
}

module attributes {stable_mosaic.version = 11 : i64} {
  func.func @_ghost_cheap_kernel(%arg0: i32, %arg1: memref<1x6x6x36xbf16, #tpu.memory_space<vmem>>, %arg2: memref<9x36xf32, #tpu.memory_space<vmem>>, %arg3: memref<1x36xf32, #tpu.memory_space<vmem>>, %arg4: memref<1x4x4x72xbf16, #tpu.memory_space<vmem>>) attributes {dimension_semantics = [#tpu.dimension_semantics<parallel>], iteration_bounds = array<i64: 2>, scalar_prefetch = 0 : i64, scratch_operands = 0 : i64, tpu.core_type = #tpu.core_type<tc>, window_params = [{transform_indices = @transform_0, window_bounds = array<i64: 1, 6, 6, 36>}, {pipeline_mode = #tpu.pipeline_mode<synchronous>, transform_indices = @transform_1, window_bounds = array<i64: 9, 36>}, {pipeline_mode = #tpu.pipeline_mode<synchronous>, transform_indices = @transform_2, window_bounds = array<i64: 1, 36>}, {transform_indices = @transform_3, window_bounds = array<i64: 1, 4, 4, 72>}]} {
    %c0 = arith.constant 0 : index
    %c0_0 = arith.constant 0 : index
    %c0_1 = arith.constant 0 : index
    %c0_2 = arith.constant 0 : index
    %0 = vector.load %arg1[%c0, %c0_0, %c0_1, %c0_2] : memref<1x6x6x36xbf16, #tpu.memory_space<vmem>>, vector<1x6x6x36xbf16>
    %1 = vector.shape_cast %0 : vector<1x6x6x36xbf16> to vector<6x6x36xbf16>
    %2 = arith.extf %1 : vector<6x6x36xbf16> to vector<6x6x36xf32>
    %c0_3 = arith.constant 0 : index
    %c0_4 = arith.constant 0 : index
    %3 = vector.load %arg2[%c0_3, %c0_4] : memref<9x36xf32, #tpu.memory_space<vmem>>, vector<9x36xf32>
    %4 = vector.extract_strided_slice %2 {offsets = [0, 0, 0], sizes = [4, 4, 36], strides = [1, 1, 1]} : vector<6x6x36xf32> to vector<4x4x36xf32>
    %5 = vector.extract_strided_slice %3 {offsets = [0, 0], sizes = [1, 36], strides = [1, 1]} : vector<9x36xf32> to vector<1x36xf32>
    %6 = vector.shape_cast %5 : vector<1x36xf32> to vector<36xf32>
    %7 = vector.shape_cast %6 : vector<36xf32> to vector<1x1x36xf32>
    %8 = vector.broadcast %7 : vector<1x1x36xf32> to vector<4x4x36xf32>
    %9 = arith.mulf %4, %8 : vector<4x4x36xf32>
    %10 = vector.extract_strided_slice %2 {offsets = [0, 1, 0], sizes = [4, 4, 36], strides = [1, 1, 1]} : vector<6x6x36xf32> to vector<4x4x36xf32>
    %11 = vector.extract_strided_slice %3 {offsets = [1, 0], sizes = [1, 36], strides = [1, 1]} : vector<9x36xf32> to vector<1x36xf32>
    %12 = vector.shape_cast %11 : vector<1x36xf32> to vector<36xf32>
    %13 = vector.shape_cast %12 : vector<36xf32> to vector<1x1x36xf32>
    %14 = vector.broadcast %13 : vector<1x1x36xf32> to vector<4x4x36xf32>
    %15 = arith.mulf %10, %14 : vector<4x4x36xf32>
    %16 = arith.addf %9, %15 : vector<4x4x36xf32>
    %17 = vector.extract_strided_slice %2 {offsets = [0, 2, 0], sizes = [4, 4, 36], strides = [1, 1, 1]} : vector<6x6x36xf32> to vector<4x4x36xf32>
    %18 = vector.extract_strided_slice %3 {offsets = [2, 0], sizes = [1, 36], strides = [1, 1]} : vector<9x36xf32> to vector<1x36xf32>
    %19 = vector.shape_cast %18 : vector<1x36xf32> to vector<36xf32>
    %20 = vector.shape_cast %19 : vector<36xf32> to vector<1x1x36xf32>
    %21 = vector.broadcast %20 : vector<1x1x36xf32> to vector<4x4x36xf32>
    %22 = arith.mulf %17, %21 : vector<4x4x36xf32>
    %23 = arith.addf %16, %22 : vector<4x4x36xf32>
    %24 = vector.extract_strided_slice %2 {offsets = [1, 0, 0], sizes = [4, 4, 36], strides = [1, 1, 1]} : vector<6x6x36xf32> to vector<4x4x36xf32>
    %25 = vector.extract_strided_slice %3 {offsets = [3, 0], sizes = [1, 36], strides = [1, 1]} : vector<9x36xf32> to vector<1x36xf32>
    %26 = vector.shape_cast %25 : vector<1x36xf32> to vector<36xf32>
    %27 = vector.shape_cast %26 : vector<36xf32> to vector<1x1x36xf32>
    %28 = vector.broadcast %27 : vector<1x1x36xf32> to vector<4x4x36xf32>
    %29 = arith.mulf %24, %28 : vector<4x4x36xf32>
    %30 = arith.addf %23, %29 : vector<4x4x36xf32>
    %31 = vector.extract_strided_slice %2 {offsets = [1, 1, 0], sizes = [4, 4, 36], strides = [1, 1, 1]} : vector<6x6x36xf32> to vector<4x4x36xf32>
    %32 = vector.extract_strided_slice %3 {offsets = [4, 0], sizes = [1, 36], strides = [1, 1]} : vector<9x36xf32> to vector<1x36xf32>
    %33 = vector.shape_cast %32 : vector<1x36xf32> to vector<36xf32>
    %34 = vector.shape_cast %33 : vector<36xf32> to vector<1x1x36xf32>
    %35 = vector.broadcast %34 : vector<1x1x36xf32> to vector<4x4x36xf32>
    %36 = arith.mulf %31, %35 : vector<4x4x36xf32>
    %37 = arith.addf %30, %36 : vector<4x4x36xf32>
    %38 = vector.extract_strided_slice %2 {offsets = [1, 2, 0], sizes = [4, 4, 36], strides = [1, 1, 1]} : vector<6x6x36xf32> to vector<4x4x36xf32>
    %39 = vector.extract_strided_slice %3 {offsets = [5, 0], sizes = [1, 36], strides = [1, 1]} : vector<9x36xf32> to vector<1x36xf32>
    %40 = vector.shape_cast %39 : vector<1x36xf32> to vector<36xf32>
    %41 = vector.shape_cast %40 : vector<36xf32> to vector<1x1x36xf32>
    %42 = vector.broadcast %41 : vector<1x1x36xf32> to vector<4x4x36xf32>
    %43 = arith.mulf %38, %42 : vector<4x4x36xf32>
    %44 = arith.addf %37, %43 : vector<4x4x36xf32>
    %45 = vector.extract_strided_slice %2 {offsets = [2, 0, 0], sizes = [4, 4, 36], strides = [1, 1, 1]} : vector<6x6x36xf32> to vector<4x4x36xf32>
    %46 = vector.extract_strided_slice %3 {offsets = [6, 0], sizes = [1, 36], strides = [1, 1]} : vector<9x36xf32> to vector<1x36xf32>
    %47 = vector.shape_cast %46 : vector<1x36xf32> to vector<36xf32>
    %48 = vector.shape_cast %47 : vector<36xf32> to vector<1x1x36xf32>
    %49 = vector.broadcast %48 : vector<1x1x36xf32> to vector<4x4x36xf32>
    %50 = arith.mulf %45, %49 : vector<4x4x36xf32>
    %51 = arith.addf %44, %50 : vector<4x4x36xf32>
    %52 = vector.extract_strided_slice %2 {offsets = [2, 1, 0], sizes = [4, 4, 36], strides = [1, 1, 1]} : vector<6x6x36xf32> to vector<4x4x36xf32>
    %53 = vector.extract_strided_slice %3 {offsets = [7, 0], sizes = [1, 36], strides = [1, 1]} : vector<9x36xf32> to vector<1x36xf32>
    %54 = vector.shape_cast %53 : vector<1x36xf32> to vector<36xf32>
    %55 = vector.shape_cast %54 : vector<36xf32> to vector<1x1x36xf32>
    %56 = vector.broadcast %55 : vector<1x1x36xf32> to vector<4x4x36xf32>
    %57 = arith.mulf %52, %56 : vector<4x4x36xf32>
    %58 = arith.addf %51, %57 : vector<4x4x36xf32>
    %59 = vector.extract_strided_slice %2 {offsets = [2, 2, 0], sizes = [4, 4, 36], strides = [1, 1, 1]} : vector<6x6x36xf32> to vector<4x4x36xf32>
    %60 = vector.extract_strided_slice %3 {offsets = [8, 0], sizes = [1, 36], strides = [1, 1]} : vector<9x36xf32> to vector<1x36xf32>
    %61 = vector.shape_cast %60 : vector<1x36xf32> to vector<36xf32>
    %62 = vector.shape_cast %61 : vector<36xf32> to vector<1x1x36xf32>
    %63 = vector.broadcast %62 : vector<1x1x36xf32> to vector<4x4x36xf32>
    %64 = arith.mulf %59, %63 : vector<4x4x36xf32>
    %65 = arith.addf %58, %64 : vector<4x4x36xf32>
    %c0_5 = arith.constant 0 : index
    %c0_6 = arith.constant 0 : index
    %66 = vector.load %arg3[%c0_5, %c0_6] : memref<1x36xf32, #tpu.memory_space<vmem>>, vector<1x36xf32>
    %67 = vector.shape_cast %66 : vector<1x36xf32> to vector<1x1x36xf32>
    %68 = vector.broadcast %67 : vector<1x1x36xf32> to vector<4x4x36xf32>
    %69 = arith.addf %65, %68 : vector<4x4x36xf32>
    %cst = arith.constant 0.000000e+00 : f32
    %70 = vector.broadcast %cst : f32 to vector<4x4x36xf32>
    %71 = arith.maximumf %69, %70 : vector<4x4x36xf32>
    %72 = vector.extract_strided_slice %2 {offsets = [1, 1, 0], sizes = [4, 4, 36], strides = [1, 1, 1]} : vector<6x6x36xf32> to vector<4x4x36xf32>
    %73 = tpu.concatenate %72, %71 in 2 : vector<4x4x36xf32>, vector<4x4x36xf32> -> vector<4x4x72xf32>
    %74 = arith.truncf %73 : vector<4x4x72xf32> to vector<4x4x72xbf16>
    %c0_7 = arith.constant 0 : index
    %c0_8 = arith.constant 0 : index
    %c0_9 = arith.constant 0 : index
    %c0_10 = arith.constant 0 : index
    %75 = vector.load %arg4[%c0_7, %c0_8, %c0_9, %c0_10] : memref<1x4x4x72xbf16, #tpu.memory_space<vmem>>, vector<1x4x4x72xbf16>
    %76 = vector.shape_cast %75 : vector<1x4x4x72xbf16> to vector<4x4x72xbf16>
    %77 = vector.shape_cast %74 : vector<4x4x72xbf16> to vector<1x4x4x72xbf16>
    tpu.vector_store %arg4[%c0_7, %c0_8, %c0_9, %c0_10], %77 {strides = array<i32>} : memref<1x4x4x72xbf16, #tpu.memory_space<vmem>>, vector<1x4x4x72xbf16>,
    return
  }
  func.func @transform_0(%arg0: i32) -> (i32, i32, i32, i32) {
    %c0_i32 = arith.constant 0 : i32
    %c0_i32_0 = arith.constant 0 : i32
    %c0_i32_1 = arith.constant 0 : i32
    %c0_i32_2 = arith.constant 0 : i32
    return %arg0, %c0_i32, %c0_i32_0, %c0_i32_1 : i32, i32, i32, i32
  }
  func.func @transform_1(%arg0: i32) -> (i32, i32) {
    %c0_i32 = arith.constant 0 : i32
    %c0_i32_0 = arith.constant 0 : i32
    %c0_i32_1 = arith.constant 0 : i32
    return %c0_i32, %c0_i32_0 : i32, i32
  }
  func.func @transform_2(%arg0: i32) -> (i32, i32) {
    %c0_i32 = arith.constant 0 : i32
    %c0_i32_0 = arith.constant 0 : i32
    %c0_i32_1 = arith.constant 0 : i32
    return %c0_i32, %c0_i32_0 : i32, i32
  }
  func.func @transform_3(%arg0: i32) -> (i32, i32, i32, i32) {
    %c0_i32 = arith.constant 0 : i32
    %c0_i32_0 = arith.constant 0 : i32
    %c0_i32_1 = arith.constant 0 : i32
    %c0_i32_2 = arith.constant 0 : i32
    return %arg0, %c0_i32, %c0_i32_0, %c0_i32_1 : i32, i32, i32, i32
  }
}

module attributes {stable_mosaic.version = 11 : i64} {
  func.func @_dw_kernel(%arg0: i32, %arg1: memref<1x16x4x72xbf16, #tpu.memory_space<vmem>>, %arg2: memref<25x72xf32, #tpu.memory_space<vmem>>, %arg3: memref<1x72xf32, #tpu.memory_space<vmem>>, %arg4: memref<1x2x2x72xbf16, #tpu.memory_space<vmem>>) attributes {dimension_semantics = [#tpu.dimension_semantics<parallel>], iteration_bounds = array<i64: 2>, scalar_prefetch = 0 : i64, scratch_operands = 0 : i64, tpu.core_type = #tpu.core_type<tc>, window_params = [{transform_indices = @transform_0, window_bounds = array<i64: 1, 16, 4, 72>}, {pipeline_mode = #tpu.pipeline_mode<synchronous>, transform_indices = @transform_1, window_bounds = array<i64: 25, 72>}, {pipeline_mode = #tpu.pipeline_mode<synchronous>, transform_indices = @transform_2, window_bounds = array<i64: 1, 72>}, {transform_indices = @transform_3, window_bounds = array<i64: 1, 2, 2, 72>}]} {
    %c0 = arith.constant 0 : index
    %c0_0 = arith.constant 0 : index
    %c0_1 = arith.constant 0 : index
    %c0_2 = arith.constant 0 : index
    %0 = vector.load %arg1[%c0, %c0_0, %c0_1, %c0_2] : memref<1x16x4x72xbf16, #tpu.memory_space<vmem>>, vector<1x16x4x72xbf16>
    %1 = vector.shape_cast %0 : vector<1x16x4x72xbf16> to vector<16x4x72xbf16>
    %2 = arith.extf %1 : vector<16x4x72xbf16> to vector<16x4x72xf32>
    %c0_3 = arith.constant 0 : index
    %c0_4 = arith.constant 0 : index
    %3 = vector.load %arg2[%c0_3, %c0_4] : memref<25x72xf32, #tpu.memory_space<vmem>>, vector<25x72xf32>
    %4 = vector.extract_strided_slice %2 {offsets = [0, 0, 0], sizes = [2, 2, 72], strides = [1, 1, 1]} : vector<16x4x72xf32> to vector<2x2x72xf32>
    %5 = vector.extract_strided_slice %3 {offsets = [0, 0], sizes = [1, 72], strides = [1, 1]} : vector<25x72xf32> to vector<1x72xf32>
    %6 = vector.shape_cast %5 : vector<1x72xf32> to vector<72xf32>
    %7 = vector.shape_cast %6 : vector<72xf32> to vector<1x1x72xf32>
    %8 = vector.broadcast %7 : vector<1x1x72xf32> to vector<2x2x72xf32>
    %9 = arith.mulf %4, %8 : vector<2x2x72xf32>
    %10 = vector.extract_strided_slice %2 {offsets = [4, 0, 0], sizes = [2, 2, 72], strides = [1, 1, 1]} : vector<16x4x72xf32> to vector<2x2x72xf32>
    %11 = vector.extract_strided_slice %3 {offsets = [1, 0], sizes = [1, 72], strides = [1, 1]} : vector<25x72xf32> to vector<1x72xf32>
    %12 = vector.shape_cast %11 : vector<1x72xf32> to vector<72xf32>
    %13 = vector.shape_cast %12 : vector<72xf32> to vector<1x1x72xf32>
    %14 = vector.broadcast %13 : vector<1x1x72xf32> to vector<2x2x72xf32>
    %15 = arith.mulf %10, %14 : vector<2x2x72xf32>
    %16 = arith.addf %9, %15 : vector<2x2x72xf32>
    %17 = vector.extract_strided_slice %2 {offsets = [0, 1, 0], sizes = [2, 2, 72], strides = [1, 1, 1]} : vector<16x4x72xf32> to vector<2x2x72xf32>
    %18 = vector.extract_strided_slice %3 {offsets = [2, 0], sizes = [1, 72], strides = [1, 1]} : vector<25x72xf32> to vector<1x72xf32>
    %19 = vector.shape_cast %18 : vector<1x72xf32> to vector<72xf32>
    %20 = vector.shape_cast %19 : vector<72xf32> to vector<1x1x72xf32>
    %21 = vector.broadcast %20 : vector<1x1x72xf32> to vector<2x2x72xf32>
    %22 = arith.mulf %17, %21 : vector<2x2x72xf32>
    %23 = arith.addf %16, %22 : vector<2x2x72xf32>
    %24 = vector.extract_strided_slice %2 {offsets = [4, 1, 0], sizes = [2, 2, 72], strides = [1, 1, 1]} : vector<16x4x72xf32> to vector<2x2x72xf32>
    %25 = vector.extract_strided_slice %3 {offsets = [3, 0], sizes = [1, 72], strides = [1, 1]} : vector<25x72xf32> to vector<1x72xf32>
    %26 = vector.shape_cast %25 : vector<1x72xf32> to vector<72xf32>
    %27 = vector.shape_cast %26 : vector<72xf32> to vector<1x1x72xf32>
    %28 = vector.broadcast %27 : vector<1x1x72xf32> to vector<2x2x72xf32>
    %29 = arith.mulf %24, %28 : vector<2x2x72xf32>
    %30 = arith.addf %23, %29 : vector<2x2x72xf32>
    %31 = vector.extract_strided_slice %2 {offsets = [0, 2, 0], sizes = [2, 2, 72], strides = [1, 1, 1]} : vector<16x4x72xf32> to vector<2x2x72xf32>
    %32 = vector.extract_strided_slice %3 {offsets = [4, 0], sizes = [1, 72], strides = [1, 1]} : vector<25x72xf32> to vector<1x72xf32>
    %33 = vector.shape_cast %32 : vector<1x72xf32> to vector<72xf32>
    %34 = vector.shape_cast %33 : vector<72xf32> to vector<1x1x72xf32>
    %35 = vector.broadcast %34 : vector<1x1x72xf32> to vector<2x2x72xf32>
    %36 = arith.mulf %31, %35 : vector<2x2x72xf32>
    %37 = arith.addf %30, %36 : vector<2x2x72xf32>
    %38 = vector.extract_strided_slice %2 {offsets = [8, 0, 0], sizes = [2, 2, 72], strides = [1, 1, 1]} : vector<16x4x72xf32> to vector<2x2x72xf32>
    %39 = vector.extract_strided_slice %3 {offsets = [5, 0], sizes = [1, 72], strides = [1, 1]} : vector<25x72xf32> to vector<1x72xf32>
    %40 = vector.shape_cast %39 : vector<1x72xf32> to vector<72xf32>
    %41 = vector.shape_cast %40 : vector<72xf32> to vector<1x1x72xf32>
    %42 = vector.broadcast %41 : vector<1x1x72xf32> to vector<2x2x72xf32>
    %43 = arith.mulf %38, %42 : vector<2x2x72xf32>
    %44 = arith.addf %37, %43 : vector<2x2x72xf32>
    %45 = vector.extract_strided_slice %2 {offsets = [12, 0, 0], sizes = [2, 2, 72], strides = [1, 1, 1]} : vector<16x4x72xf32> to vector<2x2x72xf32>
    %46 = vector.extract_strided_slice %3 {offsets = [6, 0], sizes = [1, 72], strides = [1, 1]} : vector<25x72xf32> to vector<1x72xf32>
    %47 = vector.shape_cast %46 : vector<1x72xf32> to vector<72xf32>
    %48 = vector.shape_cast %47 : vector<72xf32> to vector<1x1x72xf32>
    %49 = vector.broadcast %48 : vector<1x1x72xf32> to vector<2x2x72xf32>
    %50 = arith.mulf %45, %49 : vector<2x2x72xf32>
    %51 = arith.addf %44, %50 : vector<2x2x72xf32>
    %52 = vector.extract_strided_slice %2 {offsets = [8, 1, 0], sizes = [2, 2, 72], strides = [1, 1, 1]} : vector<16x4x72xf32> to vector<2x2x72xf32>
    %53 = vector.extract_strided_slice %3 {offsets = [7, 0], sizes = [1, 72], strides = [1, 1]} : vector<25x72xf32> to vector<1x72xf32>
    %54 = vector.shape_cast %53 : vector<1x72xf32> to vector<72xf32>
    %55 = vector.shape_cast %54 : vector<72xf32> to vector<1x1x72xf32>
    %56 = vector.broadcast %55 : vector<1x1x72xf32> to vector<2x2x72xf32>
    %57 = arith.mulf %52, %56 : vector<2x2x72xf32>
    %58 = arith.addf %51, %57 : vector<2x2x72xf32>
    %59 = vector.extract_strided_slice %2 {offsets = [12, 1, 0], sizes = [2, 2, 72], strides = [1, 1, 1]} : vector<16x4x72xf32> to vector<2x2x72xf32>
    %60 = vector.extract_strided_slice %3 {offsets = [8, 0], sizes = [1, 72], strides = [1, 1]} : vector<25x72xf32> to vector<1x72xf32>
    %61 = vector.shape_cast %60 : vector<1x72xf32> to vector<72xf32>
    %62 = vector.shape_cast %61 : vector<72xf32> to vector<1x1x72xf32>
    %63 = vector.broadcast %62 : vector<1x1x72xf32> to vector<2x2x72xf32>
    %64 = arith.mulf %59, %63 : vector<2x2x72xf32>
    %65 = arith.addf %58, %64 : vector<2x2x72xf32>
    %66 = vector.extract_strided_slice %2 {offsets = [8, 2, 0], sizes = [2, 2, 72], strides = [1, 1, 1]} : vector<16x4x72xf32> to vector<2x2x72xf32>
    %67 = vector.extract_strided_slice %3 {offsets = [9, 0], sizes = [1, 72], strides = [1, 1]} : vector<25x72xf32> to vector<1x72xf32>
    %68 = vector.shape_cast %67 : vector<1x72xf32> to vector<72xf32>
    %69 = vector.shape_cast %68 : vector<72xf32> to vector<1x1x72xf32>
    %70 = vector.broadcast %69 : vector<1x1x72xf32> to vector<2x2x72xf32>
    %71 = arith.mulf %66, %70 : vector<2x2x72xf32>
    %72 = arith.addf %65, %71 : vector<2x2x72xf32>
    %73 = vector.extract_strided_slice %2 {offsets = [1, 0, 0], sizes = [2, 2, 72], strides = [1, 1, 1]} : vector<16x4x72xf32> to vector<2x2x72xf32>
    %74 = vector.extract_strided_slice %3 {offsets = [10, 0], sizes = [1, 72], strides = [1, 1]} : vector<25x72xf32> to vector<1x72xf32>
    %75 = vector.shape_cast %74 : vector<1x72xf32> to vector<72xf32>
    %76 = vector.shape_cast %75 : vector<72xf32> to vector<1x1x72xf32>
    %77 = vector.broadcast %76 : vector<1x1x72xf32> to vector<2x2x72xf32>
    %78 = arith.mulf %73, %77 : vector<2x2x72xf32>
    %79 = arith.addf %72, %78 : vector<2x2x72xf32>
    %80 = vector.extract_strided_slice %2 {offsets = [5, 0, 0], sizes = [2, 2, 72], strides = [1, 1, 1]} : vector<16x4x72xf32> to vector<2x2x72xf32>
    %81 = vector.extract_strided_slice %3 {offsets = [11, 0], sizes = [1, 72], strides = [1, 1]} : vector<25x72xf32> to vector<1x72xf32>
    %82 = vector.shape_cast %81 : vector<1x72xf32> to vector<72xf32>
    %83 = vector.shape_cast %82 : vector<72xf32> to vector<1x1x72xf32>
    %84 = vector.broadcast %83 : vector<1x1x72xf32> to vector<2x2x72xf32>
    %85 = arith.mulf %80, %84 : vector<2x2x72xf32>
    %86 = arith.addf %79, %85 : vector<2x2x72xf32>
    %87 = vector.extract_strided_slice %2 {offsets = [1, 1, 0], sizes = [2, 2, 72], strides = [1, 1, 1]} : vector<16x4x72xf32> to vector<2x2x72xf32>
    %88 = vector.extract_strided_slice %3 {offsets = [12, 0], sizes = [1, 72], strides = [1, 1]} : vector<25x72xf32> to vector<1x72xf32>
    %89 = vector.shape_cast %88 : vector<1x72xf32> to vector<72xf32>
    %90 = vector.shape_cast %89 : vector<72xf32> to vector<1x1x72xf32>
    %91 = vector.broadcast %90 : vector<1x1x72xf32> to vector<2x2x72xf32>
    %92 = arith.mulf %87, %91 : vector<2x2x72xf32>
    %93 = arith.addf %86, %92 : vector<2x2x72xf32>
    %94 = vector.extract_strided_slice %2 {offsets = [5, 1, 0], sizes = [2, 2, 72], strides = [1, 1, 1]} : vector<16x4x72xf32> to vector<2x2x72xf32>
    %95 = vector.extract_strided_slice %3 {offsets = [13, 0], sizes = [1, 72], strides = [1, 1]} : vector<25x72xf32> to vector<1x72xf32>
    %96 = vector.shape_cast %95 : vector<1x72xf32> to vector<72xf32>
    %97 = vector.shape_cast %96 : vector<72xf32> to vector<1x1x72xf32>
    %98 = vector.broadcast %97 : vector<1x1x72xf32> to vector<2x2x72xf32>
    %99 = arith.mulf %94, %98 : vector<2x2x72xf32>
    %100 = arith.addf %93, %99 : vector<2x2x72xf32>
    %101 = vector.extract_strided_slice %2 {offsets = [1, 2, 0], sizes = [2, 2, 72], strides = [1, 1, 1]} : vector<16x4x72xf32> to vector<2x2x72xf32>
    %102 = vector.extract_strided_slice %3 {offsets = [14, 0], sizes = [1, 72], strides = [1, 1]} : vector<25x72xf32> to vector<1x72xf32>
    %103 = vector.shape_cast %102 : vector<1x72xf32> to vector<72xf32>
    %104 = vector.shape_cast %103 : vector<72xf32> to vector<1x1x72xf32>
    %105 = vector.broadcast %104 : vector<1x1x72xf32> to vector<2x2x72xf32>
    %106 = arith.mulf %101, %105 : vector<2x2x72xf32>
    %107 = arith.addf %100, %106 : vector<2x2x72xf32>
    %108 = vector.extract_strided_slice %2 {offsets = [9, 0, 0], sizes = [2, 2, 72], strides = [1, 1, 1]} : vector<16x4x72xf32> to vector<2x2x72xf32>
    %109 = vector.extract_strided_slice %3 {offsets = [15, 0], sizes = [1, 72], strides = [1, 1]} : vector<25x72xf32> to vector<1x72xf32>
    %110 = vector.shape_cast %109 : vector<1x72xf32> to vector<72xf32>
    %111 = vector.shape_cast %110 : vector<72xf32> to vector<1x1x72xf32>
    %112 = vector.broadcast %111 : vector<1x1x72xf32> to vector<2x2x72xf32>
    %113 = arith.mulf %108, %112 : vector<2x2x72xf32>
    %114 = arith.addf %107, %113 : vector<2x2x72xf32>
    %115 = vector.extract_strided_slice %2 {offsets = [13, 0, 0], sizes = [2, 2, 72], strides = [1, 1, 1]} : vector<16x4x72xf32> to vector<2x2x72xf32>
    %116 = vector.extract_strided_slice %3 {offsets = [16, 0], sizes = [1, 72], strides = [1, 1]} : vector<25x72xf32> to vector<1x72xf32>
    %117 = vector.shape_cast %116 : vector<1x72xf32> to vector<72xf32>
    %118 = vector.shape_cast %117 : vector<72xf32> to vector<1x1x72xf32>
    %119 = vector.broadcast %118 : vector<1x1x72xf32> to vector<2x2x72xf32>
    %120 = arith.mulf %115, %119 : vector<2x2x72xf32>
    %121 = arith.addf %114, %120 : vector<2x2x72xf32>
    %122 = vector.extract_strided_slice %2 {offsets = [9, 1, 0], sizes = [2, 2, 72], strides = [1, 1, 1]} : vector<16x4x72xf32> to vector<2x2x72xf32>
    %123 = vector.extract_strided_slice %3 {offsets = [17, 0], sizes = [1, 72], strides = [1, 1]} : vector<25x72xf32> to vector<1x72xf32>
    %124 = vector.shape_cast %123 : vector<1x72xf32> to vector<72xf32>
    %125 = vector.shape_cast %124 : vector<72xf32> to vector<1x1x72xf32>
    %126 = vector.broadcast %125 : vector<1x1x72xf32> to vector<2x2x72xf32>
    %127 = arith.mulf %122, %126 : vector<2x2x72xf32>
    %128 = arith.addf %121, %127 : vector<2x2x72xf32>
    %129 = vector.extract_strided_slice %2 {offsets = [13, 1, 0], sizes = [2, 2, 72], strides = [1, 1, 1]} : vector<16x4x72xf32> to vector<2x2x72xf32>
    %130 = vector.extract_strided_slice %3 {offsets = [18, 0], sizes = [1, 72], strides = [1, 1]} : vector<25x72xf32> to vector<1x72xf32>
    %131 = vector.shape_cast %130 : vector<1x72xf32> to vector<72xf32>
    %132 = vector.shape_cast %131 : vector<72xf32> to vector<1x1x72xf32>
    %133 = vector.broadcast %132 : vector<1x1x72xf32> to vector<2x2x72xf32>
    %134 = arith.mulf %129, %133 : vector<2x2x72xf32>
    %135 = arith.addf %128, %134 : vector<2x2x72xf32>
    %136 = vector.extract_strided_slice %2 {offsets = [9, 2, 0], sizes = [2, 2, 72], strides = [1, 1, 1]} : vector<16x4x72xf32> to vector<2x2x72xf32>
    %137 = vector.extract_strided_slice %3 {offsets = [19, 0], sizes = [1, 72], strides = [1, 1]} : vector<25x72xf32> to vector<1x72xf32>
    %138 = vector.shape_cast %137 : vector<1x72xf32> to vector<72xf32>
    %139 = vector.shape_cast %138 : vector<72xf32> to vector<1x1x72xf32>
    %140 = vector.broadcast %139 : vector<1x1x72xf32> to vector<2x2x72xf32>
    %141 = arith.mulf %136, %140 : vector<2x2x72xf32>
    %142 = arith.addf %135, %141 : vector<2x2x72xf32>
    %143 = vector.extract_strided_slice %2 {offsets = [2, 0, 0], sizes = [2, 2, 72], strides = [1, 1, 1]} : vector<16x4x72xf32> to vector<2x2x72xf32>
    %144 = vector.extract_strided_slice %3 {offsets = [20, 0], sizes = [1, 72], strides = [1, 1]} : vector<25x72xf32> to vector<1x72xf32>
    %145 = vector.shape_cast %144 : vector<1x72xf32> to vector<72xf32>
    %146 = vector.shape_cast %145 : vector<72xf32> to vector<1x1x72xf32>
    %147 = vector.broadcast %146 : vector<1x1x72xf32> to vector<2x2x72xf32>
    %148 = arith.mulf %143, %147 : vector<2x2x72xf32>
    %149 = arith.addf %142, %148 : vector<2x2x72xf32>
    %150 = vector.extract_strided_slice %2 {offsets = [6, 0, 0], sizes = [2, 2, 72], strides = [1, 1, 1]} : vector<16x4x72xf32> to vector<2x2x72xf32>
    %151 = vector.extract_strided_slice %3 {offsets = [21, 0], sizes = [1, 72], strides = [1, 1]} : vector<25x72xf32> to vector<1x72xf32>
    %152 = vector.shape_cast %151 : vector<1x72xf32> to vector<72xf32>
    %153 = vector.shape_cast %152 : vector<72xf32> to vector<1x1x72xf32>
    %154 = vector.broadcast %153 : vector<1x1x72xf32> to vector<2x2x72xf32>
    %155 = arith.mulf %150, %154 : vector<2x2x72xf32>
    %156 = arith.addf %149, %155 : vector<2x2x72xf32>
    %157 = vector.extract_strided_slice %2 {offsets = [2, 1, 0], sizes = [2, 2, 72], strides = [1, 1, 1]} : vector<16x4x72xf32> to vector<2x2x72xf32>
    %158 = vector.extract_strided_slice %3 {offsets = [22, 0], sizes = [1, 72], strides = [1, 1]} : vector<25x72xf32> to vector<1x72xf32>
    %159 = vector.shape_cast %158 : vector<1x72xf32> to vector<72xf32>
    %160 = vector.shape_cast %159 : vector<72xf32> to vector<1x1x72xf32>
    %161 = vector.broadcast %160 : vector<1x1x72xf32> to vector<2x2x72xf32>
    %162 = arith.mulf %157, %161 : vector<2x2x72xf32>
    %163 = arith.addf %156, %162 : vector<2x2x72xf32>
    %164 = vector.extract_strided_slice %2 {offsets = [6, 1, 0], sizes = [2, 2, 72], strides = [1, 1, 1]} : vector<16x4x72xf32> to vector<2x2x72xf32>
    %165 = vector.extract_strided_slice %3 {offsets = [23, 0], sizes = [1, 72], strides = [1, 1]} : vector<25x72xf32> to vector<1x72xf32>
    %166 = vector.shape_cast %165 : vector<1x72xf32> to vector<72xf32>
    %167 = vector.shape_cast %166 : vector<72xf32> to vector<1x1x72xf32>
    %168 = vector.broadcast %167 : vector<1x1x72xf32> to vector<2x2x72xf32>
    %169 = arith.mulf %164, %168 : vector<2x2x72xf32>
    %170 = arith.addf %163, %169 : vector<2x2x72xf32>
    %171 = vector.extract_strided_slice %2 {offsets = [2, 2, 0], sizes = [2, 2, 72], strides = [1, 1, 1]} : vector<16x4x72xf32> to vector<2x2x72xf32>
    %172 = vector.extract_strided_slice %3 {offsets = [24, 0], sizes = [1, 72], strides = [1, 1]} : vector<25x72xf32> to vector<1x72xf32>
    %173 = vector.shape_cast %172 : vector<1x72xf32> to vector<72xf32>
    %174 = vector.shape_cast %173 : vector<72xf32> to vector<1x1x72xf32>
    %175 = vector.broadcast %174 : vector<1x1x72xf32> to vector<2x2x72xf32>
    %176 = arith.mulf %171, %175 : vector<2x2x72xf32>
    %177 = arith.addf %170, %176 : vector<2x2x72xf32>
    %c0_5 = arith.constant 0 : index
    %c0_6 = arith.constant 0 : index
    %178 = vector.load %arg3[%c0_5, %c0_6] : memref<1x72xf32, #tpu.memory_space<vmem>>, vector<1x72xf32>
    %179 = vector.shape_cast %178 : vector<1x72xf32> to vector<1x1x72xf32>
    %180 = vector.broadcast %179 : vector<1x1x72xf32> to vector<2x2x72xf32>
    %181 = arith.addf %177, %180 : vector<2x2x72xf32>
    %182 = arith.truncf %181 : vector<2x2x72xf32> to vector<2x2x72xbf16>
    %c0_7 = arith.constant 0 : index
    %c0_8 = arith.constant 0 : index
    %c0_9 = arith.constant 0 : index
    %c0_10 = arith.constant 0 : index
    %183 = vector.load %arg4[%c0_7, %c0_8, %c0_9, %c0_10] : memref<1x2x2x72xbf16, #tpu.memory_space<vmem>>, vector<1x2x2x72xbf16>
    %184 = vector.shape_cast %183 : vector<1x2x2x72xbf16> to vector<2x2x72xbf16>
    %185 = vector.shape_cast %182 : vector<2x2x72xbf16> to vector<1x2x2x72xbf16>
    tpu.vector_store %arg4[%c0_7, %c0_8, %c0_9, %c0_10], %185 {strides = array<i32>} : memref<1x2x2x72xbf16, #tpu.memory_space<vmem>>, vector<1x2x2x72xbf16>,
    return
  }
  func.func @transform_0(%arg0: i32) -> (i32, i32, i32, i32) {
    %c0_i32 = arith.constant 0 : i32
    %c0_i32_0 = arith.constant 0 : i32
    %c0_i32_1 = arith.constant 0 : i32
    %c0_i32_2 = arith.constant 0 : i32
    return %arg0, %c0_i32, %c0_i32_0, %c0_i32_1 : i32, i32, i32, i32
  }
  func.func @transform_1(%arg0: i32) -> (i32, i32) {
    %c0_i32 = arith.constant 0 : i32
    %c0_i32_0 = arith.constant 0 : i32
    %c0_i32_1 = arith.constant 0 : i32
    return %c0_i32, %c0_i32_0 : i32, i32
  }
  func.func @transform_2(%arg0: i32) -> (i32, i32) {
    %c0_i32 = arith.constant 0 : i32
    %c0_i32_0 = arith.constant 0 : i32
    %c0_i32_1 = arith.constant 0 : i32
    return %c0_i32, %c0_i32_0 : i32, i32
  }
  func.func @transform_3(%arg0: i32) -> (i32, i32, i32, i32) {
    %c0_i32 = arith.constant 0 : i32
    %c0_i32_0 = arith.constant 0 : i32
    %c0_i32_1 = arith.constant 0 : i32
    %c0_i32_2 = arith.constant 0 : i32
    return %arg0, %c0_i32, %c0_i32_0, %c0_i32_1 : i32, i32, i32, i32
  }
}

module attributes {stable_mosaic.version = 11 : i64} {
  func.func @_se_gate_kernel(%arg0: i32, %arg1: memref<1x4x72xbf16, #tpu.memory_space<vmem>>, %arg2: memref<72x20xbf16, #tpu.memory_space<vmem>>, %arg3: memref<1x20xf32, #tpu.memory_space<vmem>>, %arg4: memref<20x72xbf16, #tpu.memory_space<vmem>>, %arg5: memref<1x72xf32, #tpu.memory_space<vmem>>, %arg6: memref<1x1x72xf32, #tpu.memory_space<vmem>>) attributes {dimension_semantics = [#tpu.dimension_semantics<parallel>], iteration_bounds = array<i64: 2>, scalar_prefetch = 0 : i64, scratch_operands = 0 : i64, tpu.core_type = #tpu.core_type<tc>, window_params = [{transform_indices = @transform_0, window_bounds = array<i64: 1, 4, 72>}, {pipeline_mode = #tpu.pipeline_mode<synchronous>, transform_indices = @transform_1, window_bounds = array<i64: 72, 20>}, {pipeline_mode = #tpu.pipeline_mode<synchronous>, transform_indices = @transform_2, window_bounds = array<i64: 1, 20>}, {pipeline_mode = #tpu.pipeline_mode<synchronous>, transform_indices = @transform_3, window_bounds = array<i64: 20, 72>}, {pipeline_mode = #tpu.pipeline_mode<synchronous>, transform_indices = @transform_4, window_bounds = array<i64: 1, 72>}, {transform_indices = @transform_5, window_bounds = array<i64: 1, 1, 72>}]} {
    %c0 = arith.constant 0 : index
    %c0_0 = arith.constant 0 : index
    %c0_1 = arith.constant 0 : index
    %0 = vector.load %arg1[%c0, %c0_0, %c0_1] : memref<1x4x72xbf16, #tpu.memory_space<vmem>>, vector<1x4x72xbf16>
    %1 = vector.shape_cast %0 : vector<1x4x72xbf16> to vector<4x72xbf16>
    %2 = arith.extf %1 : vector<4x72xbf16> to vector<4x72xf32>
    %cst = arith.constant dense<0.000000e+00> : vector<72xf32>
    %3 = vector.multi_reduction <add>, %2, %cst [0] : vector<4x72xf32> to vector<72xf32>
    %4 = vector.shape_cast %3 : vector<72xf32> to vector<1x72xf32>
    %cst_2 = arith.constant 4.000000e+00 : f32
    %5 = vector.broadcast %cst_2 : f32 to vector<1x72xf32>
    %6 = arith.divf %4, %5 : vector<1x72xf32>
    %7 = arith.truncf %6 : vector<1x72xf32> to vector<1x72xbf16>
    %c0_3 = arith.constant 0 : index
    %c0_4 = arith.constant 0 : index
    %8 = vector.load %arg2[%c0_3, %c0_4] : memref<72x20xbf16, #tpu.memory_space<vmem>>, vector<72x20xbf16>
    %cst_5 = arith.constant dense<0.000000e+00> : vector<1x20xf32>
    %9 = tpu.matmul %7, %8, %cst_5 {dimension_numbers = #tpu.dot_dimension_numbers<[1], [0], [0], [1], [0, 0, 1, 1], [], []>} : vector<1x72xbf16>, vector<72x20xbf16>, vector<1x20xf32> -> vector<1x20xf32>
    %c0_6 = arith.constant 0 : index
    %c0_7 = arith.constant 0 : index
    %10 = vector.load %arg3[%c0_6, %c0_7] : memref<1x20xf32, #tpu.memory_space<vmem>>, vector<1x20xf32>
    %11 = arith.addf %9, %10 : vector<1x20xf32>
    %cst_8 = arith.constant 0.000000e+00 : f32
    %12 = vector.broadcast %cst_8 : f32 to vector<1x20xf32>
    %13 = arith.maximumf %11, %12 : vector<1x20xf32>
    %14 = arith.truncf %13 : vector<1x20xf32> to vector<1x20xbf16>
    %c0_9 = arith.constant 0 : index
    %c0_10 = arith.constant 0 : index
    %15 = vector.load %arg4[%c0_9, %c0_10] : memref<20x72xbf16, #tpu.memory_space<vmem>>, vector<20x72xbf16>
    %cst_11 = arith.constant dense<0.000000e+00> : vector<1x72xf32>
    %16 = tpu.matmul %14, %15, %cst_11 {dimension_numbers = #tpu.dot_dimension_numbers<[1], [0], [0], [1], [0, 0, 1, 1], [], []>} : vector<1x20xbf16>, vector<20x72xbf16>, vector<1x72xf32> -> vector<1x72xf32>
    %c0_12 = arith.constant 0 : index
    %c0_13 = arith.constant 0 : index
    %17 = vector.load %arg5[%c0_12, %c0_13] : memref<1x72xf32, #tpu.memory_space<vmem>>, vector<1x72xf32>
    %18 = arith.addf %16, %17 : vector<1x72xf32>
    %cst_14 = arith.constant 3.000000e+00 : f32
    %19 = vector.broadcast %cst_14 : f32 to vector<1x72xf32>
    %20 = arith.addf %18, %19 : vector<1x72xf32>
    %cst_15 = arith.constant 0.000000e+00 : f32
    %cst_16 = arith.constant 6.000000e+00 : f32
    %21 = vector.broadcast %cst_15 : f32 to vector<1x72xf32>
    %22 = arith.maximumf %21, %20 : vector<1x72xf32>
    %23 = vector.broadcast %cst_16 : f32 to vector<1x72xf32>
    %24 = arith.minimumf %23, %22 : vector<1x72xf32>
    %cst_17 = arith.constant 0.166666672 : f32
    %25 = vector.broadcast %cst_17 : f32 to vector<1x72xf32>
    %26 = arith.mulf %24, %25 : vector<1x72xf32>
    %c0_18 = arith.constant 0 : index
    %c0_19 = arith.constant 0 : index
    %c0_20 = arith.constant 0 : index
    %27 = vector.load %arg6[%c0_18, %c0_19, %c0_20] : memref<1x1x72xf32, #tpu.memory_space<vmem>>, vector<1x1x72xf32>
    %28 = vector.shape_cast %27 : vector<1x1x72xf32> to vector<1x72xf32>
    %29 = vector.shape_cast %26 : vector<1x72xf32> to vector<1x1x72xf32>
    tpu.vector_store %arg6[%c0_18, %c0_19, %c0_20], %29 {strides = array<i32>} : memref<1x1x72xf32, #tpu.memory_space<vmem>>, vector<1x1x72xf32>,
    return
  }
  func.func @transform_0(%arg0: i32) -> (i32, i32, i32) {
    %c0_i32 = arith.constant 0 : i32
    %c0_i32_0 = arith.constant 0 : i32
    %c0_i32_1 = arith.constant 0 : i32
    return %arg0, %c0_i32, %c0_i32_0 : i32, i32, i32
  }
  func.func @transform_1(%arg0: i32) -> (i32, i32) {
    %c0_i32 = arith.constant 0 : i32
    %c0_i32_0 = arith.constant 0 : i32
    %c0_i32_1 = arith.constant 0 : i32
    return %c0_i32, %c0_i32_0 : i32, i32
  }
  func.func @transform_2(%arg0: i32) -> (i32, i32) {
    %c0_i32 = arith.constant 0 : i32
    %c0_i32_0 = arith.constant 0 : i32
    %c0_i32_1 = arith.constant 0 : i32
    return %c0_i32, %c0_i32_0 : i32, i32
  }
  func.func @transform_3(%arg0: i32) -> (i32, i32) {
    %c0_i32 = arith.constant 0 : i32
    %c0_i32_0 = arith.constant 0 : i32
    %c0_i32_1 = arith.constant 0 : i32
    return %c0_i32, %c0_i32_0 : i32, i32
  }
  func.func @transform_4(%arg0: i32) -> (i32, i32) {
    %c0_i32 = arith.constant 0 : i32
    %c0_i32_0 = arith.constant 0 : i32
    %c0_i32_1 = arith.constant 0 : i32
    return %c0_i32, %c0_i32_0 : i32, i32
  }
  func.func @transform_5(%arg0: i32) -> (i32, i32, i32) {
    %c0_i32 = arith.constant 0 : i32
    %c0_i32_0 = arith.constant 0 : i32
    %c0_i32_1 = arith.constant 0 : i32
    return %arg0, %c0_i32, %c0_i32_0 : i32, i32, i32
  }
}

module attributes {stable_mosaic.version = 11 : i64} {
  func.func @_pw_kernel(%arg0: i32, %arg1: memref<1x4x72xbf16, #tpu.memory_space<vmem>>, %arg2: memref<1x1x72xf32, #tpu.memory_space<vmem>>, %arg3: memref<72x20xbf16, #tpu.memory_space<vmem>>, %arg4: memref<1x20xf32, #tpu.memory_space<vmem>>, %arg5: memref<1x4x20xbf16, #tpu.memory_space<vmem>>) attributes {dimension_semantics = [#tpu.dimension_semantics<parallel>], iteration_bounds = array<i64: 2>, scalar_prefetch = 0 : i64, scratch_operands = 0 : i64, tpu.core_type = #tpu.core_type<tc>, window_params = [{transform_indices = @transform_0, window_bounds = array<i64: 1, 4, 72>}, {transform_indices = @transform_1, window_bounds = array<i64: 1, 1, 72>}, {pipeline_mode = #tpu.pipeline_mode<synchronous>, transform_indices = @transform_2, window_bounds = array<i64: 72, 20>}, {pipeline_mode = #tpu.pipeline_mode<synchronous>, transform_indices = @transform_3, window_bounds = array<i64: 1, 20>}, {transform_indices = @transform_4, window_bounds = array<i64: 1, 4, 20>}]} {
    %c0 = arith.constant 0 : index
    %c0_0 = arith.constant 0 : index
    %c0_1 = arith.constant 0 : index
    %0 = vector.load %arg1[%c0, %c0_0, %c0_1] : memref<1x4x72xbf16, #tpu.memory_space<vmem>>, vector<1x4x72xbf16>
    %1 = vector.shape_cast %0 : vector<1x4x72xbf16> to vector<4x72xbf16>
    %2 = arith.extf %1 : vector<4x72xbf16> to vector<4x72xf32>
    %c0_2 = arith.constant 0 : index
    %c0_3 = arith.constant 0 : index
    %c0_4 = arith.constant 0 : index
    %3 = vector.load %arg2[%c0_2, %c0_3, %c0_4] : memref<1x1x72xf32, #tpu.memory_space<vmem>>, vector<1x1x72xf32>
    %4 = vector.shape_cast %3 : vector<1x1x72xf32> to vector<1x72xf32>
    %5 = vector.broadcast %4 : vector<1x72xf32> to vector<4x72xf32>
    %6 = arith.mulf %2, %5 : vector<4x72xf32>
    %7 = arith.truncf %6 : vector<4x72xf32> to vector<4x72xbf16>
    %c0_5 = arith.constant 0 : index
    %c0_6 = arith.constant 0 : index
    %8 = vector.load %arg3[%c0_5, %c0_6] : memref<72x20xbf16, #tpu.memory_space<vmem>>, vector<72x20xbf16>
    %cst = arith.constant dense<0.000000e+00> : vector<4x20xf32>
    %9 = tpu.matmul %7, %8, %cst {dimension_numbers = #tpu.dot_dimension_numbers<[1], [0], [0], [1], [0, 0, 1, 1], [], []>} : vector<4x72xbf16>, vector<72x20xbf16>, vector<4x20xf32> -> vector<4x20xf32>
    %c0_7 = arith.constant 0 : index
    %c0_8 = arith.constant 0 : index
    %10 = vector.load %arg4[%c0_7, %c0_8] : memref<1x20xf32, #tpu.memory_space<vmem>>, vector<1x20xf32>
    %11 = vector.broadcast %10 : vector<1x20xf32> to vector<4x20xf32>
    %12 = arith.addf %9, %11 : vector<4x20xf32>
    %13 = arith.truncf %12 : vector<4x20xf32> to vector<4x20xbf16>
    %c0_9 = arith.constant 0 : index
    %c0_10 = arith.constant 0 : index
    %c0_11 = arith.constant 0 : index
    %14 = vector.load %arg5[%c0_9, %c0_10, %c0_11] : memref<1x4x20xbf16, #tpu.memory_space<vmem>>, vector<1x4x20xbf16>
    %15 = vector.shape_cast %14 : vector<1x4x20xbf16> to vector<4x20xbf16>
    %16 = vector.shape_cast %13 : vector<4x20xbf16> to vector<1x4x20xbf16>
    tpu.vector_store %arg5[%c0_9, %c0_10, %c0_11], %16 {strides = array<i32>} : memref<1x4x20xbf16, #tpu.memory_space<vmem>>, vector<1x4x20xbf16>,
    return
  }
  func.func @transform_0(%arg0: i32) -> (i32, i32, i32) {
    %c0_i32 = arith.constant 0 : i32
    %c0_i32_0 = arith.constant 0 : i32
    %c0_i32_1 = arith.constant 0 : i32
    return %arg0, %c0_i32, %c0_i32_0 : i32, i32, i32
  }
  func.func @transform_1(%arg0: i32) -> (i32, i32, i32) {
    %c0_i32 = arith.constant 0 : i32
    %c0_i32_0 = arith.constant 0 : i32
    %c0_i32_1 = arith.constant 0 : i32
    return %arg0, %c0_i32, %c0_i32_0 : i32, i32, i32
  }
  func.func @transform_2(%arg0: i32) -> (i32, i32) {
    %c0_i32 = arith.constant 0 : i32
    %c0_i32_0 = arith.constant 0 : i32
    %c0_i32_1 = arith.constant 0 : i32
    return %c0_i32, %c0_i32_0 : i32, i32
  }
  func.func @transform_3(%arg0: i32) -> (i32, i32) {
    %c0_i32 = arith.constant 0 : i32
    %c0_i32_0 = arith.constant 0 : i32
    %c0_i32_1 = arith.constant 0 : i32
    return %c0_i32, %c0_i32_0 : i32, i32
  }
  func.func @transform_4(%arg0: i32) -> (i32, i32, i32) {
    %c0_i32 = arith.constant 0 : i32
    %c0_i32_0 = arith.constant 0 : i32
    %c0_i32_1 = arith.constant 0 : i32
    return %arg0, %c0_i32, %c0_i32_0 : i32, i32, i32
  }
}

module attributes {stable_mosaic.version = 11 : i64} {
  func.func @_ghost_cheap_kernel(%arg0: i32, %arg1: memref<1x4x4x20xbf16, #tpu.memory_space<vmem>>, %arg2: memref<9x20xf32, #tpu.memory_space<vmem>>, %arg3: memref<1x20xf32, #tpu.memory_space<vmem>>, %arg4: memref<1x2x2x40xbf16, #tpu.memory_space<vmem>>, %arg5: memref<1x2x2x40xbf16, #tpu.memory_space<vmem>>) attributes {dimension_semantics = [#tpu.dimension_semantics<parallel>], iteration_bounds = array<i64: 2>, scalar_prefetch = 0 : i64, scratch_operands = 0 : i64, tpu.core_type = #tpu.core_type<tc>, window_params = [{transform_indices = @transform_0, window_bounds = array<i64: 1, 4, 4, 20>}, {pipeline_mode = #tpu.pipeline_mode<synchronous>, transform_indices = @transform_1, window_bounds = array<i64: 9, 20>}, {pipeline_mode = #tpu.pipeline_mode<synchronous>, transform_indices = @transform_2, window_bounds = array<i64: 1, 20>}, {transform_indices = @transform_3, window_bounds = array<i64: 1, 2, 2, 40>}, {transform_indices = @transform_4, window_bounds = array<i64: 1, 2, 2, 40>}]} {
    %c0 = arith.constant 0 : index
    %c0_0 = arith.constant 0 : index
    %c0_1 = arith.constant 0 : index
    %c0_2 = arith.constant 0 : index
    %0 = vector.load %arg1[%c0, %c0_0, %c0_1, %c0_2] : memref<1x4x4x20xbf16, #tpu.memory_space<vmem>>, vector<1x4x4x20xbf16>
    %1 = vector.shape_cast %0 : vector<1x4x4x20xbf16> to vector<4x4x20xbf16>
    %2 = arith.extf %1 : vector<4x4x20xbf16> to vector<4x4x20xf32>
    %c0_3 = arith.constant 0 : index
    %c0_4 = arith.constant 0 : index
    %3 = vector.load %arg2[%c0_3, %c0_4] : memref<9x20xf32, #tpu.memory_space<vmem>>, vector<9x20xf32>
    %4 = vector.extract_strided_slice %2 {offsets = [0, 0, 0], sizes = [2, 2, 20], strides = [1, 1, 1]} : vector<4x4x20xf32> to vector<2x2x20xf32>
    %5 = vector.extract_strided_slice %3 {offsets = [0, 0], sizes = [1, 20], strides = [1, 1]} : vector<9x20xf32> to vector<1x20xf32>
    %6 = vector.shape_cast %5 : vector<1x20xf32> to vector<20xf32>
    %7 = vector.shape_cast %6 : vector<20xf32> to vector<1x1x20xf32>
    %8 = vector.broadcast %7 : vector<1x1x20xf32> to vector<2x2x20xf32>
    %9 = arith.mulf %4, %8 : vector<2x2x20xf32>
    %10 = vector.extract_strided_slice %2 {offsets = [0, 1, 0], sizes = [2, 2, 20], strides = [1, 1, 1]} : vector<4x4x20xf32> to vector<2x2x20xf32>
    %11 = vector.extract_strided_slice %3 {offsets = [1, 0], sizes = [1, 20], strides = [1, 1]} : vector<9x20xf32> to vector<1x20xf32>
    %12 = vector.shape_cast %11 : vector<1x20xf32> to vector<20xf32>
    %13 = vector.shape_cast %12 : vector<20xf32> to vector<1x1x20xf32>
    %14 = vector.broadcast %13 : vector<1x1x20xf32> to vector<2x2x20xf32>
    %15 = arith.mulf %10, %14 : vector<2x2x20xf32>
    %16 = arith.addf %9, %15 : vector<2x2x20xf32>
    %17 = vector.extract_strided_slice %2 {offsets = [0, 2, 0], sizes = [2, 2, 20], strides = [1, 1, 1]} : vector<4x4x20xf32> to vector<2x2x20xf32>
    %18 = vector.extract_strided_slice %3 {offsets = [2, 0], sizes = [1, 20], strides = [1, 1]} : vector<9x20xf32> to vector<1x20xf32>
    %19 = vector.shape_cast %18 : vector<1x20xf32> to vector<20xf32>
    %20 = vector.shape_cast %19 : vector<20xf32> to vector<1x1x20xf32>
    %21 = vector.broadcast %20 : vector<1x1x20xf32> to vector<2x2x20xf32>
    %22 = arith.mulf %17, %21 : vector<2x2x20xf32>
    %23 = arith.addf %16, %22 : vector<2x2x20xf32>
    %24 = vector.extract_strided_slice %2 {offsets = [1, 0, 0], sizes = [2, 2, 20], strides = [1, 1, 1]} : vector<4x4x20xf32> to vector<2x2x20xf32>
    %25 = vector.extract_strided_slice %3 {offsets = [3, 0], sizes = [1, 20], strides = [1, 1]} : vector<9x20xf32> to vector<1x20xf32>
    %26 = vector.shape_cast %25 : vector<1x20xf32> to vector<20xf32>
    %27 = vector.shape_cast %26 : vector<20xf32> to vector<1x1x20xf32>
    %28 = vector.broadcast %27 : vector<1x1x20xf32> to vector<2x2x20xf32>
    %29 = arith.mulf %24, %28 : vector<2x2x20xf32>
    %30 = arith.addf %23, %29 : vector<2x2x20xf32>
    %31 = vector.extract_strided_slice %2 {offsets = [1, 1, 0], sizes = [2, 2, 20], strides = [1, 1, 1]} : vector<4x4x20xf32> to vector<2x2x20xf32>
    %32 = vector.extract_strided_slice %3 {offsets = [4, 0], sizes = [1, 20], strides = [1, 1]} : vector<9x20xf32> to vector<1x20xf32>
    %33 = vector.shape_cast %32 : vector<1x20xf32> to vector<20xf32>
    %34 = vector.shape_cast %33 : vector<20xf32> to vector<1x1x20xf32>
    %35 = vector.broadcast %34 : vector<1x1x20xf32> to vector<2x2x20xf32>
    %36 = arith.mulf %31, %35 : vector<2x2x20xf32>
    %37 = arith.addf %30, %36 : vector<2x2x20xf32>
    %38 = vector.extract_strided_slice %2 {offsets = [1, 2, 0], sizes = [2, 2, 20], strides = [1, 1, 1]} : vector<4x4x20xf32> to vector<2x2x20xf32>
    %39 = vector.extract_strided_slice %3 {offsets = [5, 0], sizes = [1, 20], strides = [1, 1]} : vector<9x20xf32> to vector<1x20xf32>
    %40 = vector.shape_cast %39 : vector<1x20xf32> to vector<20xf32>
    %41 = vector.shape_cast %40 : vector<20xf32> to vector<1x1x20xf32>
    %42 = vector.broadcast %41 : vector<1x1x20xf32> to vector<2x2x20xf32>
    %43 = arith.mulf %38, %42 : vector<2x2x20xf32>
    %44 = arith.addf %37, %43 : vector<2x2x20xf32>
    %45 = vector.extract_strided_slice %2 {offsets = [2, 0, 0], sizes = [2, 2, 20], strides = [1, 1, 1]} : vector<4x4x20xf32> to vector<2x2x20xf32>
    %46 = vector.extract_strided_slice %3 {offsets = [6, 0], sizes = [1, 20], strides = [1, 1]} : vector<9x20xf32> to vector<1x20xf32>
    %47 = vector.shape_cast %46 : vector<1x20xf32> to vector<20xf32>
    %48 = vector.shape_cast %47 : vector<20xf32> to vector<1x1x20xf32>
    %49 = vector.broadcast %48 : vector<1x1x20xf32> to vector<2x2x20xf32>
    %50 = arith.mulf %45, %49 : vector<2x2x20xf32>
    %51 = arith.addf %44, %50 : vector<2x2x20xf32>
    %52 = vector.extract_strided_slice %2 {offsets = [2, 1, 0], sizes = [2, 2, 20], strides = [1, 1, 1]} : vector<4x4x20xf32> to vector<2x2x20xf32>
    %53 = vector.extract_strided_slice %3 {offsets = [7, 0], sizes = [1, 20], strides = [1, 1]} : vector<9x20xf32> to vector<1x20xf32>
    %54 = vector.shape_cast %53 : vector<1x20xf32> to vector<20xf32>
    %55 = vector.shape_cast %54 : vector<20xf32> to vector<1x1x20xf32>
    %56 = vector.broadcast %55 : vector<1x1x20xf32> to vector<2x2x20xf32>
    %57 = arith.mulf %52, %56 : vector<2x2x20xf32>
    %58 = arith.addf %51, %57 : vector<2x2x20xf32>
    %59 = vector.extract_strided_slice %2 {offsets = [2, 2, 0], sizes = [2, 2, 20], strides = [1, 1, 1]} : vector<4x4x20xf32> to vector<2x2x20xf32>
    %60 = vector.extract_strided_slice %3 {offsets = [8, 0], sizes = [1, 20], strides = [1, 1]} : vector<9x20xf32> to vector<1x20xf32>
    %61 = vector.shape_cast %60 : vector<1x20xf32> to vector<20xf32>
    %62 = vector.shape_cast %61 : vector<20xf32> to vector<1x1x20xf32>
    %63 = vector.broadcast %62 : vector<1x1x20xf32> to vector<2x2x20xf32>
    %64 = arith.mulf %59, %63 : vector<2x2x20xf32>
    %65 = arith.addf %58, %64 : vector<2x2x20xf32>
    %c0_5 = arith.constant 0 : index
    %c0_6 = arith.constant 0 : index
    %66 = vector.load %arg3[%c0_5, %c0_6] : memref<1x20xf32, #tpu.memory_space<vmem>>, vector<1x20xf32>
    %67 = vector.shape_cast %66 : vector<1x20xf32> to vector<1x1x20xf32>
    %68 = vector.broadcast %67 : vector<1x1x20xf32> to vector<2x2x20xf32>
    %69 = arith.addf %65, %68 : vector<2x2x20xf32>
    %70 = vector.extract_strided_slice %2 {offsets = [1, 1, 0], sizes = [2, 2, 20], strides = [1, 1, 1]} : vector<4x4x20xf32> to vector<2x2x20xf32>
    %71 = tpu.concatenate %70, %69 in 2 : vector<2x2x20xf32>, vector<2x2x20xf32> -> vector<2x2x40xf32>
    %c0_7 = arith.constant 0 : index
    %c0_8 = arith.constant 0 : index
    %c0_9 = arith.constant 0 : index
    %c0_10 = arith.constant 0 : index
    %72 = vector.load %arg4[%c0_7, %c0_8, %c0_9, %c0_10] : memref<1x2x2x40xbf16, #tpu.memory_space<vmem>>, vector<1x2x2x40xbf16>
    %73 = vector.shape_cast %72 : vector<1x2x2x40xbf16> to vector<2x2x40xbf16>
    %74 = arith.extf %73 : vector<2x2x40xbf16> to vector<2x2x40xf32>
    %75 = arith.addf %71, %74 : vector<2x2x40xf32>
    %76 = arith.truncf %75 : vector<2x2x40xf32> to vector<2x2x40xbf16>
    %c0_11 = arith.constant 0 : index
    %c0_12 = arith.constant 0 : index
    %c0_13 = arith.constant 0 : index
    %c0_14 = arith.constant 0 : index
    %77 = vector.load %arg5[%c0_11, %c0_12, %c0_13, %c0_14] : memref<1x2x2x40xbf16, #tpu.memory_space<vmem>>, vector<1x2x2x40xbf16>
    %78 = vector.shape_cast %77 : vector<1x2x2x40xbf16> to vector<2x2x40xbf16>
    %79 = vector.shape_cast %76 : vector<2x2x40xbf16> to vector<1x2x2x40xbf16>
    tpu.vector_store %arg5[%c0_11, %c0_12, %c0_13, %c0_14], %79 {strides = array<i32>} : memref<1x2x2x40xbf16, #tpu.memory_space<vmem>>, vector<1x2x2x40xbf16>,
    return
  }
  func.func @transform_0(%arg0: i32) -> (i32, i32, i32, i32) {
    %c0_i32 = arith.constant 0 : i32
    %c0_i32_0 = arith.constant 0 : i32
    %c0_i32_1 = arith.constant 0 : i32
    %c0_i32_2 = arith.constant 0 : i32
    return %arg0, %c0_i32, %c0_i32_0, %c0_i32_1 : i32, i32, i32, i32
  }
  func.func @transform_1(%arg0: i32) -> (i32, i32) {
    %c0_i32 = arith.constant 0 : i32
    %c0_i32_0 = arith.constant 0 : i32
    %c0_i32_1 = arith.constant 0 : i32
    return %c0_i32, %c0_i32_0 : i32, i32
  }
  func.func @transform_2(%arg0: i32) -> (i32, i32) {
    %c0_i32 = arith.constant 0 : i32
    %c0_i32_0 = arith.constant 0 : i32
    %c0_i32_1 = arith.constant 0 : i32
    return %c0_i32, %c0_i32_0 : i32, i32
  }
  func.func @transform_3(%arg0: i32) -> (i32, i32, i32, i32) {
    %c0_i32 = arith.constant 0 : i32
    %c0_i32_0 = arith.constant 0 : i32
    %c0_i32_1 = arith.constant 0 : i32
    %c0_i32_2 = arith.constant 0 : i32
    return %arg0, %c0_i32, %c0_i32_0, %c0_i32_1 : i32, i32, i32, i32
  }
  func.func @transform_4(%arg0: i32) -> (i32, i32, i32, i32) {
    %c0_i32 = arith.constant 0 : i32
    %c0_i32_0 = arith.constant 0 : i32
    %c0_i32_1 = arith.constant 0 : i32
    %c0_i32_2 = arith.constant 0 : i32
    return %arg0, %c0_i32, %c0_i32_0, %c0_i32_1 : i32, i32, i32, i32
  }
}

module attributes {stable_mosaic.version = 11 : i64} {
  func.func @_pw_kernel(%arg0: i32, %arg1: memref<1x4x40xbf16, #tpu.memory_space<vmem>>, %arg2: memref<40x72xbf16, #tpu.memory_space<vmem>>, %arg3: memref<1x72xf32, #tpu.memory_space<vmem>>, %arg4: memref<1x4x72xbf16, #tpu.memory_space<vmem>>) attributes {dimension_semantics = [#tpu.dimension_semantics<parallel>], iteration_bounds = array<i64: 2>, scalar_prefetch = 0 : i64, scratch_operands = 0 : i64, tpu.core_type = #tpu.core_type<tc>, window_params = [{transform_indices = @transform_0, window_bounds = array<i64: 1, 4, 40>}, {pipeline_mode = #tpu.pipeline_mode<synchronous>, transform_indices = @transform_1, window_bounds = array<i64: 40, 72>}, {pipeline_mode = #tpu.pipeline_mode<synchronous>, transform_indices = @transform_2, window_bounds = array<i64: 1, 72>}, {transform_indices = @transform_3, window_bounds = array<i64: 1, 4, 72>}]} {
    %c0 = arith.constant 0 : index
    %c0_0 = arith.constant 0 : index
    %c0_1 = arith.constant 0 : index
    %0 = vector.load %arg1[%c0, %c0_0, %c0_1] : memref<1x4x40xbf16, #tpu.memory_space<vmem>>, vector<1x4x40xbf16>
    %1 = vector.shape_cast %0 : vector<1x4x40xbf16> to vector<4x40xbf16>
    %c0_2 = arith.constant 0 : index
    %c0_3 = arith.constant 0 : index
    %2 = vector.load %arg2[%c0_2, %c0_3] : memref<40x72xbf16, #tpu.memory_space<vmem>>, vector<40x72xbf16>
    %cst = arith.constant dense<0.000000e+00> : vector<4x72xf32>
    %3 = tpu.matmul %1, %2, %cst {dimension_numbers = #tpu.dot_dimension_numbers<[1], [0], [0], [1], [0, 0, 1, 1], [], []>} : vector<4x40xbf16>, vector<40x72xbf16>, vector<4x72xf32> -> vector<4x72xf32>
    %c0_4 = arith.constant 0 : index
    %c0_5 = arith.constant 0 : index
    %4 = vector.load %arg3[%c0_4, %c0_5] : memref<1x72xf32, #tpu.memory_space<vmem>>, vector<1x72xf32>
    %5 = vector.broadcast %4 : vector<1x72xf32> to vector<4x72xf32>
    %6 = arith.addf %3, %5 : vector<4x72xf32>
    %cst_6 = arith.constant 0.000000e+00 : f32
    %7 = vector.broadcast %cst_6 : f32 to vector<4x72xf32>
    %8 = arith.maximumf %6, %7 : vector<4x72xf32>
    %9 = arith.truncf %8 : vector<4x72xf32> to vector<4x72xbf16>
    %c0_7 = arith.constant 0 : index
    %c0_8 = arith.constant 0 : index
    %c0_9 = arith.constant 0 : index
    %10 = vector.load %arg4[%c0_7, %c0_8, %c0_9] : memref<1x4x72xbf16, #tpu.memory_space<vmem>>, vector<1x4x72xbf16>
    %11 = vector.shape_cast %10 : vector<1x4x72xbf16> to vector<4x72xbf16>
    %12 = vector.shape_cast %9 : vector<4x72xbf16> to vector<1x4x72xbf16>
    tpu.vector_store %arg4[%c0_7, %c0_8, %c0_9], %12 {strides = array<i32>} : memref<1x4x72xbf16, #tpu.memory_space<vmem>>, vector<1x4x72xbf16>,
    return
  }
  func.func @transform_0(%arg0: i32) -> (i32, i32, i32) {
    %c0_i32 = arith.constant 0 : i32
    %c0_i32_0 = arith.constant 0 : i32
    %c0_i32_1 = arith.constant 0 : i32
    return %arg0, %c0_i32, %c0_i32_0 : i32, i32, i32
  }
  func.func @transform_1(%arg0: i32) -> (i32, i32) {
    %c0_i32 = arith.constant 0 : i32
    %c0_i32_0 = arith.constant 0 : i32
    %c0_i32_1 = arith.constant 0 : i32
    return %c0_i32, %c0_i32_0 : i32, i32
  }
  func.func @transform_2(%arg0: i32) -> (i32, i32) {
    %c0_i32 = arith.constant 0 : i32
    %c0_i32_0 = arith.constant 0 : i32
    %c0_i32_1 = arith.constant 0 : i32
    return %c0_i32, %c0_i32_0 : i32, i32
  }
  func.func @transform_3(%arg0: i32) -> (i32, i32, i32) {
    %c0_i32 = arith.constant 0 : i32
    %c0_i32_0 = arith.constant 0 : i32
    %c0_i32_1 = arith.constant 0 : i32
    return %arg0, %c0_i32, %c0_i32_0 : i32, i32, i32
  }
}

module attributes {stable_mosaic.version = 11 : i64} {
  func.func @_head_kernel(%arg0: i32, %arg1: memref<1x4x72xbf16, #tpu.memory_space<vmem>>, %arg2: memref<72x1280xbf16, #tpu.memory_space<vmem>>, %arg3: memref<1x1280xf32, #tpu.memory_space<vmem>>, %arg4: memref<1280x8xbf16, #tpu.memory_space<vmem>>, %arg5: memref<1x8xf32, #tpu.memory_space<vmem>>, %arg6: memref<1x1x8xf32, #tpu.memory_space<vmem>>) attributes {dimension_semantics = [#tpu.dimension_semantics<parallel>], iteration_bounds = array<i64: 2>, scalar_prefetch = 0 : i64, scratch_operands = 0 : i64, tpu.core_type = #tpu.core_type<tc>, window_params = [{transform_indices = @transform_0, window_bounds = array<i64: 1, 4, 72>}, {pipeline_mode = #tpu.pipeline_mode<synchronous>, transform_indices = @transform_1, window_bounds = array<i64: 72, 1280>}, {pipeline_mode = #tpu.pipeline_mode<synchronous>, transform_indices = @transform_2, window_bounds = array<i64: 1, 1280>}, {pipeline_mode = #tpu.pipeline_mode<synchronous>, transform_indices = @transform_3, window_bounds = array<i64: 1280, 8>}, {pipeline_mode = #tpu.pipeline_mode<synchronous>, transform_indices = @transform_4, window_bounds = array<i64: 1, 8>}, {transform_indices = @transform_5, window_bounds = array<i64: 1, 1, 8>}]} {
    %c0 = arith.constant 0 : index
    %c0_0 = arith.constant 0 : index
    %c0_1 = arith.constant 0 : index
    %0 = vector.load %arg1[%c0, %c0_0, %c0_1] : memref<1x4x72xbf16, #tpu.memory_space<vmem>>, vector<1x4x72xbf16>
    %1 = vector.shape_cast %0 : vector<1x4x72xbf16> to vector<4x72xbf16>
    %2 = arith.extf %1 : vector<4x72xbf16> to vector<4x72xf32>
    %cst = arith.constant dense<0.000000e+00> : vector<72xf32>
    %3 = vector.multi_reduction <add>, %2, %cst [0] : vector<4x72xf32> to vector<72xf32>
    %4 = vector.shape_cast %3 : vector<72xf32> to vector<1x72xf32>
    %cst_2 = arith.constant 4.000000e+00 : f32
    %5 = vector.broadcast %cst_2 : f32 to vector<1x72xf32>
    %6 = arith.divf %4, %5 : vector<1x72xf32>
    %7 = arith.truncf %6 : vector<1x72xf32> to vector<1x72xbf16>
    %c0_3 = arith.constant 0 : index
    %c0_4 = arith.constant 0 : index
    %8 = vector.load %arg2[%c0_3, %c0_4] : memref<72x1280xbf16, #tpu.memory_space<vmem>>, vector<72x1280xbf16>
    %cst_5 = arith.constant dense<0.000000e+00> : vector<1x1280xf32>
    %9 = tpu.matmul %7, %8, %cst_5 {dimension_numbers = #tpu.dot_dimension_numbers<[1], [0], [0], [1], [0, 0, 1, 1], [], []>} : vector<1x72xbf16>, vector<72x1280xbf16>, vector<1x1280xf32> -> vector<1x1280xf32>
    %c0_6 = arith.constant 0 : index
    %c0_7 = arith.constant 0 : index
    %10 = vector.load %arg3[%c0_6, %c0_7] : memref<1x1280xf32, #tpu.memory_space<vmem>>, vector<1x1280xf32>
    %11 = arith.addf %9, %10 : vector<1x1280xf32>
    %cst_8 = arith.constant 0.000000e+00 : f32
    %12 = vector.broadcast %cst_8 : f32 to vector<1x1280xf32>
    %13 = arith.maximumf %11, %12 : vector<1x1280xf32>
    %14 = arith.truncf %13 : vector<1x1280xf32> to vector<1x1280xbf16>
    %c0_9 = arith.constant 0 : index
    %c0_10 = arith.constant 0 : index
    %15 = vector.load %arg4[%c0_9, %c0_10] : memref<1280x8xbf16, #tpu.memory_space<vmem>>, vector<1280x8xbf16>
    %cst_11 = arith.constant dense<0.000000e+00> : vector<1x8xf32>
    %16 = tpu.matmul %14, %15, %cst_11 {dimension_numbers = #tpu.dot_dimension_numbers<[1], [0], [0], [1], [0, 0, 1, 1], [], []>} : vector<1x1280xbf16>, vector<1280x8xbf16>, vector<1x8xf32> -> vector<1x8xf32>
    %c0_12 = arith.constant 0 : index
    %c0_13 = arith.constant 0 : index
    %17 = vector.load %arg5[%c0_12, %c0_13] : memref<1x8xf32, #tpu.memory_space<vmem>>, vector<1x8xf32>
    %18 = arith.addf %16, %17 : vector<1x8xf32>
    %c0_14 = arith.constant 0 : index
    %c0_15 = arith.constant 0 : index
    %c0_16 = arith.constant 0 : index
    %19 = vector.load %arg6[%c0_14, %c0_15, %c0_16] : memref<1x1x8xf32, #tpu.memory_space<vmem>>, vector<1x1x8xf32>
    %20 = vector.shape_cast %19 : vector<1x1x8xf32> to vector<1x8xf32>
    %21 = vector.shape_cast %18 : vector<1x8xf32> to vector<1x1x8xf32>
    tpu.vector_store %arg6[%c0_14, %c0_15, %c0_16], %21 {strides = array<i32>} : memref<1x1x8xf32, #tpu.memory_space<vmem>>, vector<1x1x8xf32>,
    return
  }
  func.func @transform_0(%arg0: i32) -> (i32, i32, i32) {
    %c0_i32 = arith.constant 0 : i32
    %c0_i32_0 = arith.constant 0 : i32
    %c0_i32_1 = arith.constant 0 : i32
    return %arg0, %c0_i32, %c0_i32_0 : i32, i32, i32
  }
  func.func @transform_1(%arg0: i32) -> (i32, i32) {
    %c0_i32 = arith.constant 0 : i32
    %c0_i32_0 = arith.constant 0 : i32
    %c0_i32_1 = arith.constant 0 : i32
    return %c0_i32, %c0_i32_0 : i32, i32
  }
  func.func @transform_2(%arg0: i32) -> (i32, i32) {
    %c0_i32 = arith.constant 0 : i32
    %c0_i32_0 = arith.constant 0 : i32
    %c0_i32_1 = arith.constant 0 : i32
    return %c0_i32, %c0_i32_0 : i32, i32
  }
  func.func @transform_3(%arg0: i32) -> (i32, i32) {
    %c0_i32 = arith.constant 0 : i32
    %c0_i32_0 = arith.constant 0 : i32
    %c0_i32_1 = arith.constant 0 : i32
    return %c0_i32, %c0_i32_0 : i32, i32
  }
  func.func @transform_4(%arg0: i32) -> (i32, i32) {
    %c0_i32 = arith.constant 0 : i32
    %c0_i32_0 = arith.constant 0 : i32
    %c0_i32_1 = arith.constant 0 : i32
    return %c0_i32, %c0_i32_0 : i32, i32
  }
  func.func @transform_5(%arg0: i32) -> (i32, i32, i32) {
    %c0_i32 = arith.constant 0 : i32
    %c0_i32_0 = arith.constant 0 : i32
    %c0_i32_1 = arith.constant 0 : i32
    return %arg0, %c0_i32, %c0_i32_0 : i32, i32, i32
  }
}

</mosaic_0001>

<bundles_post_ra>
// kernel: _lambda_.23
= control target key start
LH: loop header
LB: loop body
LE: loop exit
PB: predicated region body
PF: predicated region fallthrough
CT: control target
= control target key end

     0   :  { %s416_s12 = smov 0   ;;  %s457_s0 = inlined_call_operand.vmem [shape: bf16[2,64,16], index: 0, kind: input, shape index: {}]   ;;  %s458_s1 = inlined_call_operand.vmem [shape: bf16[16,8], index: 1, kind: input, shape index: {}]   ;;  %s459_s2 = inlined_call_operand.vmem [shape: f32[1,8], index: 2, kind: input, shape index: {}]   ;;  %s460_s3 = inlined_call_operand.vmem [shape: bf16[2,64,8], index: 3, kind: output, shape index: {}]  }
   0x1 LB: > { %s334_s13 = sadd.s32 4294967295, %s394_s12   ;;  %p338_p0 = scmp.ge.s32.totalorder %s394_s12, 1  ;;  %s394_s12 = sphi %s416_s12, %s13_s12  }
   0x2   : > { %p137_p1 = scmp.lt.s32.totalorder %s394_s12, 3 }
   0x4   : > { %p138_p2 = pnand %p338_p0, %p137_p1 }
   0x5   : > { %p161_p3 = scmp.lt.s32.totalorder (!%p138_p2), %s334_s13, 1 }
   0x6   : > { %141 = sbr.rel (%p138_p2) target bundleno = 164 (0xa4), region = 32 }
   0xb   : > { %v375_v0 = vld [vmem:[%s458_s1] sm:$0xff]  ;;  %s462_s13 = smov (!%p161_p3, %s334_s13), 1  ;;  %vm212_vm0 = vcmask 130048   ;;  %vm270_vm1 = vcmask 60416  }
   0xc   : > { %232 = vmatpush.bf16.msra.mxu0 %v375_v0  ;;  %376 = vmatpush.bf16.msra.mxu1 %v375_v0  ;;  %s369_s16 = sshll.u32 %s462_s13, 5  ;;  %v387_v5 = vld [vmem:[%s459_s2] ss:$0 sm:$0xff] }
   0xd   : > { %377 = vmatpush.bf16.msra.mxu2 %v375_v0  ;;  %378 = vmatpush.bf16.msra.mxu3 %v375_v0  ;;  %s165_s19 = scalar_lea.vmem %s457_s0, %s369_s16  ;;  %s436_s24 = scalar_lea.vmem %s460_s3, %s369_s16 }
   0xe   : > { %v371_v1 = vld [vmem:[%s165_s19] sm:$0xff]  ;;  %v372_v2 = vld [vmem:[%s165_s19 + $0x8] sm:$0xff]  ;;  %v373_v3 = vld [vmem:[%s165_s19 + $0x10] sm:$0xff] }
   0xf   : > { %v374_v4 = vld [vmem:[%s165_s19 + $0x18] sm:$0xff]  ;;  %363 = vmatmul.msk.bf16.vlgmr.msra.gmra.mxu0 %vm212_vm0, %v371_v1  ;;  %364 = vmatmul.msk.bf16.vlgmr.msra.gmra.mxu1 %vm212_vm0, %v372_v2 }
  0x10   : > { %365 = vmatmul.msk.bf16.vlgmr.msra.gmra.mxu2 %vm212_vm0, %v373_v3  ;;  %366 = vmatmul.msk.bf16.vlgmr.msra.gmra.mxu3 %vm212_vm0, %v374_v4 }
  0x8c   : > { %v234_v6 = vpop.f32.mrf.mxu0  ;;  %v239_v7 = vpop.f32.mrf.mxu1 }
  0x8d   : > { %v235_v8 = vadd.f32 %v387_v5, %v234_v6  ;;  %v240_v9 = vadd.f32 %v387_v5, %v239_v7 }
  0x8f   : > { %v254_v10 = vmax.f32 %v235_v8, 0.0  ;;  %v256_v11 = vmax.f32 %v240_v9, 0.0 }
  0x91   : > { %v262_v12 = vpack.c.bf16 %v254_v10, %v254_v10  ;;  %v264_v13 = vpack.c.bf16 %v256_v11, %v256_v11 }
  0x93   : > { %271 = vst.msk [vmem:[%s436_s24] sm:$0xf] %vm270_vm1, %v262_v12  ;;  %v244_v14 = vpop.f32.mrf.mxu2  ;;  %v249_v15 = vpop.f32.mrf.mxu3 }
  0x94   : > { %273 = vst.msk [vmem:[%s436_s24 + $0x8] sm:$0xf] %vm270_vm1, %v264_v13  ;;  %v245_v16 = vadd.f32 %v387_v5, %v244_v14  ;;  %v250_v17 = vadd.f32 %v387_v5, %v249_v15  ;;  %v236_v18 = vpop.f32.mrf.mxu0  ;;  %v241_v19 = vpop.f32.mrf.mxu1 }
  0x95   : > { %v237_v20 = vadd.f32 %v387_v5, %v236_v18  ;;  %v242_v21 = vadd.f32 %v387_v5, %v241_v19 }
  0x96   : > { %v258_v22 = vmax.f32 %v245_v16, 0.0  ;;  %v260_v23 = vmax.f32 %v250_v17, 0.0 }
  0x97   : > { %v255_v24 = vmax.f32 %v237_v20, 0.0  ;;  %v257_v25 = vmax.f32 %v242_v21, 0.0 }
  0x98   : > { %v266_v26 = vpack.c.bf16 %v258_v22, %v258_v22  ;;  %v268_v27 = vpack.c.bf16 %v260_v23, %v260_v23 }
  0x99   : > { %v263_v28 = vpack.c.bf16 %v255_v24, %v255_v24  ;;  %v265_v29 = vpack.c.bf16 %v257_v25, %v257_v25 }
  0x9a   : > { %275 = vst.msk [vmem:[%s436_s24 + $0x10] sm:$0xf] %vm270_vm1, %v266_v26 }
  0x9b   : > { %277 = vst.msk [vmem:[%s436_s24 + $0x18] sm:$0xf] %vm270_vm1, %v268_v27  ;;  %v246_v30 = vpop.f32.mrf.mxu2  ;;  %v251_v31 = vpop.f32.mrf.mxu3 }
  0x9c   : > { %272 = vst.msk [vmem:[%s436_s24 + $0x4] sm:$0xf] %vm270_vm1, %v263_v28  ;;  %v247_v32 = vadd.f32 %v387_v5, %v246_v30  ;;  %v252_v33 = vadd.f32 %v387_v5, %v251_v31 }
  0x9d   : > { %274 = vst.msk [vmem:[%s436_s24 + $0xc] sm:$0xf] %vm270_vm1, %v265_v29 }
  0x9e   : > { %v259_v34 = vmax.f32 %v247_v32, 0.0  ;;  %v261_v35 = vmax.f32 %v252_v33, 0.0 }
  0xa0   : > { %v267_v36 = vpack.c.bf16 %v259_v34, %v259_v34  ;;  %v269_v37 = vpack.c.bf16 %v261_v35, %v261_v35 }
  0xa2   : > { %276 = vst.msk [vmem:[%s436_s24 + $0x14] sm:$0xf] %vm270_vm1, %v267_v36 }
  0xa3   : > { %278 = vst.msk [vmem:[%s436_s24 + $0x1c] sm:$0xf] %vm270_vm1, %v269_v37 }
  0xa4 PF: > { %s13_s12 = sadd.s32 1, %s394_s12  }
  0xa5   : > { %p10_p4 = scmp.ge.s32.totalorder %s13_s12, 4  }
  0xa7   :  { %12 = sbr.rel (!%p10_p4) target bundleno = 1 (0x1), region = 62 }

// kernel: _lambda_.22
= control target key start
LH: loop header
LB: loop body
LE: loop exit
PB: predicated region body
PF: predicated region fallthrough
CT: control target
= control target key end

     0   :  { %s475_s12 = smov 0   ;;  %s531_s0 = inlined_call_operand.vmem [shape: bf16[2,64,72], index: 0, kind: input, shape index: {}]   ;;  %s532_s1 = inlined_call_operand.vmem [shape: bf16[72,16], index: 1, kind: input, shape index: {}]   ;;  %s533_s2 = inlined_call_operand.vmem [shape: f32[1,16], index: 2, kind: input, shape index: {}]   ;;  %s534_s3 = inlined_call_operand.vmem [shape: bf16[2,64,16], index: 3, kind: output, shape index: {}]  }
   0x1 LB: > { %s366_s13 = sadd.s32 4294967295, %s453_s12   ;;  %p370_p0 = scmp.ge.s32.totalorder %s453_s12, 1  ;;  %s453_s12 = sphi %s475_s12, %s13_s12  }
   0x2   : > { %p137_p1 = scmp.lt.s32.totalorder %s453_s12, 3 }
   0x4   : > { %p138_p2 = pnand %p370_p0, %p137_p1 }
   0x5   : > { %p161_p3 = scmp.lt.s32.totalorder (!%p138_p2), %s366_s13, 1 }
   0x6   : > { %141 = sbr.rel (%p138_p2) target bundleno = 185 (0xb9), region = 32 }
   0xb   : > { %v188_v0 = vld [vmem:[%s532_s1 + $0x20] sm:$0xf]  ;;  %vm253_vm0 = vcmask 1043456   ;;  %v422_v4 = vld [vmem:[%s532_s1 + $0x18] sm:$0xff]  ;;  %v421_v5 = vld [vmem:[%s532_s1 + $0x10] sm:$0xff]  ;;  %s536_s13 = smov (!%p161_p3, %s366_s13), 1 }
   0xc   : > { %v230_v1 = vunpack.c.l.b16 %v188_v0  ;;  %v420_v6 = vld [vmem:[%s532_s1 + $0x8] sm:$0xff]  ;;  %s413_s22 = sshll.u32 %s536_s13, 5  ;;  %v419_v7 = vld [vmem:[%s532_s1] sm:$0xff]  ;;  %vm240_vm1 = vcmask 588800   ;;  %vm302_vm2 = vcmask 125952  }
   0xd   : > { %s165_s27 = scalar_lea.vmem %s531_s0, %s413_s22  ;;  %v446_v12 = vld [vmem:[%s533_s2] ss:$0 sm:$0xff]  ;;  %s510_s5 = scalar_lea.vmem %s534_s3, %s413_s22 }
   0xe   : > { %v235_v2 = vpack.c.b16 %v230_v1, %v230_v1  ;;  %v415_v8 = vld [vmem:[%s165_s27] sm:$0xff]  ;;  %v416_v9 = vld [vmem:[%s165_s27 + $0x8] sm:$0xff]  ;;  %v417_v10 = vld [vmem:[%s165_s27 + $0x10] sm:$0xff] }
   0xf   : > { %v418_v11 = vld [vmem:[%s165_s27 + $0x18] sm:$0xff] }
  0x10   : > { %v255_v3 = vsel %vm253_vm0, %v235_v2, 0 }
  0x11   : > { %260 = vmatpush.bf16.msra.mxu0 %v255_v3  ;;  %423 = vmatpush.bf16.msra.mxu1 %v255_v3 }
  0x12   : > { %424 = vmatpush.bf16.msra.mxu2 %v255_v3  ;;  %425 = vmatpush.bf16.msra.mxu3 %v255_v3 }
  0x15   : > { %261 = vmatpush.bf16.msra.mxu0 %v422_v4  ;;  %426 = vmatpush.bf16.msra.mxu1 %v422_v4 }
  0x16   : > { %427 = vmatpush.bf16.msra.mxu2 %v422_v4  ;;  %428 = vmatpush.bf16.msra.mxu3 %v422_v4 }
  0x19   : > { %262 = vmatpush.bf16.msra.mxu0 %v421_v5  ;;  %429 = vmatpush.bf16.msra.mxu1 %v421_v5 }
  0x1a   : > { %430 = vmatpush.bf16.msra.mxu2 %v421_v5  ;;  %431 = vmatpush.bf16.msra.mxu3 %v421_v5 }
  0x1d   : > { %263 = vmatpush.bf16.msra.mxu0 %v420_v6  ;;  %432 = vmatpush.bf16.msra.mxu1 %v420_v6 }
  0x1e   : > { %433 = vmatpush.bf16.msra.mxu2 %v420_v6  ;;  %434 = vmatpush.bf16.msra.mxu3 %v420_v6 }
  0x21   : > { %264 = vmatpush.bf16.msra.mxu0 %v419_v7  ;;  %435 = vmatpush.bf16.msra.mxu1 %v419_v7 }
  0x22   : > { %436 = vmatpush.bf16.msra.mxu2 %v419_v7  ;;  %437 = vmatpush.bf16.msra.mxu3 %v419_v7 }
  0x24   : > { %407 = vmatmul.msk.bf16.vlgmr.msra.gmra.mxu0 %vm240_vm1, %v415_v8  ;;  %408 = vmatmul.msk.bf16.vlgmr.msra.gmra.mxu1 %vm240_vm1, %v416_v9 }
  0x25   : > { %409 = vmatmul.msk.bf16.vlgmr.msra.gmra.mxu2 %vm240_vm1, %v417_v10  ;;  %410 = vmatmul.msk.bf16.vlgmr.msra.gmra.mxu3 %vm240_vm1, %v418_v11 }
  0xa1   : > { %v266_v13 = vpop.f32.mrf.mxu0  ;;  %v271_v14 = vpop.f32.mrf.mxu1 }
  0xa2   : > { %v267_v15 = vadd.f32 %v446_v12, %v266_v13  ;;  %v272_v16 = vadd.f32 %v446_v12, %v271_v14 }
  0xa4   : > { %v286_v17 = vmax.f32 %v267_v15, 0.0  ;;  %v288_v18 = vmax.f32 %v272_v16, 0.0 }
  0xa6   : > { %v294_v19 = vpack.c.bf16 %v286_v17, %v286_v17  ;;  %v296_v20 = vpack.c.bf16 %v288_v18, %v288_v18 }
  0xa8   : > { %303 = vst.msk [vmem:[%s510_s5] sm:$0xf] %vm302_vm2, %v294_v19  ;;  %v276_v21 = vpop.f32.mrf.mxu2  ;;  %v281_v22 = vpop.f32.mrf.mxu3 }
  0xa9   : > { %305 = vst.msk [vmem:[%s510_s5 + $0x8] sm:$0xf] %vm302_vm2, %v296_v20  ;;  %v277_v23 = vadd.f32 %v446_v12, %v276_v21  ;;  %v282_v24 = vadd.f32 %v446_v12, %v281_v22  ;;  %v268_v25 = vpop.f32.mrf.mxu0  ;;  %v273_v26 = vpop.f32.mrf.mxu1 }
  0xaa   : > { %v269_v27 = vadd.f32 %v446_v12, %v268_v25  ;;  %v274_v28 = vadd.f32 %v446_v12, %v273_v26 }
  0xab   : > { %v290_v29 = vmax.f32 %v277_v23, 0.0  ;;  %v292_v30 = vmax.f32 %v282_v24, 0.0 }
  0xac   : > { %v287_v31 = vmax.f32 %v269_v27, 0.0  ;;  %v289_v32 = vmax.f32 %v274_v28, 0.0 }
  0xad   : > { %v298_v33 = vpack.c.bf16 %v290_v29, %v290_v29  ;;  %v300_v34 = vpack.c.bf16 %v292_v30, %v292_v30 }
  0xae   : > { %v295_v35 = vpack.c.bf16 %v287_v31, %v287_v31  ;;  %v297_v36 = vpack.c.bf16 %v289_v32, %v289_v32 }
  0xaf   : > { %307 = vst.msk [vmem:[%s510_s5 + $0x10] sm:$0xf] %vm302_vm2, %v298_v33 }
  0xb0   : > { %309 = vst.msk [vmem:[%s510_s5 + $0x18] sm:$0xf] %vm302_vm2, %v300_v34  ;;  %v278_v37 = vpop.f32.mrf.mxu2  ;;  %v283_v38 = vpop.f32.mrf.mxu3 }
  0xb1   : > { %304 = vst.msk [vmem:[%s510_s5 + $0x4] sm:$0xf] %vm302_vm2, %v295_v35  ;;  %v279_v39 = vadd.f32 %v446_v12, %v278_v37  ;;  %v284_v40 = vadd.f32 %v446_v12, %v283_v38 }
  0xb2   : > { %306 = vst.msk [vmem:[%s510_s5 + $0xc] sm:$0xf] %vm302_vm2, %v297_v36 }
  0xb3   : > { %v291_v41 = vmax.f32 %v279_v39, 0.0  ;;  %v293_v42 = vmax.f32 %v284_v40, 0.0 }
  0xb5   : > { %v299_v43 = vpack.c.bf16 %v291_v41, %v291_v41  ;;  %v301_v44 = vpack.c.bf16 %v293_v42, %v293_v42 }
  0xb7   : > { %308 = vst.msk [vmem:[%s510_s5 + $0x14] sm:$0xf] %vm302_vm2, %v299_v43 }
  0xb8   : > { %310 = vst.msk [vmem:[%s510_s5 + $0x1c] sm:$0xf] %vm302_vm2, %v301_v44 }
  0xb9 PF: > { %s13_s12 = sadd.s32 1, %s453_s12  }
  0xba   : > { %p10_p4 = scmp.ge.s32.totalorder %s13_s12, 4  }
  0xbc   :  { %12 = sbr.rel (!%p10_p4) target bundleno = 1 (0x1), region = 62 }

// kernel: _lambda_.24
= control target key start
LH: loop header
LB: loop body
LE: loop exit
PB: predicated region body
PF: predicated region fallthrough
CT: control target
= control target key end

     0   :  { %s1048_s12 = smov 0   ;;  %s1525_s0 = inlined_call_operand.vmem [shape: bf16[2,10,10,8], index: 0, kind: input, shape index: {}]   ;;  %s1526_s1 = inlined_call_operand.vmem [shape: f32[9,8], index: 1, kind: input, shape index: {}]   ;;  %s1527_s2 = inlined_call_operand.vmem [shape: f32[1,8], index: 2, kind: input, shape index: {}]   ;;  %s1528_s3 = inlined_call_operand.vmem [shape: bf16[2,8,8,16], index: 3, kind: output, shape index: {}]  }
   0x1 LB: > { %s976_s13 = sadd.s32 4294967295, %s1025_s12   ;;  %p980_p0 = scmp.ge.s32.totalorder %s1025_s12, 1  ;;  %s1025_s12 = sphi %s1048_s12, %s13_s12  }
   0x2   : > { %p137_p1 = scmp.lt.s32.totalorder %s1025_s12, 3 }
   0x4   : > { %p138_p2 = pnand %p980_p0, %p137_p1 }
   0x5   : > { %p161_p3 = scmp.lt.s32.totalorder (!%p138_p2), %s976_s13, 1  ;;  %s1027_s24 = smov (!%p138_p2), 8  }
   0x6   : > { %141 = sbr.rel (%p138_p2) target bundleno = 251 (0xfb), region = 32 }
   0xb   : > { %s1532_s13 = smov (!%p161_p3, %s976_s13), 1  ;;  %v211_v0 = vld [vmem:[%s1526_s1] sm:$0xff]  ;;  %vm255_vm0 = vcmask 1046528   ;;  %vm329_vm1 = vcmask 1045504   ;;  %vm756_vm2 = vcmask 64512   ;;  %vm912_vm5 = vcmask 125952  }
   0xc   : > { %s987_s16 = smul.u32 80, %s1532_s13  ;;  %v1062_v1 = vperm.slane %v211_v0, 0  ;;  %v1064_v2 = vperm.slane %v211_v0, 1  ;;  %v1066_v3 = vperm.slane %v211_v0, 2  ;;  %v1073_v4 = vperm.slane %v211_v0, 3  ;;  %s986_s25 = sshll.u32 %s1532_s13, 5 }
   0xd   : > { %v1075_v5 = vperm.slane %v211_v0, 4  ;;  %v1077_v6 = vperm.slane %v211_v0, 5  ;;  %v1079_v7 = vperm.slane %v211_v0, 6  ;;  %v1101_v22 = vperm.slane %v211_v0, 7  ;;  %s1472_s28 = scalar_lea.vmem %s1528_s3, %s986_s25 }
   0xe   : > { %s1071_s19 = scalar_lea.vmem %s1525_s0, %s987_s16  ;;  %vm789_vm3 = vsmask.f32 3328  ;;  %vm790_vm4 = vsmask.f32 7440 }
   0xf   : > { %v179_v8 = vld [vmem:[%s1071_s19 + $0x20] sm:$0xf]  ;;  %v180_v9 = vld [vmem:[%s1071_s19 + $0x24] sm:$0x1]  ;;  %v181_v10 = vld [vmem:[%s1071_s19 + $0x28] sm:$0xf] }
  0x10   : > { %v182_v11 = vld [vmem:[%s1071_s19 + $0x2c] sm:$0x1]  ;;  %v183_v12 = vld [vmem:[%s1071_s19 + $0x30] sm:$0xf]  ;;  %v184_v13 = vld [vmem:[%s1071_s19 + $0x34] sm:$0x1]  ;;  %v1087_v14 = vunpack.c.l.bf16 %v179_v8  ;;  %v1089_v15 = vunpack.c.l.bf16 %v180_v9  ;;  %v1091_v16 = vunpack.c.l.bf16 %v181_v10 }
  0x11   : > { %v185_v17 = vld [vmem:[%s1071_s19 + $0x38] sm:$0xf]  ;;  %v186_v18 = vld [vmem:[%s1071_s19 + $0x3c] sm:$0x1]  ;;  %v1095_v19 = vunpack.c.l.bf16 %v182_v11  ;;  %v1097_v20 = vunpack.c.l.bf16 %v183_v12  ;;  %v1099_v21 = vunpack.c.l.bf16 %v184_v13  ;;  %vm1465_vm6 = vmor %vm789_vm3, %vm790_vm4 }
  0x12   : > { %v1103_v23 = vunpack.c.l.bf16 %v185_v17  ;;  %v1105_v24 = vunpack.c.l.bf16 %v186_v18  ;;  %v218_v25 = vmul.f32 %v1062_v1, %v1087_v14  ;;  %v219_v26 = vmul.f32 %v1062_v1, %v1091_v16  ;;  %v1156_v17 = vld [vmem:[%s1526_s1 + $0x8] ss:$0 sm:$0xff] }
  0x13   : > { %v231_v27 = vmul.f32 %v1064_v2, %v1087_v14  ;;  %v232_v28 = vmul.f32 %v1064_v2, %v1089_v15  ;;  %v233_v29 = vmul.f32 %v1064_v2, %v1091_v16  ;;  %v234_v30 = vmul.f32 %v1064_v2, %v1095_v19 }
  0x14   : > { %v305_v31 = vmul.f32 %v1066_v3, %v1087_v14  ;;  %v306_v32 = vmul.f32 %v1066_v3, %v1089_v15  ;;  %v307_v33 = vmul.f32 %v1066_v3, %v1091_v16  ;;  %v308_v34 = vmul.f32 %v1066_v3, %v1095_v19 }
  0x15   : > { %v268_v35 = vrot.slane %v231_v27, 1  ;;  %v269_v36 = vrot.slane %v232_v28, 1  ;;  %v271_v37 = vrot.slane %v233_v29, 1  ;;  %v272_v38 = vrot.slane %v234_v30, 1 }
  0x16   : > { %v342_v39 = vrot.slane %v305_v31, 2  ;;  %v343_v40 = vrot.slane %v306_v32, 2  ;;  %v345_v41 = vrot.slane %v307_v33, 2  ;;  %v346_v42 = vrot.slane %v308_v34, 2 }
  0x17   : > { %v270_v43 = vsel %vm255_vm0, %v268_v35, %v269_v36  ;;  %v273_v44 = vsel %vm255_vm0, %v271_v37, %v272_v38  ;;  %v375_v45 = vmul.f32 %v1073_v4, %v1091_v16  ;;  %v376_v46 = vmul.f32 %v1073_v4, %v1097_v20 }
  0x18   : > { %v292_v47 = vadd.f32 %v270_v43, %v218_v25  ;;  %v293_v48 = vadd.f32 %v273_v44, %v219_v26  ;;  %v344_v49 = vsel %vm329_vm1, %v342_v39, %v343_v40  ;;  %v347_v50 = vsel %vm329_vm1, %v345_v41, %v346_v42  ;;  %v171_v40 = vld [vmem:[%s1071_s19] sm:$0xf] }
  0x19   : > { %v396_v51 = vmul.f32 %v1075_v5, %v1091_v16  ;;  %v397_v52 = vmul.f32 %v1075_v5, %v1095_v19  ;;  %v398_v53 = vmul.f32 %v1075_v5, %v1097_v20  ;;  %v399_v54 = vmul.f32 %v1075_v5, %v1099_v21 }
  0x1a   : > { %v366_v55 = vadd.f32 %v344_v49, %v292_v47  ;;  %v367_v56 = vadd.f32 %v347_v50, %v293_v48  ;;  %v469_v57 = vmul.f32 %v1077_v6, %v1091_v16  ;;  %v470_v58 = vmul.f32 %v1077_v6, %v1095_v19  ;;  %v1185_v50 = vld [vmem:[%s1527_s2] ss:$0 sm:$0xff] }
  0x1b   : > { %v432_v59 = vrot.slane %v396_v51, 1  ;;  %v433_v60 = vrot.slane %v397_v52, 1  ;;  %v435_v61 = vrot.slane %v398_v53, 1  ;;  %v436_v62 = vrot.slane %v399_v54, 1  ;;  %v173_v51 = vld [vmem:[%s1071_s19 + $0x8] sm:$0xf] }
  0x1c   : > { %v383_v63 = vadd.f32 %v375_v45, %v366_v55  ;;  %v384_v0 = vadd.f32 %v376_v46, %v367_v56  ;;  %v471_v8 = vmul.f32 %v1077_v6, %v1097_v20  ;;  %v472_v9 = vmul.f32 %v1077_v6, %v1099_v21  ;;  %v172_v45 = vld [vmem:[%s1071_s19 + $0x4] sm:$0x1]  ;;  %v174_v52 = vld [vmem:[%s1071_s19 + $0xc] sm:$0x1]  ;;  %v175_v56 = vld [vmem:[%s1071_s19 + $0x10] sm:$0xf] }
  0x1d   : > { %v434_v10 = vsel %vm255_vm0, %v432_v59, %v433_v60  ;;  %v437_v11 = vsel %vm255_vm0, %v435_v61, %v436_v62  ;;  %v505_v12 = vrot.slane %v469_v57, 2  ;;  %v506_v13 = vrot.slane %v470_v58, 2  ;;  %v176_v57 = vld [vmem:[%s1071_s19 + $0x14] sm:$0x1] }
  0x1e   : > { %v456_v18 = vadd.f32 %v434_v10, %v383_v63  ;;  %v457_v25 = vadd.f32 %v437_v11, %v384_v0  ;;  %v508_v26 = vrot.slane %v471_v8, 2  ;;  %v509_v27 = vrot.slane %v472_v9, 2  ;;  %v177_v63 = vld [vmem:[%s1071_s19 + $0x18] sm:$0xf]  ;;  %v178_v0 = vld [vmem:[%s1071_s19 + $0x1c] sm:$0x1] }
  0x1f   : > { %v507_v28 = vsel %vm329_vm1, %v505_v12, %v506_v13  ;;  %v538_v29 = vmul.f32 %v1079_v7, %v1097_v20  ;;  %v539_v30 = vmul.f32 %v1079_v7, %v1103_v23  ;;  %v559_v31 = vmul.f32 %v1101_v22, %v1097_v20 }
  0x20   : > { %v510_v32 = vsel %vm329_vm1, %v508_v26, %v509_v27  ;;  %v529_v33 = vadd.f32 %v507_v28, %v456_v18  ;;  %v560_v34 = vmul.f32 %v1101_v22, %v1099_v21  ;;  %v561_v35 = vmul.f32 %v1101_v22, %v1103_v23 }
  0x21   : > { %v530_v36 = vadd.f32 %v510_v32, %v457_v25  ;;  %v562_v37 = vmul.f32 %v1101_v22, %v1105_v24  ;;  %v595_v38 = vrot.slane %v559_v31, 1  ;;  %v632_v39 = vmul.f32 %v1156_v17, %v1097_v20 }
  0x22   : > { %v546_v41 = vadd.f32 %v538_v29, %v529_v33  ;;  %v596_v42 = vrot.slane %v560_v34, 1  ;;  %v598_v43 = vrot.slane %v561_v35, 1  ;;  %v633_v44 = vmul.f32 %v1156_v17, %v1099_v21 }
  0x23   : > { %v547_v46 = vadd.f32 %v539_v30, %v530_v36  ;;  %v599_v47 = vrot.slane %v562_v37, 1  ;;  %v634_v48 = vmul.f32 %v1156_v17, %v1103_v23  ;;  %v635_v49 = vmul.f32 %v1156_v17, %v1105_v24 }
  0x24   : > { %v597_v53 = vsel %vm255_vm0, %v595_v38, %v596_v42  ;;  %v668_v54 = vrot.slane %v632_v39, 2  ;;  %v669_v55 = vrot.slane %v633_v44, 2  ;;  %v191_v58 = vunpack.c.l.bf16 %v171_v40 }
  0x25   : > { %v600_v59 = vsel %vm255_vm0, %v598_v43, %v599_v47  ;;  %v619_v60 = vadd.f32 %v597_v53, %v546_v41  ;;  %v671_v61 = vrot.slane %v634_v48, 2  ;;  %v672_v62 = vrot.slane %v635_v49, 2 }
  0x26   : > { %v620_v8 = vadd.f32 %v600_v59, %v547_v46  ;;  %v670_v9 = vsel %vm329_vm1, %v668_v54, %v669_v55  ;;  %v192_v10 = vunpack.c.l.bf16 %v172_v45  ;;  %v1196_v11 = vunpack.c.l.bf16 %v173_v51 }
  0x27   : > { %v673_v12 = vsel %vm329_vm1, %v671_v61, %v672_v62  ;;  %v692_v13 = vadd.f32 %v670_v9, %v619_v60  ;;  %v1199_v18 = vunpack.c.l.bf16 %v174_v52  ;;  %v1201_v25 = vunpack.c.l.bf16 %v175_v56 }
  0x28   : > { %v693_v26 = vadd.f32 %v673_v12, %v620_v8  ;;  %v1203_v27 = vunpack.c.l.bf16 %v176_v57  ;;  %v1205_v28 = vunpack.c.l.bf16 %v177_v63  ;;  %v1207_v29 = vunpack.c.l.bf16 %v178_v0 }
  0x29   : > { %v704_v30 = vadd.f32 %v1185_v50, %v692_v13  ;;  %v214_v31 = vmul.f32 %v1062_v1, %v191_v58  ;;  %v215_v32 = vmul.f32 %v1062_v1, %v1196_v11  ;;  %v223_v33 = vmul.f32 %v1064_v2, %v191_v58 }
  0x2a   : > { %v705_v34 = vadd.f32 %v1185_v50, %v693_v26  ;;  %v224_v35 = vmul.f32 %v1064_v2, %v192_v10  ;;  %v225_v36 = vmul.f32 %v1064_v2, %v1196_v11  ;;  %v226_v37 = vmul.f32 %v1064_v2, %v1199_v18 }
  0x2b   : > { %v712_v38 = vmax.f32 %v704_v30, 0.0  ;;  %v256_v39 = vrot.slane %v223_v33, 1  ;;  %v297_v40 = vmul.f32 %v1066_v3, %v191_v58  ;;  %v298_v41 = vmul.f32 %v1066_v3, %v192_v10 }
  0x2c   : > { %v713_v42 = vmax.f32 %v705_v34, 0.0  ;;  %v257_v43 = vrot.slane %v224_v35, 1  ;;  %v259_v44 = vrot.slane %v225_v36, 1  ;;  %v260_v45 = vrot.slane %v226_v37, 1 }
  0x2d   : > { %v728_v46 = vrot.slane %v712_v38, 7  ;;  %v299_v47 = vmul.f32 %v1066_v3, %v1196_v11  ;;  %v300_v48 = vmul.f32 %v1066_v3, %v1199_v18  ;;  %v330_v49 = vrot.slane %v297_v40, 2 }
  0x2e   : > { %v729_v51 = vrot.slane %v713_v42, 7  ;;  %v258_v52 = vsel %vm255_vm0, %v256_v39, %v257_v43  ;;  %v261_v53 = vsel %vm255_vm0, %v259_v44, %v260_v45  ;;  %v331_v54 = vrot.slane %v298_v41, 2 }
  0x2f   : > { %v288_v55 = vadd.f32 %v258_v52, %v214_v31  ;;  %v289_v56 = vadd.f32 %v261_v53, %v215_v32  ;;  %v333_v57 = vrot.slane %v299_v47, 2  ;;  %v334_v58 = vrot.slane %v300_v48, 2 }
  0x30   : > { %v1007_v59 = vpack.i.bf16 %v729_v51, %v728_v46  ;;  %v332_v60 = vsel %vm329_vm1, %v330_v49, %v331_v54  ;;  %v371_v61 = vmul.f32 %v1073_v4, %v1196_v11  ;;  %v372_v62 = vmul.f32 %v1073_v4, %v1201_v25 }
  0x31   : > { %v335_v63 = vsel %vm329_vm1, %v333_v57, %v334_v58  ;;  %v362_v0 = vadd.f32 %v332_v60, %v288_v55  ;;  %v388_v8 = vmul.f32 %v1075_v5, %v1196_v11  ;;  %v389_v9 = vmul.f32 %v1075_v5, %v1199_v18 }
  0x32   : > { %1008 = vrot.lane.b32.xlu1 %v1007_v59, %s1027_s24  ;;  %v363_v10 = vadd.f32 %v335_v63, %v289_v56  ;;  %v390_v12 = vmul.f32 %v1075_v5, %v1201_v25  ;;  %v391_v13 = vmul.f32 %v1075_v5, %v1203_v27  ;;  %v461_v26 = vmul.f32 %v1077_v6, %v1196_v11 }
  0x33   : > { %v379_v30 = vadd.f32 %v371_v61, %v362_v0  ;;  %v420_v31 = vrot.slane %v388_v8, 1  ;;  %v421_v32 = vrot.slane %v389_v9, 1  ;;  %v462_v33 = vmul.f32 %v1077_v6, %v1199_v18 }
  0x34   : > { %v380_v34 = vadd.f32 %v372_v62, %v363_v10  ;;  %v423_v35 = vrot.slane %v390_v12, 1  ;;  %v424_v36 = vrot.slane %v391_v13, 1  ;;  %v463_v37 = vmul.f32 %v1077_v6, %v1201_v25  ;;  %v187_v10 = vld [vmem:[%s1071_s19 + $0x40] sm:$0xf]  ;;  %v188_v12 = vld [vmem:[%s1071_s19 + $0x44] sm:$0x1] }
  0x35   : > { %v422_v38 = vsel %vm255_vm0, %v420_v31, %v421_v32  ;;  %v464_v39 = vmul.f32 %v1077_v6, %v1203_v27  ;;  %v493_v40 = vrot.slane %v461_v26, 2  ;;  %v494_v41 = vrot.slane %v462_v33, 2  ;;  %v189_v32 = vld [vmem:[%s1071_s19 + $0x48] sm:$0xf]  ;;  %v1280_v33 = vld [vmem:[%s1071_s19 + $0x4c] sm:$0x1] }
  0x36   : > { %v425_v42 = vsel %vm255_vm0, %v423_v35, %v424_v36  ;;  %v452_v43 = vadd.f32 %v422_v38, %v379_v30  ;;  %v496_v44 = vrot.slane %v463_v37, 2  ;;  %v534_v45 = vmul.f32 %v1079_v7, %v1201_v25 }
  0x37   : > { %v453_v46 = vadd.f32 %v425_v42, %v380_v34  ;;  %v495_v47 = vsel %vm329_vm1, %v493_v40, %v494_v41  ;;  %v497_v48 = vrot.slane %v464_v39, 2  ;;  %v535_v49 = vmul.f32 %v1079_v7, %v1205_v28 }
  0x38   : > { %v525_v51 = vadd.f32 %v495_v47, %v452_v43  ;;  %v551_v52 = vmul.f32 %v1101_v22, %v1201_v25  ;;  %v552_v53 = vmul.f32 %v1101_v22, %v1203_v27  ;;  %v553_v54 = vmul.f32 %v1101_v22, %v1205_v28 }
  0x39   : > { %v498_v55 = vsel %vm329_vm1, %v496_v44, %v497_v48  ;;  %v554_v56 = vmul.f32 %v1101_v22, %v1207_v29  ;;  %v624_v57 = vmul.f32 %v1156_v17, %v1201_v25  ;;  %v625_v58 = vmul.f32 %v1156_v17, %v1203_v27 }
  0x3a   : > { %v526_v59 = vadd.f32 %v498_v55, %v453_v46  ;;  %v542_v60 = vadd.f32 %v534_v45, %v525_v51  ;;  %v583_v61 = vrot.slane %v551_v52, 1  ;;  %v584_v62 = vrot.slane %v552_v53, 1 }
  0x3b   : > { %v586_v63 = vrot.slane %v553_v54, 1  ;;  %v587_v0 = vrot.slane %v554_v56, 1  ;;  %v626_v8 = vmul.f32 %v1156_v17, %v1205_v28  ;;  %v627_v9 = vmul.f32 %v1156_v17, %v1207_v29 }
  0x3c   : > { %v543_v13 = vadd.f32 %v535_v49, %v526_v59  ;;  %v585_v26 = vsel %vm255_vm0, %v583_v61, %v584_v62  ;;  %v656_v30 = vrot.slane %v624_v57, 2  ;;  %v657_v31 = vrot.slane %v625_v58, 2 }
  0x3d   : > { %v588_v34 = vsel %vm255_vm0, %v586_v63, %v587_v0  ;;  %v615_v35 = vadd.f32 %v585_v26, %v542_v60  ;;  %v659_v36 = vrot.slane %v626_v8, 2  ;;  %v660_v37 = vrot.slane %v627_v9, 2 }
  0x3e   : > { %v616_v38 = vadd.f32 %v588_v34, %v543_v13  ;;  %v658_v39 = vsel %vm329_vm1, %v656_v30, %v657_v31  ;;  %v1284_v40 = vunpack.c.l.bf16 %v187_v10  ;;  %v1286_v41 = vunpack.c.l.bf16 %v188_v12 }
  0x3f   : > { %v661_v42 = vsel %vm329_vm1, %v659_v36, %v660_v37  ;;  %v688_v43 = vadd.f32 %v658_v39, %v615_v35  ;;  %v1289_v44 = vunpack.c.l.bf16 %v189_v32  ;;  %v210_v45 = vunpack.c.l.bf16 %v1280_v33 }
  0x40   : > { %v689_v46 = vadd.f32 %v661_v42, %v616_v38  ;;  %v220_v47 = vmul.f32 %v1062_v1, %v1097_v20  ;;  %v221_v48 = vmul.f32 %v1062_v1, %v1103_v23  ;;  %v235_v49 = vmul.f32 %v1064_v2, %v1097_v20 }
  0x41   : > { %v700_v51 = vadd.f32 %v1185_v50, %v688_v43  ;;  %v236_v52 = vmul.f32 %v1064_v2, %v1099_v21  ;;  %v237_v53 = vmul.f32 %v1064_v2, %v1103_v23  ;;  %v238_v54 = vmul.f32 %v1064_v2, %v1105_v24 }
  0x42   : > { %v701_v55 = vadd.f32 %v1185_v50, %v689_v46  ;;  %v274_v56 = vrot.slane %v235_v49, 1  ;;  %v309_v57 = vmul.f32 %v1066_v3, %v1097_v20  ;;  %v310_v58 = vmul.f32 %v1066_v3, %v1099_v21 }
  0x43   : > { %v708_v59 = vmax.f32 %v700_v51, 0.0  ;;  %v275_v60 = vrot.slane %v236_v52, 1  ;;  %v277_v61 = vrot.slane %v237_v53, 1  ;;  %v278_v62 = vrot.slane %v238_v54, 1 }
  0x44   : > { %v709_v63 = vmax.f32 %v701_v55, 0.0  ;;  %v311_v0 = vmul.f32 %v1066_v3, %v1103_v23  ;;  %v312_v8 = vmul.f32 %v1066_v3, %v1105_v24  ;;  %v348_v9 = vrot.slane %v309_v57, 2 }
  0x45   : > { %v724_v10 = vrot.slane %v708_v59, 7  ;;  %v276_v12 = vsel %vm255_vm0, %v274_v56, %v275_v60  ;;  %v279_v13 = vsel %vm255_vm0, %v277_v61, %v278_v62  ;;  %v349_v26 = vrot.slane %v310_v58, 2 }
  0x46   : > { %v725_v30 = vrot.slane %v709_v63, 7  ;;  %v294_v31 = vadd.f32 %v276_v12, %v220_v47  ;;  %v295_v32 = vadd.f32 %v279_v13, %v221_v48  ;;  %v351_v34 = vrot.slane %v311_v0, 2 }
  0x47   : > { %v350_v35 = vsel %vm329_vm1, %v348_v9, %v349_v26  ;;  %v352_v36 = vrot.slane %v312_v8, 2  ;;  %v377_v37 = vmul.f32 %v1073_v4, %v1103_v23  ;;  %v378_v38 = vmul.f32 %v1073_v4, %v1284_v40 }
  0x48   : > { %v997_v39 = vpack.i.bf16 %v725_v30, %v724_v10  ;;  %v368_v42 = vadd.f32 %v350_v35, %v294_v31  ;;  %v400_v43 = vmul.f32 %v1075_v5, %v1103_v23  ;;  %v401_v46 = vmul.f32 %v1075_v5, %v1105_v24 }
  0x49   : > { %v353_v47 = vsel %vm329_vm1, %v351_v34, %v352_v36  ;;  %v402_v48 = vmul.f32 %v1075_v5, %v1284_v40  ;;  %v403_v49 = vmul.f32 %v1075_v5, %v1286_v41  ;;  %v473_v51 = vmul.f32 %v1077_v6, %v1103_v23 }
  0x4a   : > { %998 = vrot.lane.b32.xlu0 %v997_v39, %s1027_s24  ;;  %v369_v52 = vadd.f32 %v353_v47, %v295_v32  ;;  %v385_v53 = vadd.f32 %v377_v37, %v368_v42  ;;  %v438_v54 = vrot.slane %v400_v43, 1  ;;  %v439_v55 = vrot.slane %v401_v46, 1 }
  0x4b   : > { %v441_v56 = vrot.slane %v402_v48, 1  ;;  %v442_v57 = vrot.slane %v403_v49, 1  ;;  %v474_v58 = vmul.f32 %v1077_v6, %v1105_v24  ;;  %v475_v59 = vmul.f32 %v1077_v6, %v1284_v40 }
  0x4c   : > { %v386_v60 = vadd.f32 %v378_v38, %v369_v52  ;;  %v440_v61 = vsel %vm255_vm0, %v438_v54, %v439_v55  ;;  %v476_v62 = vmul.f32 %v1077_v6, %v1286_v41  ;;  %v511_v63 = vrot.slane %v473_v51, 2 }
  0x4d   : > { %v443_v0 = vsel %vm255_vm0, %v441_v56, %v442_v57  ;;  %v458_v8 = vadd.f32 %v440_v61, %v385_v53  ;;  %v512_v9 = vrot.slane %v474_v58, 2  ;;  %v514_v10 = vrot.slane %v475_v59, 2 }
  0x4e   : > { %v459_v12 = vadd.f32 %v443_v0, %v386_v60  ;;  %v515_v13 = vrot.slane %v476_v62, 2  ;;  %v540_v26 = vmul.f32 %v1079_v7, %v1284_v40  ;;  %v541_v30 = vmul.f32 %v1079_v7, %v1289_v44 }
  0x4f   : > { %v513_v31 = vsel %vm329_vm1, %v511_v63, %v512_v9  ;;  %v563_v32 = vmul.f32 %v1101_v22, %v1284_v40  ;;  %v564_v34 = vmul.f32 %v1101_v22, %v1286_v41  ;;  %v565_v35 = vmul.f32 %v1101_v22, %v1289_v44 }
  0x50   : > { %v516_v36 = vsel %vm329_vm1, %v514_v10, %v515_v13  ;;  %v531_v37 = vadd.f32 %v513_v31, %v458_v8  ;;  %v566_v38 = vmul.f32 %v1101_v22, %v210_v45  ;;  %v636_v39 = vmul.f32 %v1156_v17, %v1284_v40 }
  0x51   : > { %v532_v42 = vadd.f32 %v516_v36, %v459_v12  ;;  %v601_v43 = vrot.slane %v563_v32, 1  ;;  %v602_v46 = vrot.slane %v564_v34, 1  ;;  %v604_v47 = vrot.slane %v565_v35, 1 }
  0x52   : > { %v548_v48 = vadd.f32 %v540_v26, %v531_v37  ;;  %v605_v49 = vrot.slane %v566_v38, 1  ;;  %v637_v51 = vmul.f32 %v1156_v17, %v1286_v41  ;;  %v638_v52 = vmul.f32 %v1156_v17, %v1289_v44 }
  0x53   : > { %v549_v53 = vadd.f32 %v541_v30, %v532_v42  ;;  %v603_v54 = vsel %vm255_vm0, %v601_v43, %v602_v46  ;;  %v639_v55 = vmul.f32 %v1156_v17, %v210_v45  ;;  %v674_v56 = vrot.slane %v636_v39, 2 }
  0x54   : > { %v606_v57 = vsel %vm255_vm0, %v604_v47, %v605_v49  ;;  %v621_v58 = vadd.f32 %v603_v54, %v548_v48  ;;  %v675_v59 = vrot.slane %v637_v51, 2  ;;  %v677_v60 = vrot.slane %v638_v52, 2 }
  0x55   : > { %v622_v61 = vadd.f32 %v606_v57, %v549_v53  ;;  %v678_v62 = vrot.slane %v639_v55, 2  ;;  %v216_v63 = vmul.f32 %v1062_v1, %v1201_v25  ;;  %v217_v44 = vmul.f32 %v1062_v1, %v1205_v28 }
  0x56   : > { %v676_v0 = vsel %vm329_vm1, %v674_v56, %v675_v59  ;;  %v227_v33 = vmul.f32 %v1064_v2, %v1201_v25  ;;  %v228_v45 = vmul.f32 %v1064_v2, %v1203_v27  ;;  %v229_v8 = vmul.f32 %v1064_v2, %v1205_v28 }
  0x57   : > { %v679_v9 = vsel %vm329_vm1, %v677_v60, %v678_v62  ;;  %v694_v10 = vadd.f32 %v676_v0, %v621_v58  ;;  %v230_v12 = vmul.f32 %v1064_v2, %v1207_v29  ;;  %v301_v1 = vmul.f32 %v1066_v3, %v1201_v25 }
  0x58   : > { %v695_v13 = vadd.f32 %v679_v9, %v622_v61  ;;  %v262_v26 = vrot.slane %v227_v33, 1  ;;  %v263_v30 = vrot.slane %v228_v45, 1  ;;  %v265_v31 = vrot.slane %v229_v8, 1 }
  0x59   : > { %v706_v32 = vadd.f32 %v1185_v50, %v694_v10  ;;  %v266_v34 = vrot.slane %v230_v12, 1  ;;  %v302_v35 = vmul.f32 %v1066_v3, %v1203_v27  ;;  %v303_v36 = vmul.f32 %v1066_v3, %v1205_v28 }
  0x5a   : > { %v707_v37 = vadd.f32 %v1185_v50, %v695_v13  ;;  %v264_v2 = vsel %vm255_vm0, %v262_v26, %v263_v30  ;;  %v304_v38 = vmul.f32 %v1066_v3, %v1207_v29  ;;  %v336_v39 = vrot.slane %v301_v1, 2 }
  0x5b   : > { %v714_v42 = vmax.f32 %v706_v32, 0.0  ;;  %v267_v43 = vsel %vm255_vm0, %v265_v31, %v266_v34  ;;  %v290_v46 = vadd.f32 %v264_v2, %v216_v63  ;;  %v337_v47 = vrot.slane %v302_v35, 2 }
  0x5c   : > { %v715_v48 = vmax.f32 %v707_v37, 0.0  ;;  %v291_v49 = vadd.f32 %v267_v43, %v217_v44  ;;  %v339_v51 = vrot.slane %v303_v36, 2  ;;  %v340_v52 = vrot.slane %v304_v38, 2 }
  0x5d   : > { %v730_v53 = vrot.slane %v714_v42, 7  ;;  %v338_v54 = vsel %vm329_vm1, %v336_v39, %v337_v47  ;;  %v373_v55 = vmul.f32 %v1073_v4, %v1205_v28  ;;  %v374_v56 = vmul.f32 %v1073_v4, %v1087_v14 }
  0x5e   : > { %v731_v3 = vrot.slane %v715_v48, 7  ;;  %v341_v57 = vsel %vm329_vm1, %v339_v51, %v340_v52  ;;  %v364_v58 = vadd.f32 %v338_v54, %v290_v46  ;;  %v392_v59 = vmul.f32 %v1075_v5, %v1205_v28 }
  0x5f   : > { %v365_v60 = vadd.f32 %v341_v57, %v291_v49  ;;  %v393_v61 = vmul.f32 %v1075_v5, %v1207_v29  ;;  %v394_v62 = vmul.f32 %v1075_v5, %v1087_v14  ;;  %v395_v63 = vmul.f32 %v1075_v5, %v1089_v15 }
  0x60   : > { %v1012_v44 = vpack.i.bf16 %v731_v3, %v730_v53  ;;  %v381_v0 = vadd.f32 %v373_v55, %v364_v58  ;;  %v426_v4 = vrot.slane %v392_v59, 1  ;;  %v465_v33 = vmul.f32 %v1077_v6, %v1205_v28 }
  0x61   : > { %v382_v45 = vadd.f32 %v374_v56, %v365_v60  ;;  %v427_v8 = vrot.slane %v393_v61, 1  ;;  %v429_v9 = vrot.slane %v394_v62, 1  ;;  %v430_v10 = vrot.slane %v395_v63, 1 }
  0x62   : > { %1013 = vrot.lane.b32.xlu1 %v1012_v44, %s1027_s24  ;;  %v466_v12 = vmul.f32 %v1077_v6, %v1207_v29  ;;  %v467_v1 = vmul.f32 %v1077_v6, %v1087_v14  ;;  %v468_v5 = vmul.f32 %v1077_v6, %v1089_v15  ;;  %v499_v13 = vrot.slane %v465_v33, 2 }
  0x63   : > { %v428_v26 = vsel %vm255_vm0, %v426_v4, %v427_v8  ;;  %v431_v30 = vsel %vm255_vm0, %v429_v9, %v430_v10  ;;  %v536_v31 = vmul.f32 %v1079_v7, %v1087_v14  ;;  %v537_v32 = vmul.f32 %v1079_v7, %v1091_v16 }
  0x64   : > { %v454_v34 = vadd.f32 %v428_v26, %v381_v0  ;;  %v455_v35 = vadd.f32 %v431_v30, %v382_v45  ;;  %v500_v36 = vrot.slane %v466_v12, 2  ;;  %v502_v37 = vrot.slane %v467_v1, 2 }
  0x65   : > { %v503_v2 = vrot.slane %v468_v5, 2  ;;  %v555_v38 = vmul.f32 %v1101_v22, %v1087_v14  ;;  %v556_v6 = vmul.f32 %v1101_v22, %v1089_v15  ;;  %v557_v39 = vmul.f32 %v1101_v22, %v1091_v16 }
  0x66   : > { %v501_v42 = vsel %vm329_vm1, %v499_v13, %v500_v36  ;;  %v558_v43 = vmul.f32 %v1101_v22, %v1095_v19  ;;  %v628_v7 = vmul.f32 %v1156_v17, %v1087_v14  ;;  %v629_v46 = vmul.f32 %v1156_v17, %v1089_v15 }
  0x67   : > { %v504_v47 = vsel %vm329_vm1, %v502_v37, %v503_v2  ;;  %v527_v48 = vadd.f32 %v501_v42, %v454_v34  ;;  %v589_v49 = vrot.slane %v555_v38, 1  ;;  %v590_v51 = vrot.slane %v556_v6, 1 }
  0x68   : > { %v528_v52 = vadd.f32 %v504_v47, %v455_v35  ;;  %v592_v53 = vrot.slane %v557_v39, 1  ;;  %v593_v54 = vrot.slane %v558_v43, 1  ;;  %v630_v55 = vmul.f32 %v1156_v17, %v1091_v16 }
  0x69   : > { %v544_v56 = vadd.f32 %v536_v31, %v527_v48  ;;  %v591_v22 = vsel %vm255_vm0, %v589_v49, %v590_v51  ;;  %v631_v3 = vmul.f32 %v1156_v17, %v1095_v19  ;;  %v662_v57 = vrot.slane %v628_v7, 2 }
  0x6a   : > { %v545_v58 = vadd.f32 %v537_v32, %v528_v52  ;;  %v594_v59 = vsel %vm255_vm0, %v592_v53, %v593_v54  ;;  %v663_v60 = vrot.slane %v629_v46, 2  ;;  %v665_v61 = vrot.slane %v630_v55, 2 }
  0x6b   : > { %v617_v62 = vadd.f32 %v591_v22, %v544_v56  ;;  %v666_v63 = vrot.slane %v631_v3, 2 }
  0x6c   : > { %v618_v44 = vadd.f32 %v594_v59, %v545_v58  ;;  %v664_v0 = vsel %vm329_vm1, %v662_v57, %v663_v60 }
  0x6d   : > { %v667_v4 = vsel %vm329_vm1, %v665_v61, %v666_v63  ;;  %v690_v33 = vadd.f32 %v664_v0, %v617_v62 }
  0x6e   : > { %v691_v45 = vadd.f32 %v667_v4, %v618_v44 }
  0x6f   : > { %v702_v8 = vadd.f32 %v1185_v50, %v690_v33 }
  0x70   : > { %v703_v9 = vadd.f32 %v1185_v50, %v691_v45 }
  0x71   : > { %v710_v17 = vmax.f32 %v702_v8, 0.0 }
  0x72   : > { %v711_v10 = vmax.f32 %v703_v9, 0.0 }
  0x73   : > { %v726_v12 = vrot.slane %v710_v17, 7 }
  0x74   : > { %v727_v1 = vrot.slane %v711_v10, 7 }
  0x76   : > { %v1002_v5 = vpack.i.bf16 %v727_v1, %v726_v12 }
  0x78   : > { %1003 = vrot.lane.b32.xlu0 %v1002_v5, %s1027_s24 }
  0xa4   : > { %v1009_v13 = vpop.permute.xlu1 %1008 }
  0xa5   : > { %v1011_v30 = vunpack.i.h.bf16 %v1009_v13  ;;  %v1010_v31 = vunpack.i.l.bf16 %v1009_v13 }
  0xa7   : > { %v767_v35 = vsel %vm756_vm2, %v1097_v20, %v1011_v30  ;;  %v768_v50 = vsel %vm756_vm2, %v1099_v21, %v1011_v30  ;;  %v765_v36 = vsel %vm756_vm2, %v1091_v16, %v1010_v31  ;;  %v766_v37 = vsel %vm756_vm2, %v1095_v19, %v1010_v31 }
  0xa8   : > { %v783_v2 = vpack.c.bf16 %v767_v35, %v767_v35  ;;  %v784_v38 = vpack.c.bf16 %v768_v50, %v768_v50  ;;  %v781_v6 = vpack.c.bf16 %v765_v36, %v765_v36  ;;  %v782_v39 = vpack.c.bf16 %v766_v37, %v766_v37 }
  0xaa   : > { %v863_v20 = vshrl.u32 %v783_v2, 16  ;;  %v866_v7 = vshll.u32 %v783_v2, 16  ;;  %v872_v21 = vshll.u32 %v784_v38, 16  ;;  %v849_v46 = vshrl.u32 %v781_v6, 16 }
  0xab   : > { %v852_v47 = vshll.u32 %v781_v6, 16  ;;  %v858_v16 = vshll.u32 %v782_v39, 16 }
  0xac   : > { %v865_v49 = vrot.slane %v863_v20, 4  ;;  %v868_v52 = vrot.slane %v866_v7, 5  ;;  %v874_v54 = vrot.slane %v872_v21, 5 }
  0xad   : > { %v854_v53 = vrot.slane %v852_v47, 5  ;;  %v860_v57 = vrot.slane %v858_v16, 5 }
  0xae   : > { %v869_v22 = vor.u32 %v868_v52, %v865_v49 }
  0xb0   : > { %v870_v62 = vrot.slane %v869_v22, 4 }
  0xb2   : > { %v875_v33 = vsel %vm1465_vm6, %v870_v62, %v874_v54 }
  0xb3   : > { %918 = vst.msk [vmem:[%s1472_s28 + $0x14] sm:$0xf] %vm912_vm5, %v875_v33 }
  0xbc   : > { %v999_v26 = vpop.permute.xlu0 %998 }
  0xbd   : > { %v1001_v32 = vunpack.i.h.bf16 %v999_v26  ;;  %v1000_v34 = vunpack.i.l.bf16 %v999_v26 }
  0xbf   : > { %v759_v42 = vsel %vm756_vm2, %v1201_v25, %v1001_v32  ;;  %v760_v43 = vsel %vm756_vm2, %v1203_v27, %v1001_v32  ;;  %v757_v19 = vsel %vm756_vm2, %v1196_v11, %v1000_v34  ;;  %v758_v25 = vsel %vm756_vm2, %v1199_v18, %v1000_v34 }
  0xc0   : > { %v775_v48 = vpack.c.bf16 %v759_v42, %v759_v42  ;;  %v776_v51 = vpack.c.bf16 %v760_v43, %v760_v43  ;;  %v851_v27 = vrot.slane %v849_v46, 4  ;;  %v773_v58 = vpack.c.bf16 %v757_v19, %v757_v19 }
  0xc1   : > { %v774_v61 = vpack.c.bf16 %v758_v25, %v758_v25 }
  0xc2   : > { %v807_v55 = vshrl.u32 %v775_v48, 16  ;;  %v810_v56 = vshll.u32 %v775_v48, 16  ;;  %v855_v3 = vor.u32 %v854_v53, %v851_v27  ;;  %v816_v60 = vshll.u32 %v776_v51, 16 }
  0xc3   : > { %v793_v44 = vshrl.u32 %v773_v58, 16  ;;  %v796_v0 = vshll.u32 %v773_v58, 16  ;;  %v802_v12 = vshll.u32 %v774_v61, 16 }
  0xc4   : > { %v809_v59 = vrot.slane %v807_v55, 4  ;;  %v812_v18 = vrot.slane %v810_v56, 5  ;;  %v856_v63 = vrot.slane %v855_v3, 4  ;;  %v818_v10 = vrot.slane %v816_v60, 5 }
  0xc5   : > { %v795_v8 = vrot.slane %v793_v44, 4  ;;  %v798_v9 = vrot.slane %v796_v0, 5  ;;  %v804_v32 = vrot.slane %v802_v12, 5 }
  0xc6   : > { %v813_v4 = vor.u32 %v812_v18, %v809_v59  ;;  %v861_v45 = vsel %vm1465_vm6, %v856_v63, %v860_v57 }
  0xc7   : > { %917 = vst.msk [vmem:[%s1472_s28 + $0x10] sm:$0xf] %vm912_vm5, %v861_v45  ;;  %v799_v1 = vor.u32 %v798_v9, %v795_v8 }
  0xc8   : > { %v814_v17 = vrot.slane %v813_v4, 4 }
  0xc9   : > { %v800_v31 = vrot.slane %v799_v1, 4 }
  0xca   : > { %v819_v13 = vsel %vm1465_vm6, %v814_v17, %v818_v10 }
  0xcb   : > { %914 = vst.msk [vmem:[%s1472_s28 + $0x4] sm:$0xf] %vm912_vm5, %v819_v13  ;;  %v805_v39 = vsel %vm1465_vm6, %v800_v31, %v804_v32 }
  0xcc   : > { %913 = vst.msk [vmem:[%s1472_s28] sm:$0xf] %vm912_vm5, %v805_v39 }
  0xd4   : > { %v1014_v5 = vpop.permute.xlu1 %1013 }
  0xd5   : > { %v1016_v26 = vunpack.i.h.bf16 %v1014_v5  ;;  %v1015_v30 = vunpack.i.l.bf16 %v1014_v5 }
  0xd7   : > { %v771_v34 = vsel %vm756_vm2, %v1284_v40, %v1016_v26  ;;  %v772_v35 = vsel %vm756_vm2, %v1286_v41, %v1016_v26  ;;  %v769_v50 = vsel %vm756_vm2, %v1103_v23, %v1015_v30  ;;  %v770_v36 = vsel %vm756_vm2, %v1105_v24, %v1015_v30 }
  0xd8   : > { %v787_v37 = vpack.c.bf16 %v771_v34, %v771_v34  ;;  %v788_v2 = vpack.c.bf16 %v772_v35, %v772_v35  ;;  %v785_v38 = vpack.c.bf16 %v769_v50, %v769_v50  ;;  %v786_v6 = vpack.c.bf16 %v770_v36, %v770_v36 }
  0xda   : > { %v891_v42 = vshrl.u32 %v787_v37, 16  ;;  %v894_v43 = vshll.u32 %v787_v37, 16  ;;  %v877_v20 = vshrl.u32 %v785_v38, 16  ;;  %v880_v40 = vshll.u32 %v785_v38, 16 }
  0xdb   : > { %v900_v7 = vshll.u32 %v788_v2, 16  ;;  %v886_v46 = vshll.u32 %v786_v6, 16 }
  0xdc   : > { %v893_v41 = vrot.slane %v891_v42, 4  ;;  %v896_v23 = vrot.slane %v894_v43, 5  ;;  %v879_v21 = vrot.slane %v877_v20, 4  ;;  %v882_v24 = vrot.slane %v880_v40, 5 }
  0xdd   : > { %v902_v19 = vrot.slane %v900_v7, 5  ;;  %v888_v51 = vrot.slane %v886_v46, 5 }
  0xde   : > { %v897_v47 = vor.u32 %v896_v23, %v893_v41  ;;  %v883_v16 = vor.u32 %v882_v24, %v879_v21 }
  0xe0   : > { %v898_v48 = vrot.slane %v897_v47, 4  ;;  %v884_v49 = vrot.slane %v883_v16, 4 }
  0xe2   : > { %v903_v25 = vsel %vm1465_vm6, %v898_v48, %v902_v19  ;;  %v889_v52 = vsel %vm1465_vm6, %v884_v49, %v888_v51 }
  0xe3   : > { %920 = vst.msk [vmem:[%s1472_s28 + $0x1c] sm:$0xf] %vm912_vm5, %v903_v25 }
  0xe4   : > { %919 = vst.msk [vmem:[%s1472_s28 + $0x18] sm:$0xf] %vm912_vm5, %v889_v52 }
  0xea   : > { %v1004_v27 = vpop.permute.xlu0 %1003 }
  0xeb   : > { %v1006_v53 = vunpack.i.h.bf16 %v1004_v27  ;;  %v1005_v54 = vunpack.i.l.bf16 %v1004_v27 }
  0xed   : > { %v763_v55 = vsel %vm756_vm2, %v1087_v14, %v1006_v53  ;;  %v764_v56 = vsel %vm756_vm2, %v1089_v15, %v1006_v53  ;;  %v761_v22 = vsel %vm756_vm2, %v1205_v28, %v1005_v54  ;;  %v762_v3 = vsel %vm756_vm2, %v1207_v29, %v1005_v54 }
  0xee   : > { %v779_v57 = vpack.c.bf16 %v763_v55, %v763_v55  ;;  %v780_v58 = vpack.c.bf16 %v764_v56, %v764_v56  ;;  %v777_v59 = vpack.c.bf16 %v761_v22, %v761_v22  ;;  %v778_v18 = vpack.c.bf16 %v762_v3, %v762_v3 }
  0xf0   : > { %v835_v60 = vshrl.u32 %v779_v57, 16  ;;  %v838_v61 = vshll.u32 %v779_v57, 16  ;;  %v821_v62 = vshrl.u32 %v777_v59, 16  ;;  %v824_v63 = vshll.u32 %v777_v59, 16 }
  0xf1   : > { %v844_v0 = vshll.u32 %v780_v58, 16  ;;  %v830_v33 = vshll.u32 %v778_v18, 16 }
  0xf2   : > { %v837_v14 = vrot.slane %v835_v60, 4  ;;  %v840_v44 = vrot.slane %v838_v61, 5  ;;  %v823_v15 = vrot.slane %v821_v62, 4  ;;  %v826_v4 = vrot.slane %v824_v63, 5 }
  0xf3   : > { %v846_v29 = vrot.slane %v844_v0, 5  ;;  %v832_v17 = vrot.slane %v830_v33, 5 }
  0xf4   : > { %v841_v28 = vor.u32 %v840_v44, %v837_v14  ;;  %v827_v45 = vor.u32 %v826_v4, %v823_v15 }
  0xf6   : > { %v842_v8 = vrot.slane %v841_v28, 4  ;;  %v828_v9 = vrot.slane %v827_v45, 4 }
  0xf8   : > { %v847_v10 = vsel %vm1465_vm6, %v842_v8, %v846_v29  ;;  %v833_v12 = vsel %vm1465_vm6, %v828_v9, %v832_v17 }
  0xf9   : > { %916 = vst.msk [vmem:[%s1472_s28 + $0xc] sm:$0xf] %vm912_vm5, %v847_v10 }
  0xfa   : > { %915 = vst.msk [vmem:[%s1472_s28 + $0x8] sm:$0xf] %vm912_vm5, %v833_v12 }
  0xfb PF: > { %s13_s12 = sadd.s32 1, %s1025_s12  }
  0xfc   : > { %p10_p4 = scmp.ge.s32.totalorder %s13_s12, 4  }
  0xfe   :  { %12 = sbr.rel (!%p10_p4) target bundleno = 1 (0x1), region = 62 }

// kernel: _lambda_.25
= control target key start
LH: loop header
LB: loop body
LE: loop exit
PB: predicated region body
PF: predicated region fallthrough
CT: control target
= control target key end

     0   :  { %s408_s12 = smov 0   ;;  %s439_s0 = inlined_call_operand.vmem [shape: bf16[2,64,16], index: 0, kind: input, shape index: {}]   ;;  %s440_s1 = inlined_call_operand.vmem [shape: bf16[16,8], index: 1, kind: input, shape index: {}]   ;;  %s441_s2 = inlined_call_operand.vmem [shape: f32[1,8], index: 2, kind: input, shape index: {}]   ;;  %s442_s3 = inlined_call_operand.vmem [shape: bf16[2,64,8], index: 3, kind: output, shape index: {}]  }
   0x1 LB: > { %s326_s13 = sadd.s32 4294967295, %s386_s12   ;;  %p330_p0 = scmp.ge.s32.totalorder %s386_s12, 1  ;;  %s386_s12 = sphi %s408_s12, %s13_s12  }
   0x2   : > { %p137_p1 = scmp.lt.s32.totalorder %s386_s12, 3 }
   0x4   : > { %p138_p2 = pnand %p330_p0, %p137_p1 }
   0x5   : > { %p161_p3 = scmp.lt.s32.totalorder (!%p138_p2), %s326_s13, 1 }
   0x6   : > { %141 = sbr.rel (%p138_p2) target bundleno = 162 (0xa2), region = 32 }
   0xb   : > { %v367_v0 = vld [vmem:[%s440_s1] sm:$0xff]  ;;  %s444_s13 = smov (!%p161_p3, %s326_s13), 1  ;;  %vm212_vm0 = vcmask 130048   ;;  %vm262_vm1 = vcmask 60416  }
   0xc   : > { %232 = vmatpush.bf16.msra.mxu0 %v367_v0  ;;  %368 = vmatpush.bf16.msra.mxu1 %v367_v0  ;;  %s361_s16 = sshll.u32 %s444_s13, 5  ;;  %v379_v5 = vld [vmem:[%s441_s2] ss:$0 sm:$0xff] }
   0xd   : > { %369 = vmatpush.bf16.msra.mxu2 %v367_v0  ;;  %370 = vmatpush.bf16.msra.mxu3 %v367_v0  ;;  %s165_s19 = scalar_lea.vmem %s439_s0, %s361_s16  ;;  %s170_s24 = scalar_lea.vmem %s442_s3, %s361_s16 }
   0xe   : > { %v363_v1 = vld [vmem:[%s165_s19] sm:$0xff]  ;;  %v364_v2 = vld [vmem:[%s165_s19 + $0x8] sm:$0xff]  ;;  %v365_v3 = vld [vmem:[%s165_s19 + $0x10] sm:$0xff] }
   0xf   : > { %v366_v4 = vld [vmem:[%s165_s19 + $0x18] sm:$0xff]  ;;  %355 = vmatmul.msk.bf16.vlgmr.msra.gmra.mxu0 %vm212_vm0, %v363_v1  ;;  %356 = vmatmul.msk.bf16.vlgmr.msra.gmra.mxu1 %vm212_vm0, %v364_v2 }
  0x10   : > { %357 = vmatmul.msk.bf16.vlgmr.msra.gmra.mxu2 %vm212_vm0, %v365_v3  ;;  %358 = vmatmul.msk.bf16.vlgmr.msra.gmra.mxu3 %vm212_vm0, %v366_v4 }
  0x8c   : > { %v234_v6 = vpop.f32.mrf.mxu0  ;;  %v239_v7 = vpop.f32.mrf.mxu1 }
  0x8d   : > { %v235_v8 = vadd.f32 %v379_v5, %v234_v6  ;;  %v240_v9 = vadd.f32 %v379_v5, %v239_v7 }
  0x8f   : > { %v254_v10 = vpack.c.bf16 %v235_v8, %v235_v8  ;;  %v256_v11 = vpack.c.bf16 %v240_v9, %v240_v9 }
  0x91   : > { %263 = vst.msk [vmem:[%s170_s24] sm:$0xf] %vm262_vm1, %v254_v10 }
  0x92   : > { %265 = vst.msk [vmem:[%s170_s24 + $0x8] sm:$0xf] %vm262_vm1, %v256_v11 }
  0x93   : > { %v244_v12 = vpop.f32.mrf.mxu2  ;;  %v249_v13 = vpop.f32.mrf.mxu3 }
  0x94   : > { %v245_v14 = vadd.f32 %v379_v5, %v244_v12  ;;  %v250_v15 = vadd.f32 %v379_v5, %v249_v13  ;;  %v236_v16 = vpop.f32.mrf.mxu0  ;;  %v241_v17 = vpop.f32.mrf.mxu1 }
  0x95   : > { %v237_v18 = vadd.f32 %v379_v5, %v236_v16  ;;  %v242_v19 = vadd.f32 %v379_v5, %v241_v17 }
  0x96   : > { %v258_v20 = vpack.c.bf16 %v245_v14, %v245_v14  ;;  %v260_v21 = vpack.c.bf16 %v250_v15, %v250_v15 }
  0x97   : > { %v255_v22 = vpack.c.bf16 %v237_v18, %v237_v18  ;;  %v257_v23 = vpack.c.bf16 %v242_v19, %v242_v19 }
  0x98   : > { %267 = vst.msk [vmem:[%s170_s24 + $0x10] sm:$0xf] %vm262_vm1, %v258_v20 }
  0x99   : > { %269 = vst.msk [vmem:[%s170_s24 + $0x18] sm:$0xf] %vm262_vm1, %v260_v21 }
  0x9a   : > { %264 = vst.msk [vmem:[%s170_s24 + $0x4] sm:$0xf] %vm262_vm1, %v255_v22 }
  0x9b   : > { %266 = vst.msk [vmem:[%s170_s24 + $0xc] sm:$0xf] %vm262_vm1, %v257_v23  ;;  %v246_v24 = vpop.f32.mrf.mxu2  ;;  %v251_v25 = vpop.f32.mrf.mxu3 }
  0x9c   : > { %v247_v26 = vadd.f32 %v379_v5, %v246_v24  ;;  %v252_v27 = vadd.f32 %v379_v5, %v251_v25 }
  0x9e   : > { %v259_v28 = vpack.c.bf16 %v247_v26, %v247_v26  ;;  %v261_v29 = vpack.c.bf16 %v252_v27, %v252_v27 }
  0xa0   : > { %268 = vst.msk [vmem:[%s170_s24 + $0x14] sm:$0xf] %vm262_vm1, %v259_v28 }
  0xa1   : > { %270 = vst.msk [vmem:[%s170_s24 + $0x1c] sm:$0xf] %vm262_vm1, %v261_v29 }
  0xa2 PF: > { %s13_s12 = sadd.s32 1, %s386_s12  }
  0xa3   : > { %p10_p4 = scmp.ge.s32.totalorder %s13_s12, 4  }
  0xa5   :  { %12 = sbr.rel (!%p10_p4) target bundleno = 1 (0x1), region = 62 }

// kernel: _lambda_.26
= control target key start
LH: loop header
LB: loop body
LE: loop exit
PB: predicated region body
PF: predicated region fallthrough
CT: control target
= control target key end

     0   :  { %s1162_s15 = smov 0   ;;  %s1643_s0 = inlined_call_operand.vmem [shape: bf16[2,10,10,8], index: 0, kind: input, shape index: {}]   ;;  %s1644_s1 = inlined_call_operand.vmem [shape: f32[9,8], index: 1, kind: input, shape index: {}]   ;;  %s1645_s2 = inlined_call_operand.vmem [shape: f32[1,8], index: 2, kind: input, shape index: {}]   ;;  %s1646_s3 = inlined_call_operand.vmem [shape: bf16[2,8,8,16], index: 3, kind: input, shape index: {}]   ;;  %s1647_s4 = inlined_call_operand.vmem [shape: bf16[2,8,8,16], index: 4, kind: output, shape index: {}]  }
   0x1 LB: > { %s1083_s16 = sadd.s32 4294967295, %s1134_s15   ;;  %p1087_p0 = scmp.ge.s32.totalorder %s1134_s15, 1  ;;  %s1134_s15 = sphi %s1162_s15, %s14_s15  }
   0x2   : > { %p172_p1 = scmp.lt.s32.totalorder %s1134_s15, 3 }
   0x4   : > { %p173_p2 = pnand %p1087_p0, %p172_p1 }
   0x5   : > { %p203_p3 = scmp.lt.s32.totalorder (!%p173_p2), %s1083_s16, 1  ;;  %s1136_s27 = smov (!%p173_p2), 8  }
   0x6   : > { %176 = sbr.rel (%p173_p2) target bundleno = 230 (0xe6), region = 36 }
   0xb   : > { %s1651_s16 = smov (!%p203_p3, %s1083_s16), 1  ;;  %v258_v0 = vld [vmem:[%s1644_s1] sm:$0xff]  ;;  %vm302_vm0 = vcmask 1046528   ;;  %vm376_vm1 = vcmask 1045504   ;;  %v1236_v33 = vld [vmem:[%s1644_s1 + $0x8] ss:$0 sm:$0xff] }
   0xc   : > { %s1116_s19 = smul.u32 80, %s1651_s16  ;;  %v1176_v1 = vperm.slane %v258_v0, 0  ;;  %v1178_v2 = vperm.slane %v258_v0, 1  ;;  %v1180_v3 = vperm.slane %v258_v0, 2  ;;  %v1187_v4 = vperm.slane %v258_v0, 3  ;;  %s1095_s28 = sshll.u32 %s1651_s16, 5 }
   0xd   : > { %v1189_v5 = vperm.slane %v258_v0, 4  ;;  %v1191_v6 = vperm.slane %v258_v0, 5  ;;  %v1193_v7 = vperm.slane %v258_v0, 6  ;;  %v1213_v20 = vperm.slane %v258_v0, 7  ;;  %s1559_s5 = scalar_lea.vmem %s1646_s3, %s1095_s28  ;;  %s1580_s8 = scalar_lea.vmem %s1647_s4, %s1095_s28 }
   0xe   : > { %s1185_s22 = scalar_lea.vmem %s1643_s0, %s1116_s19  ;;  %vm795_vm2 = vcmask 64512   ;;  %vm884_vm3 = vsmask.f32 3328  ;;  %vm885_vm4 = vsmask.f32 7440  ;;  %vm1007_vm6 = vcmask 125952  }
   0xf   : > { %v222_v8 = vld [vmem:[%s1185_s22 + $0x10] sm:$0xf]  ;;  %v223_v9 = vld [vmem:[%s1185_s22 + $0x14] sm:$0x1]  ;;  %v224_v10 = vld [vmem:[%s1185_s22 + $0x18] sm:$0xf] }
  0x10   : > { %v225_v11 = vld [vmem:[%s1185_s22 + $0x1c] sm:$0x1]  ;;  %v226_v12 = vld [vmem:[%s1185_s22 + $0x20] sm:$0xf]  ;;  %v227_v13 = vld [vmem:[%s1185_s22 + $0x24] sm:$0x1]  ;;  %v1201_v14 = vunpack.c.l.bf16 %v222_v8  ;;  %v1203_v15 = vunpack.c.l.bf16 %v223_v9  ;;  %v1205_v16 = vunpack.c.l.bf16 %v224_v10 }
  0x11   : > { %v1207_v17 = vunpack.c.l.bf16 %v225_v11  ;;  %v1209_v18 = vunpack.c.l.bf16 %v226_v12  ;;  %v1211_v19 = vunpack.c.l.bf16 %v227_v13  ;;  %v218_v42 = vld [vmem:[%s1185_s22] sm:$0xf]  ;;  %v219_v43 = vld [vmem:[%s1185_s22 + $0x4] sm:$0x1]  ;;  %v220_v48 = vld [vmem:[%s1185_s22 + $0x8] sm:$0xf] }
  0x12   : > { %v263_v21 = vmul.f32 %v1176_v1, %v1201_v14  ;;  %v274_v22 = vmul.f32 %v1178_v2, %v1201_v14  ;;  %v275_v23 = vmul.f32 %v1178_v2, %v1203_v15  ;;  %v348_v24 = vmul.f32 %v1180_v3, %v1201_v14  ;;  %v221_v53 = vld [vmem:[%s1185_s22 + $0xc] sm:$0x1]  ;;  %vm1567_vm5 = vmor %vm884_vm3, %vm885_vm4 }
  0x13   : > { %v349_v25 = vmul.f32 %v1180_v3, %v1203_v15  ;;  %v420_v26 = vmul.f32 %v1187_v4, %v1205_v16  ;;  %v439_v27 = vmul.f32 %v1189_v5, %v1205_v16  ;;  %v440_v28 = vmul.f32 %v1189_v5, %v1207_v17 }
  0x14   : > { %v309_v29 = vrot.slane %v274_v22, 1  ;;  %v310_v30 = vrot.slane %v275_v23, 1  ;;  %v383_v31 = vrot.slane %v348_v24, 2  ;;  %v512_v32 = vmul.f32 %v1191_v6, %v1205_v16 }
  0x15   : > { %v384_v34 = vrot.slane %v349_v25, 2  ;;  %v473_v35 = vrot.slane %v439_v27, 1  ;;  %v474_v36 = vrot.slane %v440_v28, 1  ;;  %v513_v37 = vmul.f32 %v1191_v6, %v1207_v17 }
  0x16   : > { %v311_v38 = vsel %vm302_vm0, %v309_v29, %v310_v30  ;;  %v546_v39 = vrot.slane %v512_v32, 2  ;;  %v583_v40 = vmul.f32 %v1193_v7, %v1209_v18  ;;  %v602_v41 = vmul.f32 %v1213_v20, %v1209_v18 }
  0x17   : > { %v337_v44 = vadd.f32 %v311_v38, %v263_v21  ;;  %v385_v45 = vsel %vm376_vm1, %v383_v31, %v384_v34  ;;  %v475_v46 = vsel %vm302_vm0, %v473_v35, %v474_v36  ;;  %v547_v47 = vrot.slane %v513_v37, 2 }
  0x18   : > { %v603_v49 = vmul.f32 %v1213_v20, %v1211_v19  ;;  %v636_v50 = vrot.slane %v602_v41, 1  ;;  %v675_v51 = vmul.f32 %v1236_v33, %v1209_v18  ;;  %v676_v52 = vmul.f32 %v1236_v33, %v1211_v19 }
  0x19   : > { %v411_v54 = vadd.f32 %v385_v45, %v337_v44  ;;  %v548_v55 = vsel %vm376_vm1, %v546_v39, %v547_v47  ;;  %v238_v56 = vunpack.c.l.bf16 %v218_v42  ;;  %v239_v57 = vunpack.c.l.bf16 %v219_v43  ;;  %v228_v42 = vld [vmem:[%s1185_s22 + $0x28] sm:$0xf] }
  0x1a   : > { %v637_v58 = vrot.slane %v603_v49, 1  ;;  %v709_v59 = vrot.slane %v675_v51, 2  ;;  %v710_v60 = vrot.slane %v676_v52, 2  ;;  %v1258_v61 = vunpack.c.l.bf16 %v220_v48  ;;  %v1292_v48 = vld [vmem:[%s1645_s2] ss:$0 sm:$0xff] }
  0x1b   : > { %v428_v62 = vadd.f32 %v420_v26, %v411_v54  ;;  %v1260_v63 = vunpack.c.l.bf16 %v221_v53  ;;  %v261_v0 = vmul.f32 %v1176_v1, %v238_v56  ;;  %v270_v8 = vmul.f32 %v1178_v2, %v238_v56  ;;  %v229_v51 = vld [vmem:[%s1185_s22 + $0x2c] sm:$0x1] }
  0x1c   : > { %v638_v9 = vsel %vm302_vm0, %v636_v50, %v637_v58  ;;  %v711_v10 = vsel %vm376_vm1, %v709_v59, %v710_v60  ;;  %v271_v11 = vmul.f32 %v1178_v2, %v239_v57  ;;  %v344_v12 = vmul.f32 %v1180_v3, %v238_v56 }
  0x1d   : > { %v501_v13 = vadd.f32 %v475_v46, %v428_v62  ;;  %v303_v21 = vrot.slane %v270_v8, 1  ;;  %v345_v22 = vmul.f32 %v1180_v3, %v239_v57  ;;  %v418_v23 = vmul.f32 %v1187_v4, %v1258_v61 }
  0x1e   : > { %v304_v24 = vrot.slane %v271_v11, 1  ;;  %v377_v25 = vrot.slane %v344_v12, 2  ;;  %v435_v26 = vmul.f32 %v1189_v5, %v1258_v61  ;;  %v436_v27 = vmul.f32 %v1189_v5, %v1260_v63 }
  0x1f   : > { %v574_v28 = vadd.f32 %v548_v55, %v501_v13  ;;  %v378_v29 = vrot.slane %v345_v22, 2  ;;  %v508_v30 = vmul.f32 %v1191_v6, %v1258_v61  ;;  %v509_v31 = vmul.f32 %v1191_v6, %v1260_v63 }
  0x20   : > { %v305_v32 = vsel %vm302_vm0, %v303_v21, %v304_v24  ;;  %v467_v34 = vrot.slane %v435_v26, 1  ;;  %v468_v35 = vrot.slane %v436_v27, 1  ;;  %v581_v36 = vmul.f32 %v1193_v7, %v1201_v14 }
  0x21   : > { %v591_v37 = vadd.f32 %v583_v40, %v574_v28  ;;  %v335_v38 = vadd.f32 %v305_v32, %v261_v0  ;;  %v379_v39 = vsel %vm376_vm1, %v377_v25, %v378_v29  ;;  %v540_v41 = vrot.slane %v508_v30, 2 }
  0x22   : > { %v469_v43 = vsel %vm302_vm0, %v467_v34, %v468_v35  ;;  %v541_v44 = vrot.slane %v509_v31, 2  ;;  %v598_v45 = vmul.f32 %v1213_v20, %v1201_v14  ;;  %v599_v46 = vmul.f32 %v1213_v20, %v1203_v15 }
  0x23   : > { %v664_v47 = vadd.f32 %v638_v9, %v591_v37  ;;  %v409_v40 = vadd.f32 %v379_v39, %v335_v38  ;;  %v671_v49 = vmul.f32 %v1236_v33, %v1201_v14  ;;  %v672_v50 = vmul.f32 %v1236_v33, %v1203_v15 }
  0x24   : > { %v542_v52 = vsel %vm376_vm1, %v540_v41, %v541_v44  ;;  %v630_v53 = vrot.slane %v598_v45, 1  ;;  %v631_v54 = vrot.slane %v599_v46, 1  ;;  %v1300_v55 = vunpack.c.l.bf16 %v228_v42 }
  0x25   : > { %v737_v56 = vadd.f32 %v711_v10, %v664_v47  ;;  %v426_v57 = vadd.f32 %v418_v23, %v409_v40  ;;  %v703_v58 = vrot.slane %v671_v49, 2  ;;  %v704_v59 = vrot.slane %v672_v50, 2 }
  0x26   : > { %v632_v60 = vsel %vm302_vm0, %v630_v53, %v631_v54  ;;  %v1303_v62 = vunpack.c.l.bf16 %v229_v51  ;;  %v264_v0 = vmul.f32 %v1176_v1, %v1205_v16  ;;  %v276_v8 = vmul.f32 %v1178_v2, %v1205_v16 }
  0x27   : > { %v749_v9 = vadd.f32 %v1292_v48, %v737_v56  ;;  %v499_v11 = vadd.f32 %v469_v43, %v426_v57  ;;  %v705_v12 = vsel %vm376_vm1, %v703_v58, %v704_v59  ;;  %v277_v10 = vmul.f32 %v1178_v2, %v1207_v17 }
  0x28   : > { %v312_v13 = vrot.slane %v276_v8, 1  ;;  %v350_v21 = vmul.f32 %v1180_v3, %v1205_v16  ;;  %v351_v22 = vmul.f32 %v1180_v3, %v1207_v17  ;;  %v421_v23 = vmul.f32 %v1187_v4, %v1209_v18 }
  0x29   : > { %v765_v24 = vrot.slane %v749_v9, 7  ;;  %v572_v25 = vadd.f32 %v542_v52, %v499_v11  ;;  %v313_v26 = vrot.slane %v277_v10, 1  ;;  %v441_v27 = vmul.f32 %v1189_v5, %v1209_v18 }
  0x2a   : > { %v386_v28 = vrot.slane %v350_v21, 2  ;;  %v387_v29 = vrot.slane %v351_v22, 2  ;;  %v442_v30 = vmul.f32 %v1189_v5, %v1211_v19  ;;  %v514_v31 = vmul.f32 %v1191_v6, %v1209_v18 }
  0x2b   : > { %775 = vrot.lane.b32.xlu1 %v765_v24, %s1136_s27  ;;  %v589_v32 = vadd.f32 %v581_v36, %v572_v25  ;;  %v314_v34 = vsel %vm302_vm0, %v312_v13, %v313_v26  ;;  %v476_v35 = vrot.slane %v441_v27, 1  ;;  %v515_v37 = vmul.f32 %v1191_v6, %v1211_v19 }
  0x2c   : > { %v338_v38 = vadd.f32 %v314_v34, %v264_v0  ;;  %v388_v39 = vsel %vm376_vm1, %v386_v28, %v387_v29  ;;  %v477_v41 = vrot.slane %v442_v30, 1  ;;  %v549_v42 = vrot.slane %v514_v31, 2 }
  0x2d   : > { %v662_v43 = vadd.f32 %v632_v60, %v589_v32  ;;  %v550_v44 = vrot.slane %v515_v37, 2  ;;  %v584_v45 = vmul.f32 %v1193_v7, %v1300_v55  ;;  %v604_v46 = vmul.f32 %v1213_v20, %v1300_v55 }
  0x2e   : > { %v412_v36 = vadd.f32 %v388_v39, %v338_v38  ;;  %v478_v47 = vsel %vm302_vm0, %v476_v35, %v477_v41  ;;  %v605_v40 = vmul.f32 %v1213_v20, %v1303_v62  ;;  %v677_v49 = vmul.f32 %v1236_v33, %v1300_v55 }
  0x2f   : > { %v735_v50 = vadd.f32 %v705_v12, %v662_v43  ;;  %v551_v51 = vsel %vm376_vm1, %v549_v42, %v550_v44  ;;  %v639_v52 = vrot.slane %v604_v46, 1  ;;  %v678_v53 = vmul.f32 %v1236_v33, %v1303_v62 }
  0x30   : > { %v429_v54 = vadd.f32 %v421_v23, %v412_v36  ;;  %v640_v56 = vrot.slane %v605_v40, 1  ;;  %v712_v57 = vrot.slane %v677_v49, 2  ;;  %v262_v58 = vmul.f32 %v1176_v1, %v1258_v61  ;;  %v232_v36 = vld [vmem:[%s1185_s22 + $0x38] sm:$0xf] }
  0x31   : > { %v747_v59 = vadd.f32 %v1292_v48, %v735_v50  ;;  %v713_v60 = vrot.slane %v678_v53, 2  ;;  %v272_v0 = vmul.f32 %v1178_v2, %v1258_v61  ;;  %v273_v8 = vmul.f32 %v1178_v2, %v1260_v63 }
  0x32   : > { %v502_v9 = vadd.f32 %v478_v47, %v429_v54  ;;  %v641_v11 = vsel %vm302_vm0, %v639_v52, %v640_v56  ;;  %v346_v12 = vmul.f32 %v1180_v3, %v1258_v61  ;;  %v347_v10 = vmul.f32 %v1180_v3, %v1260_v63  ;;  %v234_v52 = vld [vmem:[%s1185_s22 + $0x40] sm:$0xf] }
  0x33   : > { %v763_v13 = vrot.slane %v747_v59, 7  ;;  %v714_v21 = vsel %vm376_vm1, %v712_v57, %v713_v60  ;;  %v306_v22 = vrot.slane %v272_v0, 1  ;;  %v307_v23 = vrot.slane %v273_v8, 1  ;;  %v236_v59 = vld [vmem:[%s1185_s22 + $0x48] sm:$0xf] }
  0x34   : > { %v575_v24 = vadd.f32 %v551_v51, %v502_v9  ;;  %v380_v25 = vrot.slane %v346_v12, 2  ;;  %v381_v26 = vrot.slane %v347_v10, 2  ;;  %v419_v27 = vmul.f32 %v1187_v4, %v1201_v14  ;;  %v233_v51 = vld [vmem:[%s1185_s22 + $0x3c] sm:$0x1]  ;;  %v237_v9 = vld [vmem:[%s1185_s22 + $0x4c] sm:$0x1] }
  0x35   : > { %771 = vrot.lane.b32.xlu0 %v763_v13, %s1136_s27  ;;  %v308_v28 = vsel %vm302_vm0, %v306_v22, %v307_v23  ;;  %v437_v29 = vmul.f32 %v1189_v5, %v1201_v14  ;;  %v438_v30 = vmul.f32 %v1189_v5, %v1203_v15  ;;  %v510_v31 = vmul.f32 %v1191_v6, %v1201_v14 }
  0x36   : > { %v592_v32 = vadd.f32 %v584_v45, %v575_v24  ;;  %v336_v34 = vadd.f32 %v308_v28, %v262_v58  ;;  %v382_v35 = vsel %vm376_vm1, %v380_v25, %v381_v26  ;;  %v511_v37 = vmul.f32 %v1191_v6, %v1203_v15  ;;  %v235_v58 = vld [vmem:[%s1185_s22 + $0x44] sm:$0x1] }
  0x37   : > { %v470_v38 = vrot.slane %v437_v29, 1  ;;  %v471_v39 = vrot.slane %v438_v30, 1  ;;  %v543_v41 = vrot.slane %v510_v31, 2  ;;  %v582_v42 = vmul.f32 %v1193_v7, %v1205_v16 }
  0x38   : > { %v665_v43 = vadd.f32 %v641_v11, %v592_v32  ;;  %v410_v44 = vadd.f32 %v382_v35, %v336_v34  ;;  %v544_v46 = vrot.slane %v511_v37, 2  ;;  %v600_v45 = vmul.f32 %v1213_v20, %v1205_v16 }
  0x39   : > { %v472_v47 = vsel %vm302_vm0, %v470_v38, %v471_v39  ;;  %v601_v40 = vmul.f32 %v1213_v20, %v1207_v17  ;;  %v673_v49 = vmul.f32 %v1236_v33, %v1205_v16  ;;  %v674_v50 = vmul.f32 %v1236_v33, %v1207_v17 }
  0x3a   : > { %v738_v53 = vadd.f32 %v714_v21, %v665_v43  ;;  %v427_v54 = vadd.f32 %v419_v27, %v410_v44  ;;  %v545_v56 = vsel %vm376_vm1, %v543_v41, %v544_v46  ;;  %v633_v57 = vrot.slane %v600_v45, 1 }
  0x3b   : > { %v634_v60 = vrot.slane %v601_v40, 1  ;;  %v706_v0 = vrot.slane %v673_v49, 2  ;;  %v707_v8 = vrot.slane %v674_v50, 2  ;;  %v1386_v11 = vunpack.c.l.bf16 %v232_v36 }
  0x3c   : > { %v750_v12 = vadd.f32 %v1292_v48, %v738_v53  ;;  %v500_v10 = vadd.f32 %v472_v47, %v427_v54  ;;  %v1389_v13 = vunpack.c.l.bf16 %v233_v51  ;;  %v1391_v22 = vunpack.c.l.bf16 %v234_v52  ;;  %v230_v52 = vld [vmem:[%s1185_s22 + $0x30] sm:$0xf] }
  0x3d   : > { %v635_v21 = vsel %vm302_vm0, %v633_v57, %v634_v60  ;;  %v708_v23 = vsel %vm376_vm1, %v706_v0, %v707_v8  ;;  %v1395_v24 = vunpack.c.l.bf16 %v235_v58  ;;  %v256_v25 = vunpack.c.l.bf16 %v236_v59  ;;  %v231_v8 = vld [vmem:[%s1185_s22 + $0x34] sm:$0x1] }
  0x3e   : > { %v766_v26 = vrot.slane %v750_v12, 7  ;;  %v573_v27 = vadd.f32 %v545_v56, %v500_v10  ;;  %v257_v28 = vunpack.c.l.bf16 %v237_v9  ;;  %v268_v29 = vmul.f32 %v1176_v1, %v1386_v11 }
  0x3f   : > { %v284_v30 = vmul.f32 %v1178_v2, %v1386_v11  ;;  %v285_v31 = vmul.f32 %v1178_v2, %v1389_v13  ;;  %v358_v32 = vmul.f32 %v1180_v3, %v1386_v11  ;;  %v359_v34 = vmul.f32 %v1180_v3, %v1389_v13 }
  0x40   : > { %777 = vrot.lane.b32.xlu1 %v766_v26, %s1136_s27  ;;  %v590_v35 = vadd.f32 %v582_v42, %v573_v27  ;;  %v425_v37 = vmul.f32 %v1187_v4, %v1391_v22  ;;  %v449_v38 = vmul.f32 %v1189_v5, %v1391_v22  ;;  %v450_v39 = vmul.f32 %v1189_v5, %v1395_v24 }
  0x41   : > { %v324_v41 = vrot.slane %v284_v30, 1  ;;  %v325_v43 = vrot.slane %v285_v31, 1  ;;  %v398_v44 = vrot.slane %v358_v32, 2  ;;  %v399_v46 = vrot.slane %v359_v34, 2 }
  0x42   : > { %v663_v45 = vadd.f32 %v635_v21, %v590_v35  ;;  %v488_v36 = vrot.slane %v449_v38, 1  ;;  %v489_v47 = vrot.slane %v450_v39, 1  ;;  %v522_v42 = vmul.f32 %v1191_v6, %v1391_v22 }
  0x43   : > { %v326_v40 = vsel %vm302_vm0, %v324_v41, %v325_v43  ;;  %v400_v49 = vsel %vm376_vm1, %v398_v44, %v399_v46  ;;  %v523_v50 = vmul.f32 %v1191_v6, %v1395_v24  ;;  %v588_v51 = vmul.f32 %v1193_v7, %v256_v25 }
  0x44   : > { %v736_v53 = vadd.f32 %v708_v23, %v663_v45  ;;  %v342_v54 = vadd.f32 %v326_v40, %v268_v29  ;;  %v490_v56 = vsel %vm302_vm0, %v488_v36, %v489_v47  ;;  %v561_v57 = vrot.slane %v522_v42, 2 }
  0x45   : > { %v562_v58 = vrot.slane %v523_v50, 2  ;;  %v612_v59 = vmul.f32 %v1213_v20, %v256_v25  ;;  %v613_v60 = vmul.f32 %v1213_v20, %v257_v28  ;;  %v685_v0 = vmul.f32 %v1236_v33, %v256_v25 }
  0x46   : > { %v748_v9 = vadd.f32 %v1292_v48, %v736_v53  ;;  %v416_v12 = vadd.f32 %v400_v49, %v342_v54  ;;  %v686_v10 = vmul.f32 %v1236_v33, %v257_v28  ;;  %v1429_v21 = vunpack.c.l.bf16 %v230_v52 }
  0x47   : > { %v563_v23 = vsel %vm376_vm1, %v561_v57, %v562_v58  ;;  %v651_v26 = vrot.slane %v612_v59, 1  ;;  %v652_v27 = vrot.slane %v613_v60, 1  ;;  %v724_v29 = vrot.slane %v685_v0, 2 }
  0x48   : > { %v764_v30 = vrot.slane %v748_v9, 7  ;;  %v433_v31 = vadd.f32 %v425_v37, %v416_v12  ;;  %v725_v32 = vrot.slane %v686_v10, 2  ;;  %v1432_v34 = vunpack.c.l.bf16 %v231_v8 }
  0x49   : > { %v653_v25 = vsel %vm302_vm0, %v651_v26, %v652_v27  ;;  %v267_v35 = vmul.f32 %v1176_v1, %v1429_v21  ;;  %v282_v28 = vmul.f32 %v1178_v2, %v1429_v21  ;;  %v356_v38 = vmul.f32 %v1180_v3, %v1429_v21 }
  0x4a   : > { %773 = vrot.lane.b32.xlu0 %v764_v30, %s1136_s27  ;;  %v506_v39 = vadd.f32 %v490_v56, %v433_v31  ;;  %v726_v41 = vsel %vm376_vm1, %v724_v29, %v725_v32  ;;  %v283_v37 = vmul.f32 %v1178_v2, %v1432_v34  ;;  %v357_v43 = vmul.f32 %v1180_v3, %v1432_v34 }
  0x4b   : > { %v321_v44 = vrot.slane %v282_v28, 1  ;;  %v395_v46 = vrot.slane %v356_v38, 2  ;;  %v424_v45 = vmul.f32 %v1187_v4, %v1386_v11  ;;  %v447_v36 = vmul.f32 %v1189_v5, %v1386_v11 }
  0x4c   : > { %v579_v47 = vadd.f32 %v563_v23, %v506_v39  ;;  %v322_v42 = vrot.slane %v283_v37, 1  ;;  %v396_v40 = vrot.slane %v357_v43, 2  ;;  %v448_v49 = vmul.f32 %v1189_v5, %v1389_v13 }
  0x4d   : > { %v485_v50 = vrot.slane %v447_v36, 1  ;;  %v520_v52 = vmul.f32 %v1191_v6, %v1386_v11  ;;  %v521_v53 = vmul.f32 %v1191_v6, %v1389_v13  ;;  %v587_v54 = vmul.f32 %v1193_v7, %v1391_v22 }
  0x4e   : > { %v596_v56 = vadd.f32 %v588_v51, %v579_v47  ;;  %v323_v57 = vsel %vm302_vm0, %v321_v44, %v322_v42  ;;  %v397_v58 = vsel %vm376_vm1, %v395_v46, %v396_v40  ;;  %v486_v59 = vrot.slane %v448_v49, 1 }
  0x4f   : > { %v341_v60 = vadd.f32 %v323_v57, %v267_v35  ;;  %v558_v0 = vrot.slane %v520_v52, 2  ;;  %v559_v8 = vrot.slane %v521_v53, 2  ;;  %v610_v9 = vmul.f32 %v1213_v20, %v1391_v22 }
  0x50   : > { %v669_v12 = vadd.f32 %v653_v25, %v596_v56  ;;  %v487_v10 = vsel %vm302_vm0, %v485_v50, %v486_v59  ;;  %v611_v23 = vmul.f32 %v1213_v20, %v1395_v24  ;;  %v683_v51 = vmul.f32 %v1236_v33, %v1391_v22 }
  0x51   : > { %v415_v26 = vadd.f32 %v397_v58, %v341_v60  ;;  %v560_v27 = vsel %vm376_vm1, %v558_v0, %v559_v8  ;;  %v648_v29 = vrot.slane %v610_v9, 1  ;;  %v684_v30 = vmul.f32 %v1236_v33, %v1395_v24 }
  0x52   : > { %v742_v31 = vadd.f32 %v726_v41, %v669_v12  ;;  %v649_v32 = vrot.slane %v611_v23, 1  ;;  %v721_v35 = vrot.slane %v683_v51, 2  ;;  %v265_v25 = vmul.f32 %v1176_v1, %v1209_v18 }
  0x53   : > { %v432_v28 = vadd.f32 %v424_v45, %v415_v26  ;;  %v722_v38 = vrot.slane %v684_v30, 2  ;;  %v278_v39 = vmul.f32 %v1178_v2, %v1209_v18  ;;  %v279_v37 = vmul.f32 %v1178_v2, %v1211_v19 }
  0x54   : > { %v754_v43 = vadd.f32 %v1292_v48, %v742_v31  ;;  %v650_v44 = vsel %vm302_vm0, %v648_v29, %v649_v32  ;;  %v352_v41 = vmul.f32 %v1180_v3, %v1209_v18  ;;  %v353_v46 = vmul.f32 %v1180_v3, %v1211_v19 }
  0x55   : > { %v505_v36 = vadd.f32 %v487_v10, %v432_v28  ;;  %v723_v45 = vsel %vm376_vm1, %v721_v35, %v722_v38  ;;  %v315_v47 = vrot.slane %v278_v39, 1  ;;  %v316_v42 = vrot.slane %v279_v37, 1 }
  0x56   : > { %v770_v40 = vrot.slane %v754_v43, 7  ;;  %v389_v49 = vrot.slane %v352_v41, 2  ;;  %v390_v50 = vrot.slane %v353_v46, 2  ;;  %v422_v52 = vmul.f32 %v1187_v4, %v1300_v55 }
  0x57   : > { %v578_v53 = vadd.f32 %v560_v27, %v505_v36  ;;  %v317_v56 = vsel %vm302_vm0, %v315_v47, %v316_v42  ;;  %v443_v57 = vmul.f32 %v1189_v5, %v1300_v55  ;;  %v444_v58 = vmul.f32 %v1189_v5, %v1303_v62 }
  0x58   : > { %785 = vrot.lane.b32.xlu1 %v770_v40, %s1136_s27  ;;  %v339_v59 = vadd.f32 %v317_v56, %v265_v25  ;;  %v391_v60 = vsel %vm376_vm1, %v389_v49, %v390_v50  ;;  %v516_v0 = vmul.f32 %v1191_v6, %v1300_v55  ;;  %v517_v8 = vmul.f32 %v1191_v6, %v1303_v62 }
  0x59   : > { %v595_v9 = vadd.f32 %v587_v54, %v578_v53  ;;  %v479_v12 = vrot.slane %v443_v57, 1  ;;  %v480_v10 = vrot.slane %v444_v58, 1  ;;  %v585_v23 = vmul.f32 %v1193_v7, %v1429_v21 }
  0x5a   : > { %v413_v51 = vadd.f32 %v391_v60, %v339_v59  ;;  %v552_v26 = vrot.slane %v516_v0, 2  ;;  %v553_v27 = vrot.slane %v517_v8, 2  ;;  %v606_v29 = vmul.f32 %v1213_v20, %v1429_v21 }
  0x5b   : > { %v668_v30 = vadd.f32 %v650_v44, %v595_v9  ;;  %v481_v31 = vsel %vm302_vm0, %v479_v12, %v480_v10  ;;  %v607_v32 = vmul.f32 %v1213_v20, %v1432_v34  ;;  %v679_v54 = vmul.f32 %v1236_v33, %v1429_v21 }
  0x5c   : > { %v430_v35 = vadd.f32 %v422_v52, %v413_v51  ;;  %v554_v25 = vsel %vm376_vm1, %v552_v26, %v553_v27  ;;  %v642_v28 = vrot.slane %v606_v29, 1  ;;  %v680_v38 = vmul.f32 %v1236_v33, %v1432_v34 }
  0x5d   : > { %v741_v39 = vadd.f32 %v723_v45, %v668_v30  ;;  %v643_v37 = vrot.slane %v607_v32, 1  ;;  %v715_v43 = vrot.slane %v679_v54, 2  ;;  %v266_v44 = vmul.f32 %v1176_v1, %v1300_v55 }
  0x5e   : > { %v503_v41 = vadd.f32 %v481_v31, %v430_v35  ;;  %v716_v46 = vrot.slane %v680_v38, 2  ;;  %v280_v36 = vmul.f32 %v1178_v2, %v1300_v55  ;;  %v281_v47 = vmul.f32 %v1178_v2, %v1303_v62 }
  0x5f   : > { %v753_v42 = vadd.f32 %v1292_v48, %v741_v39  ;;  %v644_v40 = vsel %vm302_vm0, %v642_v28, %v643_v37  ;;  %v354_v45 = vmul.f32 %v1180_v3, %v1300_v55  ;;  %v355_v49 = vmul.f32 %v1180_v3, %v1303_v62 }
  0x60   : > { %v576_v50 = vadd.f32 %v554_v25, %v503_v41  ;;  %v717_v1 = vsel %vm376_vm1, %v715_v43, %v716_v46  ;;  %v318_v52 = vrot.slane %v280_v36, 1  ;;  %v319_v53 = vrot.slane %v281_v47, 1 }
  0x61   : > { %v769_v56 = vrot.slane %v753_v42, 7  ;;  %v392_v57 = vrot.slane %v354_v45, 2  ;;  %v393_v58 = vrot.slane %v355_v49, 2  ;;  %v423_v2 = vmul.f32 %v1187_v4, %v1429_v21 }
  0x62   : > { %v593_v59 = vadd.f32 %v585_v23, %v576_v50  ;;  %v320_v60 = vsel %vm302_vm0, %v318_v52, %v319_v53  ;;  %v445_v0 = vmul.f32 %v1189_v5, %v1429_v21  ;;  %v446_v3 = vmul.f32 %v1189_v5, %v1432_v34 }
  0x63   : > { %783 = vrot.lane.b32.xlu0 %v769_v56, %s1136_s27  ;;  %v340_v8 = vadd.f32 %v320_v60, %v266_v44  ;;  %v394_v9 = vsel %vm376_vm1, %v392_v57, %v393_v58  ;;  %v518_v12 = vmul.f32 %v1191_v6, %v1429_v21  ;;  %v519_v4 = vmul.f32 %v1191_v6, %v1432_v34  ;;  %v1098_v56 = vld [vmem:[%s1559_s5] sm:$0xff]  }
  0x64   : > { %v666_v10 = vadd.f32 %v644_v40, %v593_v59  ;;  %v482_v23 = vrot.slane %v445_v0, 1  ;;  %v483_v51 = vrot.slane %v446_v3, 1  ;;  %v608_v5 = vmul.f32 %v1213_v20, %v1386_v11 }
  0x65   : > { %v414_v26 = vadd.f32 %v394_v9, %v340_v8  ;;  %v555_v27 = vrot.slane %v518_v12, 2  ;;  %v556_v29 = vrot.slane %v519_v4, 2  ;;  %v609_v32 = vmul.f32 %v1213_v20, %v1389_v13 }
  0x66   : > { %v739_v30 = vadd.f32 %v717_v1, %v666_v10  ;;  %v484_v31 = vsel %vm302_vm0, %v482_v23, %v483_v51  ;;  %v681_v54 = vmul.f32 %v1236_v33, %v1386_v11  ;;  %v682_v6 = vmul.f32 %v1236_v33, %v1389_v13 }
  0x67   : > { %v431_v35 = vadd.f32 %v423_v2, %v414_v26  ;;  %v557_v28 = vsel %vm376_vm1, %v555_v27, %v556_v29  ;;  %v645_v38 = vrot.slane %v608_v5, 1  ;;  %v646_v39 = vrot.slane %v609_v32, 1 }
  0x68   : > { %v751_v25 = vadd.f32 %v1292_v48, %v739_v30  ;;  %v586_v43 = vmul.f32 %v1193_v7, %v1386_v11  ;;  %v718_v44 = vrot.slane %v681_v54, 2  ;;  %v719_v41 = vrot.slane %v682_v6, 2  ;;  %v1113_v7 = vld [vmem:[%s1559_s5 + $0x8] sm:$0xff]  }
  0x69   : > { %v504_v37 = vadd.f32 %v484_v31, %v431_v35  ;;  %v647_v33 = vsel %vm302_vm0, %v645_v38, %v646_v39  ;;  %v1103_v50 = vunpack.c.l.bf16 %v1113_v7  ;;  %v1099_v60 = vunpack.c.l.bf16 %v1098_v56 }
  0x6a   : > { %v767_v20 = vrot.slane %v751_v25, 7  ;;  %v720_v47 = vsel %vm376_vm1, %v718_v44, %v719_v41 }
  0x6b   : > { %v577_v46 = vadd.f32 %v557_v28, %v504_v37  ;;  %v838_v1 = vrot.slane %v1103_v50, 7  ;;  %v836_v4 = vrot.slane %v1099_v60, 7 }
  0x6c   : > { %779 = vrot.lane.b32.xlu2 %v767_v20, %s1136_s27 }
  0x6d   : > { %v594_v36 = vadd.f32 %v586_v43, %v577_v46 }
  0x6f   : > { %v667_v42 = vadd.f32 %v647_v33, %v594_v36 }
  0x71   : > { %v740_v40 = vadd.f32 %v720_v47, %v667_v42  ;;  %v1100_v42 = vunpack.c.h.bf16 %v1098_v56 }
  0x73   : > { %v752_v45 = vadd.f32 %v1292_v48, %v740_v40  ;;  %v837_v50 = vrot.slane %v1100_v42, 7 }
  0x75   : > { %v768_v49 = vrot.slane %v752_v45, 7 }
  0x77   : > { %781 = vrot.lane.b32.xlu2 %v768_v49, %s1136_s27 }
  0x9d   : > { %v776_v52 = vpop.permute.xlu1 %775 }
  0x9e   : > { %v800_v48 = vsel %vm795_vm2, %v1205_v16, %v776_v52  ;;  %v801_v53 = vsel %vm795_vm2, %v1207_v17, %v776_v52  ;;  %v1114_v52 = vld [vmem:[%s1559_s5 + $0x10] sm:$0xff]  }
  0x9f   : > { %v856_v57 = vadd.f32 %v838_v1, %v800_v48  ;;  %v857_v58 = vadd.f32 %v838_v1, %v801_v53 }
  0xa1   : > { %v872_v2 = vpack.c.bf16 %v856_v57, %v856_v57  ;;  %v873_v59 = vpack.c.bf16 %v857_v58, %v857_v58 }
  0xa3   : > { %v916_v0 = vshrl.u32 %v872_v2, 16  ;;  %v919_v3 = vshll.u32 %v872_v2, 16  ;;  %v925_v12 = vshll.u32 %v873_v59, 16  ;;  %v1107_v59 = vunpack.c.l.bf16 %v1114_v52 }
  0xa5   : > { %v918_v8 = vrot.slane %v916_v0, 4  ;;  %v921_v9 = vrot.slane %v919_v3, 5  ;;  %v927_v27 = vrot.slane %v925_v12, 5 }
  0xa7   : > { %v922_v10 = vor.u32 %v921_v9, %v918_v8  ;;  %v772_v16 = vpop.permute.xlu0 %771  ;;  %v1115_v8 = vld [vmem:[%s1559_s5 + $0x18] sm:$0xff]  }
  0xa8   : > { %v796_v17 = vsel %vm795_vm2, %v1258_v61, %v772_v16  ;;  %v797_v51 = vsel %vm795_vm2, %v1260_v63, %v772_v16  ;;  %v1104_v61 = vunpack.c.h.bf16 %v1113_v7 }
  0xa9   : > { %v923_v26 = vrot.slane %v922_v10, 4  ;;  %v852_v29 = vadd.f32 %v836_v4, %v796_v17  ;;  %v853_v5 = vadd.f32 %v836_v4, %v797_v51  ;;  %v1112_v4 = vunpack.c.h.bf16 %v1115_v8 }
  0xaa   : > { %v839_v28 = vrot.slane %v1104_v61, 7 }
  0xab   : > { %v928_v30 = vsel %vm1567_vm5, %v923_v26, %v927_v27  ;;  %v868_v31 = vpack.c.bf16 %v852_v29, %v852_v29  ;;  %v869_v32 = vpack.c.bf16 %v853_v5, %v853_v5  ;;  %v843_v29 = vrot.slane %v1112_v4, 7 }
  0xac   : > { %1010 = vst.msk [vmem:[%s1580_s8 + $0x8] sm:$0xf] %vm1007_vm6, %v928_v30 }
  0xad   : > { %v888_v63 = vshrl.u32 %v868_v31, 16  ;;  %v891_v54 = vshll.u32 %v868_v31, 16  ;;  %v897_v25 = vshll.u32 %v869_v32, 16 }
  0xaf   : > { %v890_v35 = vrot.slane %v888_v63, 4  ;;  %v893_v6 = vrot.slane %v891_v54, 5  ;;  %v899_v43 = vrot.slane %v897_v25, 5 }
  0xb1   : > { %v894_v38 = vor.u32 %v893_v6, %v890_v35  ;;  %v1108_v6 = vunpack.c.h.bf16 %v1114_v52 }
  0xb2   : > { %v778_v39 = vpop.permute.xlu1 %777 }
  0xb3   : > { %v895_v37 = vrot.slane %v894_v38, 4  ;;  %v802_v20 = vsel %vm795_vm2, %v1209_v18, %v778_v39  ;;  %v803_v44 = vsel %vm795_vm2, %v1211_v19, %v778_v39 }
  0xb4   : > { %v858_v41 = vadd.f32 %v839_v28, %v802_v20  ;;  %v859_v46 = vadd.f32 %v839_v28, %v803_v44 }
  0xb5   : > { %v900_v33 = vsel %vm1567_vm5, %v895_v37, %v899_v43 }
  0xb6   : > { %1008 = vst.msk [vmem:[%s1580_s8] sm:$0xf] %vm1007_vm6, %v900_v33  ;;  %v874_v36 = vpack.c.bf16 %v858_v41, %v858_v41  ;;  %v875_v47 = vpack.c.bf16 %v859_v46, %v859_v46  ;;  %v841_v41 = vrot.slane %v1108_v6, 7  ;;  %v1111_v33 = vunpack.c.l.bf16 %v1115_v8 }
  0xb8   : > { %v930_v40 = vshrl.u32 %v874_v36, 16  ;;  %v933_v45 = vshll.u32 %v874_v36, 16  ;;  %v939_v18 = vshll.u32 %v875_v47, 16 }
  0xba   : > { %v932_v49 = vrot.slane %v930_v40, 4  ;;  %v935_v7 = vrot.slane %v933_v45, 5  ;;  %v941_v58 = vrot.slane %v939_v18, 5 }
  0xbc   : > { %v936_v19 = vor.u32 %v935_v7, %v932_v49  ;;  %v774_v1 = vpop.permute.xlu0 %773 }
  0xbd   : > { %v798_v48 = vsel %vm795_vm2, %v1201_v14, %v774_v1  ;;  %v799_v53 = vsel %vm795_vm2, %v1203_v15, %v774_v1  ;;  %v840_v14 = vrot.slane %v1107_v59, 7 }
  0xbe   : > { %v937_v57 = vrot.slane %v936_v19, 4  ;;  %v854_v56 = vadd.f32 %v837_v50, %v798_v48  ;;  %v855_v2 = vadd.f32 %v837_v50, %v799_v53  ;;  %v842_v48 = vrot.slane %v1111_v33, 7 }
  0xc0   : > { %v942_v60 = vsel %vm1567_vm5, %v937_v57, %v941_v58  ;;  %v870_v0 = vpack.c.bf16 %v854_v56, %v854_v56  ;;  %v871_v3 = vpack.c.bf16 %v855_v2, %v855_v2 }
  0xc1   : > { %1011 = vst.msk [vmem:[%s1580_s8 + $0xc] sm:$0xf] %vm1007_vm6, %v942_v60 }
  0xc2   : > { %v902_v9 = vshrl.u32 %v870_v0, 16  ;;  %v905_v12 = vshll.u32 %v870_v0, 16  ;;  %v911_v16 = vshll.u32 %v871_v3, 16 }
  0xc4   : > { %v904_v10 = vrot.slane %v902_v9, 4  ;;  %v907_v15 = vrot.slane %v905_v12, 5  ;;  %v913_v32 = vrot.slane %v911_v16, 5 }
  0xc6   : > { %v780_v17 = vpop.permute.xlu2 %779  ;;  %v908_v51 = vor.u32 %v907_v15, %v904_v10 }
  0xc7   : > { %v804_v26 = vsel %vm795_vm2, %v1300_v55, %v780_v17  ;;  %v805_v27 = vsel %vm795_vm2, %v1303_v62, %v780_v17 }
  0xc8   : > { %v860_v5 = vadd.f32 %v840_v14, %v804_v26  ;;  %v861_v30 = vadd.f32 %v840_v14, %v805_v27  ;;  %v909_v31 = vrot.slane %v908_v51, 4 }
  0xca   : > { %v876_v61 = vpack.c.bf16 %v860_v5, %v860_v5  ;;  %v877_v63 = vpack.c.bf16 %v861_v30, %v861_v30  ;;  %v914_v54 = vsel %vm1567_vm5, %v909_v31, %v913_v32  ;;  %v786_v35 = vpop.permute.xlu1 %785 }
  0xcb   : > { %1009 = vst.msk [vmem:[%s1580_s8 + $0x4] sm:$0xf] %vm1007_vm6, %v914_v54  ;;  %v810_v55 = vsel %vm795_vm2, %v1391_v22, %v786_v35  ;;  %v811_v62 = vsel %vm795_vm2, %v1395_v24, %v786_v35 }
  0xcc   : > { %v944_v25 = vshrl.u32 %v876_v61, 16  ;;  %v947_v28 = vshll.u32 %v876_v61, 16  ;;  %v953_v38 = vshll.u32 %v877_v63, 16  ;;  %v866_v39 = vadd.f32 %v843_v29, %v810_v55 }
  0xcd   : > { %v867_v37 = vadd.f32 %v843_v29, %v811_v62 }
  0xce   : > { %v946_v43 = vrot.slane %v944_v25, 4  ;;  %v949_v20 = vrot.slane %v947_v28, 5  ;;  %v882_v44 = vpack.c.bf16 %v866_v39, %v866_v39  ;;  %v955_v47 = vrot.slane %v953_v38, 5 }
  0xcf   : > { %v883_v46 = vpack.c.bf16 %v867_v37, %v867_v37 }
  0xd0   : > { %v950_v36 = vor.u32 %v949_v20, %v946_v43  ;;  %v986_v42 = vshrl.u32 %v882_v44, 16  ;;  %v989_v40 = vshll.u32 %v882_v44, 16 }
  0xd1   : > { %v782_v22 = vpop.permute.xlu2 %781  ;;  %v995_v45 = vshll.u32 %v883_v46, 16 }
  0xd2   : > { %v951_v49 = vrot.slane %v950_v36, 4  ;;  %v806_v24 = vsel %vm795_vm2, %v1429_v21, %v782_v22  ;;  %v807_v7 = vsel %vm795_vm2, %v1432_v34, %v782_v22  ;;  %v988_v18 = vrot.slane %v986_v42, 4 }
  0xd3   : > { %v862_v50 = vadd.f32 %v841_v41, %v806_v24  ;;  %v863_v19 = vadd.f32 %v841_v41, %v807_v7  ;;  %v991_v1 = vrot.slane %v989_v40, 5  ;;  %v997_v2 = vrot.slane %v995_v45, 5 }
  0xd4   : > { %v956_v52 = vsel %vm1567_vm5, %v951_v49, %v955_v47 }
  0xd5   : > { %1012 = vst.msk [vmem:[%s1580_s8 + $0x10] sm:$0xf] %vm1007_vm6, %v956_v52  ;;  %v878_v53 = vpack.c.bf16 %v862_v50, %v862_v50  ;;  %v879_v57 = vpack.c.bf16 %v863_v19, %v863_v19  ;;  %v992_v58 = vor.u32 %v991_v1, %v988_v18  ;;  %v784_v56 = vpop.permute.xlu0 %783 }
  0xd6   : > { %v808_v21 = vsel %vm795_vm2, %v1386_v11, %v784_v56  ;;  %v809_v34 = vsel %vm795_vm2, %v1389_v13, %v784_v56 }
  0xd7   : > { %v958_v59 = vshrl.u32 %v878_v53, 16  ;;  %v961_v60 = vshll.u32 %v878_v53, 16  ;;  %v967_v0 = vshll.u32 %v879_v57, 16  ;;  %v993_v3 = vrot.slane %v992_v58, 4 }
  0xd8   : > { %v864_v8 = vadd.f32 %v842_v48, %v808_v21  ;;  %v865_v9 = vadd.f32 %v842_v48, %v809_v34 }
  0xd9   : > { %v960_v12 = vrot.slane %v958_v59, 4  ;;  %v963_v4 = vrot.slane %v961_v60, 5  ;;  %v998_v14 = vsel %vm1567_vm5, %v993_v3, %v997_v2  ;;  %v969_v16 = vrot.slane %v967_v0, 5 }
  0xda   : > { %1015 = vst.msk [vmem:[%s1580_s8 + $0x1c] sm:$0xf] %vm1007_vm6, %v998_v14  ;;  %v880_v10 = vpack.c.bf16 %v864_v8, %v864_v8  ;;  %v881_v11 = vpack.c.bf16 %v865_v9, %v865_v9 }
  0xdb   : > { %v964_v15 = vor.u32 %v963_v4, %v960_v12 }
  0xdc   : > { %v972_v13 = vshrl.u32 %v880_v10, 16  ;;  %v975_v17 = vshll.u32 %v880_v10, 16  ;;  %v981_v29 = vshll.u32 %v881_v11, 16 }
  0xdd   : > { %v965_v51 = vrot.slane %v964_v15, 4 }
  0xde   : > { %v974_v26 = vrot.slane %v972_v13, 4  ;;  %v977_v27 = vrot.slane %v975_v17, 5  ;;  %v983_v32 = vrot.slane %v981_v29, 5 }
  0xdf   : > { %v970_v5 = vsel %vm1567_vm5, %v965_v51, %v969_v16 }
  0xe0   : > { %1013 = vst.msk [vmem:[%s1580_s8 + $0x14] sm:$0xf] %vm1007_vm6, %v970_v5  ;;  %v978_v30 = vor.u32 %v977_v27, %v974_v26 }
  0xe2   : > { %v979_v31 = vrot.slane %v978_v30, 4 }
  0xe4   : > { %v984_v61 = vsel %vm1567_vm5, %v979_v31, %v983_v32 }
  0xe5   : > { %1014 = vst.msk [vmem:[%s1580_s8 + $0x18] sm:$0xf] %vm1007_vm6, %v984_v61 }
  0xe6 PF: > { %s14_s15 = sadd.s32 1, %s1134_s15  }
  0xe7   : > { %p11_p4 = scmp.ge.s32.totalorder %s14_s15, 4  }
  0xe9   :  { %13 = sbr.rel (!%p11_p4) target bundleno = 1 (0x1), region = 69 }

// kernel: _lambda_.30
= control target key start
LH: loop header
LB: loop body
LE: loop exit
PB: predicated region body
PF: predicated region fallthrough
CT: control target
= control target key end

     0   :  { %s444_s12 = smov 0   ;;  %s561_s0 = inlined_call_operand.vmem [shape: bf16[2,20,5,16], index: 0, kind: input, shape index: {}]   ;;  %s562_s1 = inlined_call_operand.vmem [shape: f32[9,16], index: 1, kind: input, shape index: {}]   ;;  %s563_s2 = inlined_call_operand.vmem [shape: f32[1,16], index: 2, kind: input, shape index: {}]   ;;  %s564_s3 = inlined_call_operand.vmem [shape: bf16[2,4,4,16], index: 3, kind: output, shape index: {}]  }
   0x1 LB: > { %s394_s13 = sadd.s32 4294967295, %s422_s12   ;;  %p398_p0 = scmp.ge.s32.totalorder %s422_s12, 1  ;;  %s422_s12 = sphi %s444_s12, %s13_s12  }
   0x2   : > { %p137_p1 = scmp.lt.s32.totalorder %s422_s12, 3 }
   0x4   : > { %p138_p2 = pnand %p398_p0, %p137_p1 }
   0x5   : > { %p161_p3 = scmp.lt.s32.totalorder (!%p138_p2), %s394_s13, 1 }
   0x6   : > { %141 = sbr.rel (%p138_p2) target bundleno = 54 (0x36), region = 32 }
   0xb   : > { %s566_s13 = smov (!%p161_p3, %s394_s13), 1  ;;  %v207_v0 = vld [vmem:[%s562_s1] sm:$0xff]  ;;  %v494_v31 = vld [vmem:[%s562_s1 + $0x8] ss:$0 sm:$0xff]  ;;  %vm334_vm0 = vcmask 123904  }
   0xc   : > { %s405_s16 = smul.u32 80, %s566_s13  ;;  %v458_v1 = vperm.slane %v207_v0, 0  ;;  %v465_v2 = vperm.slane %v207_v0, 1  ;;  %v467_v3 = vperm.slane %v207_v0, 2  ;;  %v469_v4 = vperm.slane %v207_v0, 3  ;;  %s404_s24 = sshll.u32 %s566_s13, 3 }
   0xd   : > { %v471_v5 = vperm.slane %v207_v0, 5  ;;  %v479_v17 = vperm.slane %v207_v0, 4  ;;  %v497_v33 = vperm.slane %v207_v0, 6  ;;  %v499_v34 = vperm.slane %v207_v0, 7  ;;  %s540_s27 = scalar_lea.vmem %s564_s3, %s404_s24 }
   0xe   : > { %s463_s19 = scalar_lea.vmem %s561_s0, %s405_s16 }
   0xf   : > { %v171_v6 = vld [vmem:[%s463_s19] sm:$0x7]  ;;  %v172_v7 = vld [vmem:[%s463_s19 + $0x4] sm:$0x7]  ;;  %v176_v8 = vld [vmem:[%s463_s19 + $0x14] sm:$0x7] }
  0x10   : > { %v177_v9 = vld [vmem:[%s463_s19 + $0x18] sm:$0x7]  ;;  %v181_v10 = vld [vmem:[%s463_s19 + $0x28] sm:$0x7]  ;;  %v185_v11 = vld [vmem:[%s463_s19 + $0x3c] sm:$0x7]  ;;  %v189_v12 = vunpack.c.l.bf16 %v171_v6  ;;  %v190_v13 = vunpack.c.l.bf16 %v172_v7  ;;  %v194_v14 = vunpack.c.l.bf16 %v176_v8 }
  0x11   : > { %v195_v15 = vunpack.c.l.bf16 %v177_v9  ;;  %v199_v16 = vunpack.c.l.bf16 %v181_v10  ;;  %v203_v18 = vunpack.c.l.bf16 %v185_v11  ;;  %v173_v22 = vld [vmem:[%s463_s19 + $0x8] sm:$0x7]  ;;  %v178_v26 = vld [vmem:[%s463_s19 + $0x1c] sm:$0x7]  ;;  %v182_v27 = vld [vmem:[%s463_s19 + $0x2c] sm:$0x7] }
  0x12   : > { %v210_v19 = vmul.f32 %v458_v1, %v189_v12  ;;  %v215_v20 = vmul.f32 %v465_v2, %v194_v14  ;;  %v224_v21 = vmul.f32 %v467_v3, %v189_v12  ;;  %v211_v23 = vmul.f32 %v458_v1, %v190_v13  ;;  %v186_v32 = vld [vmem:[%s463_s19 + $0x40] sm:$0x7]  ;;  %v174_v44 = vld [vmem:[%s463_s19 + $0xc] sm:$0x7]  ;;  %v183_v50 = vld [vmem:[%s463_s19 + $0x30] sm:$0x7] }
  0x13   : > { %v216_v24 = vmul.f32 %v465_v2, %v195_v15  ;;  %v263_v25 = vmul.f32 %v471_v5, %v199_v16  ;;  %v245_v30 = vmul.f32 %v469_v4, %v199_v16  ;;  %v191_v35 = vunpack.c.l.bf16 %v173_v22  ;;  %v505_v45 = vld [vmem:[%s463_s19 + $0x20] sm:$0x7]  ;;  %v187_v56 = vld [vmem:[%s463_s19 + $0x44] sm:$0x7]  ;;  %v184_v16 = vld [vmem:[%s463_s19 + $0x34] sm:$0x7] }
  0x14   : > { %v219_v28 = vadd.f32 %v215_v20, %v210_v19  ;;  %v232_v29 = vrot.slane %v224_v21, 1  ;;  %v254_v37 = vmul.f32 %v479_v17, %v203_v18  ;;  %v196_v38 = vunpack.c.l.bf16 %v178_v26  ;;  %v188_v22 = vld [vmem:[%s463_s19 + $0x48] sm:$0x7] }
  0x15   : > { %v200_v39 = vunpack.c.l.bf16 %v182_v27  ;;  %v220_v40 = vadd.f32 %v216_v24, %v211_v23  ;;  %v271_v41 = vrot.slane %v263_v25, 1  ;;  %v204_v42 = vunpack.c.l.bf16 %v186_v32  ;;  %v415_v24 = vld [vmem:[%s563_s2] ss:$0 sm:$0xff] }
  0x16   : > { %v240_v36 = vadd.f32 %v232_v29, %v219_v28  ;;  %v225_v43 = vmul.f32 %v467_v3, %v190_v13  ;;  %v302_v47 = vmul.f32 %v494_v31, %v190_v13  ;;  %v212_v48 = vmul.f32 %v458_v1, %v191_v35 }
  0x17   : > { %v217_v49 = vmul.f32 %v465_v2, %v196_v38  ;;  %v246_v52 = vmul.f32 %v469_v4, %v200_v39  ;;  %v264_v53 = vmul.f32 %v471_v5, %v200_v39  ;;  %v284_v55 = vmul.f32 %v497_v33, %v190_v13 }
  0x18   : > { %v249_v46 = vadd.f32 %v245_v30, %v240_v36  ;;  %v233_v51 = vrot.slane %v225_v43, 1  ;;  %v192_v57 = vunpack.c.l.bf16 %v174_v44  ;;  %v197_v58 = vunpack.c.l.bf16 %v505_v45 }
  0x19   : > { %v293_v59 = vmul.f32 %v499_v34, %v195_v15  ;;  %v255_v61 = vmul.f32 %v479_v17, %v204_v42  ;;  %v201_v62 = vunpack.c.l.bf16 %v183_v50  ;;  %v310_v0 = vrot.slane %v302_v47, 1  ;;  %v180_v47 = vld [vmem:[%s463_s19 + $0x24] sm:$0x7] }
  0x1a   : > { %v258_v54 = vadd.f32 %v254_v37, %v249_v46  ;;  %v241_v60 = vadd.f32 %v233_v51, %v220_v40  ;;  %v221_v6 = vadd.f32 %v217_v49, %v212_v48  ;;  %v285_v7 = vmul.f32 %v497_v33, %v191_v35  ;;  %v175_v40 = vld [vmem:[%s463_s19 + $0x10] sm:$0x7] }
  0x1b   : > { %v272_v9 = vrot.slane %v264_v53, 1  ;;  %v205_v10 = vunpack.c.l.bf16 %v187_v56  ;;  %v226_v11 = vmul.f32 %v467_v3, %v191_v35  ;;  %v303_v13 = vmul.f32 %v494_v31, %v191_v35 }
  0x1c   : > { %v279_v63 = vadd.f32 %v271_v41, %v258_v54  ;;  %v250_v8 = vadd.f32 %v246_v52, %v241_v60  ;;  %v213_v14 = vmul.f32 %v458_v1, %v192_v57  ;;  %v218_v15 = vmul.f32 %v465_v2, %v197_v58 }
  0x1d   : > { %v234_v19 = vrot.slane %v226_v11, 1  ;;  %v247_v20 = vmul.f32 %v469_v4, %v201_v62  ;;  %v265_v21 = vmul.f32 %v471_v5, %v201_v62  ;;  %v294_v1 = vmul.f32 %v499_v34, %v196_v38 }
  0x1e   : > { %v288_v12 = vadd.f32 %v284_v55, %v279_v63  ;;  %v259_v18 = vadd.f32 %v255_v61, %v250_v8  ;;  %v256_v2 = vmul.f32 %v479_v17, %v205_v10  ;;  %v202_v27 = vunpack.c.l.bf16 %v184_v16 }
  0x1f   : > { %v242_v26 = vadd.f32 %v234_v19, %v221_v6  ;;  %v222_v29 = vadd.f32 %v218_v15, %v213_v14  ;;  %v206_v30 = vunpack.c.l.bf16 %v188_v22  ;;  %v227_v32 = vmul.f32 %v467_v3, %v192_v57 }
  0x20   : > { %v297_v23 = vadd.f32 %v293_v59, %v288_v12  ;;  %v280_v25 = vadd.f32 %v272_v9, %v259_v18  ;;  %v311_v36 = vrot.slane %v303_v13, 1  ;;  %v273_v39 = vrot.slane %v265_v21, 1 }
  0x21   : > { %v251_v37 = vadd.f32 %v247_v20, %v242_v26  ;;  %v235_v42 = vrot.slane %v227_v32, 1  ;;  %v248_v38 = vmul.f32 %v469_v4, %v202_v27  ;;  %v266_v43 = vmul.f32 %v471_v5, %v202_v27 }
  0x22   : > { %v318_v28 = vadd.f32 %v310_v0, %v297_v23  ;;  %v289_v35 = vadd.f32 %v285_v7, %v280_v25  ;;  %v286_v3 = vmul.f32 %v497_v33, %v192_v57  ;;  %v304_v46 = vmul.f32 %v494_v31, %v192_v57 }
  0x23   : > { %v260_v45 = vadd.f32 %v256_v2, %v251_v37  ;;  %v193_v49 = vunpack.c.l.bf16 %v175_v40  ;;  %v243_v50 = vadd.f32 %v235_v42, %v222_v29  ;;  %v257_v4 = vmul.f32 %v479_v17, %v206_v30 }
  0x24   : > { %v326_v41 = vadd.f32 %v415_v24, %v318_v28  ;;  %v298_v44 = vadd.f32 %v294_v1, %v289_v35  ;;  %v295_v52 = vmul.f32 %v499_v34, %v197_v58  ;;  %v198_v53 = vunpack.c.l.bf16 %v180_v47 }
  0x25   : > { %v281_v5 = vadd.f32 %v273_v39, %v260_v45  ;;  %v252_v54 = vadd.f32 %v248_v38, %v243_v50  ;;  %v274_v55 = vrot.slane %v266_v43, 1  ;;  %v312_v60 = vrot.slane %v304_v46, 1 }
  0x26   : > { %v330_v48 = vpack.c.bf16 %v326_v41, %v326_v41  ;;  %v319_v51 = vadd.f32 %v311_v36, %v298_v44  ;;  %v287_v61 = vmul.f32 %v497_v33, %v193_v49  ;;  %v305_v62 = vmul.f32 %v494_v31, %v193_v49 }
  0x27   : > { %v290_v59 = vadd.f32 %v286_v3, %v281_v5  ;;  %v261_v57 = vadd.f32 %v257_v4, %v252_v54  ;;  %v296_v58 = vmul.f32 %v499_v34, %v198_v53 }
  0x28   : > { %335 = vst.msk [vmem:[%s540_s27] sm:$0x3] %vm334_vm0, %v330_v48  ;;  %v327_v56 = vadd.f32 %v415_v24, %v319_v51  ;;  %v313_v8 = vrot.slane %v305_v62, 1 }
  0x29   : > { %v299_v63 = vadd.f32 %v295_v52, %v290_v59  ;;  %v282_v0 = vadd.f32 %v274_v55, %v261_v57 }
  0x2a   : > { %v331_v17 = vpack.c.bf16 %v327_v56, %v327_v56 }
  0x2b   : > { %v320_v6 = vadd.f32 %v312_v60, %v299_v63  ;;  %v291_v7 = vadd.f32 %v287_v61, %v282_v0 }
  0x2c   : > { %336 = vst.msk [vmem:[%s540_s27 + $0x2] sm:$0x3] %vm334_vm0, %v331_v17 }
  0x2d   : > { %v328_v9 = vadd.f32 %v415_v24, %v320_v6  ;;  %v300_v10 = vadd.f32 %v296_v58, %v291_v7 }
  0x2f   : > { %v332_v11 = vpack.c.bf16 %v328_v9, %v328_v9  ;;  %v321_v12 = vadd.f32 %v313_v8, %v300_v10 }
  0x31   : > { %337 = vst.msk [vmem:[%s540_s27 + $0x4] sm:$0x3] %vm334_vm0, %v332_v11  ;;  %v329_v33 = vadd.f32 %v415_v24, %v321_v12 }
  0x33   : > { %v333_v13 = vpack.c.bf16 %v329_v33, %v329_v33 }
  0x35   : > { %338 = vst.msk [vmem:[%s540_s27 + $0x6] sm:$0x3] %vm334_vm0, %v333_v13 }
  0x36 PF: > { %s13_s12 = sadd.s32 1, %s422_s12  }
  0x37   : > { %p10_p4 = scmp.ge.s32.totalorder %s13_s12, 4  }
  0x39   :  { %12 = sbr.rel (!%p10_p4) target bundleno = 1 (0x1), region = 62 }

// kernel: _lambda_.27
= control target key start
LH: loop header
LB: loop body
LE: loop exit
PB: predicated region body
PF: predicated region fallthrough
CT: control target
= control target key end

     0   :  { %s416_s12 = smov 0   ;;  %s457_s0 = inlined_call_operand.vmem [shape: bf16[2,64,16], index: 0, kind: input, shape index: {}]   ;;  %s458_s1 = inlined_call_operand.vmem [shape: bf16[16,24], index: 1, kind: input, shape index: {}]   ;;  %s459_s2 = inlined_call_operand.vmem [shape: f32[1,24], index: 2, kind: input, shape index: {}]   ;;  %s460_s3 = inlined_call_operand.vmem [shape: bf16[2,64,24], index: 3, kind: output, shape index: {}]  }
   0x1 LB: > { %s334_s13 = sadd.s32 4294967295, %s394_s12   ;;  %p338_p0 = scmp.ge.s32.totalorder %s394_s12, 1  ;;  %s394_s12 = sphi %s416_s12, %s13_s12  }
   0x2   : > { %p137_p1 = scmp.lt.s32.totalorder %s394_s12, 3 }
   0x4   : > { %p138_p2 = pnand %p338_p0, %p137_p1 }
   0x5   : > { %p161_p3 = scmp.lt.s32.totalorder (!%p138_p2), %s334_s13, 1 }
   0x6   : > { %141 = sbr.rel (%p138_p2) target bundleno = 164 (0xa4), region = 32 }
   0xb   : > { %v375_v0 = vld [vmem:[%s458_s1] sm:$0xff]  ;;  %s462_s13 = smov (!%p161_p3, %s334_s13), 1  ;;  %vm212_vm0 = vcmask 130048   ;;  %vm270_vm1 = vcmask 191488  }
   0xc   : > { %232 = vmatpush.bf16.msra.mxu0 %v375_v0  ;;  %376 = vmatpush.bf16.msra.mxu1 %v375_v0  ;;  %s369_s16 = sshll.u32 %s462_s13, 5  ;;  %v387_v5 = vld [vmem:[%s459_s2] ss:$0 sm:$0xff] }
   0xd   : > { %377 = vmatpush.bf16.msra.mxu2 %v375_v0  ;;  %378 = vmatpush.bf16.msra.mxu3 %v375_v0  ;;  %s165_s19 = scalar_lea.vmem %s457_s0, %s369_s16  ;;  %s436_s24 = scalar_lea.vmem %s460_s3, %s369_s16 }
   0xe   : > { %v371_v1 = vld [vmem:[%s165_s19] sm:$0xff]  ;;  %v372_v2 = vld [vmem:[%s165_s19 + $0x8] sm:$0xff]  ;;  %v373_v3 = vld [vmem:[%s165_s19 + $0x10] sm:$0xff] }
   0xf   : > { %v374_v4 = vld [vmem:[%s165_s19 + $0x18] sm:$0xff]  ;;  %363 = vmatmul.msk.bf16.vlgmr.msra.gmra.mxu0 %vm212_vm0, %v371_v1  ;;  %364 = vmatmul.msk.bf16.vlgmr.msra.gmra.mxu1 %vm212_vm0, %v372_v2 }
  0x10   : > { %365 = vmatmul.msk.bf16.vlgmr.msra.gmra.mxu2 %vm212_vm0, %v373_v3  ;;  %366 = vmatmul.msk.bf16.vlgmr.msra.gmra.mxu3 %vm212_vm0, %v374_v4 }
  0x8c   : > { %v234_v6 = vpop.f32.mrf.mxu0  ;;  %v239_v7 = vpop.f32.mrf.mxu1 }
  0x8d   : > { %v235_v8 = vadd.f32 %v387_v5, %v234_v6  ;;  %v240_v9 = vadd.f32 %v387_v5, %v239_v7 }
  0x8f   : > { %v254_v10 = vmax.f32 %v235_v8, 0.0  ;;  %v256_v11 = vmax.f32 %v240_v9, 0.0 }
  0x91   : > { %v262_v12 = vpack.c.bf16 %v254_v10, %v254_v10  ;;  %v264_v13 = vpack.c.bf16 %v256_v11, %v256_v11 }
  0x93   : > { %271 = vst.msk [vmem:[%s436_s24] sm:$0xf] %vm270_vm1, %v262_v12  ;;  %v244_v14 = vpop.f32.mrf.mxu2  ;;  %v249_v15 = vpop.f32.mrf.mxu3 }
  0x94   : > { %273 = vst.msk [vmem:[%s436_s24 + $0x8] sm:$0xf] %vm270_vm1, %v264_v13  ;;  %v245_v16 = vadd.f32 %v387_v5, %v244_v14  ;;  %v250_v17 = vadd.f32 %v387_v5, %v249_v15  ;;  %v236_v18 = vpop.f32.mrf.mxu0  ;;  %v241_v19 = vpop.f32.mrf.mxu1 }
  0x95   : > { %v237_v20 = vadd.f32 %v387_v5, %v236_v18  ;;  %v242_v21 = vadd.f32 %v387_v5, %v241_v19 }
  0x96   : > { %v258_v22 = vmax.f32 %v245_v16, 0.0  ;;  %v260_v23 = vmax.f32 %v250_v17, 0.0 }
  0x97   : > { %v255_v24 = vmax.f32 %v237_v20, 0.0  ;;  %v257_v25 = vmax.f32 %v242_v21, 0.0 }
  0x98   : > { %v266_v26 = vpack.c.bf16 %v258_v22, %v258_v22  ;;  %v268_v27 = vpack.c.bf16 %v260_v23, %v260_v23 }
  0x99   : > { %v263_v28 = vpack.c.bf16 %v255_v24, %v255_v24  ;;  %v265_v29 = vpack.c.bf16 %v257_v25, %v257_v25 }
  0x9a   : > { %275 = vst.msk [vmem:[%s436_s24 + $0x10] sm:$0xf] %vm270_vm1, %v266_v26 }
  0x9b   : > { %277 = vst.msk [vmem:[%s436_s24 + $0x18] sm:$0xf] %vm270_vm1, %v268_v27  ;;  %v246_v30 = vpop.f32.mrf.mxu2  ;;  %v251_v31 = vpop.f32.mrf.mxu3 }
  0x9c   : > { %272 = vst.msk [vmem:[%s436_s24 + $0x4] sm:$0xf] %vm270_vm1, %v263_v28  ;;  %v247_v32 = vadd.f32 %v387_v5, %v246_v30  ;;  %v252_v33 = vadd.f32 %v387_v5, %v251_v31 }
  0x9d   : > { %274 = vst.msk [vmem:[%s436_s24 + $0xc] sm:$0xf] %vm270_vm1, %v265_v29 }
  0x9e   : > { %v259_v34 = vmax.f32 %v247_v32, 0.0  ;;  %v261_v35 = vmax.f32 %v252_v33, 0.0 }
  0xa0   : > { %v267_v36 = vpack.c.bf16 %v259_v34, %v259_v34  ;;  %v269_v37 = vpack.c.bf16 %v261_v35, %v261_v35 }
  0xa2   : > { %276 = vst.msk [vmem:[%s436_s24 + $0x14] sm:$0xf] %vm270_vm1, %v267_v36 }
  0xa3   : > { %278 = vst.msk [vmem:[%s436_s24 + $0x1c] sm:$0xf] %vm270_vm1, %v269_v37 }
  0xa4 PF: > { %s13_s12 = sadd.s32 1, %s394_s12  }
  0xa5   : > { %p10_p4 = scmp.ge.s32.totalorder %s13_s12, 4  }
  0xa7   :  { %12 = sbr.rel (!%p10_p4) target bundleno = 1 (0x1), region = 62 }

// kernel: _lambda_.31
= control target key start
LH: loop header
LB: loop body
LE: loop exit
PB: predicated region body
PF: predicated region fallthrough
CT: control target
= control target key end

     0   :  { %s330_s12 = smov 0   ;;  %s353_s0 = inlined_call_operand.vmem [shape: bf16[2,16,16], index: 0, kind: input, shape index: {}]   ;;  %s354_s1 = inlined_call_operand.vmem [shape: bf16[16,24], index: 1, kind: input, shape index: {}]   ;;  %s355_s2 = inlined_call_operand.vmem [shape: f32[1,24], index: 2, kind: input, shape index: {}]   ;;  %s356_s3 = inlined_call_operand.vmem [shape: bf16[2,16,24], index: 3, kind: output, shape index: {}]  }
   0x1 LB: > { %s269_s13 = sadd.s32 4294967295, %s308_s12   ;;  %p273_p0 = scmp.ge.s32.totalorder %s308_s12, 1  ;;  %s308_s12 = sphi %s330_s12, %s13_s12  }
   0x2   : > { %p137_p1 = scmp.lt.s32.totalorder %s308_s12, 3 }
   0x4   : > { %p138_p2 = pnand %p273_p0, %p137_p1 }
   0x5   : > { %p161_p3 = scmp.lt.s32.totalorder (!%p138_p2), %s269_s13, 1 }
   0x6   : > { %141 = sbr.rel (%p138_p2) target bundleno = 154 (0x9a), region = 32 }
   0xb   : > { %v292_v0 = vld [vmem:[%s354_s1] sm:$0xff]  ;;  %s358_s13 = smov (!%p161_p3, %s269_s13), 1  ;;  %vm191_vm0 = vcmask 130048   ;;  %vm211_vm1 = vcmask 191488  }
   0xc   : > { %202 = vmatpush.bf16.msra.mxu0 %v292_v0  ;;  %s289_s16 = sshll.u32 %s358_s13, 3  ;;  %v301_v2 = vld [vmem:[%s355_s2] ss:$0 sm:$0xff] }
   0xd   : > { %s165_s19 = scalar_lea.vmem %s353_s0, %s289_s16  ;;  %s170_s24 = scalar_lea.vmem %s356_s3, %s289_s16 }
   0xe   : > { %v291_v1 = vld [vmem:[%s165_s19] sm:$0xff] }
   0xf   : > { %286 = vmatmul.msk.bf16.vlgmr.msra.gmra.mxu0 %vm191_vm0, %v291_v1 }
  0x8c   : > { %v204_v3 = vpop.f32.mrf.mxu0 }
  0x8d   : > { %v205_v4 = vadd.f32 %v301_v2, %v204_v3 }
  0x8f   : > { %v209_v5 = vpack.c.bf16 %v205_v4, %v205_v4 }
  0x91   : > { %212 = vst.msk [vmem:[%s170_s24] sm:$0xf] %vm211_vm1, %v209_v5 }
  0x94   : > { %v206_v6 = vpop.f32.mrf.mxu0 }
  0x95   : > { %v207_v7 = vadd.f32 %v301_v2, %v206_v6 }
  0x97   : > { %v210_v8 = vpack.c.bf16 %v207_v7, %v207_v7 }
  0x99   : > { %213 = vst.msk [vmem:[%s170_s24 + $0x4] sm:$0xf] %vm211_vm1, %v210_v8 }
  0x9a PF: > { %s13_s12 = sadd.s32 1, %s308_s12  }
  0x9b   : > { %p10_p4 = scmp.ge.s32.totalorder %s13_s12, 4  }
  0x9d   :  { %12 = sbr.rel (!%p10_p4) target bundleno = 1 (0x1), region = 62 }

// kernel: _lambda_.28
= control target key start
LH: loop header
LB: loop body
LE: loop exit
PB: predicated region body
PF: predicated region fallthrough
CT: control target
= control target key end

     0   :  { %s1048_s12 = smov 0   ;;  %s1525_s0 = inlined_call_operand.vmem [shape: bf16[2,10,10,24], index: 0, kind: input, shape index: {}]   ;;  %s1526_s1 = inlined_call_operand.vmem [shape: f32[9,24], index: 1, kind: input, shape index: {}]   ;;  %s1527_s2 = inlined_call_operand.vmem [shape: f32[1,24], index: 2, kind: input, shape index: {}]   ;;  %s1528_s3 = inlined_call_operand.vmem [shape: bf16[2,8,8,48], index: 3, kind: output, shape index: {}]  }
   0x1 LB: > { %s976_s13 = sadd.s32 4294967295, %s1025_s12   ;;  %p980_p0 = scmp.ge.s32.totalorder %s1025_s12, 1  ;;  %s1025_s12 = sphi %s1048_s12, %s13_s12  }
   0x2   : > { %p137_p1 = scmp.lt.s32.totalorder %s1025_s12, 3 }
   0x4   : > { %p138_p2 = pnand %p980_p0, %p137_p1 }
   0x5   : > { %p161_p3 = scmp.lt.s32.totalorder (!%p138_p2), %s976_s13, 1  ;;  %s1027_s24 = smov (!%p138_p2), 24  }
   0x6   : > { %141 = sbr.rel (%p138_p2) target bundleno = 251 (0xfb), region = 32 }
   0xb   : > { %s1532_s13 = smov (!%p161_p3, %s976_s13), 1  ;;  %v211_v0 = vld [vmem:[%s1526_s1] sm:$0xff]  ;;  %vm255_vm0 = vcmask 1046528   ;;  %vm329_vm1 = vcmask 1045504   ;;  %vm756_vm2 = vcmask 195584   ;;  %vm912_vm5 = vcmask 388096  }
   0xc   : > { %s987_s16 = smul.u32 80, %s1532_s13  ;;  %v1062_v1 = vperm.slane %v211_v0, 0  ;;  %v1064_v2 = vperm.slane %v211_v0, 1  ;;  %v1066_v3 = vperm.slane %v211_v0, 2  ;;  %v1073_v4 = vperm.slane %v211_v0, 3  ;;  %s986_s25 = sshll.u32 %s1532_s13, 5 }
   0xd   : > { %v1075_v5 = vperm.slane %v211_v0, 4  ;;  %v1077_v6 = vperm.slane %v211_v0, 5  ;;  %v1079_v7 = vperm.slane %v211_v0, 6  ;;  %v1101_v22 = vperm.slane %v211_v0, 7  ;;  %s1472_s28 = scalar_lea.vmem %s1528_s3, %s986_s25 }
   0xe   : > { %s1071_s19 = scalar_lea.vmem %s1525_s0, %s987_s16  ;;  %vm789_vm3 = vsmask.f32 3328  ;;  %vm790_vm4 = vsmask.f32 7440 }
   0xf   : > { %v179_v8 = vld [vmem:[%s1071_s19 + $0x20] sm:$0xf]  ;;  %v180_v9 = vld [vmem:[%s1071_s19 + $0x24] sm:$0x1]  ;;  %v181_v10 = vld [vmem:[%s1071_s19 + $0x28] sm:$0xf] }
  0x10   : > { %v182_v11 = vld [vmem:[%s1071_s19 + $0x2c] sm:$0x1]  ;;  %v183_v12 = vld [vmem:[%s1071_s19 + $0x30] sm:$0xf]  ;;  %v184_v13 = vld [vmem:[%s1071_s19 + $0x34] sm:$0x1]  ;;  %v1087_v14 = vunpack.c.l.bf16 %v179_v8  ;;  %v1089_v15 = vunpack.c.l.bf16 %v180_v9  ;;  %v1091_v16 = vunpack.c.l.bf16 %v181_v10 }
  0x11   : > { %v185_v17 = vld [vmem:[%s1071_s19 + $0x38] sm:$0xf]  ;;  %v186_v18 = vld [vmem:[%s1071_s19 + $0x3c] sm:$0x1]  ;;  %v1095_v19 = vunpack.c.l.bf16 %v182_v11  ;;  %v1097_v20 = vunpack.c.l.bf16 %v183_v12  ;;  %v1099_v21 = vunpack.c.l.bf16 %v184_v13  ;;  %vm1465_vm6 = vmor %vm789_vm3, %vm790_vm4 }
  0x12   : > { %v1103_v23 = vunpack.c.l.bf16 %v185_v17  ;;  %v1105_v24 = vunpack.c.l.bf16 %v186_v18  ;;  %v218_v25 = vmul.f32 %v1062_v1, %v1087_v14  ;;  %v219_v26 = vmul.f32 %v1062_v1, %v1091_v16  ;;  %v1156_v17 = vld [vmem:[%s1526_s1 + $0x8] ss:$0 sm:$0xff] }
  0x13   : > { %v231_v27 = vmul.f32 %v1064_v2, %v1087_v14  ;;  %v232_v28 = vmul.f32 %v1064_v2, %v1089_v15  ;;  %v233_v29 = vmul.f32 %v1064_v2, %v1091_v16  ;;  %v234_v30 = vmul.f32 %v1064_v2, %v1095_v19 }
  0x14   : > { %v305_v31 = vmul.f32 %v1066_v3, %v1087_v14  ;;  %v306_v32 = vmul.f32 %v1066_v3, %v1089_v15  ;;  %v307_v33 = vmul.f32 %v1066_v3, %v1091_v16  ;;  %v308_v34 = vmul.f32 %v1066_v3, %v1095_v19 }
  0x15   : > { %v268_v35 = vrot.slane %v231_v27, 1  ;;  %v269_v36 = vrot.slane %v232_v28, 1  ;;  %v271_v37 = vrot.slane %v233_v29, 1  ;;  %v272_v38 = vrot.slane %v234_v30, 1 }
  0x16   : > { %v342_v39 = vrot.slane %v305_v31, 2  ;;  %v343_v40 = vrot.slane %v306_v32, 2  ;;  %v345_v41 = vrot.slane %v307_v33, 2  ;;  %v346_v42 = vrot.slane %v308_v34, 2 }
  0x17   : > { %v270_v43 = vsel %vm255_vm0, %v268_v35, %v269_v36  ;;  %v273_v44 = vsel %vm255_vm0, %v271_v37, %v272_v38  ;;  %v375_v45 = vmul.f32 %v1073_v4, %v1091_v16  ;;  %v376_v46 = vmul.f32 %v1073_v4, %v1097_v20 }
  0x18   : > { %v292_v47 = vadd.f32 %v270_v43, %v218_v25  ;;  %v293_v48 = vadd.f32 %v273_v44, %v219_v26  ;;  %v344_v49 = vsel %vm329_vm1, %v342_v39, %v343_v40  ;;  %v347_v50 = vsel %vm329_vm1, %v345_v41, %v346_v42  ;;  %v171_v40 = vld [vmem:[%s1071_s19] sm:$0xf] }
  0x19   : > { %v396_v51 = vmul.f32 %v1075_v5, %v1091_v16  ;;  %v397_v52 = vmul.f32 %v1075_v5, %v1095_v19  ;;  %v398_v53 = vmul.f32 %v1075_v5, %v1097_v20  ;;  %v399_v54 = vmul.f32 %v1075_v5, %v1099_v21 }
  0x1a   : > { %v366_v55 = vadd.f32 %v344_v49, %v292_v47  ;;  %v367_v56 = vadd.f32 %v347_v50, %v293_v48  ;;  %v469_v57 = vmul.f32 %v1077_v6, %v1091_v16  ;;  %v470_v58 = vmul.f32 %v1077_v6, %v1095_v19  ;;  %v1185_v50 = vld [vmem:[%s1527_s2] ss:$0 sm:$0xff] }
  0x1b   : > { %v432_v59 = vrot.slane %v396_v51, 1  ;;  %v433_v60 = vrot.slane %v397_v52, 1  ;;  %v435_v61 = vrot.slane %v398_v53, 1  ;;  %v436_v62 = vrot.slane %v399_v54, 1  ;;  %v173_v51 = vld [vmem:[%s1071_s19 + $0x8] sm:$0xf] }
  0x1c   : > { %v383_v63 = vadd.f32 %v375_v45, %v366_v55  ;;  %v384_v0 = vadd.f32 %v376_v46, %v367_v56  ;;  %v471_v8 = vmul.f32 %v1077_v6, %v1097_v20  ;;  %v472_v9 = vmul.f32 %v1077_v6, %v1099_v21  ;;  %v172_v45 = vld [vmem:[%s1071_s19 + $0x4] sm:$0x1]  ;;  %v174_v52 = vld [vmem:[%s1071_s19 + $0xc] sm:$0x1]  ;;  %v175_v56 = vld [vmem:[%s1071_s19 + $0x10] sm:$0xf] }
  0x1d   : > { %v434_v10 = vsel %vm255_vm0, %v432_v59, %v433_v60  ;;  %v437_v11 = vsel %vm255_vm0, %v435_v61, %v436_v62  ;;  %v505_v12 = vrot.slane %v469_v57, 2  ;;  %v506_v13 = vrot.slane %v470_v58, 2  ;;  %v176_v57 = vld [vmem:[%s1071_s19 + $0x14] sm:$0x1] }
  0x1e   : > { %v456_v18 = vadd.f32 %v434_v10, %v383_v63  ;;  %v457_v25 = vadd.f32 %v437_v11, %v384_v0  ;;  %v508_v26 = vrot.slane %v471_v8, 2  ;;  %v509_v27 = vrot.slane %v472_v9, 2  ;;  %v177_v63 = vld [vmem:[%s1071_s19 + $0x18] sm:$0xf]  ;;  %v178_v0 = vld [vmem:[%s1071_s19 + $0x1c] sm:$0x1] }
  0x1f   : > { %v507_v28 = vsel %vm329_vm1, %v505_v12, %v506_v13  ;;  %v538_v29 = vmul.f32 %v1079_v7, %v1097_v20  ;;  %v539_v30 = vmul.f32 %v1079_v7, %v1103_v23  ;;  %v559_v31 = vmul.f32 %v1101_v22, %v1097_v20 }
  0x20   : > { %v510_v32 = vsel %vm329_vm1, %v508_v26, %v509_v27  ;;  %v529_v33 = vadd.f32 %v507_v28, %v456_v18  ;;  %v560_v34 = vmul.f32 %v1101_v22, %v1099_v21  ;;  %v561_v35 = vmul.f32 %v1101_v22, %v1103_v23 }
  0x21   : > { %v530_v36 = vadd.f32 %v510_v32, %v457_v25  ;;  %v562_v37 = vmul.f32 %v1101_v22, %v1105_v24  ;;  %v595_v38 = vrot.slane %v559_v31, 1  ;;  %v632_v39 = vmul.f32 %v1156_v17, %v1097_v20 }
  0x22   : > { %v546_v41 = vadd.f32 %v538_v29, %v529_v33  ;;  %v596_v42 = vrot.slane %v560_v34, 1  ;;  %v598_v43 = vrot.slane %v561_v35, 1  ;;  %v633_v44 = vmul.f32 %v1156_v17, %v1099_v21 }
  0x23   : > { %v547_v46 = vadd.f32 %v539_v30, %v530_v36  ;;  %v599_v47 = vrot.slane %v562_v37, 1  ;;  %v634_v48 = vmul.f32 %v1156_v17, %v1103_v23  ;;  %v635_v49 = vmul.f32 %v1156_v17, %v1105_v24 }
  0x24   : > { %v597_v53 = vsel %vm255_vm0, %v595_v38, %v596_v42  ;;  %v668_v54 = vrot.slane %v632_v39, 2  ;;  %v669_v55 = vrot.slane %v633_v44, 2  ;;  %v191_v58 = vunpack.c.l.bf16 %v171_v40 }
  0x25   : > { %v600_v59 = vsel %vm255_vm0, %v598_v43, %v599_v47  ;;  %v619_v60 = vadd.f32 %v597_v53, %v546_v41  ;;  %v671_v61 = vrot.slane %v634_v48, 2  ;;  %v672_v62 = vrot.slane %v635_v49, 2 }
  0x26   : > { %v620_v8 = vadd.f32 %v600_v59, %v547_v46  ;;  %v670_v9 = vsel %vm329_vm1, %v668_v54, %v669_v55  ;;  %v192_v10 = vunpack.c.l.bf16 %v172_v45  ;;  %v1196_v11 = vunpack.c.l.bf16 %v173_v51 }
  0x27   : > { %v673_v12 = vsel %vm329_vm1, %v671_v61, %v672_v62  ;;  %v692_v13 = vadd.f32 %v670_v9, %v619_v60  ;;  %v1199_v18 = vunpack.c.l.bf16 %v174_v52  ;;  %v1201_v25 = vunpack.c.l.bf16 %v175_v56 }
  0x28   : > { %v693_v26 = vadd.f32 %v673_v12, %v620_v8  ;;  %v1203_v27 = vunpack.c.l.bf16 %v176_v57  ;;  %v1205_v28 = vunpack.c.l.bf16 %v177_v63  ;;  %v1207_v29 = vunpack.c.l.bf16 %v178_v0 }
  0x29   : > { %v704_v30 = vadd.f32 %v1185_v50, %v692_v13  ;;  %v214_v31 = vmul.f32 %v1062_v1, %v191_v58  ;;  %v215_v32 = vmul.f32 %v1062_v1, %v1196_v11  ;;  %v223_v33 = vmul.f32 %v1064_v2, %v191_v58 }
  0x2a   : > { %v705_v34 = vadd.f32 %v1185_v50, %v693_v26  ;;  %v224_v35 = vmul.f32 %v1064_v2, %v192_v10  ;;  %v225_v36 = vmul.f32 %v1064_v2, %v1196_v11  ;;  %v226_v37 = vmul.f32 %v1064_v2, %v1199_v18 }
  0x2b   : > { %v712_v38 = vmax.f32 %v704_v30, 0.0  ;;  %v256_v39 = vrot.slane %v223_v33, 1  ;;  %v297_v40 = vmul.f32 %v1066_v3, %v191_v58  ;;  %v298_v41 = vmul.f32 %v1066_v3, %v192_v10 }
  0x2c   : > { %v713_v42 = vmax.f32 %v705_v34, 0.0  ;;  %v257_v43 = vrot.slane %v224_v35, 1  ;;  %v259_v44 = vrot.slane %v225_v36, 1  ;;  %v260_v45 = vrot.slane %v226_v37, 1 }
  0x2d   : > { %v728_v46 = vrot.slane %v712_v38, 7  ;;  %v299_v47 = vmul.f32 %v1066_v3, %v1196_v11  ;;  %v300_v48 = vmul.f32 %v1066_v3, %v1199_v18  ;;  %v330_v49 = vrot.slane %v297_v40, 2 }
  0x2e   : > { %v729_v51 = vrot.slane %v713_v42, 7  ;;  %v258_v52 = vsel %vm255_vm0, %v256_v39, %v257_v43  ;;  %v261_v53 = vsel %vm255_vm0, %v259_v44, %v260_v45  ;;  %v331_v54 = vrot.slane %v298_v41, 2 }
  0x2f   : > { %v288_v55 = vadd.f32 %v258_v52, %v214_v31  ;;  %v289_v56 = vadd.f32 %v261_v53, %v215_v32  ;;  %v333_v57 = vrot.slane %v299_v47, 2  ;;  %v334_v58 = vrot.slane %v300_v48, 2 }
  0x30   : > { %v1007_v59 = vpack.i.bf16 %v729_v51, %v728_v46  ;;  %v332_v60 = vsel %vm329_vm1, %v330_v49, %v331_v54  ;;  %v371_v61 = vmul.f32 %v1073_v4, %v1196_v11  ;;  %v372_v62 = vmul.f32 %v1073_v4, %v1201_v25 }
  0x31   : > { %v335_v63 = vsel %vm329_vm1, %v333_v57, %v334_v58  ;;  %v362_v0 = vadd.f32 %v332_v60, %v288_v55  ;;  %v388_v8 = vmul.f32 %v1075_v5, %v1196_v11  ;;  %v389_v9 = vmul.f32 %v1075_v5, %v1199_v18 }
  0x32   : > { %1008 = vrot.lane.b32.xlu1 %v1007_v59, %s1027_s24  ;;  %v363_v10 = vadd.f32 %v335_v63, %v289_v56  ;;  %v390_v12 = vmul.f32 %v1075_v5, %v1201_v25  ;;  %v391_v13 = vmul.f32 %v1075_v5, %v1203_v27  ;;  %v461_v26 = vmul.f32 %v1077_v6, %v1196_v11 }
  0x33   : > { %v379_v30 = vadd.f32 %v371_v61, %v362_v0  ;;  %v420_v31 = vrot.slane %v388_v8, 1  ;;  %v421_v32 = vrot.slane %v389_v9, 1  ;;  %v462_v33 = vmul.f32 %v1077_v6, %v1199_v18 }
  0x34   : > { %v380_v34 = vadd.f32 %v372_v62, %v363_v10  ;;  %v423_v35 = vrot.slane %v390_v12, 1  ;;  %v424_v36 = vrot.slane %v391_v13, 1  ;;  %v463_v37 = vmul.f32 %v1077_v6, %v1201_v25  ;;  %v187_v10 = vld [vmem:[%s1071_s19 + $0x40] sm:$0xf]  ;;  %v188_v12 = vld [vmem:[%s1071_s19 + $0x44] sm:$0x1] }
  0x35   : > { %v422_v38 = vsel %vm255_vm0, %v420_v31, %v421_v32  ;;  %v464_v39 = vmul.f32 %v1077_v6, %v1203_v27  ;;  %v493_v40 = vrot.slane %v461_v26, 2  ;;  %v494_v41 = vrot.slane %v462_v33, 2  ;;  %v189_v32 = vld [vmem:[%s1071_s19 + $0x48] sm:$0xf]  ;;  %v1280_v33 = vld [vmem:[%s1071_s19 + $0x4c] sm:$0x1] }
  0x36   : > { %v425_v42 = vsel %vm255_vm0, %v423_v35, %v424_v36  ;;  %v452_v43 = vadd.f32 %v422_v38, %v379_v30  ;;  %v496_v44 = vrot.slane %v463_v37, 2  ;;  %v534_v45 = vmul.f32 %v1079_v7, %v1201_v25 }
  0x37   : > { %v453_v46 = vadd.f32 %v425_v42, %v380_v34  ;;  %v495_v47 = vsel %vm329_vm1, %v493_v40, %v494_v41  ;;  %v497_v48 = vrot.slane %v464_v39, 2  ;;  %v535_v49 = vmul.f32 %v1079_v7, %v1205_v28 }
  0x38   : > { %v525_v51 = vadd.f32 %v495_v47, %v452_v43  ;;  %v551_v52 = vmul.f32 %v1101_v22, %v1201_v25  ;;  %v552_v53 = vmul.f32 %v1101_v22, %v1203_v27  ;;  %v553_v54 = vmul.f32 %v1101_v22, %v1205_v28 }
  0x39   : > { %v498_v55 = vsel %vm329_vm1, %v496_v44, %v497_v48  ;;  %v554_v56 = vmul.f32 %v1101_v22, %v1207_v29  ;;  %v624_v57 = vmul.f32 %v1156_v17, %v1201_v25  ;;  %v625_v58 = vmul.f32 %v1156_v17, %v1203_v27 }
  0x3a   : > { %v526_v59 = vadd.f32 %v498_v55, %v453_v46  ;;  %v542_v60 = vadd.f32 %v534_v45, %v525_v51  ;;  %v583_v61 = vrot.slane %v551_v52, 1  ;;  %v584_v62 = vrot.slane %v552_v53, 1 }
  0x3b   : > { %v586_v63 = vrot.slane %v553_v54, 1  ;;  %v587_v0 = vrot.slane %v554_v56, 1  ;;  %v626_v8 = vmul.f32 %v1156_v17, %v1205_v28  ;;  %v627_v9 = vmul.f32 %v1156_v17, %v1207_v29 }
  0x3c   : > { %v543_v13 = vadd.f32 %v535_v49, %v526_v59  ;;  %v585_v26 = vsel %vm255_vm0, %v583_v61, %v584_v62  ;;  %v656_v30 = vrot.slane %v624_v57, 2  ;;  %v657_v31 = vrot.slane %v625_v58, 2 }
  0x3d   : > { %v588_v34 = vsel %vm255_vm0, %v586_v63, %v587_v0  ;;  %v615_v35 = vadd.f32 %v585_v26, %v542_v60  ;;  %v659_v36 = vrot.slane %v626_v8, 2  ;;  %v660_v37 = vrot.slane %v627_v9, 2 }
  0x3e   : > { %v616_v38 = vadd.f32 %v588_v34, %v543_v13  ;;  %v658_v39 = vsel %vm329_vm1, %v656_v30, %v657_v31  ;;  %v1284_v40 = vunpack.c.l.bf16 %v187_v10  ;;  %v1286_v41 = vunpack.c.l.bf16 %v188_v12 }
  0x3f   : > { %v661_v42 = vsel %vm329_vm1, %v659_v36, %v660_v37  ;;  %v688_v43 = vadd.f32 %v658_v39, %v615_v35  ;;  %v1289_v44 = vunpack.c.l.bf16 %v189_v32  ;;  %v210_v45 = vunpack.c.l.bf16 %v1280_v33 }
  0x40   : > { %v689_v46 = vadd.f32 %v661_v42, %v616_v38  ;;  %v220_v47 = vmul.f32 %v1062_v1, %v1097_v20  ;;  %v221_v48 = vmul.f32 %v1062_v1, %v1103_v23  ;;  %v235_v49 = vmul.f32 %v1064_v2, %v1097_v20 }
  0x41   : > { %v700_v51 = vadd.f32 %v1185_v50, %v688_v43  ;;  %v236_v52 = vmul.f32 %v1064_v2, %v1099_v21  ;;  %v237_v53 = vmul.f32 %v1064_v2, %v1103_v23  ;;  %v238_v54 = vmul.f32 %v1064_v2, %v1105_v24 }
  0x42   : > { %v701_v55 = vadd.f32 %v1185_v50, %v689_v46  ;;  %v274_v56 = vrot.slane %v235_v49, 1  ;;  %v309_v57 = vmul.f32 %v1066_v3, %v1097_v20  ;;  %v310_v58 = vmul.f32 %v1066_v3, %v1099_v21 }
  0x43   : > { %v708_v59 = vmax.f32 %v700_v51, 0.0  ;;  %v275_v60 = vrot.slane %v236_v52, 1  ;;  %v277_v61 = vrot.slane %v237_v53, 1  ;;  %v278_v62 = vrot.slane %v238_v54, 1 }
  0x44   : > { %v709_v63 = vmax.f32 %v701_v55, 0.0  ;;  %v311_v0 = vmul.f32 %v1066_v3, %v1103_v23  ;;  %v312_v8 = vmul.f32 %v1066_v3, %v1105_v24  ;;  %v348_v9 = vrot.slane %v309_v57, 2 }
  0x45   : > { %v724_v10 = vrot.slane %v708_v59, 7  ;;  %v276_v12 = vsel %vm255_vm0, %v274_v56, %v275_v60  ;;  %v279_v13 = vsel %vm255_vm0, %v277_v61, %v278_v62  ;;  %v349_v26 = vrot.slane %v310_v58, 2 }
  0x46   : > { %v725_v30 = vrot.slane %v709_v63, 7  ;;  %v294_v31 = vadd.f32 %v276_v12, %v220_v47  ;;  %v295_v32 = vadd.f32 %v279_v13, %v221_v48  ;;  %v351_v34 = vrot.slane %v311_v0, 2 }
  0x47   : > { %v350_v35 = vsel %vm329_vm1, %v348_v9, %v349_v26  ;;  %v352_v36 = vrot.slane %v312_v8, 2  ;;  %v377_v37 = vmul.f32 %v1073_v4, %v1103_v23  ;;  %v378_v38 = vmul.f32 %v1073_v4, %v1284_v40 }
  0x48   : > { %v997_v39 = vpack.i.bf16 %v725_v30, %v724_v10  ;;  %v368_v42 = vadd.f32 %v350_v35, %v294_v31  ;;  %v400_v43 = vmul.f32 %v1075_v5, %v1103_v23  ;;  %v401_v46 = vmul.f32 %v1075_v5, %v1105_v24 }
  0x49   : > { %v353_v47 = vsel %vm329_vm1, %v351_v34, %v352_v36  ;;  %v402_v48 = vmul.f32 %v1075_v5, %v1284_v40  ;;  %v403_v49 = vmul.f32 %v1075_v5, %v1286_v41  ;;  %v473_v51 = vmul.f32 %v1077_v6, %v1103_v23 }
  0x4a   : > { %998 = vrot.lane.b32.xlu0 %v997_v39, %s1027_s24  ;;  %v369_v52 = vadd.f32 %v353_v47, %v295_v32  ;;  %v385_v53 = vadd.f32 %v377_v37, %v368_v42  ;;  %v438_v54 = vrot.slane %v400_v43, 1  ;;  %v439_v55 = vrot.slane %v401_v46, 1 }
  0x4b   : > { %v441_v56 = vrot.slane %v402_v48, 1  ;;  %v442_v57 = vrot.slane %v403_v49, 1  ;;  %v474_v58 = vmul.f32 %v1077_v6, %v1105_v24  ;;  %v475_v59 = vmul.f32 %v1077_v6, %v1284_v40 }
  0x4c   : > { %v386_v60 = vadd.f32 %v378_v38, %v369_v52  ;;  %v440_v61 = vsel %vm255_vm0, %v438_v54, %v439_v55  ;;  %v476_v62 = vmul.f32 %v1077_v6, %v1286_v41  ;;  %v511_v63 = vrot.slane %v473_v51, 2 }
  0x4d   : > { %v443_v0 = vsel %vm255_vm0, %v441_v56, %v442_v57  ;;  %v458_v8 = vadd.f32 %v440_v61, %v385_v53  ;;  %v512_v9 = vrot.slane %v474_v58, 2  ;;  %v514_v10 = vrot.slane %v475_v59, 2 }
  0x4e   : > { %v459_v12 = vadd.f32 %v443_v0, %v386_v60  ;;  %v515_v13 = vrot.slane %v476_v62, 2  ;;  %v540_v26 = vmul.f32 %v1079_v7, %v1284_v40  ;;  %v541_v30 = vmul.f32 %v1079_v7, %v1289_v44 }
  0x4f   : > { %v513_v31 = vsel %vm329_vm1, %v511_v63, %v512_v9  ;;  %v563_v32 = vmul.f32 %v1101_v22, %v1284_v40  ;;  %v564_v34 = vmul.f32 %v1101_v22, %v1286_v41  ;;  %v565_v35 = vmul.f32 %v1101_v22, %v1289_v44 }
  0x50   : > { %v516_v36 = vsel %vm329_vm1, %v514_v10, %v515_v13  ;;  %v531_v37 = vadd.f32 %v513_v31, %v458_v8  ;;  %v566_v38 = vmul.f32 %v1101_v22, %v210_v45  ;;  %v636_v39 = vmul.f32 %v1156_v17, %v1284_v40 }
  0x51   : > { %v532_v42 = vadd.f32 %v516_v36, %v459_v12  ;;  %v601_v43 = vrot.slane %v563_v32, 1  ;;  %v602_v46 = vrot.slane %v564_v34, 1  ;;  %v604_v47 = vrot.slane %v565_v35, 1 }
  0x52   : > { %v548_v48 = vadd.f32 %v540_v26, %v531_v37  ;;  %v605_v49 = vrot.slane %v566_v38, 1  ;;  %v637_v51 = vmul.f32 %v1156_v17, %v1286_v41  ;;  %v638_v52 = vmul.f32 %v1156_v17, %v1289_v44 }
  0x53   : > { %v549_v53 = vadd.f32 %v541_v30, %v532_v42  ;;  %v603_v54 = vsel %vm255_vm0, %v601_v43, %v602_v46  ;;  %v639_v55 = vmul.f32 %v1156_v17, %v210_v45  ;;  %v674_v56 = vrot.slane %v636_v39, 2 }
  0x54   : > { %v606_v57 = vsel %vm255_vm0, %v604_v47, %v605_v49  ;;  %v621_v58 = vadd.f32 %v603_v54, %v548_v48  ;;  %v675_v59 = vrot.slane %v637_v51, 2  ;;  %v677_v60 = vrot.slane %v638_v52, 2 }
  0x55   : > { %v622_v61 = vadd.f32 %v606_v57, %v549_v53  ;;  %v678_v62 = vrot.slane %v639_v55, 2  ;;  %v216_v63 = vmul.f32 %v1062_v1, %v1201_v25  ;;  %v217_v44 = vmul.f32 %v1062_v1, %v1205_v28 }
  0x56   : > { %v676_v0 = vsel %vm329_vm1, %v674_v56, %v675_v59  ;;  %v227_v33 = vmul.f32 %v1064_v2, %v1201_v25  ;;  %v228_v45 = vmul.f32 %v1064_v2, %v1203_v27  ;;  %v229_v8 = vmul.f32 %v1064_v2, %v1205_v28 }
  0x57   : > { %v679_v9 = vsel %vm329_vm1, %v677_v60, %v678_v62  ;;  %v694_v10 = vadd.f32 %v676_v0, %v621_v58  ;;  %v230_v12 = vmul.f32 %v1064_v2, %v1207_v29  ;;  %v301_v1 = vmul.f32 %v1066_v3, %v1201_v25 }
  0x58   : > { %v695_v13 = vadd.f32 %v679_v9, %v622_v61  ;;  %v262_v26 = vrot.slane %v227_v33, 1  ;;  %v263_v30 = vrot.slane %v228_v45, 1  ;;  %v265_v31 = vrot.slane %v229_v8, 1 }
  0x59   : > { %v706_v32 = vadd.f32 %v1185_v50, %v694_v10  ;;  %v266_v34 = vrot.slane %v230_v12, 1  ;;  %v302_v35 = vmul.f32 %v1066_v3, %v1203_v27  ;;  %v303_v36 = vmul.f32 %v1066_v3, %v1205_v28 }
  0x5a   : > { %v707_v37 = vadd.f32 %v1185_v50, %v695_v13  ;;  %v264_v2 = vsel %vm255_vm0, %v262_v26, %v263_v30  ;;  %v304_v38 = vmul.f32 %v1066_v3, %v1207_v29  ;;  %v336_v39 = vrot.slane %v301_v1, 2 }
  0x5b   : > { %v714_v42 = vmax.f32 %v706_v32, 0.0  ;;  %v267_v43 = vsel %vm255_vm0, %v265_v31, %v266_v34  ;;  %v290_v46 = vadd.f32 %v264_v2, %v216_v63  ;;  %v337_v47 = vrot.slane %v302_v35, 2 }
  0x5c   : > { %v715_v48 = vmax.f32 %v707_v37, 0.0  ;;  %v291_v49 = vadd.f32 %v267_v43, %v217_v44  ;;  %v339_v51 = vrot.slane %v303_v36, 2  ;;  %v340_v52 = vrot.slane %v304_v38, 2 }
  0x5d   : > { %v730_v53 = vrot.slane %v714_v42, 7  ;;  %v338_v54 = vsel %vm329_vm1, %v336_v39, %v337_v47  ;;  %v373_v55 = vmul.f32 %v1073_v4, %v1205_v28  ;;  %v374_v56 = vmul.f32 %v1073_v4, %v1087_v14 }
  0x5e   : > { %v731_v3 = vrot.slane %v715_v48, 7  ;;  %v341_v57 = vsel %vm329_vm1, %v339_v51, %v340_v52  ;;  %v364_v58 = vadd.f32 %v338_v54, %v290_v46  ;;  %v392_v59 = vmul.f32 %v1075_v5, %v1205_v28 }
  0x5f   : > { %v365_v60 = vadd.f32 %v341_v57, %v291_v49  ;;  %v393_v61 = vmul.f32 %v1075_v5, %v1207_v29  ;;  %v394_v62 = vmul.f32 %v1075_v5, %v1087_v14  ;;  %v395_v63 = vmul.f32 %v1075_v5, %v1089_v15 }
  0x60   : > { %v1012_v44 = vpack.i.bf16 %v731_v3, %v730_v53  ;;  %v381_v0 = vadd.f32 %v373_v55, %v364_v58  ;;  %v426_v4 = vrot.slane %v392_v59, 1  ;;  %v465_v33 = vmul.f32 %v1077_v6, %v1205_v28 }
  0x61   : > { %v382_v45 = vadd.f32 %v374_v56, %v365_v60  ;;  %v427_v8 = vrot.slane %v393_v61, 1  ;;  %v429_v9 = vrot.slane %v394_v62, 1  ;;  %v430_v10 = vrot.slane %v395_v63, 1 }
  0x62   : > { %1013 = vrot.lane.b32.xlu1 %v1012_v44, %s1027_s24  ;;  %v466_v12 = vmul.f32 %v1077_v6, %v1207_v29  ;;  %v467_v1 = vmul.f32 %v1077_v6, %v1087_v14  ;;  %v468_v5 = vmul.f32 %v1077_v6, %v1089_v15  ;;  %v499_v13 = vrot.slane %v465_v33, 2 }
  0x63   : > { %v428_v26 = vsel %vm255_vm0, %v426_v4, %v427_v8  ;;  %v431_v30 = vsel %vm255_vm0, %v429_v9, %v430_v10  ;;  %v536_v31 = vmul.f32 %v1079_v7, %v1087_v14  ;;  %v537_v32 = vmul.f32 %v1079_v7, %v1091_v16 }
  0x64   : > { %v454_v34 = vadd.f32 %v428_v26, %v381_v0  ;;  %v455_v35 = vadd.f32 %v431_v30, %v382_v45  ;;  %v500_v36 = vrot.slane %v466_v12, 2  ;;  %v502_v37 = vrot.slane %v467_v1, 2 }
  0x65   : > { %v503_v2 = vrot.slane %v468_v5, 2  ;;  %v555_v38 = vmul.f32 %v1101_v22, %v1087_v14  ;;  %v556_v6 = vmul.f32 %v1101_v22, %v1089_v15  ;;  %v557_v39 = vmul.f32 %v1101_v22, %v1091_v16 }
  0x66   : > { %v501_v42 = vsel %vm329_vm1, %v499_v13, %v500_v36  ;;  %v558_v43 = vmul.f32 %v1101_v22, %v1095_v19  ;;  %v628_v7 = vmul.f32 %v1156_v17, %v1087_v14  ;;  %v629_v46 = vmul.f32 %v1156_v17, %v1089_v15 }
  0x67   : > { %v504_v47 = vsel %vm329_vm1, %v502_v37, %v503_v2  ;;  %v527_v48 = vadd.f32 %v501_v42, %v454_v34  ;;  %v589_v49 = vrot.slane %v555_v38, 1  ;;  %v590_v51 = vrot.slane %v556_v6, 1 }
  0x68   : > { %v528_v52 = vadd.f32 %v504_v47, %v455_v35  ;;  %v592_v53 = vrot.slane %v557_v39, 1  ;;  %v593_v54 = vrot.slane %v558_v43, 1  ;;  %v630_v55 = vmul.f32 %v1156_v17, %v1091_v16 }
  0x69   : > { %v544_v56 = vadd.f32 %v536_v31, %v527_v48  ;;  %v591_v22 = vsel %vm255_vm0, %v589_v49, %v590_v51  ;;  %v631_v3 = vmul.f32 %v1156_v17, %v1095_v19  ;;  %v662_v57 = vrot.slane %v628_v7, 2 }
  0x6a   : > { %v545_v58 = vadd.f32 %v537_v32, %v528_v52  ;;  %v594_v59 = vsel %vm255_vm0, %v592_v53, %v593_v54  ;;  %v663_v60 = vrot.slane %v629_v46, 2  ;;  %v665_v61 = vrot.slane %v630_v55, 2 }
  0x6b   : > { %v617_v62 = vadd.f32 %v591_v22, %v544_v56  ;;  %v666_v63 = vrot.slane %v631_v3, 2 }
  0x6c   : > { %v618_v44 = vadd.f32 %v594_v59, %v545_v58  ;;  %v664_v0 = vsel %vm329_vm1, %v662_v57, %v663_v60 }
  0x6d   : > { %v667_v4 = vsel %vm329_vm1, %v665_v61, %v666_v63  ;;  %v690_v33 = vadd.f32 %v664_v0, %v617_v62 }
  0x6e   : > { %v691_v45 = vadd.f32 %v667_v4, %v618_v44 }
  0x6f   : > { %v702_v8 = vadd.f32 %v1185_v50, %v690_v33 }
  0x70   : > { %v703_v9 = vadd.f32 %v1185_v50, %v691_v45 }
  0x71   : > { %v710_v17 = vmax.f32 %v702_v8, 0.0 }
  0x72   : > { %v711_v10 = vmax.f32 %v703_v9, 0.0 }
  0x73   : > { %v726_v12 = vrot.slane %v710_v17, 7 }
  0x74   : > { %v727_v1 = vrot.slane %v711_v10, 7 }
  0x76   : > { %v1002_v5 = vpack.i.bf16 %v727_v1, %v726_v12 }
  0x78   : > { %1003 = vrot.lane.b32.xlu0 %v1002_v5, %s1027_s24 }
  0xa4   : > { %v1009_v13 = vpop.permute.xlu1 %1008 }
  0xa5   : > { %v1011_v30 = vunpack.i.h.bf16 %v1009_v13  ;;  %v1010_v31 = vunpack.i.l.bf16 %v1009_v13 }
  0xa7   : > { %v767_v35 = vsel %vm756_vm2, %v1097_v20, %v1011_v30  ;;  %v768_v50 = vsel %vm756_vm2, %v1099_v21, %v1011_v30  ;;  %v765_v36 = vsel %vm756_vm2, %v1091_v16, %v1010_v31  ;;  %v766_v37 = vsel %vm756_vm2, %v1095_v19, %v1010_v31 }
  0xa8   : > { %v783_v2 = vpack.c.bf16 %v767_v35, %v767_v35  ;;  %v784_v38 = vpack.c.bf16 %v768_v50, %v768_v50  ;;  %v781_v6 = vpack.c.bf16 %v765_v36, %v765_v36  ;;  %v782_v39 = vpack.c.bf16 %v766_v37, %v766_v37 }
  0xaa   : > { %v863_v20 = vshrl.u32 %v783_v2, 16  ;;  %v866_v7 = vshll.u32 %v783_v2, 16  ;;  %v872_v21 = vshll.u32 %v784_v38, 16  ;;  %v849_v46 = vshrl.u32 %v781_v6, 16 }
  0xab   : > { %v852_v47 = vshll.u32 %v781_v6, 16  ;;  %v858_v16 = vshll.u32 %v782_v39, 16 }
  0xac   : > { %v865_v49 = vrot.slane %v863_v20, 4  ;;  %v868_v52 = vrot.slane %v866_v7, 5  ;;  %v874_v54 = vrot.slane %v872_v21, 5 }
  0xad   : > { %v854_v53 = vrot.slane %v852_v47, 5  ;;  %v860_v57 = vrot.slane %v858_v16, 5 }
  0xae   : > { %v869_v22 = vor.u32 %v868_v52, %v865_v49 }
  0xb0   : > { %v870_v62 = vrot.slane %v869_v22, 4 }
  0xb2   : > { %v875_v33 = vsel %vm1465_vm6, %v870_v62, %v874_v54 }
  0xb3   : > { %918 = vst.msk [vmem:[%s1472_s28 + $0x14] sm:$0xf] %vm912_vm5, %v875_v33 }
  0xbc   : > { %v999_v26 = vpop.permute.xlu0 %998 }
  0xbd   : > { %v1001_v32 = vunpack.i.h.bf16 %v999_v26  ;;  %v1000_v34 = vunpack.i.l.bf16 %v999_v26 }
  0xbf   : > { %v759_v42 = vsel %vm756_vm2, %v1201_v25, %v1001_v32  ;;  %v760_v43 = vsel %vm756_vm2, %v1203_v27, %v1001_v32  ;;  %v757_v19 = vsel %vm756_vm2, %v1196_v11, %v1000_v34  ;;  %v758_v25 = vsel %vm756_vm2, %v1199_v18, %v1000_v34 }
  0xc0   : > { %v775_v48 = vpack.c.bf16 %v759_v42, %v759_v42  ;;  %v776_v51 = vpack.c.bf16 %v760_v43, %v760_v43  ;;  %v851_v27 = vrot.slane %v849_v46, 4  ;;  %v773_v58 = vpack.c.bf16 %v757_v19, %v757_v19 }
  0xc1   : > { %v774_v61 = vpack.c.bf16 %v758_v25, %v758_v25 }
  0xc2   : > { %v807_v55 = vshrl.u32 %v775_v48, 16  ;;  %v810_v56 = vshll.u32 %v775_v48, 16  ;;  %v855_v3 = vor.u32 %v854_v53, %v851_v27  ;;  %v816_v60 = vshll.u32 %v776_v51, 16 }
  0xc3   : > { %v793_v44 = vshrl.u32 %v773_v58, 16  ;;  %v796_v0 = vshll.u32 %v773_v58, 16  ;;  %v802_v12 = vshll.u32 %v774_v61, 16 }
  0xc4   : > { %v809_v59 = vrot.slane %v807_v55, 4  ;;  %v812_v18 = vrot.slane %v810_v56, 5  ;;  %v856_v63 = vrot.slane %v855_v3, 4  ;;  %v818_v10 = vrot.slane %v816_v60, 5 }
  0xc5   : > { %v795_v8 = vrot.slane %v793_v44, 4  ;;  %v798_v9 = vrot.slane %v796_v0, 5  ;;  %v804_v32 = vrot.slane %v802_v12, 5 }
  0xc6   : > { %v813_v4 = vor.u32 %v812_v18, %v809_v59  ;;  %v861_v45 = vsel %vm1465_vm6, %v856_v63, %v860_v57 }
  0xc7   : > { %917 = vst.msk [vmem:[%s1472_s28 + $0x10] sm:$0xf] %vm912_vm5, %v861_v45  ;;  %v799_v1 = vor.u32 %v798_v9, %v795_v8 }
  0xc8   : > { %v814_v17 = vrot.slane %v813_v4, 4 }
  0xc9   : > { %v800_v31 = vrot.slane %v799_v1, 4 }
  0xca   : > { %v819_v13 = vsel %vm1465_vm6, %v814_v17, %v818_v10 }
  0xcb   : > { %914 = vst.msk [vmem:[%s1472_s28 + $0x4] sm:$0xf] %vm912_vm5, %v819_v13  ;;  %v805_v39 = vsel %vm1465_vm6, %v800_v31, %v804_v32 }
  0xcc   : > { %913 = vst.msk [vmem:[%s1472_s28] sm:$0xf] %vm912_vm5, %v805_v39 }
  0xd4   : > { %v1014_v5 = vpop.permute.xlu1 %1013 }
  0xd5   : > { %v1016_v26 = vunpack.i.h.bf16 %v1014_v5  ;;  %v1015_v30 = vunpack.i.l.bf16 %v1014_v5 }
  0xd7   : > { %v771_v34 = vsel %vm756_vm2, %v1284_v40, %v1016_v26  ;;  %v772_v35 = vsel %vm756_vm2, %v1286_v41, %v1016_v26  ;;  %v769_v50 = vsel %vm756_vm2, %v1103_v23, %v1015_v30  ;;  %v770_v36 = vsel %vm756_vm2, %v1105_v24, %v1015_v30 }
  0xd8   : > { %v787_v37 = vpack.c.bf16 %v771_v34, %v771_v34  ;;  %v788_v2 = vpack.c.bf16 %v772_v35, %v772_v35  ;;  %v785_v38 = vpack.c.bf16 %v769_v50, %v769_v50  ;;  %v786_v6 = vpack.c.bf16 %v770_v36, %v770_v36 }
  0xda   : > { %v891_v42 = vshrl.u32 %v787_v37, 16  ;;  %v894_v43 = vshll.u32 %v787_v37, 16  ;;  %v877_v20 = vshrl.u32 %v785_v38, 16  ;;  %v880_v40 = vshll.u32 %v785_v38, 16 }
  0xdb   : > { %v900_v7 = vshll.u32 %v788_v2, 16  ;;  %v886_v46 = vshll.u32 %v786_v6, 16 }
  0xdc   : > { %v893_v41 = vrot.slane %v891_v42, 4  ;;  %v896_v23 = vrot.slane %v894_v43, 5  ;;  %v879_v21 = vrot.slane %v877_v20, 4  ;;  %v882_v24 = vrot.slane %v880_v40, 5 }
  0xdd   : > { %v902_v19 = vrot.slane %v900_v7, 5  ;;  %v888_v51 = vrot.slane %v886_v46, 5 }
  0xde   : > { %v897_v47 = vor.u32 %v896_v23, %v893_v41  ;;  %v883_v16 = vor.u32 %v882_v24, %v879_v21 }
  0xe0   : > { %v898_v48 = vrot.slane %v897_v47, 4  ;;  %v884_v49 = vrot.slane %v883_v16, 4 }
  0xe2   : > { %v903_v25 = vsel %vm1465_vm6, %v898_v48, %v902_v19  ;;  %v889_v52 = vsel %vm1465_vm6, %v884_v49, %v888_v51 }
  0xe3   : > { %920 = vst.msk [vmem:[%s1472_s28 + $0x1c] sm:$0xf] %vm912_vm5, %v903_v25 }
  0xe4   : > { %919 = vst.msk [vmem:[%s1472_s28 + $0x18] sm:$0xf] %vm912_vm5, %v889_v52 }
  0xea   : > { %v1004_v27 = vpop.permute.xlu0 %1003 }
  0xeb   : > { %v1006_v53 = vunpack.i.h.bf16 %v1004_v27  ;;  %v1005_v54 = vunpack.i.l.bf16 %v1004_v27 }
  0xed   : > { %v763_v55 = vsel %vm756_vm2, %v1087_v14, %v1006_v53  ;;  %v764_v56 = vsel %vm756_vm2, %v1089_v15, %v1006_v53  ;;  %v761_v22 = vsel %vm756_vm2, %v1205_v28, %v1005_v54  ;;  %v762_v3 = vsel %vm756_vm2, %v1207_v29, %v1005_v54 }
  0xee   : > { %v779_v57 = vpack.c.bf16 %v763_v55, %v763_v55  ;;  %v780_v58 = vpack.c.bf16 %v764_v56, %v764_v56  ;;  %v777_v59 = vpack.c.bf16 %v761_v22, %v761_v22  ;;  %v778_v18 = vpack.c.bf16 %v762_v3, %v762_v3 }
  0xf0   : > { %v835_v60 = vshrl.u32 %v779_v57, 16  ;;  %v838_v61 = vshll.u32 %v779_v57, 16  ;;  %v821_v62 = vshrl.u32 %v777_v59, 16  ;;  %v824_v63 = vshll.u32 %v777_v59, 16 }
  0xf1   : > { %v844_v0 = vshll.u32 %v780_v58, 16  ;;  %v830_v33 = vshll.u32 %v778_v18, 16 }
  0xf2   : > { %v837_v14 = vrot.slane %v835_v60, 4  ;;  %v840_v44 = vrot.slane %v838_v61, 5  ;;  %v823_v15 = vrot.slane %v821_v62, 4  ;;  %v826_v4 = vrot.slane %v824_v63, 5 }
  0xf3   : > { %v846_v29 = vrot.slane %v844_v0, 5  ;;  %v832_v17 = vrot.slane %v830_v33, 5 }
  0xf4   : > { %v841_v28 = vor.u32 %v840_v44, %v837_v14  ;;  %v827_v45 = vor.u32 %v826_v4, %v823_v15 }
  0xf6   : > { %v842_v8 = vrot.slane %v841_v28, 4  ;;  %v828_v9 = vrot.slane %v827_v45, 4 }
  0xf8   : > { %v847_v10 = vsel %vm1465_vm6, %v842_v8, %v846_v29  ;;  %v833_v12 = vsel %vm1465_vm6, %v828_v9, %v832_v17 }
  0xf9   : > { %916 = vst.msk [vmem:[%s1472_s28 + $0xc] sm:$0xf] %vm912_vm5, %v847_v10 }
  0xfa   : > { %915 = vst.msk [vmem:[%s1472_s28 + $0x8] sm:$0xf] %vm912_vm5, %v833_v12 }
  0xfb PF: > { %s13_s12 = sadd.s32 1, %s1025_s12  }
  0xfc   : > { %p10_p4 = scmp.ge.s32.totalorder %s13_s12, 4  }
  0xfe   :  { %12 = sbr.rel (!%p10_p4) target bundleno = 1 (0x1), region = 62 }

// kernel: _lambda_.29
= control target key start
LH: loop header
LB: loop body
LE: loop exit
PB: predicated region body
PF: predicated region fallthrough
CT: control target
= control target key end

     0   :  { %s444_s12 = smov 0   ;;  %s561_s0 = inlined_call_operand.vmem [shape: bf16[2,20,5,48], index: 0, kind: input, shape index: {}]   ;;  %s562_s1 = inlined_call_operand.vmem [shape: f32[9,48], index: 1, kind: input, shape index: {}]   ;;  %s563_s2 = inlined_call_operand.vmem [shape: f32[1,48], index: 2, kind: input, shape index: {}]   ;;  %s564_s3 = inlined_call_operand.vmem [shape: bf16[2,4,4,48], index: 3, kind: output, shape index: {}]  }
   0x1 LB: > { %s394_s13 = sadd.s32 4294967295, %s422_s12   ;;  %p398_p0 = scmp.ge.s32.totalorder %s422_s12, 1  ;;  %s422_s12 = sphi %s444_s12, %s13_s12  }
   0x2   : > { %p137_p1 = scmp.lt.s32.totalorder %s422_s12, 3 }
   0x4   : > { %p138_p2 = pnand %p398_p0, %p137_p1 }
   0x5   : > { %p161_p3 = scmp.lt.s32.totalorder (!%p138_p2), %s394_s13, 1 }
   0x6   : > { %141 = sbr.rel (%p138_p2) target bundleno = 54 (0x36), region = 32 }
   0xb   : > { %s566_s13 = smov (!%p161_p3, %s394_s13), 1  ;;  %v207_v0 = vld [vmem:[%s562_s1] sm:$0xff]  ;;  %v494_v31 = vld [vmem:[%s562_s1 + $0x8] ss:$0 sm:$0xff]  ;;  %vm334_vm0 = vcmask 386048  }
   0xc   : > { %s405_s16 = smul.u32 80, %s566_s13  ;;  %v458_v1 = vperm.slane %v207_v0, 0  ;;  %v465_v2 = vperm.slane %v207_v0, 1  ;;  %v467_v3 = vperm.slane %v207_v0, 2  ;;  %v469_v4 = vperm.slane %v207_v0, 3  ;;  %s404_s24 = sshll.u32 %s566_s13, 3 }
   0xd   : > { %v471_v5 = vperm.slane %v207_v0, 5  ;;  %v479_v17 = vperm.slane %v207_v0, 4  ;;  %v497_v33 = vperm.slane %v207_v0, 6  ;;  %v499_v34 = vperm.slane %v207_v0, 7  ;;  %s540_s27 = scalar_lea.vmem %s564_s3, %s404_s24 }
   0xe   : > { %s463_s19 = scalar_lea.vmem %s561_s0, %s405_s16 }
   0xf   : > { %v171_v6 = vld [vmem:[%s463_s19] sm:$0x7]  ;;  %v172_v7 = vld [vmem:[%s463_s19 + $0x4] sm:$0x7]  ;;  %v176_v8 = vld [vmem:[%s463_s19 + $0x14] sm:$0x7] }
  0x10   : > { %v177_v9 = vld [vmem:[%s463_s19 + $0x18] sm:$0x7]  ;;  %v181_v10 = vld [vmem:[%s463_s19 + $0x28] sm:$0x7]  ;;  %v185_v11 = vld [vmem:[%s463_s19 + $0x3c] sm:$0x7]  ;;  %v189_v12 = vunpack.c.l.bf16 %v171_v6  ;;  %v190_v13 = vunpack.c.l.bf16 %v172_v7  ;;  %v194_v14 = vunpack.c.l.bf16 %v176_v8 }
  0x11   : > { %v195_v15 = vunpack.c.l.bf16 %v177_v9  ;;  %v199_v16 = vunpack.c.l.bf16 %v181_v10  ;;  %v203_v18 = vunpack.c.l.bf16 %v185_v11  ;;  %v173_v22 = vld [vmem:[%s463_s19 + $0x8] sm:$0x7]  ;;  %v178_v26 = vld [vmem:[%s463_s19 + $0x1c] sm:$0x7]  ;;  %v182_v27 = vld [vmem:[%s463_s19 + $0x2c] sm:$0x7] }
  0x12   : > { %v210_v19 = vmul.f32 %v458_v1, %v189_v12  ;;  %v215_v20 = vmul.f32 %v465_v2, %v194_v14  ;;  %v224_v21 = vmul.f32 %v467_v3, %v189_v12  ;;  %v211_v23 = vmul.f32 %v458_v1, %v190_v13  ;;  %v186_v32 = vld [vmem:[%s463_s19 + $0x40] sm:$0x7]  ;;  %v174_v44 = vld [vmem:[%s463_s19 + $0xc] sm:$0x7]  ;;  %v183_v50 = vld [vmem:[%s463_s19 + $0x30] sm:$0x7] }
  0x13   : > { %v216_v24 = vmul.f32 %v465_v2, %v195_v15  ;;  %v263_v25 = vmul.f32 %v471_v5, %v199_v16  ;;  %v245_v30 = vmul.f32 %v469_v4, %v199_v16  ;;  %v191_v35 = vunpack.c.l.bf16 %v173_v22  ;;  %v505_v45 = vld [vmem:[%s463_s19 + $0x20] sm:$0x7]  ;;  %v187_v56 = vld [vmem:[%s463_s19 + $0x44] sm:$0x7]  ;;  %v184_v16 = vld [vmem:[%s463_s19 + $0x34] sm:$0x7] }
  0x14   : > { %v219_v28 = vadd.f32 %v215_v20, %v210_v19  ;;  %v232_v29 = vrot.slane %v224_v21, 1  ;;  %v254_v37 = vmul.f32 %v479_v17, %v203_v18  ;;  %v196_v38 = vunpack.c.l.bf16 %v178_v26  ;;  %v188_v22 = vld [vmem:[%s463_s19 + $0x48] sm:$0x7] }
  0x15   : > { %v200_v39 = vunpack.c.l.bf16 %v182_v27  ;;  %v220_v40 = vadd.f32 %v216_v24, %v211_v23  ;;  %v271_v41 = vrot.slane %v263_v25, 1  ;;  %v204_v42 = vunpack.c.l.bf16 %v186_v32  ;;  %v415_v24 = vld [vmem:[%s563_s2] ss:$0 sm:$0xff] }
  0x16   : > { %v240_v36 = vadd.f32 %v232_v29, %v219_v28  ;;  %v225_v43 = vmul.f32 %v467_v3, %v190_v13  ;;  %v302_v47 = vmul.f32 %v494_v31, %v190_v13  ;;  %v212_v48 = vmul.f32 %v458_v1, %v191_v35 }
  0x17   : > { %v217_v49 = vmul.f32 %v465_v2, %v196_v38  ;;  %v246_v52 = vmul.f32 %v469_v4, %v200_v39  ;;  %v264_v53 = vmul.f32 %v471_v5, %v200_v39  ;;  %v284_v55 = vmul.f32 %v497_v33, %v190_v13 }
  0x18   : > { %v249_v46 = vadd.f32 %v245_v30, %v240_v36  ;;  %v233_v51 = vrot.slane %v225_v43, 1  ;;  %v192_v57 = vunpack.c.l.bf16 %v174_v44  ;;  %v197_v58 = vunpack.c.l.bf16 %v505_v45 }
  0x19   : > { %v293_v59 = vmul.f32 %v499_v34, %v195_v15  ;;  %v255_v61 = vmul.f32 %v479_v17, %v204_v42  ;;  %v201_v62 = vunpack.c.l.bf16 %v183_v50  ;;  %v310_v0 = vrot.slane %v302_v47, 1  ;;  %v180_v47 = vld [vmem:[%s463_s19 + $0x24] sm:$0x7] }
  0x1a   : > { %v258_v54 = vadd.f32 %v254_v37, %v249_v46  ;;  %v241_v60 = vadd.f32 %v233_v51, %v220_v40  ;;  %v221_v6 = vadd.f32 %v217_v49, %v212_v48  ;;  %v285_v7 = vmul.f32 %v497_v33, %v191_v35  ;;  %v175_v40 = vld [vmem:[%s463_s19 + $0x10] sm:$0x7] }
  0x1b   : > { %v272_v9 = vrot.slane %v264_v53, 1  ;;  %v205_v10 = vunpack.c.l.bf16 %v187_v56  ;;  %v226_v11 = vmul.f32 %v467_v3, %v191_v35  ;;  %v303_v13 = vmul.f32 %v494_v31, %v191_v35 }
  0x1c   : > { %v279_v63 = vadd.f32 %v271_v41, %v258_v54  ;;  %v250_v8 = vadd.f32 %v246_v52, %v241_v60  ;;  %v213_v14 = vmul.f32 %v458_v1, %v192_v57  ;;  %v218_v15 = vmul.f32 %v465_v2, %v197_v58 }
  0x1d   : > { %v234_v19 = vrot.slane %v226_v11, 1  ;;  %v247_v20 = vmul.f32 %v469_v4, %v201_v62  ;;  %v265_v21 = vmul.f32 %v471_v5, %v201_v62  ;;  %v294_v1 = vmul.f32 %v499_v34, %v196_v38 }
  0x1e   : > { %v288_v12 = vadd.f32 %v284_v55, %v279_v63  ;;  %v259_v18 = vadd.f32 %v255_v61, %v250_v8  ;;  %v256_v2 = vmul.f32 %v479_v17, %v205_v10  ;;  %v202_v27 = vunpack.c.l.bf16 %v184_v16 }
  0x1f   : > { %v242_v26 = vadd.f32 %v234_v19, %v221_v6  ;;  %v222_v29 = vadd.f32 %v218_v15, %v213_v14  ;;  %v206_v30 = vunpack.c.l.bf16 %v188_v22  ;;  %v227_v32 = vmul.f32 %v467_v3, %v192_v57 }
  0x20   : > { %v297_v23 = vadd.f32 %v293_v59, %v288_v12  ;;  %v280_v25 = vadd.f32 %v272_v9, %v259_v18  ;;  %v311_v36 = vrot.slane %v303_v13, 1  ;;  %v273_v39 = vrot.slane %v265_v21, 1 }
  0x21   : > { %v251_v37 = vadd.f32 %v247_v20, %v242_v26  ;;  %v235_v42 = vrot.slane %v227_v32, 1  ;;  %v248_v38 = vmul.f32 %v469_v4, %v202_v27  ;;  %v266_v43 = vmul.f32 %v471_v5, %v202_v27 }
  0x22   : > { %v318_v28 = vadd.f32 %v310_v0, %v297_v23  ;;  %v289_v35 = vadd.f32 %v285_v7, %v280_v25  ;;  %v286_v3 = vmul.f32 %v497_v33, %v192_v57  ;;  %v304_v46 = vmul.f32 %v494_v31, %v192_v57 }
  0x23   : > { %v260_v45 = vadd.f32 %v256_v2, %v251_v37  ;;  %v193_v49 = vunpack.c.l.bf16 %v175_v40  ;;  %v243_v50 = vadd.f32 %v235_v42, %v222_v29  ;;  %v257_v4 = vmul.f32 %v479_v17, %v206_v30 }
  0x24   : > { %v326_v41 = vadd.f32 %v415_v24, %v318_v28  ;;  %v298_v44 = vadd.f32 %v294_v1, %v289_v35  ;;  %v295_v52 = vmul.f32 %v499_v34, %v197_v58  ;;  %v198_v53 = vunpack.c.l.bf16 %v180_v47 }
  0x25   : > { %v281_v5 = vadd.f32 %v273_v39, %v260_v45  ;;  %v252_v54 = vadd.f32 %v248_v38, %v243_v50  ;;  %v274_v55 = vrot.slane %v266_v43, 1  ;;  %v312_v60 = vrot.slane %v304_v46, 1 }
  0x26   : > { %v330_v48 = vpack.c.bf16 %v326_v41, %v326_v41  ;;  %v319_v51 = vadd.f32 %v311_v36, %v298_v44  ;;  %v287_v61 = vmul.f32 %v497_v33, %v193_v49  ;;  %v305_v62 = vmul.f32 %v494_v31, %v193_v49 }
  0x27   : > { %v290_v59 = vadd.f32 %v286_v3, %v281_v5  ;;  %v261_v57 = vadd.f32 %v257_v4, %v252_v54  ;;  %v296_v58 = vmul.f32 %v499_v34, %v198_v53 }
  0x28   : > { %335 = vst.msk [vmem:[%s540_s27] sm:$0x3] %vm334_vm0, %v330_v48  ;;  %v327_v56 = vadd.f32 %v415_v24, %v319_v51  ;;  %v313_v8 = vrot.slane %v305_v62, 1 }
  0x29   : > { %v299_v63 = vadd.f32 %v295_v52, %v290_v59  ;;  %v282_v0 = vadd.f32 %v274_v55, %v261_v57 }
  0x2a   : > { %v331_v17 = vpack.c.bf16 %v327_v56, %v327_v56 }
  0x2b   : > { %v320_v6 = vadd.f32 %v312_v60, %v299_v63  ;;  %v291_v7 = vadd.f32 %v287_v61, %v282_v0 }
  0x2c   : > { %336 = vst.msk [vmem:[%s540_s27 + $0x2] sm:$0x3] %vm334_vm0, %v331_v17 }
  0x2d   : > { %v328_v9 = vadd.f32 %v415_v24, %v320_v6  ;;  %v300_v10 = vadd.f32 %v296_v58, %v291_v7 }
  0x2f   : > { %v332_v11 = vpack.c.bf16 %v328_v9, %v328_v9  ;;  %v321_v12 = vadd.f32 %v313_v8, %v300_v10 }
  0x31   : > { %337 = vst.msk [vmem:[%s540_s27 + $0x4] sm:$0x3] %vm334_vm0, %v332_v11  ;;  %v329_v33 = vadd.f32 %v415_v24, %v321_v12 }
  0x33   : > { %v333_v13 = vpack.c.bf16 %v329_v33, %v329_v33 }
  0x35   : > { %338 = vst.msk [vmem:[%s540_s27 + $0x6] sm:$0x3] %vm334_vm0, %v333_v13 }
  0x36 PF: > { %s13_s12 = sadd.s32 1, %s422_s12  }
  0x37   : > { %p10_p4 = scmp.ge.s32.totalorder %s13_s12, 4  }
  0x39   :  { %12 = sbr.rel (!%p10_p4) target bundleno = 1 (0x1), region = 62 }

// kernel: _lambda_.32
= control target key start
LH: loop header
LB: loop body
LE: loop exit
PB: predicated region body
PF: predicated region fallthrough
CT: control target
= control target key end

     0   :  { %s356_s12 = smov 0   ;;  %s385_s0 = inlined_call_operand.vmem [shape: bf16[2,16,48], index: 0, kind: input, shape index: {}]   ;;  %s386_s1 = inlined_call_operand.vmem [shape: bf16[48,12], index: 1, kind: input, shape index: {}]   ;;  %s387_s2 = inlined_call_operand.vmem [shape: f32[1,12], index: 2, kind: input, shape index: {}]   ;;  %s388_s3 = inlined_call_operand.vmem [shape: bf16[2,16,12], index: 3, kind: output, shape index: {}]  }
   0x1 LB: > { %s285_s13 = sadd.s32 4294967295, %s334_s12   ;;  %p289_p0 = scmp.ge.s32.totalorder %s334_s12, 1  ;;  %s334_s12 = sphi %s356_s12, %s13_s12  }
   0x2   : > { %p137_p1 = scmp.lt.s32.totalorder %s334_s12, 3 }
   0x4   : > { %p138_p2 = pnand %p289_p0, %p137_p1 }
   0x5   : > { %p161_p3 = scmp.lt.s32.totalorder (!%p138_p2), %s285_s13, 1 }
   0x6   : > { %141 = sbr.rel (%p138_p2) target bundleno = 162 (0xa2), region = 32 }
   0xb   : > { %v318_v0 = vld [vmem:[%s386_s1 + $0x10] sm:$0xff]  ;;  %v317_v1 = vld [vmem:[%s386_s1 + $0x8] sm:$0xff]  ;;  %s390_s13 = smov (!%p161_p3, %s285_s13), 1  ;;  %v316_v2 = vld [vmem:[%s386_s1] sm:$0xff]  ;;  %vm207_vm0 = vcmask 392192   ;;  %vm227_vm1 = vcmask 93184  }
   0xc   : > { %216 = vmatpush.bf16.msra.mxu0 %v318_v0  ;;  %s313_s18 = sshll.u32 %s390_s13, 3  ;;  %v327_v4 = vld [vmem:[%s387_s2] ss:$0 sm:$0xff] }
   0xd   : > { %s165_s23 = scalar_lea.vmem %s385_s0, %s313_s18  ;;  %s170_s28 = scalar_lea.vmem %s388_s3, %s313_s18 }
   0xe   : > { %v315_v3 = vld [vmem:[%s165_s23] sm:$0xff] }
  0x10   : > { %217 = vmatpush.bf16.msra.mxu0 %v317_v1 }
  0x14   : > { %218 = vmatpush.bf16.msra.mxu0 %v316_v2 }
  0x17   : > { %310 = vmatmul.msk.bf16.vlgmr.msra.gmra.mxu0 %vm207_vm0, %v315_v3 }
  0x94   : > { %v220_v5 = vpop.f32.mrf.mxu0 }
  0x95   : > { %v221_v6 = vadd.f32 %v327_v4, %v220_v5 }
  0x97   : > { %v225_v7 = vpack.c.bf16 %v221_v6, %v221_v6 }
  0x99   : > { %228 = vst.msk [vmem:[%s170_s28] sm:$0xf] %vm227_vm1, %v225_v7 }
  0x9c   : > { %v222_v8 = vpop.f32.mrf.mxu0 }
  0x9d   : > { %v223_v9 = vadd.f32 %v327_v4, %v222_v8 }
  0x9f   : > { %v226_v10 = vpack.c.bf16 %v223_v9, %v223_v9 }
  0xa1   : > { %229 = vst.msk [vmem:[%s170_s28 + $0x4] sm:$0xf] %vm227_vm1, %v226_v10 }
  0xa2 PF: > { %s13_s12 = sadd.s32 1, %s334_s12  }
  0xa3   : > { %p10_p4 = scmp.ge.s32.totalorder %s13_s12, 4  }
  0xa5   :  { %12 = sbr.rel (!%p10_p4) target bundleno = 1 (0x1), region = 62 }

// kernel: _lambda_.33
= control target key start
LH: loop header
LB: loop body
LE: loop exit
PB: predicated region body
PF: predicated region fallthrough
CT: control target
= control target key end

     0   :  { %s682_s15 = smov 0   ;;  %s858_s0 = inlined_call_operand.vmem [shape: bf16[2,6,6,12], index: 0, kind: input, shape index: {}]   ;;  %s859_s1 = inlined_call_operand.vmem [shape: f32[9,12], index: 1, kind: input, shape index: {}]   ;;  %s860_s2 = inlined_call_operand.vmem [shape: f32[1,12], index: 2, kind: input, shape index: {}]   ;;  %s861_s3 = inlined_call_operand.vmem [shape: bf16[2,4,4,24], index: 3, kind: input, shape index: {}]   ;;  %s862_s4 = inlined_call_operand.vmem [shape: bf16[2,4,4,24], index: 4, kind: output, shape index: {}]  }
   0x1 LB: > { %s622_s16 = sadd.s32 4294967295, %s654_s15   ;;  %p626_p0 = scmp.ge.s32.totalorder %s654_s15, 1  ;;  %s654_s15 = sphi %s682_s15, %s14_s15  }
   0x2   : > { %p172_p1 = scmp.lt.s32.totalorder %s654_s15, 3 }
   0x4   : > { %p173_p2 = pnand %p626_p0, %p172_p1 }
   0x5   : > { %p203_p3 = scmp.lt.s32.totalorder (!%p173_p2), %s622_s16, 1  ;;  %s656_s5 = smov (!%p173_p2), 12  }
   0x6   : > { %176 = sbr.rel (%p173_p2) target bundleno = 187 (0xbb), region = 36 }
   0xb   : > { %s866_s16 = smov (!%p203_p3, %s622_s16), 1  ;;  %v230_v0 = vld [vmem:[%s859_s1] sm:$0xff]  ;;  %v712_v6 = vld [vmem:[%s859_s1 + $0x8] ss:$0 sm:$0xff]  ;;  %vm409_vm0 = vcmask 97280   ;;  %vm461_vm1 = vcmask 1041408  }
   0xc   : > { %s636_s19 = smul.u32 24, %s866_s16  ;;  %v696_v1 = vperm.slane %v230_v0, 0  ;;  %v701_v2 = vperm.slane %v230_v0, 1  ;;  %v703_v3 = vperm.slane %v230_v0, 2  ;;  %v705_v4 = vperm.slane %v230_v0, 4  ;;  %s634_s25 = sshll.u32 %s866_s16, 3 }
   0xd   : > { %v707_v5 = vperm.slane %v230_v0, 5  ;;  %v720_v13 = vperm.slane %v230_v0, 7  ;;  %v722_v16 = vperm.slane %v230_v0, 3  ;;  %v730_v21 = vperm.slane %v230_v0, 6  ;;  %s212_s28 = scalar_lea.vmem %s861_s3, %s634_s25  ;;  %s833_s8 = scalar_lea.vmem %s862_s4, %s634_s25 }
   0xe   : > { %s207_s22 = scalar_lea.vmem %s858_s0, %s636_s19  ;;  %vm487_vm2 = vsmask.f32 1280  ;;  %vm465_vm3 = vcmask 1043458   ;;  %vm488_vm4 = vsmask.f32 3336  ;;  %vm550_vm9 = vcmask 189440  }
   0xf   : > { %v220_v7 = vld [vmem:[%s207_s22 + $0x8] sm:$0x7]  ;;  %v221_v8 = vld [vmem:[%s207_s22 + $0xc] sm:$0x7]  ;;  %v222_v9 = vld [vmem:[%s207_s22 + $0x10] sm:$0x7] }
  0x10   : > { %v714_v10 = vunpack.c.l.bf16 %v220_v7  ;;  %v716_v11 = vunpack.c.l.bf16 %v221_v8  ;;  %v718_v12 = vunpack.c.l.bf16 %v222_v9  ;;  %v218_v14 = vld [vmem:[%s207_s22] sm:$0x7]  ;;  %v219_v15 = vld [vmem:[%s207_s22 + $0x4] sm:$0x7]  ;;  %v223_v22 = vld [vmem:[%s207_s22 + $0x14] sm:$0x7] }
  0x11   : > { %v224_v17 = vunpack.c.l.bf16 %v218_v14  ;;  %v736_v25 = vunpack.c.l.bf16 %v219_v15  ;;  %v746_v32 = vunpack.c.l.bf16 %v223_v22  ;;  %vm489_vm5 = vmor %vm487_vm2, %vm488_vm4  ;;  %vm490_vm6 = vsmask.f32 5392 }
  0x12   : > { %v235_v18 = vmul.f32 %v696_v1, %v714_v10  ;;  %v240_v19 = vmul.f32 %v701_v2, %v714_v10  ;;  %v261_v20 = vmul.f32 %v703_v3, %v714_v10  ;;  %v291_v23 = vmul.f32 %v705_v4, %v716_v11  ;;  %vm491_vm8 = vmor %vm489_vm5, %vm490_vm6 }
  0x13   : > { %v312_v24 = vmul.f32 %v707_v5, %v716_v11  ;;  %v342_v28 = vmul.f32 %v720_v13, %v718_v12  ;;  %v742_v29 = vmul.f32 %v712_v6, %v718_v12  ;;  %v233_v30 = vmul.f32 %v696_v1, %v224_v17 }
  0x14   : > { %v248_v26 = vrot.slane %v240_v19, 1  ;;  %v269_v27 = vrot.slane %v261_v20, 2  ;;  %v238_v31 = vmul.f32 %v701_v2, %v224_v17  ;;  %v282_v34 = vmul.f32 %v722_v16, %v716_v11 }
  0x15   : > { %v333_v35 = vmul.f32 %v730_v21, %v718_v12  ;;  %v259_v36 = vmul.f32 %v703_v3, %v224_v17  ;;  %v299_v37 = vrot.slane %v291_v23, 1  ;;  %v320_v38 = vrot.slane %v312_v24, 2 }
  0x16   : > { %v256_v33 = vadd.f32 %v248_v26, %v235_v18  ;;  %v246_v39 = vrot.slane %v238_v31, 1  ;;  %v289_v40 = vmul.f32 %v705_v4, %v736_v25  ;;  %v350_v42 = vrot.slane %v342_v28, 1 }
  0x17   : > { %v371_v43 = vrot.slane %v742_v29, 2  ;;  %v267_v44 = vrot.slane %v259_v36, 2  ;;  %v280_v46 = vmul.f32 %v722_v16, %v736_v25  ;;  %v310_v47 = vmul.f32 %v707_v5, %v736_v25  ;;  %v647_v29 = vld [vmem:[%s860_s2] ss:$0 sm:$0xff] }
  0x18   : > { %v277_v41 = vadd.f32 %v269_v27, %v256_v33  ;;  %v254_v45 = vadd.f32 %v246_v39, %v233_v30  ;;  %v340_v48 = vmul.f32 %v720_v13, %v714_v10  ;;  %v331_v50 = vmul.f32 %v730_v21, %v714_v10 }
  0x19   : > { %v236_v51 = vmul.f32 %v696_v1, %v716_v11  ;;  %v241_v52 = vmul.f32 %v701_v2, %v716_v11  ;;  %v297_v54 = vrot.slane %v289_v40, 1  ;;  %v262_v55 = vmul.f32 %v703_v3, %v716_v11 }
  0x1a   : > { %v286_v49 = vadd.f32 %v282_v34, %v277_v41  ;;  %v275_v53 = vadd.f32 %v267_v44, %v254_v45  ;;  %v292_v56 = vmul.f32 %v705_v4, %v718_v12  ;;  %v361_v58 = vmul.f32 %v712_v6, %v714_v10  ;;  %v415_v41 = vld [vmem:[%s212_s28 + $0x2] sm:$0x3] }
  0x1b   : > { %v249_v59 = vrot.slane %v241_v52, 1  ;;  %v313_v60 = vmul.f32 %v707_v5, %v718_v12  ;;  %v318_v62 = vrot.slane %v310_v47, 2  ;;  %v348_v63 = vrot.slane %v340_v48, 1  ;;  %v416_v47 = vld [vmem:[%s212_s28 + $0x4] sm:$0x3] }
  0x1c   : > { %v307_v57 = vadd.f32 %v299_v37, %v286_v49  ;;  %v284_v61 = vadd.f32 %v280_v46, %v275_v53  ;;  %v270_v0 = vrot.slane %v262_v55, 2  ;;  %v283_v9 = vmul.f32 %v722_v16, %v718_v12  ;;  %v414_v37 = vld [vmem:[%s212_s28] sm:$0x3] }
  0x1d   : > { %v257_v8 = vadd.f32 %v249_v59, %v236_v51  ;;  %v300_v14 = vrot.slane %v292_v56, 1  ;;  %v343_v17 = vmul.f32 %v720_v13, %v746_v32  ;;  %v234_v18 = vmul.f32 %v696_v1, %v736_v25 }
  0x1e   : > { %v328_v7 = vadd.f32 %v320_v38, %v307_v57  ;;  %v305_v15 = vadd.f32 %v297_v54, %v284_v61  ;;  %v239_v19 = vmul.f32 %v701_v2, %v736_v25  ;;  %v321_v23 = vrot.slane %v313_v60, 2 }
  0x1f   : > { %v278_v22 = vadd.f32 %v270_v0, %v257_v8  ;;  %v260_v24 = vmul.f32 %v703_v3, %v736_v25  ;;  %v364_v27 = vmul.f32 %v712_v6, %v746_v32  ;;  %v290_v1 = vmul.f32 %v705_v4, %v714_v10 }
  0x20   : > { %v337_v20 = vadd.f32 %v333_v35, %v328_v7  ;;  %v326_v26 = vadd.f32 %v318_v62, %v305_v15  ;;  %v247_v28 = vrot.slane %v239_v19, 1  ;;  %v311_v31 = vmul.f32 %v707_v5, %v714_v10  ;;  %v417_v5 = vld [vmem:[%s212_s28 + $0x6] sm:$0x3] }
  0x21   : > { %v287_v30 = vadd.f32 %v283_v9, %v278_v22  ;;  %v268_v3 = vrot.slane %v260_v24, 2  ;;  %v369_v34 = vrot.slane %v361_v58, 2  ;;  %v281_v36 = vmul.f32 %v722_v16, %v714_v10 }
  0x22   : > { %v358_v2 = vadd.f32 %v350_v42, %v337_v20  ;;  %v335_v33 = vadd.f32 %v331_v50, %v326_v26  ;;  %v255_v35 = vadd.f32 %v247_v28, %v234_v18  ;;  %v334_v4 = vmul.f32 %v730_v21, %v746_v32 }
  0x23   : > { %v308_v39 = vadd.f32 %v300_v14, %v287_v30  ;;  %v351_v40 = vrot.slane %v343_v17, 1  ;;  %v372_v44 = vrot.slane %v364_v27, 2  ;;  %v298_v46 = vrot.slane %v290_v1, 1 }
  0x24   : > { %v379_v38 = vadd.f32 %v371_v43, %v358_v2  ;;  %v356_v42 = vadd.f32 %v348_v63, %v335_v33  ;;  %v276_v45 = vadd.f32 %v268_v3, %v255_v35  ;;  %v319_v50 = vrot.slane %v311_v31, 2 }
  0x25   : > { %v329_v49 = vadd.f32 %v321_v23, %v308_v39  ;;  %v418_v51 = vunpack.c.l.bf16 %v414_v37  ;;  %v341_v43 = vmul.f32 %v720_v13, %v716_v11  ;;  %v419_v53 = vunpack.c.l.bf16 %v415_v41 }
  0x26   : > { %v387_v48 = vadd.f32 %v647_v29, %v379_v38  ;;  %v377_v52 = vadd.f32 %v369_v34, %v356_v42  ;;  %v285_v16 = vadd.f32 %v281_v36, %v276_v45  ;;  %v420_v55 = vunpack.c.l.bf16 %v416_v47 }
  0x27   : > { %v338_v32 = vadd.f32 %v334_v4, %v329_v49  ;;  %v421_v56 = vunpack.c.l.bf16 %v417_v5  ;;  %426 = vst [vmem:[#allocation1] ss:$2 sm:$0xff] %v418_v51  ;;  %v332_v59 = vmul.f32 %v730_v21, %v716_v11  ;;  %v362_v60 = vmul.f32 %v712_v6, %v716_v11 }
  0x28   : > { %v395_v54 = vrot.slane %v387_v48, 7  ;;  %v385_v57 = vadd.f32 %v647_v29, %v377_v52  ;;  %v306_v58 = vadd.f32 %v298_v46, %v285_v16  ;;  %429 = vst [vmem:[#allocation1 + $0x10] ss:$2 sm:$0xff] %v419_v53  ;;  %v349_v63 = vrot.slane %v341_v43, 1 }
  0x29   : > { %v359_v61 = vadd.f32 %v351_v40, %v338_v32  ;;  %432 = vst [vmem:[#allocation1 + $0x20] ss:$2 sm:$0xff] %v420_v55  ;;  %v370_v8 = vrot.slane %v362_v60, 2  ;;  %vm492_vm7 = vsmask.f32 7448 }
  0x2a   : > { %401 = vrot.lane.b32.xlu1 %v395_v54, %s656_s5  ;;  %v393_v13 = vrot.slane %v385_v57, 7  ;;  %v327_v62 = vadd.f32 %v319_v50, %v306_v58  ;;  %435 = vst [vmem:[#allocation1 + $0x30] ss:$2 sm:$0xff] %v421_v56  ;;  %vm822_vm10 = vmor %vm491_vm8, %vm492_vm7 }
  0x2b   : > { %v380_v0 = vadd.f32 %v372_v44, %v359_v61 }
  0x2c   : > { %397 = vrot.lane.b32.xlu0 %v393_v13, %s656_s5  ;;  %v336_v7 = vadd.f32 %v332_v59, %v327_v62 }
  0x2d   : > { %v388_v9 = vadd.f32 %v647_v29, %v380_v0 }
  0x2e   : > { %v357_v14 = vadd.f32 %v349_v63, %v336_v7  ;;  %v427_v20 = vld.sshfl [vmem:[#allocation1] sm:$0xff pattern:$0x75316420] }
  0x2f   : > { %v396_v15 = vrot.slane %v388_v9, 7  ;;  %v437_v24 = vrot.slane %v427_v20, 7  ;;  %v430_v31 = vld.sshfl [vmem:[#allocation1 + $0x10] sm:$0xff pattern:$0x75316420] }
  0x30   : > { %v378_v21 = vadd.f32 %v370_v8, %v357_v14  ;;  %v433_v18 = vld.sshfl [vmem:[#allocation1 + $0x20] sm:$0xff pattern:$0x75316420]  ;;  %v438_v4 = vrot.slane %v430_v31, 7 }
  0x31   : > { %v439_v19 = vrot.slane %v433_v18, 7 }
  0x32   : > { %403 = vrot.lane.b32.xlu1 %v396_v15, %s656_s5  ;;  %v386_v17 = vadd.f32 %v647_v29, %v378_v21  ;;  %v436_v29 = vld.sshfl [vmem:[#allocation1 + $0x30] sm:$0xff pattern:$0x75316420] }
  0x33   : > { %v440_v34 = vrot.slane %v436_v29, 7 }
  0x34   : > { %v394_v6 = vrot.slane %v386_v17, 7 }
  0x36   : > { %399 = vrot.lane.b32.xlu0 %v394_v6, %s656_s5 }
  0x9c   : > { %v402_v22 = vpop.permute.xlu1 %401 }
  0x9d   : > { %v412_v23 = vsel %vm409_vm0, %v716_v11, %v402_v22 }
  0x9e   : > { %v447_v26 = vadd.f32 %v439_v19, %v412_v23  ;;  %v398_v27 = vpop.permute.xlu0 %397 }
  0x9f   : > { %v410_v1 = vsel %vm409_vm0, %v736_v25, %v398_v27 }
  0xa0   : > { %v451_v28 = vpack.c.bf16 %v447_v26, %v447_v26  ;;  %v445_v2 = vadd.f32 %v437_v24, %v410_v1 }
  0xa2   : > { %v459_v30 = vrot.slane %v451_v28, 2  ;;  %v449_v3 = vpack.c.bf16 %v445_v2, %v445_v2 }
  0xa4   : > { %v477_v11 = vsel %vm461_vm1, %v451_v28, %v459_v30  ;;  %v478_v33 = vsel %vm465_vm3, %v451_v28, %v459_v30  ;;  %v404_v35 = vpop.permute.xlu1 %403  ;;  %v457_v39 = vrot.slane %v449_v3, 2 }
  0xa5   : > { %v480_v36 = vrot.slane %v478_v33, 2  ;;  %v520_v37 = vshrl.u32 %v477_v11, 16  ;;  %v523_v38 = vshll.u32 %v477_v11, 16  ;;  %v413_v25 = vsel %vm409_vm0, %v718_v12, %v404_v35 }
  0xa6   : > { %v464_v44 = vsel %vm461_vm1, %v449_v3, %v457_v39  ;;  %v466_v45 = vsel %vm465_vm3, %v449_v3, %v457_v39  ;;  %v448_v5 = vadd.f32 %v440_v34, %v413_v25 }
  0xa7   : > { %v522_v40 = vrot.slane %v520_v37, 6  ;;  %v525_v41 = vrot.slane %v523_v38, 7  ;;  %v529_v42 = vshll.u32 %v480_v36, 16  ;;  %v494_v46 = vshrl.u32 %v464_v44, 16 }
  0xa8   : > { %v497_v47 = vshll.u32 %v464_v44, 16  ;;  %v468_v49 = vrot.slane %v466_v45, 2  ;;  %v400_v50 = vpop.permute.xlu0 %399  ;;  %v452_v16 = vpack.c.bf16 %v448_v5, %v448_v5 }
  0xa9   : > { %v526_v48 = vor.u32 %v525_v41, %v522_v40  ;;  %v496_v51 = vrot.slane %v494_v46, 6  ;;  %v411_v43 = vsel %vm409_vm0, %v714_v10, %v400_v50  ;;  %v531_v54 = vrot.slane %v529_v42, 7 }
  0xaa   : > { %v499_v52 = vrot.slane %v497_v47, 7  ;;  %v503_v32 = vshll.u32 %v468_v49, 16  ;;  %v446_v55 = vadd.f32 %v438_v4, %v411_v43  ;;  %v460_v57 = vrot.slane %v452_v16, 2 }
  0xab   : > { %v527_v53 = vrot.slane %v526_v48, 2 }
  0xac   : > { %v500_v56 = vor.u32 %v499_v52, %v496_v51  ;;  %v450_v59 = vpack.c.bf16 %v446_v55, %v446_v55  ;;  %v505_v60 = vrot.slane %v503_v32, 7  ;;  %v483_v61 = vsel %vm461_vm1, %v452_v16, %v460_v57 }
  0xad   : > { %v532_v58 = vsel %vm822_vm10, %v527_v53, %v531_v54  ;;  %v484_v13 = vsel %vm465_vm3, %v452_v16, %v460_v57  ;;  %v533_v63 = vshrl.u32 %v483_v61, 16  ;;  %v536_v0 = vshll.u32 %v483_v61, 16 }
  0xae   : > { %553 = vst.msk [vmem:[%s833_s8 + $0x4] sm:$0x3] %vm550_vm9, %v532_v58  ;;  %v501_v10 = vrot.slane %v500_v56, 2  ;;  %v486_v62 = vrot.slane %v484_v13, 2  ;;  %v458_v7 = vrot.slane %v450_v59, 2 }
  0xaf   : > { %v535_v9 = vrot.slane %v533_v63, 6  ;;  %v538_v14 = vrot.slane %v536_v0, 7 }
  0xb0   : > { %v506_v8 = vsel %vm822_vm10, %v501_v10, %v505_v60  ;;  %v542_v15 = vshll.u32 %v486_v62, 16  ;;  %v471_v21 = vsel %vm461_vm1, %v450_v59, %v458_v7  ;;  %v472_v17 = vsel %vm465_vm3, %v450_v59, %v458_v7 }
  0xb1   : > { %551 = vst.msk [vmem:[%s833_s8] sm:$0x3] %vm550_vm9, %v506_v8  ;;  %v507_v6 = vshrl.u32 %v471_v21, 16  ;;  %v510_v18 = vshll.u32 %v471_v21, 16  ;;  %v539_v19 = vor.u32 %v538_v14, %v535_v9  ;;  %v474_v20 = vrot.slane %v472_v17, 2 }
  0xb2   : > { %v544_v26 = vrot.slane %v542_v15, 7 }
  0xb3   : > { %v509_v22 = vrot.slane %v507_v6, 6  ;;  %v512_v23 = vrot.slane %v510_v18, 7  ;;  %v540_v24 = vrot.slane %v539_v19, 2  ;;  %v516_v27 = vshll.u32 %v474_v20, 16 }
  0xb5   : > { %v513_v28 = vor.u32 %v512_v23, %v509_v22  ;;  %v545_v1 = vsel %vm822_vm10, %v540_v24, %v544_v26  ;;  %v518_v29 = vrot.slane %v516_v27, 7 }
  0xb6   : > { %554 = vst.msk [vmem:[%s833_s8 + $0x6] sm:$0x3] %vm550_vm9, %v545_v1 }
  0xb7   : > { %v514_v2 = vrot.slane %v513_v28, 2 }
  0xb9   : > { %v519_v30 = vsel %vm822_vm10, %v514_v2, %v518_v29 }
  0xba   : > { %552 = vst.msk [vmem:[%s833_s8 + $0x2] sm:$0x3] %vm550_vm9, %v519_v30 }
  0xbb PF: > { %s14_s15 = sadd.s32 1, %s654_s15  }
  0xbc   : > { %p11_p4 = scmp.ge.s32.totalorder %s14_s15, 4  }
  0xbe   :  { %13 = sbr.rel (!%p11_p4) target bundleno = 1 (0x1), region = 72 }

// kernel: _lambda_.39
= control target key start
LH: loop header
LB: loop body
LE: loop exit
PB: predicated region body
PF: predicated region fallthrough
CT: control target
= control target key end

     0   :  { %s313_s12 = smov 0   ;;  %s339_s0 = inlined_call_operand.vmem [shape: bf16[2,4,24], index: 0, kind: input, shape index: {}]   ;;  %s340_s1 = inlined_call_operand.vmem [shape: bf16[24,40], index: 1, kind: input, shape index: {}]   ;;  %s341_s2 = inlined_call_operand.vmem [shape: f32[1,40], index: 2, kind: input, shape index: {}]   ;;  %s342_s3 = inlined_call_operand.vmem [shape: bf16[2,4,40], index: 3, kind: output, shape index: {}]  }
   0x1 LB: > { %s261_s13 = sadd.s32 4294967295, %s291_s12   ;;  %p265_p0 = scmp.ge.s32.totalorder %s291_s12, 1  ;;  %s291_s12 = sphi %s313_s12, %s13_s12  }
   0x2   : > { %p136_p1 = scmp.lt.s32.totalorder %s291_s12, 3 }
   0x4   : > { %p137_p2 = pnand %p265_p0, %p136_p1 }
   0x5   : > { %p158_p3 = scmp.lt.s32.totalorder (!%p137_p2), %s261_s13, 1 }
   0x6   : > { %140 = sbr.rel (%p137_p2) target bundleno = 158 (0x9e), region = 32 }
   0xb   : > { %v170_v0 = vld [vmem:[%s340_s1 + $0x8] sm:$0xf]  ;;  %vm188_vm0 = vcmask 1043456   ;;  %s344_s13 = smov (!%p158_p3, %s261_s13), 1  ;;  %v275_v4 = vld [vmem:[%s340_s1] sm:$0xff]  ;;  %vm184_vm1 = vcmask 195584  }
   0xc   : > { %v180_v1 = vunpack.c.l.b16 %v170_v0  ;;  %s266_s16 = sshll.u32 %s344_s13, 1  ;;  %v284_v6 = vld [vmem:[%s341_s2] ss:$0 sm:$0xff]  ;;  %vm206_vm2 = vcmask 320512  }
   0xd   : > { %s161_s21 = scalar_lea.vmem %s339_s0, %s266_s16  ;;  %s165_s26 = scalar_lea.vmem %s342_s3, %s266_s16 }
   0xe   : > { %v182_v2 = vpack.c.b16 %v180_v1, %v180_v1  ;;  %v167_v5 = vld [vmem:[%s161_s21] sm:$0x3] }
  0x10   : > { %v190_v3 = vsel %vm188_vm0, %v182_v2, 0 }
  0x11   : > { %198 = vmatpush.bf16.msra.mxu0 %v190_v3 }
  0x15   : > { %199 = vmatpush.bf16.msra.mxu0 %v275_v4 }
  0x18   : > { %272 = vmatmul.msk.bf16.vlgmr.msra.gmra.mxu0 %vm184_vm1, %v167_v5 }
  0x95   : > { %v201_v7 = vpop.f32.mrf.mxu0 }
  0x96   : > { %v202_v8 = vadd.f32 %v284_v6, %v201_v7 }
  0x98   : > { %v205_v9 = vpack.c.bf16 %v202_v8, %v202_v8 }
  0x9a   : > { %207 = vst.msk [vmem:[%s165_s26] sm:$0x3] %vm206_vm2, %v205_v9 }
  0x9d   : > { %v203_v10 = vpop.f32.mrf.mxu0 }
  0x9e PF: > { %s13_s12 = sadd.s32 1, %s291_s12  }
  0x9f   : > { %p10_p4 = scmp.ge.s32.totalorder %s13_s12, 4  }
  0xa1   :  { %12 = sbr.rel (!%p10_p4) target bundleno = 1 (0x1), region = 62 }

// kernel: _lambda_.34
= control target key start
LH: loop header
LB: loop body
LE: loop exit
PB: predicated region body
PF: predicated region fallthrough
CT: control target
= control target key end

     0   :  { %s340_s12 = smov 0   ;;  %s366_s0 = inlined_call_operand.vmem [shape: bf16[2,16,24], index: 0, kind: input, shape index: {}]   ;;  %s367_s1 = inlined_call_operand.vmem [shape: bf16[24,36], index: 1, kind: input, shape index: {}]   ;;  %s368_s2 = inlined_call_operand.vmem [shape: f32[1,36], index: 2, kind: input, shape index: {}]   ;;  %s369_s3 = inlined_call_operand.vmem [shape: bf16[2,16,36], index: 3, kind: output, shape index: {}]  }
   0x1 LB: > { %s279_s13 = sadd.s32 4294967295, %s318_s12   ;;  %p283_p0 = scmp.ge.s32.totalorder %s318_s12, 1  ;;  %s318_s12 = sphi %s340_s12, %s13_s12  }
   0x2   : > { %p137_p1 = scmp.lt.s32.totalorder %s318_s12, 3 }
   0x4   : > { %p138_p2 = pnand %p283_p0, %p137_p1 }
   0x5   : > { %p161_p3 = scmp.lt.s32.totalorder (!%p138_p2), %s279_s13, 1 }
   0x6   : > { %141 = sbr.rel (%p138_p2) target bundleno = 165 (0xa5), region = 32 }
   0xb   : > { %v176_v0 = vld [vmem:[%s367_s1 + $0x8] sm:$0xf]  ;;  %vm199_vm0 = vcmask 1043456   ;;  %s371_s13 = smov (!%p161_p3, %s279_s13), 1  ;;  %v302_v4 = vld [vmem:[%s367_s1] sm:$0xff]  ;;  %vm195_vm1 = vcmask 195584  }
   0xc   : > { %v191_v1 = vunpack.c.l.b16 %v176_v0  ;;  %s299_s16 = sshll.u32 %s371_s13, 3  ;;  %v311_v6 = vld [vmem:[%s368_s2] ss:$0 sm:$0xff]  ;;  %vm221_vm2 = vcmask 289792  }
   0xd   : > { %s165_s21 = scalar_lea.vmem %s366_s0, %s299_s16  ;;  %s170_s26 = scalar_lea.vmem %s369_s3, %s299_s16 }
   0xe   : > { %v193_v2 = vpack.c.b16 %v191_v1, %v191_v1  ;;  %v301_v5 = vld [vmem:[%s165_s21] sm:$0xff] }
  0x10   : > { %v201_v3 = vsel %vm199_vm0, %v193_v2, 0 }
  0x11   : > { %209 = vmatpush.bf16.msra.mxu0 %v201_v3 }
  0x15   : > { %210 = vmatpush.bf16.msra.mxu0 %v302_v4 }
  0x18   : > { %296 = vmatmul.msk.bf16.vlgmr.msra.gmra.mxu0 %vm195_vm1, %v301_v5 }
  0x95   : > { %v212_v7 = vpop.f32.mrf.mxu0 }
  0x96   : > { %v213_v8 = vadd.f32 %v311_v6, %v212_v7 }
  0x98   : > { %v217_v9 = vmax.f32 %v213_v8, 0.0 }
  0x9a   : > { %v219_v10 = vpack.c.bf16 %v217_v9, %v217_v9 }
  0x9c   : > { %222 = vst.msk [vmem:[%s170_s26] sm:$0xf] %vm221_vm2, %v219_v10 }
  0x9d   : > { %v214_v11 = vpop.f32.mrf.mxu0 }
  0x9e   : > { %v215_v12 = vadd.f32 %v311_v6, %v214_v11 }
  0xa0   : > { %v218_v13 = vmax.f32 %v215_v12, 0.0 }
  0xa2   : > { %v220_v14 = vpack.c.bf16 %v218_v13, %v218_v13 }
  0xa4   : > { %223 = vst.msk [vmem:[%s170_s26 + $0x4] sm:$0xf] %vm221_vm2, %v220_v14 }
  0xa5 PF: > { %s13_s12 = sadd.s32 1, %s318_s12  }
  0xa6   : > { %p10_p4 = scmp.ge.s32.totalorder %s13_s12, 4  }
  0xa8   :  { %12 = sbr.rel (!%p10_p4) target bundleno = 1 (0x1), region = 62 }

// kernel: _lambda_.38
= control target key start
LH: loop header
LB: loop body
LE: loop exit
PB: predicated region body
PF: predicated region fallthrough
CT: control target
= control target key end

     0   :  { %s587_s12 = smov 0   ;;  %s701_s0 = inlined_call_operand.vmem [shape: bf16[2,16,4,24], index: 0, kind: input, shape index: {}]   ;;  %s702_s1 = inlined_call_operand.vmem [shape: f32[25,24], index: 1, kind: input, shape index: {}]   ;;  %s703_s2 = inlined_call_operand.vmem [shape: f32[1,24], index: 2, kind: input, shape index: {}]   ;;  %s704_s3 = inlined_call_operand.vmem [shape: bf16[2,2,2,24], index: 3, kind: output, shape index: {}]  }
   0x1 LB: > { %s508_s13 = sadd.s32 4294967295, %s565_s12   ;;  %p512_p0 = scmp.ge.s32.totalorder %s565_s12, 1  ;;  %s565_s12 = sphi %s587_s12, %s13_s12  }
   0x2   : > { %p137_p1 = scmp.lt.s32.totalorder %s565_s12, 3 }
   0x4   : > { %p138_p2 = pnand %p512_p0, %p137_p1 }
   0x5   : > { %p160_p3 = scmp.lt.s32.totalorder (!%p138_p2), %s508_s13, 1 }
   0x6   : > { %141 = sbr.rel (%p138_p2) target bundleno = 73 (0x49), region = 32 }
   0xb   : > { %s706_s13 = smov (!%p160_p3, %s508_s13), 1  ;;  %v197_v0 = vld [vmem:[%s702_s1] sm:$0xff]  ;;  %v625_v26 = vld [vmem:[%s702_s1 + $0x8] sm:$0xff]  ;;  %vm452_vm0 = vcmask 188416  }
   0xc   : > { %s548_s16 = sshll.u32 %s706_s13, 5  ;;  %v201_v1 = vperm.slane %v197_v0, 0  ;;  %v204_v8 = vperm.slane %v197_v0, 1  ;;  %v209_v12 = vperm.slane %v197_v0, 2  ;;  %v222_v13 = vperm.slane %v197_v0, 3  ;;  %s515_s28 = sshll.u32 %s706_s13, 1 }
   0xd   : > { %s604_s19 = scalar_lea.vmem %s701_s0, %s548_s16  ;;  %v235_v16 = vperm.slane %v197_v0, 4  ;;  %v248_v18 = vperm.slane %v197_v0, 5  ;;  %v258_v19 = vperm.slane %v197_v0, 7  ;;  %v253_v41 = vperm.slane %v197_v0, 6  ;;  %s168_s4 = scalar_lea.vmem %s704_s3, %s515_s28 }
   0xe   : > { %v169_v2 = vld [vmem:[%s604_s19] sm:$0x3]  ;;  %v170_v3 = vld [vmem:[%s604_s19 + $0x2] sm:$0x3]  ;;  %v173_v4 = vld [vmem:[%s604_s19 + $0x8] sm:$0x3] }
   0xf   : > { %v174_v5 = vld [vmem:[%s604_s19 + $0xa] sm:$0x3]  ;;  %v183_v6 = vunpack.c.l.bf16 %v169_v2  ;;  %v610_v7 = vunpack.c.l.bf16 %v170_v3  ;;  %v177_v9 = vld [vmem:[%s604_s19 + $0x10] sm:$0x3]  ;;  %v187_v10 = vunpack.c.l.bf16 %v173_v4  ;;  %v178_v14 = vld [vmem:[%s604_s19 + $0x12] sm:$0x3] }
  0x10   : > { %v613_v11 = vunpack.c.l.bf16 %v174_v5  ;;  %v191_v20 = vunpack.c.l.bf16 %v177_v9  ;;  %v617_v21 = vunpack.c.l.bf16 %v178_v14  ;;  %v180_v24 = vld [vmem:[%s604_s19 + $0x18] sm:$0x3]  ;;  %v181_v25 = vld [vmem:[%s604_s19 + $0x1a] sm:$0x3]  ;;  %v271_v42 = vperm.slane %v625_v26, 0 }
  0x11   : > { %v202_v15 = vmul.f32 %v201_v1, %v183_v6  ;;  %v203_v17 = vmul.f32 %v201_v1, %v610_v7  ;;  %v205_v22 = vmul.f32 %v204_v8, %v187_v10  ;;  %v210_v27 = vmul.f32 %v209_v12, %v183_v6  ;;  %v171_v56 = vld [vmem:[%s604_s19 + $0x4] sm:$0x3]  ;;  %v175_v63 = vld [vmem:[%s604_s19 + $0xc] sm:$0x3] }
  0x12   : > { %v206_v23 = vmul.f32 %v204_v8, %v613_v11  ;;  %v211_v28 = vmul.f32 %v209_v12, %v610_v7  ;;  %v223_v29 = vmul.f32 %v222_v13, %v187_v10  ;;  %v224_v30 = vmul.f32 %v222_v13, %v613_v11 }
  0x13   : > { %v207_v31 = vadd.f32 %v205_v22, %v202_v15  ;;  %v236_v33 = vmul.f32 %v235_v16, %v183_v6  ;;  %v237_v34 = vmul.f32 %v235_v16, %v610_v7  ;;  %v516_v35 = vrot.slane %v210_v27, 9 }
  0x14   : > { %v208_v32 = vadd.f32 %v206_v23, %v203_v17  ;;  %v517_v36 = vrot.slane %v211_v28, 9  ;;  %v518_v37 = vrot.slane %v223_v29, 9  ;;  %v519_v38 = vrot.slane %v224_v30, 9 }
  0x15   : > { %v194_v39 = vunpack.c.l.bf16 %v180_v24  ;;  %v630_v40 = vunpack.c.l.bf16 %v181_v25  ;;  %v220_v43 = vadd.f32 %v516_v35, %v207_v31  ;;  %v520_v45 = vrot.slane %v236_v33, 10  ;;  %v179_v31 = vld [vmem:[%s604_s19 + $0x14] sm:$0x3] }
  0x16   : > { %v221_v44 = vadd.f32 %v517_v36, %v208_v32  ;;  %v521_v46 = vrot.slane %v237_v34, 10  ;;  %v249_v47 = vmul.f32 %v248_v18, %v191_v20  ;;  %v250_v48 = vmul.f32 %v248_v18, %v617_v21  ;;  %v660_v32 = vld [vmem:[%s702_s1 + $0x10] sm:$0xff] }
  0x17   : > { %v284_v49 = vperm.slane %v625_v26, 1  ;;  %v233_v50 = vadd.f32 %v518_v37, %v220_v43  ;;  %v259_v52 = vmul.f32 %v258_v19, %v191_v20  ;;  %v260_v53 = vmul.f32 %v258_v19, %v617_v21 }
  0x18   : > { %v234_v51 = vadd.f32 %v519_v38, %v221_v44  ;;  %v254_v54 = vmul.f32 %v253_v41, %v194_v39  ;;  %v255_v55 = vmul.f32 %v253_v41, %v630_v40  ;;  %v272_v59 = vmul.f32 %v271_v42, %v194_v39  ;;  %v182_v39 = vld [vmem:[%s604_s19 + $0x1c] sm:$0x3] }
  0x19   : > { %v246_v57 = vadd.f32 %v520_v45, %v233_v50  ;;  %v273_v60 = vmul.f32 %v271_v42, %v630_v40  ;;  %v285_v61 = vmul.f32 %v284_v49, %v191_v20  ;;  %v286_v62 = vmul.f32 %v284_v49, %v617_v21 }
  0x1a   : > { %v247_v58 = vadd.f32 %v521_v46, %v234_v51  ;;  %v522_v2 = vrot.slane %v259_v52, 9  ;;  %v523_v3 = vrot.slane %v260_v53, 9  ;;  %v641_v4 = vunpack.c.l.bf16 %v171_v56 }
  0x1b   : > { %v251_v0 = vadd.f32 %v249_v47, %v246_v57  ;;  %v297_v5 = vperm.slane %v625_v26, 2  ;;  %v307_v6 = vperm.slane %v625_v26, 4  ;;  %v524_v10 = vrot.slane %v272_v59, 9 }
  0x1c   : > { %v252_v1 = vadd.f32 %v250_v48, %v247_v58  ;;  %v525_v12 = vrot.slane %v273_v60, 9  ;;  %v645_v13 = vunpack.c.l.bf16 %v175_v63  ;;  %v302_v14 = vperm.slane %v625_v26, 3 }
  0x1d   : > { %v256_v8 = vadd.f32 %v254_v54, %v251_v0  ;;  %v320_v15 = vperm.slane %v625_v26, 5  ;;  %v526_v18 = vrot.slane %v285_v61, 10  ;;  %v527_v19 = vrot.slane %v286_v62, 10 }
  0x1e   : > { %v257_v9 = vadd.f32 %v255_v55, %v252_v1  ;;  %v298_v20 = vmul.f32 %v297_v5, %v610_v7  ;;  %v299_v22 = vmul.f32 %v297_v5, %v641_v4  ;;  %v333_v23 = vperm.slane %v625_v26, 6  ;;  %v172_v1 = vld [vmem:[%s604_s19 + $0x6] sm:$0x3] }
  0x1f   : > { %v269_v16 = vadd.f32 %v522_v2, %v256_v8  ;;  %v308_v27 = vmul.f32 %v307_v6, %v610_v7  ;;  %v309_v28 = vmul.f32 %v307_v6, %v641_v4  ;;  %v303_v29 = vmul.f32 %v302_v14, %v613_v11 }
  0x20   : > { %v270_v17 = vadd.f32 %v523_v3, %v257_v9  ;;  %v304_v30 = vmul.f32 %v302_v14, %v645_v13  ;;  %v321_v35 = vmul.f32 %v320_v15, %v613_v11  ;;  %v322_v36 = vmul.f32 %v320_v15, %v645_v13 }
  0x21   : > { %v282_v24 = vadd.f32 %v524_v10, %v269_v16  ;;  %v334_v37 = vmul.f32 %v333_v23, %v610_v7  ;;  %v335_v38 = vmul.f32 %v333_v23, %v641_v4  ;;  %v528_v43 = vrot.slane %v308_v27, 9  ;;  %v176_v10 = vld [vmem:[%s604_s19 + $0xe] sm:$0x3] }
  0x22   : > { %v283_v25 = vadd.f32 %v525_v12, %v270_v17  ;;  %v529_v44 = vrot.slane %v309_v28, 9  ;;  %v193_v45 = vunpack.c.l.bf16 %v179_v31  ;;  %v346_v46 = vperm.slane %v625_v26, 7 }
  0x23   : > { %v295_v33 = vadd.f32 %v526_v18, %v282_v24  ;;  %v356_v47 = vperm.slane %v660_v32, 1  ;;  %v530_v50 = vrot.slane %v321_v35, 9  ;;  %v531_v11 = vrot.slane %v322_v36, 9 }
  0x24   : > { %v296_v34 = vadd.f32 %v527_v19, %v283_v25  ;;  %v196_v51 = vunpack.c.l.bf16 %v182_v39  ;;  %v351_v7 = vperm.slane %v660_v32, 0  ;;  %v369_v52 = vperm.slane %v660_v32, 2 }
  0x25   : > { %v300_v41 = vadd.f32 %v298_v20, %v295_v33  ;;  %v532_v55 = vrot.slane %v334_v37, 10  ;;  %v533_v56 = vrot.slane %v335_v38, 10  ;;  %v347_v57 = vmul.f32 %v346_v46, %v617_v21 }
  0x26   : > { %v301_v42 = vadd.f32 %v299_v22, %v296_v34  ;;  %v357_v26 = vmul.f32 %v356_v47, %v617_v21  ;;  %v382_v58 = vperm.slane %v660_v32, 3  ;;  %v348_v61 = vmul.f32 %v346_v46, %v193_v45  ;;  %v557_v34 = vld [vmem:[%s702_s1 + $0x18] ss:$0 sm:$0xff] }
  0x27   : > { %v305_v48 = vadd.f32 %v303_v29, %v300_v41  ;;  %v358_v62 = vmul.f32 %v356_v47, %v193_v45  ;;  %v352_v63 = vmul.f32 %v351_v7, %v630_v40  ;;  %v370_v0 = vmul.f32 %v369_v52, %v630_v40 }
  0x28   : > { %v306_v49 = vadd.f32 %v304_v30, %v301_v42  ;;  %v353_v5 = vmul.f32 %v351_v7, %v196_v51  ;;  %v371_v6 = vmul.f32 %v369_v52, %v196_v51  ;;  %v534_v8 = vrot.slane %v357_v26, 9 }
  0x29   : > { %v318_v53 = vadd.f32 %v528_v43, %v305_v48  ;;  %v383_v9 = vmul.f32 %v382_v58, %v617_v21  ;;  %v535_v15 = vrot.slane %v358_v62, 9  ;;  %v384_v16 = vmul.f32 %v382_v58, %v193_v45 }
  0x2a   : > { %v319_v54 = vadd.f32 %v529_v44, %v306_v49  ;;  %v186_v17 = vunpack.c.l.bf16 %v172_v1  ;;  %v536_v18 = vrot.slane %v370_v0, 9  ;;  %v395_v19 = vperm.slane %v660_v32, 4 }
  0x2b   : > { %v331_v59 = vadd.f32 %v530_v50, %v318_v53  ;;  %v537_v40 = vrot.slane %v371_v6, 9  ;;  %v405_v23 = vperm.slane %v660_v32, 6  ;;  %v190_v24 = vunpack.c.l.bf16 %v176_v10 }
  0x2c   : > { %v332_v60 = vadd.f32 %v531_v11, %v319_v54  ;;  %v538_v25 = vrot.slane %v383_v9, 10  ;;  %v400_v27 = vperm.slane %v660_v32, 5  ;;  %v539_v29 = vrot.slane %v384_v16, 10 }
  0x2d   : > { %v344_v2 = vadd.f32 %v532_v55, %v331_v59  ;;  %v418_v30 = vperm.slane %v660_v32, 7  ;;  %v396_v31 = vmul.f32 %v395_v19, %v641_v4  ;;  %v397_v33 = vmul.f32 %v395_v19, %v186_v17 }
  0x2e   : > { %v345_v3 = vadd.f32 %v533_v56, %v332_v60  ;;  %v406_v37 = vmul.f32 %v405_v23, %v641_v4  ;;  %v407_v38 = vmul.f32 %v405_v23, %v186_v17  ;;  %v401_v39 = vmul.f32 %v400_v27, %v645_v13 }
  0x2f   : > { %v349_v12 = vadd.f32 %v347_v57, %v344_v2  ;;  %v402_v41 = vmul.f32 %v400_v27, %v190_v24  ;;  %v419_v44 = vmul.f32 %v418_v30, %v645_v13  ;;  %v420_v32 = vmul.f32 %v418_v30, %v190_v24 }
  0x30   : > { %v350_v14 = vadd.f32 %v348_v61, %v345_v3  ;;  %v432_v45 = vmul.f32 %v557_v34, %v641_v4  ;;  %v433_v46 = vmul.f32 %v557_v34, %v186_v17  ;;  %v540_v49 = vrot.slane %v406_v37, 9  ;;  %v558_v4 = vld [vmem:[%s703_s2] ss:$0 sm:$0xff] }
  0x31   : > { %v354_v20 = vadd.f32 %v352_v63, %v349_v12  ;;  %v541_v50 = vrot.slane %v407_v38, 9  ;;  %v542_v7 = vrot.slane %v419_v44, 9  ;;  %v543_v52 = vrot.slane %v420_v32, 9 }
  0x32   : > { %v355_v22 = vadd.f32 %v353_v5, %v350_v14  ;;  %v544_v55 = vrot.slane %v432_v45, 10  ;;  %v545_v56 = vrot.slane %v433_v46, 10 }
  0x33   : > { %v367_v28 = vadd.f32 %v534_v8, %v354_v20 }
  0x34   : > { %v368_v21 = vadd.f32 %v535_v15, %v355_v22 }
  0x35   : > { %v380_v35 = vadd.f32 %v536_v18, %v367_v28 }
  0x36   : > { %v381_v36 = vadd.f32 %v537_v40, %v368_v21 }
  0x37   : > { %v393_v42 = vadd.f32 %v538_v25, %v380_v35 }
  0x38   : > { %v394_v43 = vadd.f32 %v539_v29, %v381_v36 }
  0x39   : > { %v398_v47 = vadd.f32 %v396_v31, %v393_v42 }
  0x3a   : > { %v399_v48 = vadd.f32 %v397_v33, %v394_v43 }
  0x3b   : > { %v403_v11 = vadd.f32 %v401_v39, %v398_v47 }
  0x3c   : > { %v404_v51 = vadd.f32 %v402_v41, %v399_v48 }
  0x3d   : > { %v416_v53 = vadd.f32 %v540_v49, %v403_v11 }
  0x3e   : > { %v417_v54 = vadd.f32 %v541_v50, %v404_v51 }
  0x3f   : > { %v429_v57 = vadd.f32 %v542_v7, %v416_v53 }
  0x40   : > { %v430_v26 = vadd.f32 %v543_v52, %v417_v54 }
  0x41   : > { %v442_v13 = vadd.f32 %v544_v55, %v429_v57 }
  0x42   : > { %v443_v58 = vadd.f32 %v545_v56, %v430_v26 }
  0x43   : > { %v448_v59 = vadd.f32 %v558_v4, %v442_v13 }
  0x44   : > { %v449_v60 = vadd.f32 %v558_v4, %v443_v58 }
  0x45   : > { %v450_v61 = vpack.c.bf16 %v448_v59, %v448_v59 }
  0x46   : > { %v451_v62 = vpack.c.bf16 %v449_v60, %v449_v60 }
  0x47   : > { %453 = vst.msk [vmem:[%s168_s4] sm:$0x1] %vm452_vm0, %v450_v61 }
  0x48   : > { %454 = vst.msk [vmem:[%s168_s4 + $0x1] sm:$0x1] %vm452_vm0, %v451_v62 }
  0x49 PF: > { %s13_s12 = sadd.s32 1, %s565_s12  }
  0x4a   : > { %p10_p4 = scmp.ge.s32.totalorder %s13_s12, 4  }
  0x4c   :  { %12 = sbr.rel (!%p10_p4) target bundleno = 1 (0x1), region = 62 }

// kernel: _lambda_.35
= control target key start
LH: loop header
LB: loop body
LE: loop exit
PB: predicated region body
PF: predicated region fallthrough
CT: control target
= control target key end

     0   :  { %s594_s12 = smov 0   ;;  %s749_s0 = inlined_call_operand.vmem [shape: bf16[2,6,6,36], index: 0, kind: input, shape index: {}]   ;;  %s750_s1 = inlined_call_operand.vmem [shape: f32[9,36], index: 1, kind: input, shape index: {}]   ;;  %s751_s2 = inlined_call_operand.vmem [shape: f32[1,36], index: 2, kind: input, shape index: {}]   ;;  %s752_s3 = inlined_call_operand.vmem [shape: bf16[2,4,4,72], index: 3, kind: output, shape index: {}]  }
   0x1 LB: > { %s532_s13 = sadd.s32 4294967295, %s571_s12   ;;  %p536_p0 = scmp.ge.s32.totalorder %s571_s12, 1  ;;  %s571_s12 = sphi %s594_s12, %s13_s12  }
   0x2   : > { %p137_p1 = scmp.lt.s32.totalorder %s571_s12, 3 }
   0x4   : > { %p138_p2 = pnand %p536_p0, %p137_p1 }
   0x5   : > { %p161_p3 = scmp.lt.s32.totalorder (!%p138_p2), %s532_s13, 1  ;;  %s573_s24 = smov (!%p138_p2), 36  }
   0x6   : > { %141 = sbr.rel (%p138_p2) target bundleno = 189 (0xbd), region = 32 }
   0xb   : > { %s756_s13 = smov (!%p161_p3, %s532_s13), 1  ;;  %v183_v0 = vld [vmem:[%s750_s1] sm:$0xff]  ;;  %v653_v37 = vld [vmem:[%s750_s1 + $0x8] ss:$0 sm:$0xff]  ;;  %vm366_vm0 = vcmask 293888   ;;  %vm383_vm1 = vcmask 1041408  }
   0xc   : > { %s543_s16 = smul.u32 24, %s756_s13  ;;  %v185_v1 = vperm.slane %v183_v0, 0  ;;  %v190_v2 = vperm.slane %v183_v0, 1  ;;  %v608_v3 = vperm.slane %v183_v0, 2  ;;  %v613_v4 = vperm.slane %v183_v0, 3  ;;  %s542_s25 = sshll.u32 %s756_s13, 3 }
   0xd   : > { %v615_v5 = vperm.slane %v183_v0, 4  ;;  %v617_v6 = vperm.slane %v183_v0, 5  ;;  %v619_v7 = vperm.slane %v183_v0, 6  ;;  %v627_v18 = vperm.slane %v183_v0, 7  ;;  %s724_s28 = scalar_lea.vmem %s752_s3, %s542_s25 }
   0xe   : > { %s165_s19 = scalar_lea.vmem %s749_s0, %s543_s16  ;;  %vm387_vm2 = vcmask 1043458   ;;  %vm409_vm3 = vsmask.f32 1280  ;;  %vm410_vm4 = vsmask.f32 3336  ;;  %vm472_vm10 = vcmask 582656  }
   0xf   : > { %v171_v8 = vld [vmem:[%s165_s19] sm:$0x7]  ;;  %v172_v9 = vld [vmem:[%s165_s19 + $0x4] sm:$0x7]  ;;  %v173_v10 = vld [vmem:[%s165_s19 + $0x8] sm:$0x7] }
  0x10   : > { %v174_v11 = vld [vmem:[%s165_s19 + $0xc] sm:$0x7]  ;;  %v177_v12 = vunpack.c.l.bf16 %v171_v8  ;;  %v621_v13 = vunpack.c.l.bf16 %v172_v9  ;;  %v623_v14 = vunpack.c.l.bf16 %v173_v10  ;;  %v175_v15 = vld [vmem:[%s165_s19 + $0x10] sm:$0x7]  ;;  %v176_v16 = vld [vmem:[%s165_s19 + $0x14] sm:$0x7] }
  0x11   : > { %v625_v17 = vunpack.c.l.bf16 %v174_v11  ;;  %v629_v19 = vunpack.c.l.bf16 %v175_v15  ;;  %v631_v20 = vunpack.c.l.bf16 %v176_v16  ;;  %vm412_vm5 = vsmask.f32 5392  ;;  %vm411_vm7 = vmor %vm409_vm3, %vm410_vm4 }
  0x12   : > { %v186_v21 = vmul.f32 %v185_v1, %v177_v12  ;;  %v187_v22 = vmul.f32 %v185_v1, %v621_v13  ;;  %v191_v23 = vmul.f32 %v190_v2, %v177_v12  ;;  %v192_v24 = vmul.f32 %v190_v2, %v621_v13  ;;  %vm413_vm8 = vmor %vm411_vm7, %vm412_vm5 }
  0x13   : > { %v212_v25 = vmul.f32 %v608_v3, %v177_v12  ;;  %v213_v26 = vmul.f32 %v608_v3, %v621_v13  ;;  %v233_v27 = vmul.f32 %v613_v4, %v621_v13  ;;  %v234_v28 = vmul.f32 %v613_v4, %v623_v14 }
  0x14   : > { %v199_v29 = vrot.slane %v191_v23, 1  ;;  %v200_v30 = vrot.slane %v192_v24, 1  ;;  %v242_v31 = vmul.f32 %v615_v5, %v621_v13  ;;  %v243_v32 = vmul.f32 %v615_v5, %v623_v14 }
  0x15   : > { %v220_v33 = vrot.slane %v212_v25, 2  ;;  %v221_v34 = vrot.slane %v213_v26, 2  ;;  %v263_v35 = vmul.f32 %v617_v6, %v621_v13  ;;  %v264_v36 = vmul.f32 %v617_v6, %v623_v14 }
  0x16   : > { %v207_v38 = vadd.f32 %v199_v29, %v186_v21  ;;  %v208_v39 = vadd.f32 %v200_v30, %v187_v22  ;;  %v250_v40 = vrot.slane %v242_v31, 1  ;;  %v251_v41 = vrot.slane %v243_v32, 1 }
  0x17   : > { %v271_v42 = vrot.slane %v263_v35, 2  ;;  %v272_v43 = vrot.slane %v264_v36, 2  ;;  %v284_v44 = vmul.f32 %v619_v7, %v623_v14  ;;  %v285_v45 = vmul.f32 %v619_v7, %v625_v17 }
  0x18   : > { %v228_v46 = vadd.f32 %v220_v33, %v207_v38  ;;  %v229_v47 = vadd.f32 %v221_v34, %v208_v39  ;;  %v293_v48 = vmul.f32 %v627_v18, %v623_v14  ;;  %v294_v49 = vmul.f32 %v627_v18, %v625_v17  ;;  %v564_v33 = vld [vmem:[%s751_s2] ss:$0 sm:$0xff] }
  0x19   : > { %v314_v50 = vmul.f32 %v653_v37, %v623_v14  ;;  %v315_v51 = vmul.f32 %v653_v37, %v625_v17  ;;  %v188_v52 = vmul.f32 %v185_v1, %v623_v14  ;;  %v189_v53 = vmul.f32 %v185_v1, %v625_v17 }
  0x1a   : > { %v237_v54 = vadd.f32 %v233_v27, %v228_v46  ;;  %v238_v55 = vadd.f32 %v234_v28, %v229_v47  ;;  %v301_v56 = vrot.slane %v293_v48, 1  ;;  %v302_v57 = vrot.slane %v294_v49, 1 }
  0x1b   : > { %v322_v58 = vrot.slane %v314_v50, 2  ;;  %v323_v59 = vrot.slane %v315_v51, 2  ;;  %v193_v60 = vmul.f32 %v190_v2, %v623_v14  ;;  %v194_v61 = vmul.f32 %v190_v2, %v625_v17 }
  0x1c   : > { %v258_v62 = vadd.f32 %v250_v40, %v237_v54  ;;  %v259_v63 = vadd.f32 %v251_v41, %v238_v55  ;;  %v214_v0 = vmul.f32 %v608_v3, %v623_v14  ;;  %v215_v8 = vmul.f32 %v608_v3, %v625_v17 }
  0x1d   : > { %v201_v9 = vrot.slane %v193_v60, 1  ;;  %v202_v1 = vrot.slane %v194_v61, 1  ;;  %v235_v10 = vmul.f32 %v613_v4, %v625_v17  ;;  %v236_v11 = vmul.f32 %v613_v4, %v629_v19 }
  0x1e   : > { %v279_v12 = vadd.f32 %v271_v42, %v258_v62  ;;  %v280_v15 = vadd.f32 %v272_v43, %v259_v63  ;;  %v222_v16 = vrot.slane %v214_v0, 2  ;;  %v223_v2 = vrot.slane %v215_v8, 2 }
  0x1f   : > { %v209_v21 = vadd.f32 %v201_v9, %v188_v52  ;;  %v210_v22 = vadd.f32 %v202_v1, %v189_v53  ;;  %v244_v23 = vmul.f32 %v615_v5, %v625_v17  ;;  %v245_v3 = vmul.f32 %v615_v5, %v629_v19 }
  0x20   : > { %v288_v24 = vadd.f32 %v284_v44, %v279_v12  ;;  %v289_v25 = vadd.f32 %v285_v45, %v280_v15  ;;  %v265_v26 = vmul.f32 %v617_v6, %v625_v17  ;;  %v266_v4 = vmul.f32 %v617_v6, %v629_v19 }
  0x21   : > { %v230_v27 = vadd.f32 %v222_v16, %v209_v21  ;;  %v231_v28 = vadd.f32 %v223_v2, %v210_v22  ;;  %v252_v29 = vrot.slane %v244_v23, 1  ;;  %v253_v30 = vrot.slane %v245_v3, 1 }
  0x22   : > { %v309_v31 = vadd.f32 %v301_v56, %v288_v24  ;;  %v310_v32 = vadd.f32 %v302_v57, %v289_v25  ;;  %v273_v34 = vrot.slane %v265_v26, 2  ;;  %v274_v5 = vrot.slane %v266_v4, 2 }
  0x23   : > { %v239_v35 = vadd.f32 %v235_v10, %v230_v27  ;;  %v240_v36 = vadd.f32 %v236_v11, %v231_v28  ;;  %v286_v38 = vmul.f32 %v619_v7, %v629_v19  ;;  %v287_v6 = vmul.f32 %v619_v7, %v631_v20 }
  0x24   : > { %v330_v39 = vadd.f32 %v322_v58, %v309_v31  ;;  %v331_v40 = vadd.f32 %v323_v59, %v310_v32  ;;  %v295_v41 = vmul.f32 %v627_v18, %v629_v19  ;;  %v296_v42 = vmul.f32 %v627_v18, %v631_v20 }
  0x25   : > { %v260_v43 = vadd.f32 %v252_v29, %v239_v35  ;;  %v261_v44 = vadd.f32 %v253_v30, %v240_v36  ;;  %v316_v45 = vmul.f32 %v653_v37, %v629_v19  ;;  %v317_v46 = vmul.f32 %v653_v37, %v631_v20 }
  0x26   : > { %v338_v47 = vadd.f32 %v564_v33, %v330_v39  ;;  %v339_v48 = vadd.f32 %v564_v33, %v331_v40  ;;  %v303_v50 = vrot.slane %v295_v41, 1  ;;  %v304_v51 = vrot.slane %v296_v42, 1 }
  0x27   : > { %v281_v49 = vadd.f32 %v273_v34, %v260_v43  ;;  %v282_v7 = vadd.f32 %v274_v5, %v261_v44  ;;  %v324_v56 = vrot.slane %v316_v45, 2  ;;  %v325_v18 = vrot.slane %v317_v46, 2 }
  0x28   : > { %v342_v52 = vmax.f32 %v338_v47, 0.0  ;;  %v343_v53 = vmax.f32 %v339_v48, 0.0  ;;  %vm414_vm6 = vsmask.f32 7448 }
  0x29   : > { %v290_v54 = vadd.f32 %v286_v38, %v281_v49  ;;  %v291_v55 = vadd.f32 %v287_v6, %v282_v7  ;;  %vm717_vm9 = vmor %vm413_vm8, %vm414_vm6 }
  0x2a   : > { %v350_v57 = vrot.slane %v342_v52, 7  ;;  %v351_v58 = vrot.slane %v343_v53, 7 }
  0x2b   : > { %v311_v59 = vadd.f32 %v303_v50, %v290_v54  ;;  %v312_v60 = vadd.f32 %v304_v51, %v291_v55 }
  0x2c   : > { %v553_v61 = vpack.i.bf16 %v351_v58, %v350_v57 }
  0x2d   : > { %v332_v62 = vadd.f32 %v324_v56, %v311_v59  ;;  %v333_v63 = vadd.f32 %v325_v18, %v312_v60 }
  0x2e   : > { %554 = vrot.lane.b32.xlu0 %v553_v61, %s573_s24 }
  0x2f   : > { %v340_v20 = vadd.f32 %v564_v33, %v332_v62  ;;  %v341_v37 = vadd.f32 %v564_v33, %v333_v63 }
  0x31   : > { %v344_v0 = vmax.f32 %v340_v20, 0.0  ;;  %v345_v8 = vmax.f32 %v341_v37, 0.0 }
  0x33   : > { %v352_v9 = vrot.slane %v344_v0, 7  ;;  %v353_v1 = vrot.slane %v345_v8, 7 }
  0x35   : > { %v558_v10 = vpack.i.bf16 %v353_v1, %v352_v9 }
  0x37   : > { %559 = vrot.lane.b32.xlu0 %v558_v10, %s573_s24 }
  0xa0   : > { %v555_v11 = vpop.permute.xlu0 %554 }
  0xa1   : > { %v557_v12 = vunpack.i.h.bf16 %v555_v11  ;;  %v556_v15 = vunpack.i.l.bf16 %v555_v11 }
  0xa3   : > { %v368_v16 = vsel %vm366_vm0, %v623_v14, %v557_v12  ;;  %v367_v2 = vsel %vm366_vm0, %v621_v13, %v556_v15 }
  0xa4   : > { %v372_v21 = vpack.c.bf16 %v368_v16, %v368_v16  ;;  %v371_v22 = vpack.c.bf16 %v367_v2, %v367_v2 }
  0xa6   : > { %v380_v23 = vrot.slane %v372_v21, 2  ;;  %v379_v3 = vrot.slane %v371_v22, 2 }
  0xa8   : > { %v393_v24 = vsel %vm383_vm1, %v372_v21, %v380_v23  ;;  %v394_v25 = vsel %vm387_vm2, %v372_v21, %v380_v23  ;;  %v386_v14 = vsel %vm383_vm1, %v371_v22, %v379_v3  ;;  %v388_v13 = vsel %vm387_vm2, %v371_v22, %v379_v3 }
  0xa9   : > { %v396_v26 = vrot.slane %v394_v25, 2  ;;  %v429_v4 = vshrl.u32 %v393_v24, 16  ;;  %v432_v27 = vshll.u32 %v393_v24, 16  ;;  %v390_v28 = vrot.slane %v388_v13, 2  ;;  %v560_v29 = vpop.permute.xlu0 %559 }
  0xaa   : > { %v416_v30 = vshrl.u32 %v386_v14, 16  ;;  %v419_v31 = vshll.u32 %v386_v14, 16  ;;  %v562_v32 = vunpack.i.h.bf16 %v560_v29  ;;  %v561_v33 = vunpack.i.l.bf16 %v560_v29 }
  0xab   : > { %v431_v34 = vrot.slane %v429_v4, 6  ;;  %v434_v5 = vrot.slane %v432_v27, 7  ;;  %v438_v35 = vshll.u32 %v396_v26, 16  ;;  %v425_v36 = vshll.u32 %v390_v28, 16 }
  0xac   : > { %v418_v38 = vrot.slane %v416_v30, 6  ;;  %v421_v6 = vrot.slane %v419_v31, 7  ;;  %v370_v39 = vsel %vm366_vm0, %v629_v19, %v562_v32  ;;  %v369_v40 = vsel %vm366_vm0, %v625_v17, %v561_v33 }
  0xad   : > { %v435_v41 = vor.u32 %v434_v5, %v431_v34  ;;  %v374_v42 = vpack.c.bf16 %v370_v39, %v370_v39  ;;  %v373_v45 = vpack.c.bf16 %v369_v40, %v369_v40  ;;  %v440_v46 = vrot.slane %v438_v35, 7 }
  0xae   : > { %v422_v44 = vor.u32 %v421_v6, %v418_v38  ;;  %v427_v48 = vrot.slane %v425_v36, 7 }
  0xaf   : > { %v436_v19 = vrot.slane %v435_v41, 2  ;;  %v382_v17 = vrot.slane %v374_v42, 2  ;;  %v381_v49 = vrot.slane %v373_v45, 2 }
  0xb0   : > { %v423_v47 = vrot.slane %v422_v44, 2 }
  0xb1   : > { %v441_v7 = vsel %vm717_vm9, %v436_v19, %v440_v46  ;;  %v405_v50 = vsel %vm383_vm1, %v374_v42, %v382_v17  ;;  %v406_v51 = vsel %vm387_vm2, %v374_v42, %v382_v17  ;;  %v399_v56 = vsel %vm383_vm1, %v373_v45, %v381_v49 }
  0xb2   : > { %474 = vst.msk [vmem:[%s724_s28 + $0x2] sm:$0x3] %vm472_vm10, %v441_v7  ;;  %v428_v52 = vsel %vm717_vm9, %v423_v47, %v427_v48  ;;  %v408_v53 = vrot.slane %v406_v51, 2  ;;  %v455_v54 = vshrl.u32 %v405_v50, 16  ;;  %v458_v55 = vshll.u32 %v405_v50, 16 }
  0xb3   : > { %473 = vst.msk [vmem:[%s724_s28] sm:$0x3] %vm472_vm10, %v428_v52  ;;  %v400_v18 = vsel %vm387_vm2, %v373_v45, %v381_v49  ;;  %v442_v61 = vshrl.u32 %v399_v56, 16  ;;  %v445_v62 = vshll.u32 %v399_v56, 16 }
  0xb4   : > { %v457_v57 = vrot.slane %v455_v54, 6  ;;  %v460_v58 = vrot.slane %v458_v55, 7  ;;  %v464_v59 = vshll.u32 %v408_v53, 16  ;;  %v402_v60 = vrot.slane %v400_v18, 2 }
  0xb5   : > { %v444_v20 = vrot.slane %v442_v61, 6  ;;  %v447_v37 = vrot.slane %v445_v62, 7 }
  0xb6   : > { %v461_v63 = vor.u32 %v460_v58, %v457_v57  ;;  %v451_v0 = vshll.u32 %v402_v60, 16  ;;  %v466_v9 = vrot.slane %v464_v59, 7 }
  0xb7   : > { %v448_v1 = vor.u32 %v447_v37, %v444_v20 }
  0xb8   : > { %v462_v8 = vrot.slane %v461_v63, 2  ;;  %v453_v12 = vrot.slane %v451_v0, 7 }
  0xb9   : > { %v449_v11 = vrot.slane %v448_v1, 2 }
  0xba   : > { %v467_v10 = vsel %vm717_vm9, %v462_v8, %v466_v9 }
  0xbb   : > { %476 = vst.msk [vmem:[%s724_s28 + $0x6] sm:$0x3] %vm472_vm10, %v467_v10  ;;  %v454_v15 = vsel %vm717_vm9, %v449_v11, %v453_v12 }
  0xbc   : > { %475 = vst.msk [vmem:[%s724_s28 + $0x4] sm:$0x3] %vm472_vm10, %v454_v15 }
  0xbd PF: > { %s13_s12 = sadd.s32 1, %s571_s12  }
  0xbe   : > { %p10_p4 = scmp.ge.s32.totalorder %s13_s12, 4  }
  0xc0   :  { %12 = sbr.rel (!%p10_p4) target bundleno = 1 (0x1), region = 62 }

// kernel: _lambda_.40
= control target key start
LH: loop header
LB: loop body
LE: loop exit
PB: predicated region body
PF: predicated region fallthrough
CT: control target
= control target key end

     0   :  { %s415_s15 = smov 0   ;;  %s453_s0 = inlined_call_operand.vmem [shape: bf16[2,4,72], index: 0, kind: input, shape index: {}]   ;;  %s454_s1 = inlined_call_operand.vmem [shape: f32[2,1,72], index: 1, kind: input, shape index: {}]   ;;  %s455_s2 = inlined_call_operand.vmem [shape: bf16[72,20], index: 2, kind: input, shape index: {}]   ;;  %s456_s3 = inlined_call_operand.vmem [shape: f32[1,20], index: 3, kind: input, shape index: {}]   ;;  %s457_s4 = inlined_call_operand.vmem [shape: bf16[2,4,20], index: 4, kind: output, shape index: {}]  }
   0x1 LB: > { %s342_s16 = sadd.s32 4294967295, %s388_s15   ;;  %p346_p0 = scmp.ge.s32.totalorder %s388_s15, 1  ;;  %s388_s15 = sphi %s415_s15, %s14_s15  }
   0x2   : > { %p169_p1 = scmp.lt.s32.totalorder %s388_s15, 3 }
   0x4   : > { %p170_p2 = pnand %p346_p0, %p169_p1 }
   0x5   : > { %p196_p3 = scmp.lt.s32.totalorder (!%p170_p2), %s342_s16, 1 }
   0x6   : > { %173 = sbr.rel (%p170_p2) target bundleno = 170 (0xaa), region = 36 }
   0xb   : > { %v224_v0 = vld [vmem:[%s455_s2 + $0x20] sm:$0xf]  ;;  %vm260_vm0 = vcmask 1043456   ;;  %s459_s16 = smov (!%p196_p3, %s342_s16), 1  ;;  %v371_v4 = vld [vmem:[%s455_s2 + $0x18] sm:$0xff]  ;;  %v370_v5 = vld [vmem:[%s455_s2 + $0x10] sm:$0xff] }
   0xc   : > { %v246_v1 = vunpack.c.l.b16 %v224_v0  ;;  %s347_s19 = sshll.u32 %s459_s16, 1  ;;  %s202_s22 = scalar_lea.vmem %s454_s1, %s459_s16  ;;  %v369_v9 = vld [vmem:[%s455_s2 + $0x8] sm:$0xff]  ;;  %v368_v11 = vld [vmem:[%s455_s2] sm:$0xff]  ;;  %vm256_vm1 = vcmask 588800   ;;  %vm278_vm2 = vcmask 156672  }
   0xd   : > { %s199_s27 = scalar_lea.vmem %s453_s0, %s347_s19  ;;  %v380_v8 = vld [vmem:[%s202_s22] ss:$0 sm:$0xff]  ;;  %s206_s12 = scalar_lea.vmem %s457_s4, %s347_s19 }
   0xe   : > { %v251_v2 = vpack.c.b16 %v246_v1, %v246_v1  ;;  %v208_v6 = vld [vmem:[%s199_s27] sm:$0x3] }
   0xf   : > { %v209_v7 = vunpack.c.l.bf16 %v208_v6  ;;  %v381_v13 = vld [vmem:[%s456_s3] ss:$0 sm:$0xff] }
  0x10   : > { %v262_v3 = vsel %vm260_vm0, %v251_v2, 0 }
  0x11   : > { %267 = vmatpush.bf16.msra.mxu0 %v262_v3  ;;  %v214_v10 = vmul.f32 %v380_v8, %v209_v7 }
  0x13   : > { %v215_v12 = vpack.c.bf16 %v214_v10, %v214_v10 }
  0x15   : > { %268 = vmatpush.bf16.msra.mxu0 %v371_v4 }
  0x19   : > { %269 = vmatpush.bf16.msra.mxu0 %v370_v5 }
  0x1d   : > { %270 = vmatpush.bf16.msra.mxu0 %v369_v9 }
  0x21   : > { %271 = vmatpush.bf16.msra.mxu0 %v368_v11 }
  0x24   : > { %365 = vmatmul.msk.bf16.vlgmr.msra.gmra.mxu0 %vm256_vm1, %v215_v12 }
  0xa1   : > { %v273_v14 = vpop.f32.mrf.mxu0 }
  0xa2   : > { %v274_v15 = vadd.f32 %v381_v13, %v273_v14 }
  0xa4   : > { %v277_v16 = vpack.c.bf16 %v274_v15, %v274_v15 }
  0xa6   : > { %279 = vst.msk [vmem:[%s206_s12] sm:$0x3] %vm278_vm2, %v277_v16 }
  0xa9   : > { %v275_v17 = vpop.f32.mrf.mxu0 }
  0xaa PF: > { %s14_s15 = sadd.s32 1, %s388_s15  }
  0xab   : > { %p11_p4 = scmp.ge.s32.totalorder %s14_s15, 4  }
  0xad   :  { %13 = sbr.rel (!%p11_p4) target bundleno = 1 (0x1), region = 69 }

// kernel: _lambda_.37
= control target key start
LH: loop header
LB: loop body
LE: loop exit
PB: predicated region body
PF: predicated region fallthrough
CT: control target
= control target key end

     0   :  { %s470_s18 = smov 0   ;;  %s518_s0 = inlined_call_operand.vmem [shape: bf16[2,4,72], index: 0, kind: input, shape index: {}]   ;;  %s519_s1 = inlined_call_operand.vmem [shape: bf16[72,20], index: 1, kind: input, shape index: {}]   ;;  %s520_s2 = inlined_call_operand.vmem [shape: f32[1,20], index: 2, kind: input, shape index: {}]   ;;  %s521_s3 = inlined_call_operand.vmem [shape: bf16[20,72], index: 3, kind: input, shape index: {}]   ;;  %s522_s4 = inlined_call_operand.vmem [shape: f32[1,72], index: 4, kind: input, shape index: {}]   ;;  %s523_s5 = inlined_call_operand.vmem [shape: f32[2,1,72], index: 5, kind: output, shape index: {}]  }
   0x1 LB: > { %s385_s19 = sadd.s32 4294967295, %s437_s18   ;;  %p389_p0 = scmp.ge.s32.totalorder %s437_s18, 1  ;;  %s437_s18 = sphi %s470_s18, %s15_s18  }
   0x2   : > { %p186_p1 = scmp.lt.s32.totalorder %s437_s18, 3 }
   0x4   : > { %p187_p2 = pnand %p389_p0, %p186_p1 }
   0x5   : > { %p211_p3 = scmp.lt.s32.totalorder (!%p187_p2), %s385_s19, 1 }
   0x6   : > { %190 = sbr.rel (%p187_p2) target bundleno = 305 (0x131), region = 40 }
   0xb   : > { %v246_v0 = vld [vmem:[%s519_s1 + $0x20] sm:$0xf]  ;;  %vm279_vm0 = vcmask 1043456   ;;  %s525_s19 = smov (!%p211_p3, %s385_s19), 1  ;;  %v439_v2 = vmov 4.0   ;;  %v418_v5 = vld [vmem:[%s519_s1 + $0x18] sm:$0xff] }
   0xc   : > { %v265_v1 = vunpack.c.l.b16 %v246_v0  ;;  %429 = vrcp.f32 %v439_v2  ;;  %s390_s22 = sshll.u32 %s525_s19, 1  ;;  %vm221_vm1 = vcmask 584704   ;;  %v417_v11 = vld [vmem:[%s519_s1 + $0x10] sm:$0xff]  ;;  %v416_v16 = vld [vmem:[%s519_s1 + $0x8] sm:$0xff]  ;;  %v415_v20 = vld [vmem:[%s519_s1] sm:$0xff]  ;;  %vm275_vm3 = vcmask 588800   ;;  %s217_s21 = scalar_lea.vmem %s523_s5, %s525_s19 }
   0xd   : > { %s214_s25 = scalar_lea.vmem %s518_s0, %s390_s22  ;;  %v300_v26 = vld [vmem:[%s521_s3 + $0x8] sm:$0x3]  ;;  %vm315_vm4 = vcmask 1041408   ;;  %v419_v30 = vld [vmem:[%s521_s3] sm:$0xff]  ;;  %vm311_vm5 = vcmask 162816   ;;  %vm336_vm6 = vcmask 581632  }
   0xe   : > { %v270_v3 = vpack.c.b16 %v265_v1, %v265_v1  ;;  %v219_v6 = vld [vmem:[%s214_s25] sm:$0x3]  ;;  %v307_v27 = vunpack.c.l.b16 %v300_v26 }
   0xf   : > { %v220_v7 = vunpack.c.l.bf16 %v219_v6  ;;  %v247_v31 = vld [vmem:[%s520_s2] sm:$0x1] }
  0x10   : > { %v281_v4 = vsel %vm279_vm0, %v270_v3, 0  ;;  %v309_v28 = vpack.c.b16 %v307_v27, %v307_v27  ;;  %v301_v37 = vld [vmem:[%s522_s4] sm:$0x1] }
  0x11   : > { %286 = vmatpush.bf16.msra.mxu0 %v281_v4  ;;  %v222_v9 = vsel %vm221_vm1, %v220_v7, 0.0 }
  0x12   : > { %v430_v8 = vpop.eup %429  ;;  %v223_v12 = vrot.slane %v222_v9, 4  ;;  %v317_v29 = vsel %vm315_vm4, %v309_v28, 0 }
  0x13   : > { %v230_v10 = vmul.f32 4.0, %v430_v8  ;;  %vm234_vm2 = vweird.f32 %v430_v8  ;;  %325 = vmatpush.bf16.msra.mxu1 %v317_v29 }
  0x14   : > { %v224_v14 = vadd.f32 %v223_v12, %v222_v9 }
  0x15   : > { %287 = vmatpush.bf16.msra.mxu0 %v418_v5  ;;  %v231_v13 = vsub.f32 1.0, %v230_v10 }
  0x16   : > { %v225_v17 = vrot.slane %v224_v14, 2 }
  0x17   : > { %v232_v15 = vmul.f32 %v430_v8, %v231_v13  ;;  %326 = vmatpush.bf16.msra.mxu1 %v419_v30 }
  0x18   : > { %v226_v19 = vadd.f32 %v225_v17, %v224_v14 }
  0x19   : > { %288 = vmatpush.bf16.msra.mxu0 %v417_v11  ;;  %v233_v18 = vadd.f32 %v430_v8, %v232_v15 }
  0x1a   : > { %v227_v21 = vrot.slane %v226_v19, 1 }
  0x1b   : > { %v235_v22 = vsel %vm234_vm2, %v430_v8, %v233_v18 }
  0x1c   : > { %v228_v23 = vadd.f32 %v227_v21, %v226_v19 }
  0x1d   : > { %289 = vmatpush.bf16.msra.mxu0 %v416_v16 }
  0x1e   : > { %v236_v24 = vmul.f32 %v235_v22, %v228_v23 }
  0x20   : > { %v237_v25 = vpack.c.bf16 %v236_v24, %v236_v24 }
  0x21   : > { %290 = vmatpush.bf16.msra.mxu0 %v415_v20 }
  0x24   : > { %407 = vmatmul.msk.bf16.vlgmr.msra.gmra.mxu0 %vm275_vm3, %v237_v25 }
  0xa1   : > { %v292_v32 = vpop.f32.mrf.mxu0 }
  0xa2   : > { %v293_v33 = vadd.f32 %v292_v32, %v247_v31 }
  0xa4   : > { %v296_v34 = vmax.f32 %v293_v33, 0.0 }
  0xa6   : > { %v297_v35 = vpack.c.bf16 %v296_v34, %v296_v34 }
  0xa8   : > { %412 = vmatmul.msk.bf16.vlgmr.msra.gmra.mxu1 %vm311_vm5, %v297_v35 }
  0xa9   : > { %v294_v36 = vpop.f32.mrf.mxu0 }
 0x125   : > { %v328_v38 = vpop.f32.mrf.mxu1 }
 0x126   : > { %v329_v39 = vadd.f32 %v328_v38, %v301_v37 }
 0x128   : > { %v332_v40 = vadd.f32 3.0, %v329_v39 }
 0x12a   : > { %v333_v41 = vmax.f32 %v332_v40, 0.0 }
 0x12c   : > { %v334_v42 = vmin.f32 %v333_v41, 6.0 }
 0x12d   : > { %v330_v43 = vpop.f32.mrf.mxu1 }
 0x12e   : > { %v335_v44 = vmul.f32 0.16666667, %v334_v42 }
 0x130   : > { %337 = vst.msk [vmem:[%s217_s21] sm:$0x1] %vm336_vm6, %v335_v44 }
 0x131 PF: > { %s15_s18 = sadd.s32 1, %s437_s18  }
 0x132   : > { %p12_p4 = scmp.ge.s32.totalorder %s15_s18, 4  }
 0x134   :  { %14 = sbr.rel (!%p12_p4) target bundleno = 1 (0x1), region = 70 }

// kernel: _lambda_.36
= control target key start
LH: loop header
LB: loop body
LE: loop exit
PB: predicated region body
PF: predicated region fallthrough
CT: control target
= control target key end

     0   :  { %s587_s12 = smov 0   ;;  %s701_s0 = inlined_call_operand.vmem [shape: bf16[2,16,4,72], index: 0, kind: input, shape index: {}]   ;;  %s702_s1 = inlined_call_operand.vmem [shape: f32[25,72], index: 1, kind: input, shape index: {}]   ;;  %s703_s2 = inlined_call_operand.vmem [shape: f32[1,72], index: 2, kind: input, shape index: {}]   ;;  %s704_s3 = inlined_call_operand.vmem [shape: bf16[2,2,2,72], index: 3, kind: output, shape index: {}]  }
   0x1 LB: > { %s508_s13 = sadd.s32 4294967295, %s565_s12   ;;  %p512_p0 = scmp.ge.s32.totalorder %s565_s12, 1  ;;  %s565_s12 = sphi %s587_s12, %s13_s12  }
   0x2   : > { %p137_p1 = scmp.lt.s32.totalorder %s565_s12, 3 }
   0x4   : > { %p138_p2 = pnand %p512_p0, %p137_p1 }
   0x5   : > { %p160_p3 = scmp.lt.s32.totalorder (!%p138_p2), %s508_s13, 1 }
   0x6   : > { %141 = sbr.rel (%p138_p2) target bundleno = 73 (0x49), region = 32 }
   0xb   : > { %s706_s13 = smov (!%p160_p3, %s508_s13), 1  ;;  %v197_v0 = vld [vmem:[%s702_s1] sm:$0xff]  ;;  %v625_v26 = vld [vmem:[%s702_s1 + $0x8] sm:$0xff]  ;;  %vm452_vm0 = vcmask 581632  }
   0xc   : > { %s548_s16 = sshll.u32 %s706_s13, 5  ;;  %v201_v1 = vperm.slane %v197_v0, 0  ;;  %v204_v8 = vperm.slane %v197_v0, 1  ;;  %v209_v12 = vperm.slane %v197_v0, 2  ;;  %v222_v13 = vperm.slane %v197_v0, 3  ;;  %s515_s28 = sshll.u32 %s706_s13, 1 }
   0xd   : > { %s604_s19 = scalar_lea.vmem %s701_s0, %s548_s16  ;;  %v235_v16 = vperm.slane %v197_v0, 4  ;;  %v248_v18 = vperm.slane %v197_v0, 5  ;;  %v258_v19 = vperm.slane %v197_v0, 7  ;;  %v253_v41 = vperm.slane %v197_v0, 6  ;;  %s168_s4 = scalar_lea.vmem %s704_s3, %s515_s28 }
   0xe   : > { %v169_v2 = vld [vmem:[%s604_s19] sm:$0x3]  ;;  %v170_v3 = vld [vmem:[%s604_s19 + $0x2] sm:$0x3]  ;;  %v173_v4 = vld [vmem:[%s604_s19 + $0x8] sm:$0x3] }
   0xf   : > { %v174_v5 = vld [vmem:[%s604_s19 + $0xa] sm:$0x3]  ;;  %v183_v6 = vunpack.c.l.bf16 %v169_v2  ;;  %v610_v7 = vunpack.c.l.bf16 %v170_v3  ;;  %v177_v9 = vld [vmem:[%s604_s19 + $0x10] sm:$0x3]  ;;  %v187_v10 = vunpack.c.l.bf16 %v173_v4  ;;  %v178_v14 = vld [vmem:[%s604_s19 + $0x12] sm:$0x3] }
  0x10   : > { %v613_v11 = vunpack.c.l.bf16 %v174_v5  ;;  %v191_v20 = vunpack.c.l.bf16 %v177_v9  ;;  %v617_v21 = vunpack.c.l.bf16 %v178_v14  ;;  %v180_v24 = vld [vmem:[%s604_s19 + $0x18] sm:$0x3]  ;;  %v181_v25 = vld [vmem:[%s604_s19 + $0x1a] sm:$0x3]  ;;  %v271_v42 = vperm.slane %v625_v26, 0 }
  0x11   : > { %v202_v15 = vmul.f32 %v201_v1, %v183_v6  ;;  %v203_v17 = vmul.f32 %v201_v1, %v610_v7  ;;  %v205_v22 = vmul.f32 %v204_v8, %v187_v10  ;;  %v210_v27 = vmul.f32 %v209_v12, %v183_v6  ;;  %v171_v56 = vld [vmem:[%s604_s19 + $0x4] sm:$0x3]  ;;  %v175_v63 = vld [vmem:[%s604_s19 + $0xc] sm:$0x3] }
  0x12   : > { %v206_v23 = vmul.f32 %v204_v8, %v613_v11  ;;  %v211_v28 = vmul.f32 %v209_v12, %v610_v7  ;;  %v223_v29 = vmul.f32 %v222_v13, %v187_v10  ;;  %v224_v30 = vmul.f32 %v222_v13, %v613_v11 }
  0x13   : > { %v207_v31 = vadd.f32 %v205_v22, %v202_v15  ;;  %v236_v33 = vmul.f32 %v235_v16, %v183_v6  ;;  %v237_v34 = vmul.f32 %v235_v16, %v610_v7  ;;  %v516_v35 = vrot.slane %v210_v27, 9 }
  0x14   : > { %v208_v32 = vadd.f32 %v206_v23, %v203_v17  ;;  %v517_v36 = vrot.slane %v211_v28, 9  ;;  %v518_v37 = vrot.slane %v223_v29, 9  ;;  %v519_v38 = vrot.slane %v224_v30, 9 }
  0x15   : > { %v194_v39 = vunpack.c.l.bf16 %v180_v24  ;;  %v630_v40 = vunpack.c.l.bf16 %v181_v25  ;;  %v220_v43 = vadd.f32 %v516_v35, %v207_v31  ;;  %v520_v45 = vrot.slane %v236_v33, 10  ;;  %v179_v31 = vld [vmem:[%s604_s19 + $0x14] sm:$0x3] }
  0x16   : > { %v221_v44 = vadd.f32 %v517_v36, %v208_v32  ;;  %v521_v46 = vrot.slane %v237_v34, 10  ;;  %v249_v47 = vmul.f32 %v248_v18, %v191_v20  ;;  %v250_v48 = vmul.f32 %v248_v18, %v617_v21  ;;  %v660_v32 = vld [vmem:[%s702_s1 + $0x10] sm:$0xff] }
  0x17   : > { %v284_v49 = vperm.slane %v625_v26, 1  ;;  %v233_v50 = vadd.f32 %v518_v37, %v220_v43  ;;  %v259_v52 = vmul.f32 %v258_v19, %v191_v20  ;;  %v260_v53 = vmul.f32 %v258_v19, %v617_v21 }
  0x18   : > { %v234_v51 = vadd.f32 %v519_v38, %v221_v44  ;;  %v254_v54 = vmul.f32 %v253_v41, %v194_v39  ;;  %v255_v55 = vmul.f32 %v253_v41, %v630_v40  ;;  %v272_v59 = vmul.f32 %v271_v42, %v194_v39  ;;  %v182_v39 = vld [vmem:[%s604_s19 + $0x1c] sm:$0x3] }
  0x19   : > { %v246_v57 = vadd.f32 %v520_v45, %v233_v50  ;;  %v273_v60 = vmul.f32 %v271_v42, %v630_v40  ;;  %v285_v61 = vmul.f32 %v284_v49, %v191_v20  ;;  %v286_v62 = vmul.f32 %v284_v49, %v617_v21 }
  0x1a   : > { %v247_v58 = vadd.f32 %v521_v46, %v234_v51  ;;  %v522_v2 = vrot.slane %v259_v52, 9  ;;  %v523_v3 = vrot.slane %v260_v53, 9  ;;  %v641_v4 = vunpack.c.l.bf16 %v171_v56 }
  0x1b   : > { %v251_v0 = vadd.f32 %v249_v47, %v246_v57  ;;  %v297_v5 = vperm.slane %v625_v26, 2  ;;  %v307_v6 = vperm.slane %v625_v26, 4  ;;  %v524_v10 = vrot.slane %v272_v59, 9 }
  0x1c   : > { %v252_v1 = vadd.f32 %v250_v48, %v247_v58  ;;  %v525_v12 = vrot.slane %v273_v60, 9  ;;  %v645_v13 = vunpack.c.l.bf16 %v175_v63  ;;  %v302_v14 = vperm.slane %v625_v26, 3 }
  0x1d   : > { %v256_v8 = vadd.f32 %v254_v54, %v251_v0  ;;  %v320_v15 = vperm.slane %v625_v26, 5  ;;  %v526_v18 = vrot.slane %v285_v61, 10  ;;  %v527_v19 = vrot.slane %v286_v62, 10 }
  0x1e   : > { %v257_v9 = vadd.f32 %v255_v55, %v252_v1  ;;  %v298_v20 = vmul.f32 %v297_v5, %v610_v7  ;;  %v299_v22 = vmul.f32 %v297_v5, %v641_v4  ;;  %v333_v23 = vperm.slane %v625_v26, 6  ;;  %v172_v1 = vld [vmem:[%s604_s19 + $0x6] sm:$0x3] }
  0x1f   : > { %v269_v16 = vadd.f32 %v522_v2, %v256_v8  ;;  %v308_v27 = vmul.f32 %v307_v6, %v610_v7  ;;  %v309_v28 = vmul.f32 %v307_v6, %v641_v4  ;;  %v303_v29 = vmul.f32 %v302_v14, %v613_v11 }
  0x20   : > { %v270_v17 = vadd.f32 %v523_v3, %v257_v9  ;;  %v304_v30 = vmul.f32 %v302_v14, %v645_v13  ;;  %v321_v35 = vmul.f32 %v320_v15, %v613_v11  ;;  %v322_v36 = vmul.f32 %v320_v15, %v645_v13 }
  0x21   : > { %v282_v24 = vadd.f32 %v524_v10, %v269_v16  ;;  %v334_v37 = vmul.f32 %v333_v23, %v610_v7  ;;  %v335_v38 = vmul.f32 %v333_v23, %v641_v4  ;;  %v528_v43 = vrot.slane %v308_v27, 9  ;;  %v176_v10 = vld [vmem:[%s604_s19 + $0xe] sm:$0x3] }
  0x22   : > { %v283_v25 = vadd.f32 %v525_v12, %v270_v17  ;;  %v529_v44 = vrot.slane %v309_v28, 9  ;;  %v193_v45 = vunpack.c.l.bf16 %v179_v31  ;;  %v346_v46 = vperm.slane %v625_v26, 7 }
  0x23   : > { %v295_v33 = vadd.f32 %v526_v18, %v282_v24  ;;  %v356_v47 = vperm.slane %v660_v32, 1  ;;  %v530_v50 = vrot.slane %v321_v35, 9  ;;  %v531_v11 = vrot.slane %v322_v36, 9 }
  0x24   : > { %v296_v34 = vadd.f32 %v527_v19, %v283_v25  ;;  %v196_v51 = vunpack.c.l.bf16 %v182_v39  ;;  %v351_v7 = vperm.slane %v660_v32, 0  ;;  %v369_v52 = vperm.slane %v660_v32, 2 }
  0x25   : > { %v300_v41 = vadd.f32 %v298_v20, %v295_v33  ;;  %v532_v55 = vrot.slane %v334_v37, 10  ;;  %v533_v56 = vrot.slane %v335_v38, 10  ;;  %v347_v57 = vmul.f32 %v346_v46, %v617_v21 }
  0x26   : > { %v301_v42 = vadd.f32 %v299_v22, %v296_v34  ;;  %v357_v26 = vmul.f32 %v356_v47, %v617_v21  ;;  %v382_v58 = vperm.slane %v660_v32, 3  ;;  %v348_v61 = vmul.f32 %v346_v46, %v193_v45  ;;  %v557_v34 = vld [vmem:[%s702_s1 + $0x18] ss:$0 sm:$0xff] }
  0x27   : > { %v305_v48 = vadd.f32 %v303_v29, %v300_v41  ;;  %v358_v62 = vmul.f32 %v356_v47, %v193_v45  ;;  %v352_v63 = vmul.f32 %v351_v7, %v630_v40  ;;  %v370_v0 = vmul.f32 %v369_v52, %v630_v40 }
  0x28   : > { %v306_v49 = vadd.f32 %v304_v30, %v301_v42  ;;  %v353_v5 = vmul.f32 %v351_v7, %v196_v51  ;;  %v371_v6 = vmul.f32 %v369_v52, %v196_v51  ;;  %v534_v8 = vrot.slane %v357_v26, 9 }
  0x29   : > { %v318_v53 = vadd.f32 %v528_v43, %v305_v48  ;;  %v383_v9 = vmul.f32 %v382_v58, %v617_v21  ;;  %v535_v15 = vrot.slane %v358_v62, 9  ;;  %v384_v16 = vmul.f32 %v382_v58, %v193_v45 }
  0x2a   : > { %v319_v54 = vadd.f32 %v529_v44, %v306_v49  ;;  %v186_v17 = vunpack.c.l.bf16 %v172_v1  ;;  %v536_v18 = vrot.slane %v370_v0, 9  ;;  %v395_v19 = vperm.slane %v660_v32, 4 }
  0x2b   : > { %v331_v59 = vadd.f32 %v530_v50, %v318_v53  ;;  %v537_v40 = vrot.slane %v371_v6, 9  ;;  %v405_v23 = vperm.slane %v660_v32, 6  ;;  %v190_v24 = vunpack.c.l.bf16 %v176_v10 }
  0x2c   : > { %v332_v60 = vadd.f32 %v531_v11, %v319_v54  ;;  %v538_v25 = vrot.slane %v383_v9, 10  ;;  %v400_v27 = vperm.slane %v660_v32, 5  ;;  %v539_v29 = vrot.slane %v384_v16, 10 }
  0x2d   : > { %v344_v2 = vadd.f32 %v532_v55, %v331_v59  ;;  %v418_v30 = vperm.slane %v660_v32, 7  ;;  %v396_v31 = vmul.f32 %v395_v19, %v641_v4  ;;  %v397_v33 = vmul.f32 %v395_v19, %v186_v17 }
  0x2e   : > { %v345_v3 = vadd.f32 %v533_v56, %v332_v60  ;;  %v406_v37 = vmul.f32 %v405_v23, %v641_v4  ;;  %v407_v38 = vmul.f32 %v405_v23, %v186_v17  ;;  %v401_v39 = vmul.f32 %v400_v27, %v645_v13 }
  0x2f   : > { %v349_v12 = vadd.f32 %v347_v57, %v344_v2  ;;  %v402_v41 = vmul.f32 %v400_v27, %v190_v24  ;;  %v419_v44 = vmul.f32 %v418_v30, %v645_v13  ;;  %v420_v32 = vmul.f32 %v418_v30, %v190_v24 }
  0x30   : > { %v350_v14 = vadd.f32 %v348_v61, %v345_v3  ;;  %v432_v45 = vmul.f32 %v557_v34, %v641_v4  ;;  %v433_v46 = vmul.f32 %v557_v34, %v186_v17  ;;  %v540_v49 = vrot.slane %v406_v37, 9  ;;  %v558_v4 = vld [vmem:[%s703_s2] ss:$0 sm:$0xff] }
  0x31   : > { %v354_v20 = vadd.f32 %v352_v63, %v349_v12  ;;  %v541_v50 = vrot.slane %v407_v38, 9  ;;  %v542_v7 = vrot.slane %v419_v44, 9  ;;  %v543_v52 = vrot.slane %v420_v32, 9 }
  0x32   : > { %v355_v22 = vadd.f32 %v353_v5, %v350_v14  ;;  %v544_v55 = vrot.slane %v432_v45, 10  ;;  %v545_v56 = vrot.slane %v433_v46, 10 }
  0x33   : > { %v367_v28 = vadd.f32 %v534_v8, %v354_v20 }
  0x34   : > { %v368_v21 = vadd.f32 %v535_v15, %v355_v22 }
  0x35   : > { %v380_v35 = vadd.f32 %v536_v18, %v367_v28 }
  0x36   : > { %v381_v36 = vadd.f32 %v537_v40, %v368_v21 }
  0x37   : > { %v393_v42 = vadd.f32 %v538_v25, %v380_v35 }
  0x38   : > { %v394_v43 = vadd.f32 %v539_v29, %v381_v36 }
  0x39   : > { %v398_v47 = vadd.f32 %v396_v31, %v393_v42 }
  0x3a   : > { %v399_v48 = vadd.f32 %v397_v33, %v394_v43 }
  0x3b   : > { %v403_v11 = vadd.f32 %v401_v39, %v398_v47 }
  0x3c   : > { %v404_v51 = vadd.f32 %v402_v41, %v399_v48 }
  0x3d   : > { %v416_v53 = vadd.f32 %v540_v49, %v403_v11 }
  0x3e   : > { %v417_v54 = vadd.f32 %v541_v50, %v404_v51 }
  0x3f   : > { %v429_v57 = vadd.f32 %v542_v7, %v416_v53 }
  0x40   : > { %v430_v26 = vadd.f32 %v543_v52, %v417_v54 }
  0x41   : > { %v442_v13 = vadd.f32 %v544_v55, %v429_v57 }
  0x42   : > { %v443_v58 = vadd.f32 %v545_v56, %v430_v26 }
  0x43   : > { %v448_v59 = vadd.f32 %v558_v4, %v442_v13 }
  0x44   : > { %v449_v60 = vadd.f32 %v558_v4, %v443_v58 }
  0x45   : > { %v450_v61 = vpack.c.bf16 %v448_v59, %v448_v59 }
  0x46   : > { %v451_v62 = vpack.c.bf16 %v449_v60, %v449_v60 }
  0x47   : > { %453 = vst.msk [vmem:[%s168_s4] sm:$0x1] %vm452_vm0, %v450_v61 }
  0x48   : > { %454 = vst.msk [vmem:[%s168_s4 + $0x1] sm:$0x1] %vm452_vm0, %v451_v62 }
  0x49 PF: > { %s13_s12 = sadd.s32 1, %s565_s12  }
  0x4a   : > { %p10_p4 = scmp.ge.s32.totalorder %s13_s12, 4  }
  0x4c   :  { %12 = sbr.rel (!%p10_p4) target bundleno = 1 (0x1), region = 62 }

// kernel: _lambda_.41
= control target key start
LH: loop header
LB: loop body
LE: loop exit
PB: predicated region body
PF: predicated region fallthrough
CT: control target
= control target key end

     0   :  { %s547_s15 = smov 0   ;;  %s612_s0 = inlined_call_operand.vmem [shape: bf16[2,4,4,20], index: 0, kind: input, shape index: {}]   ;;  %s613_s1 = inlined_call_operand.vmem [shape: f32[9,20], index: 1, kind: input, shape index: {}]   ;;  %s614_s2 = inlined_call_operand.vmem [shape: f32[1,20], index: 2, kind: input, shape index: {}]   ;;  %s615_s3 = inlined_call_operand.vmem [shape: bf16[2,2,2,40], index: 3, kind: input, shape index: {}]   ;;  %s616_s4 = inlined_call_operand.vmem [shape: bf16[2,2,2,40], index: 4, kind: output, shape index: {}]  }
   0x1 LB: > { %s476_s16 = sadd.s32 4294967295, %s519_s15   ;;  %p480_p0 = scmp.ge.s32.totalorder %s519_s15, 1  ;;  %s519_s15 = sphi %s547_s15, %s14_s15  }
   0x2   : > { %p171_p1 = scmp.lt.s32.totalorder %s519_s15, 3 }
   0x4   : > { %p172_p2 = pnand %p480_p0, %p171_p1 }
   0x5   : > { %p200_p3 = scmp.lt.s32.totalorder (!%p172_p2), %s476_s16, 1  ;;  %s521_s5 = smov (!%p172_p2), 20  }
   0x6   : > { %175 = sbr.rel (%p172_p2) target bundleno = 186 (0xba), region = 36 }
   0xb   : > { %s618_s16 = smov (!%p200_p3, %s476_s16), 1  ;;  %v221_v0 = vld [vmem:[%s613_s1] sm:$0xff]  ;;  %v511_v33 = vld [vmem:[%s613_s1 + $0x8] ss:$0 sm:$0xff]  ;;  %vm375_vm0 = vsmask.f32 256 }
   0xc   : > { %s501_s19 = sshll.u32 %s618_s16, 3  ;;  %v223_v1 = vperm.slane %v221_v0, 0  ;;  %v226_v2 = vperm.slane %v221_v0, 1  ;;  %v239_v3 = vperm.slane %v221_v0, 2  ;;  %v257_v8 = vperm.slane %v221_v0, 4  ;;  %s483_s23 = sshll.u32 %s618_s16, 1 }
   0xd   : > { %s204_s22 = scalar_lea.vmem %s612_s0, %s501_s19  ;;  %v252_v9 = vperm.slane %v221_v0, 3  ;;  %v270_v14 = vperm.slane %v221_v0, 5  ;;  %v288_v19 = vperm.slane %v221_v0, 7  ;;  %s579_s26 = scalar_lea.vmem %s615_s3, %s483_s23  ;;  %v283_v32 = vperm.slane %v221_v0, 6  ;;  %v512_v61 = vld [vmem:[%s614_s2] ss:$0 sm:$0xff] }
   0xe   : > { %v213_v4 = vld [vmem:[%s204_s22] sm:$0x3]  ;;  %v214_v5 = vld [vmem:[%s204_s22 + $0x2] sm:$0x3]  ;;  %v215_v10 = vld [vmem:[%s204_s22 + $0x4] sm:$0x3]  ;;  %s212_s8 = scalar_lea.vmem %s616_s4, %s483_s23 }
   0xf   : > { %v217_v6 = vunpack.c.l.bf16 %v213_v4  ;;  %v564_v7 = vunpack.c.l.bf16 %v214_v5  ;;  %v568_v18 = vunpack.c.l.bf16 %v215_v10  ;;  %v216_v25 = vld [vmem:[%s204_s22 + $0x6] sm:$0x3]  ;;  %v339_v29 = vld [vmem:[%s579_s26 + $0x1] sm:$0x1]  ;;  %v338_v5 = vld [vmem:[%s579_s26] sm:$0x1] }
  0x10   : > { %v220_v35 = vunpack.c.l.bf16 %v216_v25  ;;  %v341_v42 = vunpack.c.l.bf16 %v339_v29  ;;  %vm376_vm1 = vsmask.f32 1284  ;;  %vm378_vm3 = vsmask.f32 2312 }
  0x11   : > { %v224_v11 = vmul.f32 %v223_v1, %v217_v6  ;;  %v227_v12 = vmul.f32 %v226_v2, %v217_v6  ;;  %v240_v13 = vmul.f32 %v239_v3, %v217_v6  ;;  %v258_v17 = vmul.f32 %v257_v8, %v564_v7  ;;  %vm377_vm2 = vmor %vm375_vm0, %vm376_vm1 }
  0x12   : > { %v225_v20 = vmul.f32 %v223_v1, %v564_v7  ;;  %v228_v21 = vmul.f32 %v226_v2, %v564_v7  ;;  %v253_v23 = vmul.f32 %v252_v9, %v564_v7  ;;  %v271_v24 = vmul.f32 %v270_v14, %v564_v7  ;;  %347 = vst [vmem:[#allocation1 + $0x20] ss:$4 sm:$0xff] %v341_v42  ;;  %vm379_vm4 = vmor %vm377_vm2, %vm378_vm3 }
  0x13   : > { %v485_v15 = vrot.slane %v227_v12, 9  ;;  %v487_v16 = vrot.slane %v240_v13, 10  ;;  %v241_v26 = vmul.f32 %v239_v3, %v564_v7  ;;  %v259_v28 = vmul.f32 %v257_v8, %v568_v18 }
  0x14   : > { %v486_v27 = vrot.slane %v228_v21, 9  ;;  %v489_v31 = vrot.slane %v258_v17, 9  ;;  %v254_v37 = vmul.f32 %v252_v9, %v568_v18  ;;  %v272_v38 = vmul.f32 %v270_v14, %v568_v18 }
  0x15   : > { %v237_v22 = vadd.f32 %v485_v15, %v224_v11  ;;  %v488_v34 = vrot.slane %v241_v26, 10  ;;  %v491_v40 = vrot.slane %v271_v24, 10  ;;  %v289_v41 = vmul.f32 %v288_v19, %v568_v18 }
  0x16   : > { %v238_v36 = vadd.f32 %v486_v27, %v225_v20  ;;  %v490_v44 = vrot.slane %v259_v28, 9  ;;  %v284_v46 = vmul.f32 %v283_v32, %v568_v18  ;;  %v302_v47 = vmul.f32 %v511_v33, %v568_v18 }
  0x17   : > { %v250_v30 = vadd.f32 %v487_v16, %v237_v22  ;;  %v492_v49 = vrot.slane %v272_v38, 10  ;;  %v290_v50 = vmul.f32 %v288_v19, %v220_v35  ;;  %v493_v52 = vrot.slane %v289_v41, 9 }
  0x18   : > { %v251_v43 = vadd.f32 %v488_v34, %v238_v36  ;;  %v285_v54 = vmul.f32 %v283_v32, %v220_v35  ;;  %v303_v55 = vmul.f32 %v511_v33, %v220_v35  ;;  %v495_v57 = vrot.slane %v302_v47, 10 }
  0x19   : > { %v255_v39 = vadd.f32 %v253_v23, %v250_v30  ;;  %v494_v59 = vrot.slane %v290_v50, 9  ;;  %v340_v8 = vunpack.c.l.bf16 %v338_v5  ;;  %vm380_vm5 = vsmask.f32 3340  ;;  %v348_v17 = vld.sshfl [vmem:[#allocation1 + $0x20] sm:$0xff pattern:$0x73625140] }
  0x1a   : > { %v256_v48 = vadd.f32 %v254_v37, %v251_v43  ;;  %v496_v63 = vrot.slane %v303_v55, 10  ;;  %vm335_vm6 = vcmask 162816   ;;  %vm381_vm7 = vmor %vm379_vm4, %vm380_vm5  ;;  %vm382_vm8 = vsmask.f32 4368 }
  0x1b   : > { %v268_v45 = vadd.f32 %v489_v31, %v255_v39  ;;  %vm383_vm9 = vmor %vm381_vm7, %vm382_vm8  ;;  %vm384_vm10 = vsmask.f32 5396  ;;  %vm386_vm12 = vsmask.f32 6424  ;;  %vm361_vm13 = vcmask 1040384  }
  0x1c   : > { %v269_v53 = vadd.f32 %v490_v44, %v256_v48  ;;  %vm385_vm11 = vmor %vm383_vm9, %vm384_vm10  ;;  %vm365_vm14 = vcmask 1041409   ;;  %v350_v21 = vrot.slane %v348_v17, 7  ;;  %vm388_vm0 = vsmask.f32 7452 }
  0x1d   : > { %v281_v51 = vadd.f32 %v491_v40, %v268_v45  ;;  %vm387_vm15 = vmor %vm385_vm11, %vm386_vm12  ;;  %vm408_vm2 = vcmask 319488  }
  0x1e   : > { %v282_v58 = vadd.f32 %v492_v49, %v269_v53  ;;  %vm389_vm1 = vmor %vm387_vm15, %vm388_vm0 }
  0x1f   : > { %v286_v56 = vadd.f32 %v284_v46, %v281_v51 }
  0x20   : > { %v287_v62 = vadd.f32 %v285_v54, %v282_v58 }
  0x21   : > { %v299_v60 = vadd.f32 %v493_v52, %v286_v56 }
  0x22   : > { %v300_v1 = vadd.f32 %v494_v59, %v287_v62 }
  0x23   : > { %v312_v0 = vadd.f32 %v495_v57, %v299_v60 }
  0x24   : > { %v313_v3 = vadd.f32 %v496_v63, %v300_v1 }
  0x25   : > { %v318_v2 = vadd.f32 %v512_v61, %v312_v0 }
  0x26   : > { %v319_v4 = vadd.f32 %v512_v61, %v313_v3 }
  0x27   : > { %322 = vst [vmem:[#allocation1] ss:$2 sm:$0xff] %v318_v2 }
  0x28   : > { %325 = vst [vmem:[#allocation1 + $0x10] ss:$2 sm:$0xff] %v319_v4 }
  0x2e   : > { %v323_v6 = vld.sshfl [vmem:[#allocation1] sm:$0xff pattern:$0x75316420] }
  0x2f   : > { %v327_v9 = vrot.slane %v323_v6, 7  ;;  %v326_v10 = vld.sshfl [vmem:[#allocation1 + $0x10] sm:$0xff pattern:$0x75316420] }
  0x30   : > { %344 = vst [vmem:[#allocation1] ss:$4 sm:$0xff] %v340_v8  ;;  %v328_v11 = vrot.slane %v326_v10, 7 }
  0x31   : > { %329 = vrot.lane.b32.xlu0 %v327_v9, %s521_s5 }
  0x37   : > { %v345_v12 = vld.sshfl [vmem:[#allocation1] sm:$0xff pattern:$0x73625140] }
  0x38   : > { %v349_v13 = vrot.slane %v345_v12, 7 }
  0x39   : > { %331 = vrot.lane.b32.xlu0 %v328_v11, %s521_s5 }
  0xa3   : > { %v330_v14 = vpop.permute.xlu0 %329 }
  0xa4   : > { %v336_v15 = vsel %vm335_vm6, %v564_v7, %v330_v14 }
  0xa5   : > { %v353_v16 = vadd.f32 %v349_v13, %v336_v15 }
  0xa7   : > { %v355_v19 = vpack.c.bf16 %v353_v16, %v353_v16 }
  0xa9   : > { %v359_v20 = vrot.slane %v355_v19, 3 }
  0xab   : > { %v364_v22 = vsel %vm361_vm13, %v355_v19, %v359_v20  ;;  %v366_v23 = vsel %vm365_vm14, %v355_v19, %v359_v20  ;;  %v332_v24 = vpop.permute.xlu0 %331 }
  0xac   : > { %v368_v25 = vrot.slane %v366_v23, 1  ;;  %v337_v7 = vsel %vm335_vm6, %v568_v18, %v332_v24  ;;  %v390_v27 = vshrl.u32 %v364_v22, 16 }
  0xad   : > { %v354_v26 = vadd.f32 %v350_v21, %v337_v7 }
  0xae   : > { %v395_v28 = vshll.u32 %v368_v25, 16 }
  0xaf   : > { %v356_v29 = vpack.c.bf16 %v354_v26, %v354_v26 }
  0xb0   : > { %v397_v30 = vsel %vm389_vm1, %v390_v27, %v395_v28 }
  0xb1   : > { %409 = vst.msk [vmem:[%s212_s8] sm:$0x1] %vm408_vm2, %v397_v30  ;;  %v360_v31 = vrot.slane %v356_v29, 3 }
  0xb3   : > { %v371_v32 = vsel %vm361_vm13, %v356_v29, %v360_v31  ;;  %v372_v33 = vsel %vm365_vm14, %v356_v29, %v360_v31 }
  0xb4   : > { %v374_v34 = vrot.slane %v372_v33, 1  ;;  %v398_v18 = vshrl.u32 %v371_v32, 16 }
  0xb6   : > { %v403_v35 = vshll.u32 %v374_v34, 16 }
  0xb8   : > { %v405_v36 = vsel %vm389_vm1, %v398_v18, %v403_v35 }
  0xb9   : > { %410 = vst.msk [vmem:[%s212_s8 + $0x1] sm:$0x1] %vm408_vm2, %v405_v36 }
  0xba PF: > { %s14_s15 = sadd.s32 1, %s519_s15  }
  0xbb   : > { %p11_p4 = scmp.ge.s32.totalorder %s14_s15, 4  }
  0xbd   :  { %13 = sbr.rel (!%p11_p4) target bundleno = 1 (0x1), region = 71 }

// kernel: _lambda_.42
= control target key start
LH: loop header
LB: loop body
LE: loop exit
PB: predicated region body
PF: predicated region fallthrough
CT: control target
= control target key end

     0   :  { %s327_s12 = smov 0   ;;  %s356_s0 = inlined_call_operand.vmem [shape: bf16[2,4,40], index: 0, kind: input, shape index: {}]   ;;  %s357_s1 = inlined_call_operand.vmem [shape: bf16[40,72], index: 1, kind: input, shape index: {}]   ;;  %s358_s2 = inlined_call_operand.vmem [shape: f32[1,72], index: 2, kind: input, shape index: {}]   ;;  %s359_s3 = inlined_call_operand.vmem [shape: bf16[2,4,72], index: 3, kind: output, shape index: {}]  }
   0x1 LB: > { %s270_s13 = sadd.s32 4294967295, %s305_s12   ;;  %p274_p0 = scmp.ge.s32.totalorder %s305_s12, 1  ;;  %s305_s12 = sphi %s327_s12, %s13_s12  }
   0x2   : > { %p136_p1 = scmp.lt.s32.totalorder %s305_s12, 3 }
   0x4   : > { %p137_p2 = pnand %p274_p0, %p136_p1 }
   0x5   : > { %p158_p3 = scmp.lt.s32.totalorder (!%p137_p2), %s270_s13, 1 }
   0x6   : > { %140 = sbr.rel (%p137_p2) target bundleno = 162 (0xa2), region = 32 }
   0xb   : > { %v172_v0 = vld [vmem:[%s357_s1 + $0x10] sm:$0xf]  ;;  %vm196_vm0 = vcmask 1043456   ;;  %s361_s13 = smov (!%p158_p3, %s270_s13), 1  ;;  %v289_v4 = vld [vmem:[%s357_s1 + $0x8] sm:$0xff]  ;;  %v288_v5 = vld [vmem:[%s357_s1] sm:$0xff] }
   0xc   : > { %v186_v1 = vunpack.c.l.b16 %v172_v0  ;;  %s275_s18 = sshll.u32 %s361_s13, 1  ;;  %vm192_vm1 = vcmask 326656   ;;  %v298_v7 = vld [vmem:[%s358_s2] ss:$0 sm:$0xff]  ;;  %vm215_vm2 = vcmask 582656  }
   0xd   : > { %s161_s23 = scalar_lea.vmem %s356_s0, %s275_s18  ;;  %s165_s28 = scalar_lea.vmem %s359_s3, %s275_s18 }
   0xe   : > { %v189_v2 = vpack.c.b16 %v186_v1, %v186_v1  ;;  %v167_v6 = vld [vmem:[%s161_s23] sm:$0x3] }
  0x10   : > { %v198_v3 = vsel %vm196_vm0, %v189_v2, 0 }
  0x11   : > { %205 = vmatpush.bf16.msra.mxu0 %v198_v3 }
  0x15   : > { %206 = vmatpush.bf16.msra.mxu0 %v289_v4 }
  0x19   : > { %207 = vmatpush.bf16.msra.mxu0 %v288_v5 }
  0x1c   : > { %285 = vmatmul.msk.bf16.vlgmr.msra.gmra.mxu0 %vm192_vm1, %v167_v6 }
  0x99   : > { %v209_v8 = vpop.f32.mrf.mxu0 }
  0x9a   : > { %v210_v9 = vadd.f32 %v298_v7, %v209_v8 }
  0x9c   : > { %v213_v10 = vmax.f32 %v210_v9, 0.0 }
  0x9e   : > { %v214_v11 = vpack.c.bf16 %v213_v10, %v213_v10 }
  0xa0   : > { %216 = vst.msk [vmem:[%s165_s28] sm:$0x3] %vm215_vm2, %v214_v11 }
  0xa1   : > { %v211_v12 = vpop.f32.mrf.mxu0 }
  0xa2 PF: > { %s13_s12 = sadd.s32 1, %s305_s12  }
  0xa3   : > { %p10_p4 = scmp.ge.s32.totalorder %s13_s12, 4  }
  0xa5   :  { %12 = sbr.rel (!%p10_p4) target bundleno = 1 (0x1), region = 62 }

// kernel: _lambda_.43
= control target key start
LH: loop header
LB: loop body
LE: loop exit
PB: predicated region body
PF: predicated region fallthrough
CT: control target
= control target key end

     0   :  { %10 = vsyncpa [#allocation3], 0  ;;  %s2947_s0 = inlined_call_operand.vmem [shape: bf16[2,4,72], index: 0, kind: input, shape index: {}]   ;;  %s2948_s1 = inlined_call_operand.vmem [shape: bf16[72,1280], index: 1, kind: input, shape index: {}]   ;;  %s2949_s2 = inlined_call_operand.vmem [shape: f32[1,1280], index: 2, kind: input, shape index: {}]   ;;  %s2950_s3 = inlined_call_operand.vmem [shape: bf16[1280,8], index: 3, kind: input, shape index: {}]   ;;  %s2951_s4 = inlined_call_operand.vmem [shape: f32[1,8], index: 4, kind: input, shape index: {}]   ;;  %s2952_s5 = inlined_call_operand.hbm [shape: f32[2,1,8], index: 5, kind: output, shape index: {}]  }
   0x1   :  { %12 = vsyncpa [#allocation3 + $0x1], 0  ;;  %s2313_s18 = smov 0   ;;  %s2315_s19 = smov 0  }
   0x2   :  { %s2317_s20 = smov 0   ;;  %s2319_s21 = smov 0  }
   0x3 LB: > { %s2334_s22 = sadd.s32 4294967295, %s2280_s21   ;;  %s1559_s23 = sadd.s32 4294967294, %s2280_s21   ;;  %s2280_s21 = sphi %s2319_s21, %s2958_s21   ;;  %s2276_s20 = sphi %s2317_s20, %s2957_s20   ;;  %s2272_s19 = sphi %s2315_s19, %s2956_s19   ;;  %s2268_s18 = sphi %s2313_s18, %s2955_s18  }
   0x4   : > { %s2338_s24 = sadd.s32 1, %s2280_s21   ;;  %s135_s25 = sadd.s32 1, %s2276_s20 }
   0x5   : > { %s132_s26 = ssub.s32 %s2280_s21, %s2338_s24  ;;  %p145_p0 = scmp.ne.s32.totalorder %s2276_s20, %s2272_s19 }
   0x6   : > { %p133_p1 = scmp.eq.s32.totalorder %s132_s26, 0  ;;  %p146_p2 = scmp.eq.s32.totalorder %s2334_s22, 1 }
   0x7   : > { %p151_p3 = scmp.ne.s32.totalorder %s2272_s19, %s2268_s18  ;;  %p152_p4 = scmp.eq.s32.totalorder %s1559_s23, 1 }
   0x8   : > { %s2349_s27 = scalar_select %p133_p1, %s2276_s20, %s135_s25  }
   0x9   : > { %p2351_p5 = por %p146_p2, %p145_p0  ;;  %p2355_p6 = por %p152_p4, %p151_p3 }
   0xa   : > { %p1562_p7 = scmp.ge.s32.totalorder %s2280_s21, 1  ;;  %p189_p8 = scmp.lt.s32.totalorder %s2280_s21, 3 }
   0xc   : > { %p190_p9 = pnand %p1562_p7, %p189_p8 }
   0xd   : > { %p215_p10 = scmp.lt.s32.totalorder (!%p190_p9), %s2334_s22, 1  ;;  %s213_s10 = sand.u32 (!%p190_p9), 1, %s2272_s19  }
   0xe   : > { %193 = sbr.rel (%p190_p9) target bundleno = 356 (0x164), region = 40  ;;  %s1500_s13 = scalar_lea.hbm (!%p190_p9), %s2952_s5, %s2334_s22 }
   0xf   : > { %s1504_s16 = sshll.u32 (!%p190_p9), %s1500_s13, 4  ;;  %s2238_s30 = scalar_lea.hbm (!%p190_p9), %s2952_s5, 2  ;;  %s1505_s16 = int_to_ptr.hbm [resolvable:$true] %s1504_s16 }
  0x10   : > { %s2232_s23 = sshra.s32 (!%p190_p9), %s1505_s16, 4  ;;  %s2233_s23 = int_to_ptr.hbm [resolvable:$true] %s2232_s23 }
  0x11   : > { %s2234_s26 = scalar_lea.hbm (!%p190_p9), %s2233_s23, 1  ;;  %p2239_p0 = scmp.lt.s32.totalorder (!%p190_p9), %s2233_s23, %s2952_s5 }
  0x12   : > { %p2235_p11 = scmp.ne.s32.totalorder (!%p190_p9), %s2233_s23, %s2234_s26  ;;  %p2240_p1 = scmp.lt.s32.totalorder (!%p190_p9), %s2238_s30, %s2234_s26 }
  0x13   : > { %v279_v0 = vld [vmem:[%s2948_s1 + $0x140] sm:$0xff]  ;;  %v280_v3 = vld [vmem:[%s2948_s1 + $0x148] sm:$0xff]  ;;  %vm537_vm0 = vcmask 1043456   ;;  %v1686_v4 = vld [vmem:[%s2948_s1 + $0xf0] sm:$0xf]  ;;  %s216_s25 = scalar_select %p215_p10, %s2334_s22, 1 }
  0x14   : > { %v411_v1 = vunpack.c.l.b16 %v279_v0  ;;  %v412_v2 = vunpack.c.h.b16 %v279_v0  ;;  %v2091_v5 = vld [vmem:[%s2948_s1 + $0x114] sm:$0xf0]  ;;  %v413_v6 = vunpack.c.l.b16 %v280_v3  ;;  %v414_v7 = vunpack.c.h.b16 %v280_v3  ;;  %v2086_v10 = vld [vmem:[%s2948_s1 + $0xf4] sm:$0xf]  ;;  %v1688_v11 = vld [vmem:[%s2948_s1 + $0x118] sm:$0xf0]  ;;  %p2236_p12 = pnand %p2235_p11, %p2351_p5  ;;  %p2241_p2 = por %p2240_p1, %p2239_p0 }
  0x15   : > { %v1694_v12 = vld [vmem:[%s2948_s1 + $0xf8] sm:$0xf]  ;;  %v2092_v15 = vld [vmem:[%s2948_s1 + $0x11c] sm:$0xf0]  ;;  %v2087_v16 = vld [vmem:[%s2948_s1 + $0xfc] sm:$0xf]  ;;  %v1687_v20 = vor.u32 %v2091_v5, %v1686_v4  ;;  %v1691_v21 = vor.u32 %v2086_v10, %v1688_v11 }
  0x16   : > { %v461_v8 = vpack.c.b16 %v411_v1, %v411_v1  ;;  %v462_v9 = vpack.c.b16 %v412_v2, %v412_v2  ;;  %v463_v13 = vpack.c.b16 %v413_v6, %v413_v6  ;;  %v464_v14 = vpack.c.b16 %v414_v7, %v414_v7  ;;  %v1696_v17 = vld [vmem:[%s2948_s1 + $0x120] sm:$0xf0]  ;;  %v1646_v24 = vld [vmem:[%s2948_s1 + $0xa0] sm:$0xf]  ;;  %v2081_v25 = vld [vmem:[%s2948_s1 + $0xc4] sm:$0xf0]  ;;  %p2237_p13 = pneg %p2236_p12 }
  0x17   : > { %v2076_v26 = vld [vmem:[%s2948_s1 + $0xa4] sm:$0xf]  ;;  %v1648_v27 = vld [vmem:[%s2948_s1 + $0xc8] sm:$0xf0]  ;;  %v1695_v28 = vor.u32 %v2092_v15, %v1694_v12  ;;  %v1699_v29 = vor.u32 %v2087_v16, %v1696_v17  ;;  %v1654_v30 = vld [vmem:[%s2948_s1 + $0xa8] sm:$0xf]  ;;  %v1647_v36 = vor.u32 %v2081_v25, %v1646_v24 }
  0x18   : > { %v539_v18 = vsel %vm537_vm0, %v461_v8, 0  ;;  %v542_v19 = vsel %vm537_vm0, %v462_v9, 0  ;;  %v545_v22 = vsel %vm537_vm0, %v463_v13, 0  ;;  %v548_v23 = vsel %vm537_vm0, %v464_v14, 0  ;;  %v2082_v31 = vld [vmem:[%s2948_s1 + $0xcc] sm:$0xf0]  ;;  %p2242_p3 = pnand %p2241_p2, %p2237_p13 }
  0x19   : > { %571 = vmatpush.bf16.msra.mxu0 %v539_v18  ;;  %584 = vmatpush.bf16.msra.mxu1 %v542_v19  ;;  %v2077_v32 = vld [vmem:[%s2948_s1 + $0xac] sm:$0xf]  ;;  %v1656_v33 = vld [vmem:[%s2948_s1 + $0xd0] sm:$0xf0]  ;;  %v1606_v34 = vld [vmem:[%s2948_s1 + $0x50] sm:$0xf]  ;;  %v1651_v37 = vor.u32 %v2076_v26, %v1648_v27  ;;  %v1655_v41 = vor.u32 %v2082_v31, %v1654_v30 }
  0x1a   : > { %597 = vmatpush.bf16.msra.mxu2 %v545_v22  ;;  %610 = vmatpush.bf16.msra.mxu3 %v548_v23  ;;  %v2071_v35 = vld [vmem:[%s2948_s1 + $0x74] sm:$0xf0]  ;;  %v2066_v38 = vld [vmem:[%s2948_s1 + $0x54] sm:$0xf]  ;;  %v1608_v39 = vld [vmem:[%s2948_s1 + $0x78] sm:$0xf0]  ;;  %v1659_v42 = vor.u32 %v2077_v32, %v1656_v33 }
  0x1b   : > { %v281_v40 = vld [vmem:[%s2948_s1 + $0x150] sm:$0xff]  ;;  %v1614_v43 = vld [vmem:[%s2948_s1 + $0x58] sm:$0xf]  ;;  %v2072_v44 = vld [vmem:[%s2948_s1 + $0x7c] sm:$0xf0]  ;;  %s1563_s14 = sshll.u32 %s216_s25, 1  ;;  %v1607_v53 = vor.u32 %v2071_v35, %v1606_v34  ;;  %v1611_v54 = vor.u32 %v2066_v38, %v1608_v39 }
  0x1c   : > { %v415_v45 = vunpack.c.l.b16 %v281_v40  ;;  %v282_v46 = vld [vmem:[%s2948_s1 + $0x158] sm:$0xff]  ;;  %v416_v47 = vunpack.c.h.b16 %v281_v40  ;;  %v1616_v49 = vld [vmem:[%s2948_s1 + $0x80] sm:$0xf0]  ;;  %s218_s17 = scalar_lea.vmem %s2947_s0, %s1563_s14  ;;  %v2282_v50 = vmov 4.0   ;;  %v1566_v55 = vld [vmem:[%s2948_s1] sm:$0xf]  ;;  %v1615_v60 = vor.u32 %v2072_v44, %v1614_v43 }
  0x1d   : > { %572 = vmatpush.bf16.msra.mxu0 %v1687_v20  ;;  %585 = vmatpush.bf16.msra.mxu1 %v1691_v21  ;;  %v2067_v48 = vld [vmem:[%s2948_s1 + $0x5c] sm:$0xf]  ;;  %2216 = vrcp.f32 %v2282_v50  ;;  %v417_v51 = vunpack.c.l.b16 %v282_v46  ;;  %v418_v52 = vunpack.c.h.b16 %v282_v46  ;;  %v220_v56 = vld [vmem:[%s218_s17] sm:$0x3]  ;;  %vm222_vm1 = vcmask 584704   ;;  %s214_s14 = scalar_lea.vmem [#allocation2], %s213_s10 }
  0x1e   : > { %598 = vmatpush.bf16.msra.mxu2 %v1695_v28  ;;  %611 = vmatpush.bf16.msra.mxu3 %v1699_v29  ;;  %v2061_v57 = vld [vmem:[%s2948_s1 + $0x24] sm:$0xf0]  ;;  %v2056_v58 = vld [vmem:[%s2948_s1 + $0x4] sm:$0xf]  ;;  %v1568_v59 = vld [vmem:[%s2948_s1 + $0x28] sm:$0xf0]  ;;  %v465_v61 = vpack.c.b16 %v415_v45, %v415_v45  ;;  %v1619_v62 = vor.u32 %v2067_v48, %v1616_v49  ;;  %v221_v63 = vunpack.c.l.bf16 %v220_v56  ;;  %v466_v0 = vpack.c.b16 %v416_v47, %v416_v47 }
  0x1f   : > { %v1574_v1 = vld [vmem:[%s2948_s1 + $0x8] sm:$0xf]  ;;  %v2062_v2 = vld [vmem:[%s2948_s1 + $0x2c] sm:$0xf0]  ;;  %v467_v4 = vpack.c.b16 %v417_v51, %v417_v51  ;;  %v2057_v5 = vld [vmem:[%s2948_s1 + $0xc] sm:$0xf]  ;;  %v468_v7 = vpack.c.b16 %v418_v52, %v418_v52  ;;  %v1567_v8 = vor.u32 %v2061_v57, %v1566_v55  ;;  %v1571_v9 = vor.u32 %v2056_v58, %v1568_v59 }
  0x20   : > { %v223_v3 = vsel %vm222_vm1, %v221_v63, 0.0  ;;  %v1576_v6 = vld [vmem:[%s2948_s1 + $0x30] sm:$0xf0]  ;;  %v551_v12 = vsel %vm537_vm0, %v465_v61, 0  ;;  %v1575_v13 = vor.u32 %v2062_v2, %v1574_v1  ;;  %v1702_v14 = vld [vmem:[%s2948_s1 + $0x100] sm:$0xf] }
  0x21   : > { %573 = vmatpush.bf16.msra.mxu0 %v1647_v36  ;;  %586 = vmatpush.bf16.msra.mxu1 %v1651_v37  ;;  %v224_v10 = vrot.slane %v223_v3, 4  ;;  %v2093_v15 = vld [vmem:[%s2948_s1 + $0x124] sm:$0xf0]  ;;  %v554_v16 = vsel %vm537_vm0, %v466_v0, 0  ;;  %v2088_v19 = vld [vmem:[%s2948_s1 + $0x104] sm:$0xf]  ;;  %v1579_v21 = vor.u32 %v2057_v5, %v1576_v6 }
  0x22   : > { %599 = vmatpush.bf16.msra.mxu2 %v1655_v41  ;;  %612 = vmatpush.bf16.msra.mxu3 %v1659_v42  ;;  %v1704_v20 = vld [vmem:[%s2948_s1 + $0x128] sm:$0xf0]  ;;  %v557_v22 = vsel %vm537_vm0, %v467_v4, 0  ;;  %v560_v23 = vsel %vm537_vm0, %v468_v7, 0  ;;  %v1710_v24 = vld [vmem:[%s2948_s1 + $0x108] sm:$0xf]  ;;  %v1703_v30 = vor.u32 %v2093_v15, %v1702_v14 }
  0x23   : > { %v2217_v11 = vpop.eup %2216  ;;  %v225_v17 = vadd.f32 %v224_v10, %v223_v3  ;;  %v2094_v25 = vld [vmem:[%s2948_s1 + $0x12c] sm:$0xf0]  ;;  %v2089_v28 = vld [vmem:[%s2948_s1 + $0x10c] sm:$0xf]  ;;  %v1712_v29 = vld [vmem:[%s2948_s1 + $0x130] sm:$0xf0]  ;;  %v1707_v31 = vor.u32 %v2088_v19, %v1704_v20 }
  0x24   : > { %v231_v18 = vmul.f32 4.0, %v2217_v11  ;;  %v1662_v32 = vld [vmem:[%s2948_s1 + $0xb0] sm:$0xf]  ;;  %v2083_v35 = vld [vmem:[%s2948_s1 + $0xd4] sm:$0xf0]  ;;  %vm235_vm2 = vweird.f32 %v2217_v11  ;;  %v1711_v38 = vor.u32 %v2094_v25, %v1710_v24  ;;  %v1715_v39 = vor.u32 %v2089_v28, %v1712_v29  ;;  %v283_v42 = vld [vmem:[%s2948_s1 + $0x160] sm:$0xff] }
  0x25   : > { %574 = vmatpush.bf16.msra.mxu0 %v1607_v53  ;;  %587 = vmatpush.bf16.msra.mxu1 %v1611_v54  ;;  %v226_v26 = vrot.slane %v225_v17, 2  ;;  %v2078_v36 = vld [vmem:[%s2948_s1 + $0xb4] sm:$0xf]  ;;  %v1664_v37 = vld [vmem:[%s2948_s1 + $0xd8] sm:$0xf0]  ;;  %v1663_v47 = vor.u32 %v2083_v35, %v1662_v32  ;;  %v419_v53 = vunpack.c.l.b16 %v283_v42  ;;  %v420_v59 = vunpack.c.h.b16 %v283_v42  ;;  %v2109_v42 = vld [vmem:[%s2950_s3 + $0x68] sm:$0xff] }
  0x26   : > { %600 = vmatpush.bf16.msra.mxu2 %v1615_v60  ;;  %613 = vmatpush.bf16.msra.mxu3 %v1619_v62  ;;  %v232_v27 = vsub.f32 1.0, %v231_v18  ;;  %v1670_v40 = vld [vmem:[%s2948_s1 + $0xb8] sm:$0xf]  ;;  %v2084_v41 = vld [vmem:[%s2948_s1 + $0xdc] sm:$0xf0]  ;;  %v1667_v48 = vor.u32 %v2078_v36, %v1664_v37  ;;  %vm533_vm3 = vcmask 588800  }
  0x27   : > { %v227_v33 = vadd.f32 %v226_v26, %v225_v17  ;;  %v2079_v45 = vld [vmem:[%s2948_s1 + $0xbc] sm:$0xf]  ;;  %v1672_v46 = vld [vmem:[%s2948_s1 + $0xe0] sm:$0xf0]  ;;  %v1622_v51 = vld [vmem:[%s2948_s1 + $0x60] sm:$0xf]  ;;  %v1671_v56 = vor.u32 %v2084_v41, %v1670_v40  ;;  %v469_v4 = vpack.c.b16 %v419_v53, %v419_v53 }
  0x28   : > { %v233_v34 = vmul.f32 %v2217_v11, %v232_v27  ;;  %v2073_v52 = vld [vmem:[%s2948_s1 + $0x84] sm:$0xf0]  ;;  %v2068_v54 = vld [vmem:[%s2948_s1 + $0x64] sm:$0xf]  ;;  %v1624_v55 = vld [vmem:[%s2948_s1 + $0x88] sm:$0xf0]  ;;  %v1675_v57 = vor.u32 %v2079_v45, %v1672_v46 }
  0x29   : > { %575 = vmatpush.bf16.msra.mxu0 %v1567_v8  ;;  %588 = vmatpush.bf16.msra.mxu1 %v1571_v9  ;;  %v228_v43 = vrot.slane %v227_v33, 1  ;;  %v1630_v58 = vld [vmem:[%s2948_s1 + $0x68] sm:$0xf]  ;;  %v2074_v61 = vld [vmem:[%s2948_s1 + $0x8c] sm:$0xf0]  ;;  %v1623_v1 = vor.u32 %v2073_v52, %v1622_v51  ;;  %v1627_v2 = vor.u32 %v2068_v54, %v1624_v55  ;;  %v470_v9 = vpack.c.b16 %v420_v59, %v420_v59  ;;  %v2103_v25 = vld [vmem:[%s2950_s3 + $0x38] sm:$0xff] }
  0x2a   : > { %601 = vmatpush.bf16.msra.mxu2 %v1575_v13  ;;  %614 = vmatpush.bf16.msra.mxu3 %v1579_v21  ;;  %v234_v44 = vadd.f32 %v2217_v11, %v233_v34  ;;  %v2069_v62 = vld [vmem:[%s2948_s1 + $0x6c] sm:$0xf]  ;;  %v1632_v63 = vld [vmem:[%s2948_s1 + $0x90] sm:$0xf0]  ;;  %v1582_v3 = vld [vmem:[%s2948_s1 + $0x10] sm:$0xf]  ;;  %v1631_v8 = vor.u32 %v2074_v61, %v1630_v58 }
  0x2b   : > { %v229_v49 = vadd.f32 %v228_v43, %v227_v33  ;;  %v2063_v5 = vld [vmem:[%s2948_s1 + $0x34] sm:$0xf0]  ;;  %v2058_v6 = vld [vmem:[%s2948_s1 + $0x14] sm:$0xf]  ;;  %v1584_v7 = vld [vmem:[%s2948_s1 + $0x38] sm:$0xf0]  ;;  %v1635_v10 = vor.u32 %v2069_v62, %v1632_v63 }
  0x2c   : > { %v236_v50 = vsel %vm235_vm2, %v2217_v11, %v234_v44  ;;  %v1590_v11 = vld [vmem:[%s2948_s1 + $0x18] sm:$0xf]  ;;  %v2059_v13 = vld [vmem:[%s2948_s1 + $0x1c] sm:$0xf]  ;;  %v1592_v14 = vld [vmem:[%s2948_s1 + $0x40] sm:$0xf0]  ;;  %v1583_v15 = vor.u32 %v2063_v5, %v1582_v3 }
  0x2d   : > { %623 = vmatpush.bf16.msrb.mxu0 %v551_v12  ;;  %636 = vmatpush.bf16.msrb.mxu1 %v554_v16  ;;  %v237_v60 = vmul.f32 %v236_v50, %v229_v49  ;;  %v2064_v12 = vld [vmem:[%s2948_s1 + $0x3c] sm:$0xf0]  ;;  %v1587_v16 = vor.u32 %v2058_v6, %v1584_v7  ;;  %v563_v17 = vsel %vm537_vm0, %v469_v4, 0  ;;  %v566_v18 = vsel %vm537_vm0, %v470_v9, 0  ;;  %v1718_v19 = vld [vmem:[%s2948_s1 + $0x110] sm:$0xf] }
  0x2e   : > { %649 = vmatpush.bf16.msrb.mxu2 %v557_v22  ;;  %662 = vmatpush.bf16.msrb.mxu3 %v560_v23  ;;  %v1591_v20 = vor.u32 %v2064_v12, %v1590_v11  ;;  %v2095_v21 = vld [vmem:[%s2948_s1 + $0x134] sm:$0xf0]  ;;  %v2090_v22 = vld [vmem:[%s2948_s1 + $0x114] sm:$0xf]  ;;  %v1720_v23 = vld [vmem:[%s2948_s1 + $0x138] sm:$0xf0]  ;;  %v1595_v24 = vor.u32 %v2059_v13, %v1592_v14 }
  0x2f   : > { %v2560_v0 = vpack.c.bf16 %v237_v60, %v237_v60  ;;  %v2111_v26 = vld [vmem:[%s2950_s3 + $0x78] sm:$0xff]  ;;  %v1719_v27 = vor.u32 %v2095_v21, %v1718_v19  ;;  %v1723_v28 = vor.u32 %v2090_v22, %v1720_v23  ;;  %v1678_v29 = vld [vmem:[%s2948_s1 + $0xc0] sm:$0xf]  ;;  %v1680_v32 = vld [vmem:[%s2948_s1 + $0xe8] sm:$0xf0]  ;;  %s1502_s15 = sshll.u32 %s214_s14, 4  ;;  %s1503_s15 = int_to_ptr.vmem [resolvable:$true] %s1502_s15 }
  0x30   : > { %v2102_v33 = vld [vmem:[%s2950_s3 + $0x30] sm:$0xff]  ;;  %v1640_v40 = vld [vmem:[%s2948_s1 + $0x98] sm:$0xf0]  ;;  %v2101_v41 = vld [vmem:[%s2950_s3 + $0x28] sm:$0xff]  ;;  %vm1489_vm4 = vcmask 57344   ;;  %s1492_s17 = scalar_lea.sflag [#allocation3], %s213_s10 }
  0x31   : > { %624 = vmatpush.bf16.msrb.mxu0 %v1703_v30  ;;  %637 = vmatpush.bf16.msrb.mxu1 %v1707_v31  ;;  %v2085_v30 = vld [vmem:[%s2948_s1 + $0xe4] sm:$0xf0]  ;;  %v2080_v31 = vld [vmem:[%s2948_s1 + $0xc4] sm:$0xf]  ;;  %v2110_v34 = vld [vmem:[%s2950_s3 + $0x70] sm:$0xff] }
  0x32   : > { %650 = vmatpush.bf16.msrb.mxu2 %v1711_v38  ;;  %663 = vmatpush.bf16.msrb.mxu3 %v1715_v39  ;;  %v1679_v35 = vor.u32 %v2085_v30, %v1678_v29  ;;  %v1683_v36 = vor.u32 %v2080_v31, %v1680_v32  ;;  %v1638_v37 = vld [vmem:[%s2948_s1 + $0x70] sm:$0xf]  ;;  %v2075_v38 = vld [vmem:[%s2948_s1 + $0x94] sm:$0xf0]  ;;  %v2070_v39 = vld [vmem:[%s2948_s1 + $0x74] sm:$0xf] }
  0x33   : > { %1724 = vmatmul.msk.bf16.vlgmr.msra.gmra.mxu0 %vm533_vm3, %v2560_v0  ;;  %1725 = vmatmul.msk.bf16.vlgmr.msra.gmra.mxu1 %vm533_vm3, %v2560_v0  ;;  %v1639_v43 = vor.u32 %v2075_v38, %v1638_v37  ;;  %v1643_v44 = vor.u32 %v2070_v39, %v1640_v40  ;;  %v1598_v45 = vld [vmem:[%s2948_s1 + $0x20] sm:$0xf]  ;;  %v2065_v46 = vld [vmem:[%s2948_s1 + $0x44] sm:$0xf0]  ;;  %v2119_v53 = vld [vmem:[%s2950_s3 + $0xb8] sm:$0xff] }
  0x34   : > { %1726 = vmatmul.msk.bf16.vlgmr.msra.gmra.mxu2 %vm533_vm3, %v2560_v0  ;;  %1727 = vmatmul.msk.bf16.vlgmr.msra.gmra.mxu3 %vm533_vm3, %v2560_v0  ;;  %v2100_v49 = vld [vmem:[%s2950_s3 + $0x20] sm:$0xff]  ;;  %v1599_v51 = vor.u32 %v2065_v46, %v1598_v45  ;;  %v2127_v54 = vld [vmem:[%s2950_s3 + $0xf8] sm:$0xff]  ;;  %v2126_v58 = vld [vmem:[%s2950_s3 + $0xf0] sm:$0xff] }
  0x35   : > { %625 = vmatpush.bf16.msrb.mxu0 %v1663_v47  ;;  %638 = vmatpush.bf16.msrb.mxu1 %v1667_v48  ;;  %v2060_v47 = vld [vmem:[%s2948_s1 + $0x24] sm:$0xf]  ;;  %v1600_v48 = vld [vmem:[%s2948_s1 + $0x48] sm:$0xf0]  ;;  %v2099_v55 = vld [vmem:[%s2950_s3 + $0x18] sm:$0xff] }
  0x36   : > { %651 = vmatpush.bf16.msrb.mxu2 %v1671_v56  ;;  %664 = vmatpush.bf16.msrb.mxu3 %v1675_v57  ;;  %v2108_v50 = vld [vmem:[%s2950_s3 + $0x60] sm:$0xff]  ;;  %v1603_v52 = vor.u32 %v2060_v47, %v1600_v48  ;;  %v2107_v56 = vld [vmem:[%s2950_s3 + $0x58] sm:$0xff]  ;;  %v2118_v57 = vld [vmem:[%s2950_s3 + $0xb0] sm:$0xff] }
  0x37   : > { %v2098_v59 = vld [vmem:[%s2950_s3 + $0x10] sm:$0xff]  ;;  %v2117_v61 = vld [vmem:[%s2950_s3 + $0xa8] sm:$0xff]  ;;  %v2124_v3 = vld [vmem:[%s2950_s3 + $0xe0] sm:$0xff] }
  0x38   : > { %v2106_v60 = vld [vmem:[%s2950_s3 + $0x50] sm:$0xff]  ;;  %v2125_v62 = vld [vmem:[%s2950_s3 + $0xe8] sm:$0xff]  ;;  %v2096_v4 = vld [vmem:[%s2950_s3] sm:$0xff] }
  0x39   : > { %626 = vmatpush.bf16.msrb.mxu0 %v1623_v1  ;;  %639 = vmatpush.bf16.msrb.mxu1 %v1627_v2  ;;  %v2097_v63 = vld [vmem:[%s2950_s3 + $0x8] sm:$0xff]  ;;  %v2116_v2 = vld [vmem:[%s2950_s3 + $0xa0] sm:$0xff]  ;;  %v2135_v5 = vld [vmem:[%s2950_s3 + $0x138] sm:$0xff] }
  0x3a   : > { %652 = vmatpush.bf16.msrb.mxu2 %v1631_v8  ;;  %665 = vmatpush.bf16.msrb.mxu3 %v1635_v10  ;;  %v2105_v1 = vld [vmem:[%s2950_s3 + $0x48] sm:$0xff]  ;;  %v2143_v6 = vld [vmem:[%s2950_s3 + $0x178] sm:$0xff]  ;;  %v2134_v9 = vld [vmem:[%s2950_s3 + $0x130] sm:$0xff] }
  0x3b   : > { %v2115_v7 = vld [vmem:[%s2950_s3 + $0x98] sm:$0xff]  ;;  %v2142_v10 = vld [vmem:[%s2950_s3 + $0x170] sm:$0xff]  ;;  %v2133_v13 = vld [vmem:[%s2950_s3 + $0x128] sm:$0xff] }
  0x3c   : > { %v2123_v8 = vld [vmem:[%s2950_s3 + $0xd8] sm:$0xff]  ;;  %v2114_v11 = vld [vmem:[%s2950_s3 + $0x90] sm:$0xff]  ;;  %v2141_v14 = vld [vmem:[%s2950_s3 + $0x168] sm:$0xff] }
  0x3d   : > { %627 = vmatpush.bf16.msrb.mxu0 %v1583_v15  ;;  %640 = vmatpush.bf16.msrb.mxu1 %v1587_v16  ;;  %v2122_v12 = vld [vmem:[%s2950_s3 + $0xd0] sm:$0xff]  ;;  %v2113_v15 = vld [vmem:[%s2950_s3 + $0x88] sm:$0xff]  ;;  %v2131_v19 = vld [vmem:[%s2950_s3 + $0x118] sm:$0xff] }
  0x3e   : > { %653 = vmatpush.bf16.msrb.mxu2 %v1591_v20  ;;  %666 = vmatpush.bf16.msrb.mxu3 %v1595_v24  ;;  %v2121_v16 = vld [vmem:[%s2950_s3 + $0xc8] sm:$0xff]  ;;  %v2139_v20 = vld [vmem:[%s2950_s3 + $0x158] sm:$0xff]  ;;  %v2130_v21 = vld [vmem:[%s2950_s3 + $0x110] sm:$0xff] }
  0x3f   : > { %v2138_v22 = vld [vmem:[%s2950_s3 + $0x150] sm:$0xff]  ;;  %v2112_v23 = vld [vmem:[%s2950_s3 + $0x80] sm:$0xff]  ;;  %v2151_v24 = vld [vmem:[%s2950_s3 + $0x1b8] sm:$0xff] }
  0x40   : > { %v2150_v29 = vld [vmem:[%s2950_s3 + $0x1b0] sm:$0xff]  ;;  %v2128_v30 = vld [vmem:[%s2950_s3 + $0x100] sm:$0xff]  ;;  %v2147_v37 = vld [vmem:[%s2950_s3 + $0x198] sm:$0xff] }
  0x41   : > { %675 = vmatpush.bf16.msra.mxu0 %v563_v17  ;;  %688 = vmatpush.bf16.msra.mxu1 %v566_v18  ;;  %v2132_v17 = vld [vmem:[%s2950_s3 + $0x120] sm:$0xff]  ;;  %v2158_v32 = vld [vmem:[%s2950_s3 + $0x1f0] sm:$0xff]  ;;  %v2155_v38 = vld [vmem:[%s2950_s3 + $0x1d8] sm:$0xff] }
  0x42   : > { %1359 = vmatpush.bf16.msra.mxu2 %v2103_v25  ;;  %1372 = vmatpush.bf16.msra.mxu3 %v2111_v26  ;;  %v2140_v18 = vld [vmem:[%s2950_s3 + $0x160] sm:$0xff]  ;;  %v2129_v26 = vld [vmem:[%s2950_s3 + $0x108] sm:$0xff]  ;;  %v2146_v39 = vld [vmem:[%s2950_s3 + $0x190] sm:$0xff] }
  0x43   : > { %1728 = vmatmul.msk.bf16.vlgmr.msrb.gmra.mxu0 %vm533_vm3, %v2560_v0  ;;  %1729 = vmatmul.msk.bf16.vlgmr.msrb.gmra.mxu1 %vm533_vm3, %v2560_v0  ;;  %v2120_v25 = vld [vmem:[%s2950_s3 + $0xc0] sm:$0xff]  ;;  %v2154_v40 = vld [vmem:[%s2950_s3 + $0x1d0] sm:$0xff] }
  0x44   : > { %1730 = vmatmul.msk.bf16.vlgmr.msrb.gmra.mxu2 %vm533_vm3, %v2560_v0  ;;  %1731 = vmatmul.msk.bf16.vlgmr.msrb.gmra.mxu3 %vm533_vm3, %v2560_v0  ;;  %v2136_v31 = vld [vmem:[%s2950_s3 + $0x140] sm:$0xff] }
  0x45   : > { %676 = vmatpush.bf16.msra.mxu0 %v1719_v27  ;;  %689 = vmatpush.bf16.msra.mxu1 %v1723_v28  ;;  %v2137_v27 = vld [vmem:[%s2950_s3 + $0x148] sm:$0xff]  ;;  %v2159_v28 = vld [vmem:[%s2950_s3 + $0x1f8] sm:$0xff]  ;;  %v2152_v47 = vld [vmem:[%s2950_s3 + $0x1c0] sm:$0xff] }
  0x46   : > { %1360 = vmatpush.bf16.msra.mxu2 %v2102_v33  ;;  %1373 = vmatpush.bf16.msra.mxu3 %v2110_v34  ;;  %v2149_v33 = vld [vmem:[%s2950_s3 + $0x1a8] sm:$0xff] }
  0x47   : > { %v2157_v34 = vld [vmem:[%s2950_s3 + $0x1e8] sm:$0xff] }
  0x49   : > { %677 = vmatpush.bf16.msra.mxu0 %v1679_v35  ;;  %690 = vmatpush.bf16.msra.mxu1 %v1683_v36  ;;  %v2148_v35 = vld [vmem:[%s2950_s3 + $0x1a0] sm:$0xff] }
  0x4a   : > { %1361 = vmatpush.bf16.msra.mxu2 %v2101_v41  ;;  %1374 = vmatpush.bf16.msra.mxu3 %v2109_v42  ;;  %v2156_v36 = vld [vmem:[%s2950_s3 + $0x1e0] sm:$0xff]  ;;  %v2145_v41 = vld [vmem:[%s2950_s3 + $0x188] sm:$0xff] }
  0x4b   : > { %v2842_v42 = vld [vmem:[%s2949_s2] sm:$0xff] }
  0x4c   : > { %v513_v45 = vperm.slane %v2842_v42, 0  ;;  %v514_v46 = vperm.slane %v2842_v42, 1 }
  0x4d   : > { %678 = vmatpush.bf16.msra.mxu0 %v1639_v43  ;;  %691 = vmatpush.bf16.msra.mxu1 %v1643_v44  ;;  %v2153_v43 = vld [vmem:[%s2950_s3 + $0x1c8] sm:$0xff]  ;;  %v2144_v44 = vld [vmem:[%s2950_s3 + $0x180] sm:$0xff] }
  0x4e   : > { %1362 = vmatpush.bf16.msra.mxu2 %v2100_v49  ;;  %1375 = vmatpush.bf16.msra.mxu3 %v2108_v50 }
  0x51   : > { %679 = vmatpush.bf16.msra.mxu0 %v1599_v51  ;;  %692 = vmatpush.bf16.msra.mxu1 %v1603_v52 }
  0x52   : > { %1363 = vmatpush.bf16.msra.mxu2 %v2099_v55  ;;  %1376 = vmatpush.bf16.msra.mxu3 %v2107_v56  ;;  %v2175_v55 = vld [vmem:[%s2950_s3 + $0x278] sm:$0xff]  ;;  %v515_v56 = vperm.slane %v2842_v42, 2 }
  0x54   : > { %1732 = vmatmul.msk.bf16.vlgmr.msra.gmra.mxu0 %vm533_vm3, %v2560_v0  ;;  %1733 = vmatmul.msk.bf16.vlgmr.msra.gmra.mxu1 %vm533_vm3, %v2560_v0  ;;  %v2104_v0 = vld [vmem:[%s2950_s3 + $0x40] sm:$0xff] }
  0x55   : > { %1385 = vmatpush.bf16.msrb.mxu0 %v2119_v53  ;;  %1398 = vmatpush.bf16.msrb.mxu1 %v2127_v54  ;;  %v2167_v54 = vld [vmem:[%s2950_s3 + $0x238] sm:$0xff] }
  0x56   : > { %1364 = vmatpush.bf16.msra.mxu2 %v2098_v59  ;;  %1377 = vmatpush.bf16.msra.mxu3 %v2106_v60 }
  0x59   : > { %1386 = vmatpush.bf16.msrb.mxu0 %v2118_v57  ;;  %1399 = vmatpush.bf16.msrb.mxu1 %v2126_v58  ;;  %v516_v57 = vperm.slane %v2842_v42, 3 }
  0x5a   : > { %1365 = vmatpush.bf16.msra.mxu2 %v2097_v63  ;;  %1378 = vmatpush.bf16.msra.mxu3 %v2105_v1 }
  0x5d   : > { %1387 = vmatpush.bf16.msrb.mxu0 %v2117_v61  ;;  %1400 = vmatpush.bf16.msrb.mxu1 %v2125_v62 }
  0x5e   : > { %1366 = vmatpush.bf16.msra.mxu2 %v2096_v4  ;;  %1379 = vmatpush.bf16.msra.mxu3 %v2104_v0  ;;  %v2174_v4 = vld [vmem:[%s2950_s3 + $0x270] sm:$0xff] }
  0x61   : > { %1388 = vmatpush.bf16.msrb.mxu0 %v2116_v2  ;;  %1401 = vmatpush.bf16.msrb.mxu1 %v2124_v3  ;;  %v2166_v3 = vld [vmem:[%s2950_s3 + $0x230] sm:$0xff] }
  0x62   : > { %1411 = vmatpush.bf16.msrb.mxu2 %v2135_v5  ;;  %1424 = vmatpush.bf16.msrb.mxu3 %v2143_v6 }
  0x65   : > { %1389 = vmatpush.bf16.msrb.mxu0 %v2115_v7  ;;  %1402 = vmatpush.bf16.msrb.mxu1 %v2123_v8  ;;  %v2165_v8 = vld [vmem:[%s2950_s3 + $0x228] sm:$0xff] }
  0x66   : > { %1412 = vmatpush.bf16.msrb.mxu2 %v2134_v9  ;;  %1425 = vmatpush.bf16.msrb.mxu3 %v2142_v10  ;;  %v2173_v9 = vld [vmem:[%s2950_s3 + $0x268] sm:$0xff]  ;;  %v517_v10 = vperm.slane %v2842_v42, 4 }
  0x69   : > { %1390 = vmatpush.bf16.msrb.mxu0 %v2114_v11  ;;  %1403 = vmatpush.bf16.msrb.mxu1 %v2122_v12  ;;  %v518_v11 = vperm.slane %v2842_v42, 5 }
  0x6a   : > { %1413 = vmatpush.bf16.msrb.mxu2 %v2133_v13  ;;  %1426 = vmatpush.bf16.msrb.mxu3 %v2141_v14 }
  0x6d   : > { %1391 = vmatpush.bf16.msrb.mxu0 %v2113_v15  ;;  %1404 = vmatpush.bf16.msrb.mxu1 %v2121_v16  ;;  %v2164_v16 = vld [vmem:[%s2950_s3 + $0x220] sm:$0xff] }
  0x6e   : > { %1414 = vmatpush.bf16.msrb.mxu2 %v2132_v17  ;;  %1427 = vmatpush.bf16.msrb.mxu3 %v2140_v18  ;;  %v2172_v17 = vld [vmem:[%s2950_s3 + $0x260] sm:$0xff] }
  0x71   : > { %1392 = vmatpush.bf16.msrb.mxu0 %v2112_v23  ;;  %1405 = vmatpush.bf16.msrb.mxu1 %v2120_v25  ;;  %v2171_v23 = vld [vmem:[%s2950_s3 + $0x258] sm:$0xff]  ;;  %v520_v25 = vperm.slane %v2842_v42, 7 }
  0x72   : > { %1415 = vmatpush.bf16.msrb.mxu2 %v2131_v19  ;;  %1428 = vmatpush.bf16.msrb.mxu3 %v2139_v20 }
  0x75   : > { %1437 = vmatpush.bf16.msra.mxu0 %v2151_v24  ;;  %1450 = vmatpush.bf16.msra.mxu1 %v2159_v28  ;;  %v519_v24 = vperm.slane %v2842_v42, 6  ;;  %v2169_v42 = vld [vmem:[%s2950_s3 + $0x248] sm:$0xff] }
  0x76   : > { %1416 = vmatpush.bf16.msrb.mxu2 %v2130_v21  ;;  %1429 = vmatpush.bf16.msrb.mxu3 %v2138_v22  ;;  %v2163_v22 = vld [vmem:[%s2950_s3 + $0x218] sm:$0xff] }
  0x79   : > { %1438 = vmatpush.bf16.msra.mxu0 %v2150_v29  ;;  %1451 = vmatpush.bf16.msra.mxu1 %v2158_v32 }
  0x7a   : > { %1417 = vmatpush.bf16.msrb.mxu2 %v2129_v26  ;;  %1430 = vmatpush.bf16.msrb.mxu3 %v2137_v27 }
  0x7d   : > { %1439 = vmatpush.bf16.msra.mxu0 %v2149_v33  ;;  %1452 = vmatpush.bf16.msra.mxu1 %v2157_v34  ;;  %v2162_v34 = vld [vmem:[%s2950_s3 + $0x210] sm:$0xff] }
  0x7e   : > { %1418 = vmatpush.bf16.msrb.mxu2 %v2128_v30  ;;  %1431 = vmatpush.bf16.msrb.mxu3 %v2136_v31 }
  0x81   : > { %1440 = vmatpush.bf16.msra.mxu0 %v2148_v35  ;;  %1453 = vmatpush.bf16.msra.mxu1 %v2156_v36  ;;  %v2170_v35 = vld [vmem:[%s2950_s3 + $0x250] sm:$0xff] }
  0x85   : > { %1441 = vmatpush.bf16.msra.mxu0 %v2147_v37  ;;  %1454 = vmatpush.bf16.msra.mxu1 %v2155_v38  ;;  %v285_v38 = vld [vmem:[%s2949_s2 + $0x8] sm:$0x3] }
  0x89   : > { %1442 = vmatpush.bf16.msra.mxu0 %v2146_v39  ;;  %1455 = vmatpush.bf16.msra.mxu1 %v2154_v40 }
  0x8d   : > { %1443 = vmatpush.bf16.msra.mxu0 %v2145_v41  ;;  %1456 = vmatpush.bf16.msra.mxu1 %v2153_v43  ;;  %v2161_v41 = vld [vmem:[%s2950_s3 + $0x208] sm:$0xff]  ;;  %v521_v43 = vperm.slane %v285_v38, 0 }
  0x91   : > { %1444 = vmatpush.bf16.msra.mxu0 %v2144_v44  ;;  %1457 = vmatpush.bf16.msra.mxu1 %v2152_v47  ;;  %v522_v44 = vperm.slane %v285_v38, 1 }
  0xb0   : > { %v577_v48 = vpop.f32.mrf.mxu0  ;;  %v590_v49 = vpop.f32.mrf.mxu1 }
  0xb1   : > { %v578_v50 = vadd.f32 %v577_v48, %v513_v45  ;;  %v591_v51 = vadd.f32 %v590_v49, %v514_v46  ;;  %v2160_v49 = vld [vmem:[%s2950_s3 + $0x200] sm:$0xff] }
  0xb3   : > { %v698_v52 = vmax.f32 %v578_v50, 0.0  ;;  %v699_v53 = vmax.f32 %v591_v51, 0.0  ;;  %v2168_v50 = vld [vmem:[%s2950_s3 + $0x240] sm:$0xff] }
  0xb5   : > { %v708_v58 = vpack.c.bf16 %v698_v52, %v698_v52  ;;  %v709_v59 = vpack.c.bf16 %v699_v53, %v699_v53 }
  0xb7   : > { %1367 = vmatmul.bf16.vlgmr.msra.gmra.mxu2 %v708_v58  ;;  %1380 = vmatmul.bf16.vlgmr.msra.gmra.mxu3 %v709_v59  ;;  %v603_v60 = vpop.f32.mrf.mxu2  ;;  %v616_v61 = vpop.f32.mrf.mxu3 }
  0xb8   : > { %v579_v62 = vpop.f32.mrf.mxu0  ;;  %v592_v63 = vpop.f32.mrf.mxu1  ;;  %1463 = vmatpush.bf16.msra.mxu2 %v2167_v54  ;;  %1476 = vmatpush.bf16.msra.mxu3 %v2175_v55  ;;  %v604_v1 = vadd.f32 %v603_v60, %v515_v56  ;;  %v617_v2 = vadd.f32 %v616_v61, %v516_v57 }
  0xb9   : > { %v878_v63 = vld [vmem:[%s2951_s4] sm:$0x1] }
  0xba   : > { %v700_v0 = vmax.f32 %v604_v1, 0.0  ;;  %v701_v5 = vmax.f32 %v617_v2, 0.0 }
  0xbc   : > { %v710_v6 = vpack.c.bf16 %v700_v0, %v700_v0  ;;  %v711_v7 = vpack.c.bf16 %v701_v5, %v701_v5  ;;  %1464 = vmatpush.bf16.msra.mxu2 %v2166_v3  ;;  %1477 = vmatpush.bf16.msra.mxu3 %v2174_v4 }
  0xbe   : > { %1393 = vmatmul.bf16.vlgmr.msrb.gmra.mxu0 %v710_v6  ;;  %1406 = vmatmul.bf16.vlgmr.msrb.gmra.mxu1 %v711_v7 }
  0xbf   : > { %v605_v12 = vpop.f32.mrf.mxu2  ;;  %v618_v13 = vpop.f32.mrf.mxu3 }
  0xc0   : > { %v629_v14 = vpop.f32.mrf.mxu0  ;;  %v642_v15 = vpop.f32.mrf.mxu1  ;;  %1465 = vmatpush.bf16.msra.mxu2 %v2165_v8  ;;  %1478 = vmatpush.bf16.msra.mxu3 %v2173_v9 }
  0xc1   : > { %v630_v18 = vadd.f32 %v629_v14, %v517_v10  ;;  %v643_v19 = vadd.f32 %v642_v15, %v518_v11 }
  0xc3   : > { %v702_v20 = vmax.f32 %v630_v18, 0.0  ;;  %v703_v21 = vmax.f32 %v643_v19, 0.0 }
  0xc4   : > { %1466 = vmatpush.bf16.msra.mxu2 %v2164_v16  ;;  %1479 = vmatpush.bf16.msra.mxu3 %v2172_v17 }
  0xc5   : > { %v712_v26 = vpack.c.bf16 %v702_v20, %v702_v20  ;;  %v713_v27 = vpack.c.bf16 %v703_v21, %v703_v21 }
  0xc7   : > { %1419 = vmatmul.bf16.vlgmr.msrb.gmra.mxu2 %v712_v26  ;;  %1432 = vmatmul.bf16.vlgmr.msrb.gmra.mxu3 %v713_v27  ;;  %v655_v28 = vpop.f32.mrf.mxu2  ;;  %v668_v29 = vpop.f32.mrf.mxu3 }
  0xc8   : > { %v631_v30 = vpop.f32.mrf.mxu0  ;;  %v644_v31 = vpop.f32.mrf.mxu1  ;;  %1467 = vmatpush.bf16.msra.mxu2 %v2163_v22  ;;  %1480 = vmatpush.bf16.msra.mxu3 %v2171_v23  ;;  %v656_v32 = vadd.f32 %v655_v28, %v519_v24  ;;  %v669_v33 = vadd.f32 %v668_v29, %v520_v25 }
  0xca   : > { %v704_v36 = vmax.f32 %v656_v32, 0.0  ;;  %v705_v37 = vmax.f32 %v669_v33, 0.0 }
  0xcc   : > { %v714_v39 = vpack.c.bf16 %v704_v36, %v704_v36  ;;  %v715_v40 = vpack.c.bf16 %v705_v37, %v705_v37  ;;  %1468 = vmatpush.bf16.msra.mxu2 %v2162_v34  ;;  %1481 = vmatpush.bf16.msra.mxu3 %v2170_v35 }
  0xce   : > { %1445 = vmatmul.bf16.vlgmr.msra.gmra.mxu0 %v714_v39  ;;  %1458 = vmatmul.bf16.vlgmr.msra.gmra.mxu1 %v715_v40 }
  0xcf   : > { %v657_v45 = vpop.f32.mrf.mxu2  ;;  %v670_v46 = vpop.f32.mrf.mxu3 }
  0xd0   : > { %1469 = vmatpush.bf16.msra.mxu2 %v2161_v41  ;;  %1482 = vmatpush.bf16.msra.mxu3 %v2169_v42 }
  0xd1   : > { %v681_v47 = vpop.f32.mrf.mxu0  ;;  %v694_v48 = vpop.f32.mrf.mxu1 }
  0xd2   : > { %v682_v51 = vadd.f32 %v681_v47, %v521_v43  ;;  %v695_v52 = vadd.f32 %v694_v48, %v522_v44 }
  0xd4   : > { %v706_v53 = vmax.f32 %v682_v51, 0.0  ;;  %v707_v54 = vmax.f32 %v695_v52, 0.0  ;;  %1470 = vmatpush.bf16.msra.mxu2 %v2160_v49  ;;  %1483 = vmatpush.bf16.msra.mxu3 %v2168_v50 }
  0xd6   : > { %v716_v55 = vpack.c.bf16 %v706_v53, %v706_v53  ;;  %v717_v56 = vpack.c.bf16 %v707_v54, %v707_v54 }
  0xd8   : > { %1471 = vmatmul.bf16.vlgmr.msra.gmra.mxu2 %v716_v55  ;;  %1484 = vmatmul.bf16.vlgmr.msra.gmra.mxu3 %v717_v56 }
  0xd9   : > { %v683_v57 = vpop.f32.mrf.mxu0  ;;  %v696_v58 = vpop.f32.mrf.mxu1 }
 0x13a   : > { %v1368_v59 = vpop.f32.mrf.mxu2  ;;  %v1381_v60 = vpop.f32.mrf.mxu3 }
 0x13b   : > { %v1394_v61 = vpop.f32.mrf.mxu0  ;;  %v1407_v62 = vpop.f32.mrf.mxu1  ;;  %v1369_v1 = vadd.f32 %v1368_v59, %v878_v63 }
 0x13d   : > { %v1382_v4 = vadd.f32 %v1381_v60, %v1369_v1 }
 0x13f   : > { %v1395_v6 = vadd.f32 %v1394_v61, %v1382_v4 }
 0x141   : > { %v1408_v9 = vadd.f32 %v1407_v62, %v1395_v6 }
 0x142   : > { %v1370_v2 = vpop.f32.mrf.mxu2  ;;  %v1383_v3 = vpop.f32.mrf.mxu3 }
 0x143   : > { %v1396_v0 = vpop.f32.mrf.mxu0  ;;  %v1409_v5 = vpop.f32.mrf.mxu1 }
 0x14a   : > { %v1420_v7 = vpop.f32.mrf.mxu2  ;;  %v1433_v8 = vpop.f32.mrf.mxu3 }
 0x14b   : > { %v1446_v10 = vpop.f32.mrf.mxu0  ;;  %v1459_v11 = vpop.f32.mrf.mxu1  ;;  %v1421_v12 = vadd.f32 %v1420_v7, %v1408_v9 }
 0x14d   : > { %v1434_v13 = vadd.f32 %v1433_v8, %v1421_v12 }
 0x14f   : > { %v1447_v18 = vadd.f32 %v1446_v10, %v1434_v13 }
 0x151   : > { %v1460_v19 = vadd.f32 %v1459_v11, %v1447_v18 }
 0x152   : > { %v1422_v14 = vpop.f32.mrf.mxu2  ;;  %v1435_v15 = vpop.f32.mrf.mxu3 }
 0x153   : > { %v1448_v16 = vpop.f32.mrf.mxu0  ;;  %v1461_v17 = vpop.f32.mrf.mxu1 }
 0x15b   : > { %v1472_v20 = vpop.f32.mrf.mxu2  ;;  %v1485_v21 = vpop.f32.mrf.mxu3 }
 0x15c   : > { %v1473_v22 = vadd.f32 %v1472_v20, %v1460_v19 }
 0x15e   : > { %v1486_v23 = vadd.f32 %v1485_v21, %v1473_v22 }
 0x160   : > { %1490 = vst.msk [vmem:[%s214_s14] sm:$0x1] %vm1489_vm4, %v1486_v23 }
 0x161   : > { %2245 = shalt.err (!%p2242_p3)
}
 0x162   : > { %2176 = dma.vmem_to_hbm [thread:$0]  (%p2351_p5), %s1503_s15, 16, %s1505_s16, %s1492_s17  }
 0x163   : > { %v1474_v24 = vpop.f32.mrf.mxu2  ;;  %v1487_v25 = vpop.f32.mrf.mxu3 }
 0x164 PF: > { %p2182_p4 = scmp.ge.s32.totalorder %s2280_s21, 2  ;;  %s1516_s8 = sand.u32 1, %s2268_s18  }
 0x165   : > { %s1517_s9 = scalar_lea.sflag [#allocation3], %s1516_s8 }
 0x166   : > { %p2179_p7 = pnand %p2182_p4, %p2355_p6 }
 0x168   : > { %p2180_p8 = pneg %p2179_p7 }
 0x16a   : > { %2263 = dma.done.wait (%p2180_p8), %s1517_s9, 16  }
 0x16b   : > { %2265 = vsyncadd (%p2180_p8), %s1517_s9, 4294967280  ;;  %p15_p5 = scmp.ge.s32.totalorder %s2338_s24, 4   ;;  %s2955_s18 = smov %s2272_s19 }
 0x16c   : > { %s2956_s19 = smov %s2276_s20  ;;  %s2957_s20 = smov %s2349_s27 }
 0x16d   : > { %s2958_s21 = smov %s2338_s24  ;;  %17 = sbr.rel (!%p15_p5) target bundleno = 3 (0x3), region = 75 }
 0x172   :  { %1522 = vsyncpa [#allocation3], 1 }
 0x173   :  { %1524 = vsyncpa [#allocation3 + $0x1], 1 }

</bundles_post_ra>
